<compile_context>
chip_gen: v7x
topology: tpu7x:2x2x1
jax: 0.10.0
libtpu: 0.0.40
codegen_flags: <defaults>
</compile_context>

<pallas_src>
import jax
import jax.numpy as jnp
from jax import lax
from jax.experimental import pallas as pl
from jax.experimental.pallas import tpu as pltpu

EPS = 1e-5


def _round_up(x, m):
    return (x + m - 1) // m * m


def _full_spec(shape):
    # single full-array block (block_shape == array dims is always legal)
    return pl.BlockSpec(shape, lambda *_: (0,) * len(shape))


# ---------------------------------------------------------------------------
# BatchNorm (training-mode batch stats) -> per-channel (scale, shift)
# so that relu(bn(x)) == relu(x * scale + shift)
# ---------------------------------------------------------------------------

def bn_scale_shift(x, gamma, beta):
    n, h, w, c = x.shape
    rows = n * h * w
    x2 = x.reshape(rows, c)
    tr = min(256, _round_up(rows, 8))
    rp = _round_up(rows, tr)
    if rp != rows:
        x2 = jnp.pad(x2, ((0, rp - rows), (0, 0)))   # zero rows don't bias sums
    inv_rows = 1.0 / rows

    def kernel(x_ref, g_ref, b_ref, scale_ref, shift_ref, s1, s2):
        @pl.when(pl.program_id(0) == 0)
        def _():
            s1[...] = jnp.zeros_like(s1)
            s2[...] = jnp.zeros_like(s2)

        xv = x_ref[...]
        s1[...] += jnp.sum(xv, axis=0, keepdims=True)
        s2[...] += jnp.sum(xv * xv, axis=0, keepdims=True)

        @pl.when(pl.program_id(0) == pl.num_programs(0) - 1)
        def _():
            m = s1[...] * inv_rows
            v = s2[...] * inv_rows - m * m          # biased batch variance
            sc = g_ref[...] * jax.lax.rsqrt(v + EPS)
            scale_ref[...] = sc
            shift_ref[...] = b_ref[...] - m * sc

    scale, shift = pl.pallas_call(
        kernel,
        out_shape=(jax.ShapeDtypeStruct((1, c), jnp.float32),
                   jax.ShapeDtypeStruct((1, c), jnp.float32)),
        grid_spec=pltpu.PrefetchScalarGridSpec(
            num_scalar_prefetch=0,
            grid=(rp // tr,),
            in_specs=[pl.BlockSpec((tr, c), lambda i: (i, 0)),
                      pl.BlockSpec((1, c), lambda i: (0, 0)),
                      pl.BlockSpec((1, c), lambda i: (0, 0))],
            out_specs=[pl.BlockSpec((1, c), lambda i: (0, 0)),
                       pl.BlockSpec((1, c), lambda i: (0, 0))],
            scratch_shapes=[pltpu.VMEM((1, c), jnp.float32),
                            pltpu.VMEM((1, c), jnp.float32)]),
        compiler_params=pltpu.CompilerParams(
            dimension_semantics=("arbitrary",)),
    )(x2, gamma.reshape(1, c), beta.reshape(1, c))
    return scale, shift


# ---------------------------------------------------------------------------
# Fused GEMM: optional BN+ReLU prologue on A, optional residual epilogue
# ---------------------------------------------------------------------------

def fused_gemm(a, b_bf16, *, scale=None, shift=None,
               residual=None, res_x=None, res_scale=None, res_shift=None,
               alpha=1.0):
    """(M,K) @ (K,N) -> (M,N) f32.  K and N are single full blocks; only M is
    tiled.  Prologue: A' = relu(A*scale + shift).  Epilogue:
      out = alpha*(A' @ B) + residual                       (residual given), or
      out = alpha*(A' @ B) + relu(res_x*res_scale+res_shift) (identity shortcut).
    """
    m, k = a.shape
    k2, n = b_bf16.shape
    assert k == k2
    tm = min(256, _round_up(m, 8))
    mp = _round_up(m, tm)
    pad = mp - m
    if pad:
        a = jnp.pad(a, ((0, pad), (0, 0)))
        if residual is not None:
            residual = jnp.pad(residual, ((0, pad), (0, 0)))
        if res_x is not None:
            res_x = jnp.pad(res_x, ((0, pad), (0, 0)))

    has_prologue = scale is not None
    res_mode = "add" if residual is not None else (
        "bn_relu" if res_x is not None else "none")

    inputs = [a, b_bf16]
    in_specs = [pl.BlockSpec((tm, k), lambda i: (i, 0)),
                pl.BlockSpec((k, n), lambda i: (0, 0))]
    if has_prologue:
        inputs += [scale, shift]
        in_specs += [pl.BlockSpec((1, k), lambda i: (0, 0)),
                     pl.BlockSpec((1, k), lambda i: (0, 0))]
    if res_mode == "add":
        inputs += [residual]
        in_specs += [pl.BlockSpec((tm, n), lambda i: (i, 0))]
    elif res_mode == "bn_relu":
        inputs += [res_x, res_scale, res_shift]
        in_specs += [pl.BlockSpec((tm, n), lambda i: (i, 0)),
                     pl.BlockSpec((1, n), lambda i: (0, 0)),
                     pl.BlockSpec((1, n), lambda i: (0, 0))]

    def kernel(*refs):
        refs = list(refs)
        o_ref = refs.pop()          # output is last
        a_ref = refs.pop(0)
        b_ref = refs.pop(0)
        av = a_ref[...]
        if has_prologue:
            sc_ref = refs.pop(0)
            sh_ref = refs.pop(0)
            # BN/ReLU math in f32, cast to bf16 only at the MXU dot.
            av = jnp.maximum(av * sc_ref[...] + sh_ref[...], 0.0)
        acc = jnp.dot(av.astype(jnp.bfloat16), b_ref[...],
                      preferred_element_type=jnp.float32)
        if res_mode == "add":
            r_ref = refs.pop(0)
            acc = alpha * acc + r_ref[...]
        elif res_mode == "bn_relu":
            rx_ref = refs.pop(0)
            rs_ref = refs.pop(0)
            rb_ref = refs.pop(0)
            acc = alpha * acc + jnp.maximum(
                rx_ref[...] * rs_ref[...] + rb_ref[...], 0.0)
        o_ref[...] = acc

    out = pl.pallas_call(
        kernel,
        out_shape=jax.ShapeDtypeStruct((mp, n), jnp.float32),
        grid_spec=pltpu.PrefetchScalarGridSpec(
            num_scalar_prefetch=0,
            grid=(mp // tm,),
            in_specs=in_specs,
            out_specs=pl.BlockSpec((tm, n), lambda i: (i, 0))),
        compiler_params=pltpu.CompilerParams(
            dimension_semantics=("parallel",)),
    )(*inputs)
    return out[:m] if pad else out


# ---------------------------------------------------------------------------
# Conv = im2col (glue) + fused Pallas GEMM
# ---------------------------------------------------------------------------

def conv2d(x, w_oihw, stride, *, scale=None, shift=None,
           residual=None, res_x=None, res_scale=None, res_shift=None,
           alpha=1.0):
    """PyTorch conv_2d semantics (padding = ks//2, no bias).  If scale/shift
    are given the conv consumes relu(x*scale + shift) (fused BN+ReLU
    prologue); residual/res_x enable the fused 0.2*out + r epilogue."""
    n, h, w, cin = x.shape
    o, cin2, kh, kw = w_oihw.shape
    assert cin == cin2
    p = kh // 2
    ho = (h + 2 * p - kh) // stride + 1
    wo = (w + 2 * p - kw) // stride + 1

    if kh == 1 and kw == 1:
        a = x[:, ::stride, ::stride, :].reshape(n * ho * wo, cin)
        k = cin
        scale_k, shift_k = scale, shift
    else:
        if p > 0 and scale is not None:
            # The reference zero-pads relu(bn(x)).  Pad x with the per-channel
            # value that normalizes to zero so the fused prologue reproduces
            # exactly that: relu(pv*scale + shift) == 0 at padded positions.
            safe = jnp.where(scale == 0.0, 1.0, scale)
            pv = (-shift / safe).reshape(1, 1, 1, cin)
            xp = jnp.pad(x - pv, ((0, 0), (p, p), (p, p), (0, 0))) + pv
        else:
            xp = jnp.pad(x, ((0, 0), (p, p), (p, p), (0, 0)))
        # TODO(synk): patches are still materialized in HBM by XLA before the
        # GEMM custom call; folding the kh*kw taps into the kernel's index_map
        # would remove that traffic entirely.
        pat = lax.conv_general_dilated_patches(
            xp, (kh, kw), (stride, stride), ((0, 0), (0, 0)),
            dimension_numbers=("NHWC", "HWIO", "NHWC"),
            precision=lax.Precision.HIGHEST)
        k = cin * kh * kw            # feature index = c*kh*kw + tap (c major)
        a = pat.reshape(n * ho * wo, k)
        if scale is not None:
            scale_k = jnp.repeat(scale, kh * kw, axis=1)
            shift_k = jnp.repeat(shift, kh * kw, axis=1)
        else:
            scale_k = shift_k = None

    if scale_k is None:
        a = a.astype(jnp.bfloat16)   # no f32 prologue math needed

    # weight matrix matching the c-major / tap-minor K ordering; bf16 for MXU
    wm = w_oihw.reshape(o, k).T.astype(jnp.bfloat16)

    r2 = residual.reshape(n * ho * wo, o) if residual is not None else None
    rx2 = res_x.reshape(n * ho * wo, o) if res_x is not None else None
    out = fused_gemm(a, wm, scale=scale_k, shift=shift_k,
                     residual=r2, res_x=rx2,
                     res_scale=res_scale, res_shift=res_shift, alpha=alpha)
    return out.reshape(n, ho, wo, o)


# ---------------------------------------------------------------------------
# Head: final BN+ReLU + AdaptiveAvgPool2d(1) + Flatten + Linear (+bias), fused
# ---------------------------------------------------------------------------

def head(x, scale, shift, fc_w, fc_b):
    n, h, w, c = x.shape
    classes = fc_w.shape[0]
    x3 = x.reshape(n, h * w, c)
    inv_hw = 1.0 / (h * w)

    def kernel(x_ref, sc_ref, sh_ref, w_ref, b_ref, o_ref):
        xv = jnp.maximum(x_ref[...] * sc_ref[...] + sh_ref[...], 0.0)
        feat = jnp.sum(xv, axis=1) * inv_hw                        # (n, c)
        o_ref[...] = jnp.dot(feat, w_ref[...],
                             preferred_element_type=jnp.float32) + b_ref[...]

    return pl.pallas_call(
        kernel,
        out_shape=jax.ShapeDtypeStruct((n, classes), jnp.float32),
        grid=(1,),
        in_specs=[_full_spec((n, h * w, c)),
                  _full_spec((1, 1, c)),
                  _full_spec((1, 1, c)),
                  _full_spec((c, classes)),
                  _full_spec((1, classes))],
        out_specs=_full_spec((n, classes)),
    )(x3, scale.reshape(1, 1, c), shift.reshape(1, 1, c),
      fc_w.T, fc_b.reshape(1, classes))


# ---------------------------------------------------------------------------
# Model: parameters + forward
# ---------------------------------------------------------------------------

def _conv_init(key, o, i, kh, kw):
    fan_in = float(i * kh * kw)
    return jax.random.normal(key, (o, i, kh, kw), jnp.float32) * (fan_in ** -0.5)


def init_wideresnet_params(key, start_channel, N, n_classes, groups=3, k=6):
    keys = iter(jax.random.split(key, 128))
    params = {'stem_w': _conv_init(next(keys), start_channel, 1, 3, 3)}
    channels = [start_channel]
    blocks = []
    for i in range(groups):
        channels.append(start_channel * 2 ** i * k)
        stride = 2 if i > 0 else 1
        for j in range(N):
            ni = channels[i] if j == 0 else channels[i + 1]
            nf = channels[i + 1]
            s = stride if j == 0 else 1
            blk = {
                'stride': s,
                'bn1_w': jnp.ones((ni,), jnp.float32),
                'bn1_b': jnp.zeros((ni,), jnp.float32),
                'conv1_w': _conv_init(next(keys), nf, ni, 3, 3),
                'bn2_w': jnp.ones((nf,), jnp.float32),
                'bn2_b': jnp.zeros((nf,), jnp.float32),
                'conv2_w': _conv_init(next(keys), nf, nf, 3, 3),
            }
            if ni != nf:
                blk['shortcut_w'] = _conv_init(next(keys), nf, ni, 1, 1)
            blocks.append(blk)
    params['blocks'] = blocks
    c_last = channels[-1]
    params['final_bn_w'] = jnp.ones((c_last,), jnp.float32)
    params['final_bn_b'] = jnp.zeros((c_last,), jnp.float32)
    params['fc_w'] = jax.random.normal(next(keys), (n_classes, c_last),
                                       jnp.float32) * (c_last ** -0.5)
    params['fc_b'] = jnp.zeros((n_classes,), jnp.float32)
    return params


def wideresnet_forward(params, x_nchw):
    x = jnp.transpose(x_nchw, (0, 2, 3, 1))              # NCHW -> NHWC
    x = conv2d(x, params['stem_w'], 1)                   # stem: conv_2d(1, start_channel)
    for blk in params['blocks']:
        # h = relu(bn1(x)) is never materialized: it is applied as the GEMM
        # prologue of conv1 / shortcut (and recomputed in the conv2 epilogue
        # for identity shortcuts).
        s1, b1 = bn_scale_shift(x, blk['bn1_w'], blk['bn1_b'])
        y = conv2d(x, blk['conv1_w'], blk['stride'], scale=s1, shift=b1)
        s2, b2 = bn_scale_shift(y, blk['bn2_w'], blk['bn2_b'])
        if 'shortcut_w' in blk:
            r = conv2d(x, blk['shortcut_w'], blk['stride'], scale=s1, shift=b1)
            x = conv2d(y, blk['conv2_w'], 1, scale=s2, shift=b2,
                       residual=r, alpha=0.2)            # 0.2*conv2(...) + r
        else:
            x = conv2d(y, blk['conv2_w'], 1, scale=s2, shift=b2,
                       res_x=x, res_scale=s1, res_shift=b1, alpha=0.2)
    sF, bF = bn_scale_shift(x, params['final_bn_w'], params['final_bn_b'])
    return head(x, sF, bF, params['fc_w'], params['fc_b'])


if __name__ == "__main__":
    key = jax.random.PRNGKey(0)
    kx, kp = jax.random.split(key)
    # Matches WideResNet(start_channel=4, N=1, n_classes=10, groups=3, k=6);
    # input is NCHW with 1 input channel (first layer is conv_2d(1, start_channel)).
    x = jax.random.normal(kx, (2, 1, 16, 16), jnp.float32)
    params = init_wideresnet_params(kp, start_channel=4, N=1, n_classes=10,
                                    groups=3, k=6)
    fwd = jax.jit(lambda inp: wideresnet_forward(params, inp))
    out = fwd(x)
    jax.block_until_ready(out)
    assert out.shape == (2, 10) and out.dtype == jnp.float32
    print("KERNEL_OK")
</pallas_src>

<mosaic_0001>
module attributes {stable_mosaic.version = 11 : i64} {
  func.func @kernel(%arg0: i32, %arg1: memref<256x4xf32, #tpu.memory_space<vmem>>, %arg2: memref<1x4xf32, #tpu.memory_space<vmem>>, %arg3: memref<1x4xf32, #tpu.memory_space<vmem>>, %arg4: memref<1x4xf32, #tpu.memory_space<vmem>>, %arg5: memref<1x4xf32, #tpu.memory_space<vmem>>, %arg6: memref<1x4xf32, #tpu.memory_space<vmem>>, %arg7: memref<1x4xf32, #tpu.memory_space<vmem>>) attributes {dimension_semantics = [#tpu.dimension_semantics<arbitrary>], iteration_bounds = array<i64: 2>, scalar_prefetch = 0 : i64, scratch_operands = 2 : i64, tpu.core_type = #tpu.core_type<tc>, window_params = [{transform_indices = @transform_0, window_bounds = array<i64: 256, 4>}, {pipeline_mode = #tpu.pipeline_mode<synchronous>, transform_indices = @transform_1, window_bounds = array<i64: 1, 4>}, {pipeline_mode = #tpu.pipeline_mode<synchronous>, transform_indices = @transform_2, window_bounds = array<i64: 1, 4>}, {pipeline_mode = #tpu.pipeline_mode<synchronous>, transform_indices = @transform_3, window_bounds = array<i64: 1, 4>}, {pipeline_mode = #tpu.pipeline_mode<synchronous>, transform_indices = @transform_4, window_bounds = array<i64: 1, 4>}]} {
    %c0_i32 = arith.constant 0 : i32
    %0 = arith.cmpi eq, %arg0, %c0_i32 : i32
    %1 = arith.extui %0 : i1 to i32
    %c0_i32_0 = arith.constant 0 : i32
    %2 = arith.cmpi ne, %1, %c0_i32_0 : i32
    scf.if %2 {
      %cst_12 = arith.constant 0.000000e+00 : f32
      %18 = vector.broadcast %cst_12 : f32 to vector<1x4xf32>
      %c0_13 = arith.constant 0 : index
      %c0_14 = arith.constant 0 : index
      %19 = vector.load %arg6[%c0_13, %c0_14] : memref<1x4xf32, #tpu.memory_space<vmem>>, vector<1x4xf32>
      tpu.vector_store %arg6[%c0_13, %c0_14], %18 {strides = array<i32>} : memref<1x4xf32, #tpu.memory_space<vmem>>, vector<1x4xf32>,
      %cst_15 = arith.constant 0.000000e+00 : f32
      %20 = vector.broadcast %cst_15 : f32 to vector<1x4xf32>
      %c0_16 = arith.constant 0 : index
      %c0_17 = arith.constant 0 : index
      %21 = vector.load %arg7[%c0_16, %c0_17] : memref<1x4xf32, #tpu.memory_space<vmem>>, vector<1x4xf32>
      tpu.vector_store %arg7[%c0_16, %c0_17], %20 {strides = array<i32>} : memref<1x4xf32, #tpu.memory_space<vmem>>, vector<1x4xf32>,
    } else {
    }
    %c0 = arith.constant 0 : index
    %c0_1 = arith.constant 0 : index
    %3 = vector.load %arg1[%c0, %c0_1] : memref<256x4xf32, #tpu.memory_space<vmem>>, vector<256x4xf32>
    %c0_2 = arith.constant 0 : index
    %c0_3 = arith.constant 0 : index
    %4 = vector.load %arg6[%c0_2, %c0_3] : memref<1x4xf32, #tpu.memory_space<vmem>>, vector<1x4xf32>
    %cst = arith.constant dense<0.000000e+00> : vector<4xf32>
    %5 = vector.multi_reduction <add>, %3, %cst [0] : vector<256x4xf32> to vector<4xf32>
    %6 = vector.shape_cast %5 : vector<4xf32> to vector<1x4xf32>
    %7 = arith.addf %4, %6 : vector<1x4xf32>
    %c0_4 = arith.constant 0 : index
    %c0_5 = arith.constant 0 : index
    %8 = vector.load %arg6[%c0_4, %c0_5] : memref<1x4xf32, #tpu.memory_space<vmem>>, vector<1x4xf32>
    tpu.vector_store %arg6[%c0_4, %c0_5], %7 {strides = array<i32>} : memref<1x4xf32, #tpu.memory_space<vmem>>, vector<1x4xf32>,
    %c0_6 = arith.constant 0 : index
    %c0_7 = arith.constant 0 : index
    %9 = vector.load %arg7[%c0_6, %c0_7] : memref<1x4xf32, #tpu.memory_space<vmem>>, vector<1x4xf32>
    %10 = arith.mulf %3, %3 : vector<256x4xf32>
    %cst_8 = arith.constant dense<0.000000e+00> : vector<4xf32>
    %11 = vector.multi_reduction <add>, %10, %cst_8 [0] : vector<256x4xf32> to vector<4xf32>
    %12 = vector.shape_cast %11 : vector<4xf32> to vector<1x4xf32>
    %13 = arith.addf %9, %12 : vector<1x4xf32>
    %c0_9 = arith.constant 0 : index
    %c0_10 = arith.constant 0 : index
    %14 = vector.load %arg7[%c0_9, %c0_10] : memref<1x4xf32, #tpu.memory_space<vmem>>, vector<1x4xf32>
    tpu.vector_store %arg7[%c0_9, %c0_10], %13 {strides = array<i32>} : memref<1x4xf32, #tpu.memory_space<vmem>>, vector<1x4xf32>,
    %c1_i32 = arith.constant 1 : i32
    %15 = arith.cmpi eq, %arg0, %c1_i32 : i32
    %16 = arith.extui %15 : i1 to i32
    %c0_i32_11 = arith.constant 0 : i32
    %17 = arith.cmpi ne, %16, %c0_i32_11 : i32
    scf.if %17 {
      %c0_12 = arith.constant 0 : index
      %c0_13 = arith.constant 0 : index
      %18 = vector.load %arg6[%c0_12, %c0_13] : memref<1x4xf32, #tpu.memory_space<vmem>>, vector<1x4xf32>
      %cst_14 = arith.constant 0.001953125 : f32
      %19 = vector.broadcast %cst_14 : f32 to vector<1x4xf32>
      %20 = arith.mulf %18, %19 : vector<1x4xf32>
      %c0_15 = arith.constant 0 : index
      %c0_16 = arith.constant 0 : index
      %21 = vector.load %arg7[%c0_15, %c0_16] : memref<1x4xf32, #tpu.memory_space<vmem>>, vector<1x4xf32>
      %cst_17 = arith.constant 0.001953125 : f32
      %22 = vector.broadcast %cst_17 : f32 to vector<1x4xf32>
      %23 = arith.mulf %21, %22 : vector<1x4xf32>
      %24 = arith.mulf %20, %20 : vector<1x4xf32>
      %25 = arith.subf %23, %24 : vector<1x4xf32>
      %c0_18 = arith.constant 0 : index
      %c0_19 = arith.constant 0 : index
      %26 = vector.load %arg2[%c0_18, %c0_19] : memref<1x4xf32, #tpu.memory_space<vmem>>, vector<1x4xf32>
      %cst_20 = arith.constant 9.99999974E-6 : f32
      %27 = vector.broadcast %cst_20 : f32 to vector<1x4xf32>
      %28 = arith.addf %25, %27 : vector<1x4xf32>
      %29 = math.rsqrt %28 : vector<1x4xf32>
      %30 = arith.mulf %26, %29 : vector<1x4xf32>
      %c0_21 = arith.constant 0 : index
      %c0_22 = arith.constant 0 : index
      %31 = vector.load %arg4[%c0_21, %c0_22] : memref<1x4xf32, #tpu.memory_space<vmem>>, vector<1x4xf32>
      tpu.vector_store %arg4[%c0_21, %c0_22], %30 {strides = array<i32>} : memref<1x4xf32, #tpu.memory_space<vmem>>, vector<1x4xf32>,
      %c0_23 = arith.constant 0 : index
      %c0_24 = arith.constant 0 : index
      %32 = vector.load %arg3[%c0_23, %c0_24] : memref<1x4xf32, #tpu.memory_space<vmem>>, vector<1x4xf32>
      %33 = arith.mulf %20, %30 : vector<1x4xf32>
      %34 = arith.subf %32, %33 : vector<1x4xf32>
      %c0_25 = arith.constant 0 : index
      %c0_26 = arith.constant 0 : index
      %35 = vector.load %arg5[%c0_25, %c0_26] : memref<1x4xf32, #tpu.memory_space<vmem>>, vector<1x4xf32>
      tpu.vector_store %arg5[%c0_25, %c0_26], %34 {strides = array<i32>} : memref<1x4xf32, #tpu.memory_space<vmem>>, vector<1x4xf32>,
    } else {
    }
    return
  }
  func.func @transform_0(%arg0: i32) -> (i32, i32) {
    %c0_i32 = arith.constant 0 : i32
    %c0_i32_0 = arith.constant 0 : i32
    return %arg0, %c0_i32 : i32, i32
  }
  func.func @transform_1(%arg0: i32) -> (i32, i32) {
    %c0_i32 = arith.constant 0 : i32
    %c0_i32_0 = arith.constant 0 : i32
    %c0_i32_1 = arith.constant 0 : i32
    return %c0_i32, %c0_i32_0 : i32, i32
  }
  func.func @transform_2(%arg0: i32) -> (i32, i32) {
    %c0_i32 = arith.constant 0 : i32
    %c0_i32_0 = arith.constant 0 : i32
    %c0_i32_1 = arith.constant 0 : i32
    return %c0_i32, %c0_i32_0 : i32, i32
  }
  func.func @transform_3(%arg0: i32) -> (i32, i32) {
    %c0_i32 = arith.constant 0 : i32
    %c0_i32_0 = arith.constant 0 : i32
    %c0_i32_1 = arith.constant 0 : i32
    return %c0_i32, %c0_i32_0 : i32, i32
  }
  func.func @transform_4(%arg0: i32) -> (i32, i32) {
    %c0_i32 = arith.constant 0 : i32
    %c0_i32_0 = arith.constant 0 : i32
    %c0_i32_1 = arith.constant 0 : i32
    return %c0_i32, %c0_i32_0 : i32, i32
  }
}

module attributes {stable_mosaic.version = 11 : i64} {
  func.func @kernel(%arg0: i32, %arg1: memref<256x9xbf16, #tpu.memory_space<vmem>>, %arg2: memref<9x4xbf16, #tpu.memory_space<vmem>>, %arg3: memref<256x4xf32, #tpu.memory_space<vmem>>) attributes {dimension_semantics = [#tpu.dimension_semantics<parallel>], iteration_bounds = array<i64: 2>, scalar_prefetch = 0 : i64, scratch_operands = 0 : i64, tpu.core_type = #tpu.core_type<tc>, window_params = [{transform_indices = @transform_0, window_bounds = array<i64: 256, 9>}, {pipeline_mode = #tpu.pipeline_mode<synchronous>, transform_indices = @transform_1, window_bounds = array<i64: 9, 4>}, {transform_indices = @transform_2, window_bounds = array<i64: 256, 4>}]} {
    %c0 = arith.constant 0 : index
    %c0_0 = arith.constant 0 : index
    %0 = vector.load %arg1[%c0, %c0_0] : memref<256x9xbf16, #tpu.memory_space<vmem>>, vector<256x9xbf16>
    %c0_1 = arith.constant 0 : index
    %c0_2 = arith.constant 0 : index
    %1 = vector.load %arg2[%c0_1, %c0_2] : memref<9x4xbf16, #tpu.memory_space<vmem>>, vector<9x4xbf16>
    %cst = arith.constant dense<0.000000e+00> : vector<256x4xf32>
    %2 = tpu.matmul %0, %1, %cst {dimension_numbers = #tpu.dot_dimension_numbers<[1], [0], [0], [1], [0, 0, 1, 1], [], []>} : vector<256x9xbf16>, vector<9x4xbf16>, vector<256x4xf32> -> vector<256x4xf32>
    %c0_3 = arith.constant 0 : index
    %c0_4 = arith.constant 0 : index
    %3 = vector.load %arg3[%c0_3, %c0_4] : memref<256x4xf32, #tpu.memory_space<vmem>>, vector<256x4xf32>
    tpu.vector_store %arg3[%c0_3, %c0_4], %2 {strides = array<i32>} : memref<256x4xf32, #tpu.memory_space<vmem>>, vector<256x4xf32>,
    return
  }
  func.func @transform_0(%arg0: i32) -> (i32, i32) {
    %c0_i32 = arith.constant 0 : i32
    %c0_i32_0 = arith.constant 0 : i32
    return %arg0, %c0_i32 : i32, i32
  }
  func.func @transform_1(%arg0: i32) -> (i32, i32) {
    %c0_i32 = arith.constant 0 : i32
    %c0_i32_0 = arith.constant 0 : i32
    %c0_i32_1 = arith.constant 0 : i32
    return %c0_i32, %c0_i32_0 : i32, i32
  }
  func.func @transform_2(%arg0: i32) -> (i32, i32) {
    %c0_i32 = arith.constant 0 : i32
    %c0_i32_0 = arith.constant 0 : i32
    return %arg0, %c0_i32 : i32, i32
  }
}

module attributes {stable_mosaic.version = 11 : i64} {
  func.func @kernel(%arg0: i32, %arg1: memref<256x36xf32, #tpu.memory_space<vmem>>, %arg2: memref<36x24xbf16, #tpu.memory_space<vmem>>, %arg3: memref<1x36xf32, #tpu.memory_space<vmem>>, %arg4: memref<1x36xf32, #tpu.memory_space<vmem>>, %arg5: memref<256x24xf32, #tpu.memory_space<vmem>>) attributes {dimension_semantics = [#tpu.dimension_semantics<parallel>], iteration_bounds = array<i64: 2>, scalar_prefetch = 0 : i64, scratch_operands = 0 : i64, tpu.core_type = #tpu.core_type<tc>, window_params = [{transform_indices = @transform_0, window_bounds = array<i64: 256, 36>}, {pipeline_mode = #tpu.pipeline_mode<synchronous>, transform_indices = @transform_1, window_bounds = array<i64: 36, 24>}, {pipeline_mode = #tpu.pipeline_mode<synchronous>, transform_indices = @transform_2, window_bounds = array<i64: 1, 36>}, {pipeline_mode = #tpu.pipeline_mode<synchronous>, transform_indices = @transform_3, window_bounds = array<i64: 1, 36>}, {transform_indices = @transform_4, window_bounds = array<i64: 256, 24>}]} {
    %c0 = arith.constant 0 : index
    %c0_0 = arith.constant 0 : index
    %0 = vector.load %arg1[%c0, %c0_0] : memref<256x36xf32, #tpu.memory_space<vmem>>, vector<256x36xf32>
    %c0_1 = arith.constant 0 : index
    %c0_2 = arith.constant 0 : index
    %1 = vector.load %arg3[%c0_1, %c0_2] : memref<1x36xf32, #tpu.memory_space<vmem>>, vector<1x36xf32>
    %2 = vector.broadcast %1 : vector<1x36xf32> to vector<256x36xf32>
    %3 = arith.mulf %0, %2 : vector<256x36xf32>
    %c0_3 = arith.constant 0 : index
    %c0_4 = arith.constant 0 : index
    %4 = vector.load %arg4[%c0_3, %c0_4] : memref<1x36xf32, #tpu.memory_space<vmem>>, vector<1x36xf32>
    %5 = vector.broadcast %4 : vector<1x36xf32> to vector<256x36xf32>
    %6 = arith.addf %3, %5 : vector<256x36xf32>
    %cst = arith.constant 0.000000e+00 : f32
    %7 = vector.broadcast %cst : f32 to vector<256x36xf32>
    %8 = arith.maximumf %6, %7 : vector<256x36xf32>
    %9 = arith.truncf %8 : vector<256x36xf32> to vector<256x36xbf16>
    %c0_5 = arith.constant 0 : index
    %c0_6 = arith.constant 0 : index
    %10 = vector.load %arg2[%c0_5, %c0_6] : memref<36x24xbf16, #tpu.memory_space<vmem>>, vector<36x24xbf16>
    %cst_7 = arith.constant dense<0.000000e+00> : vector<256x24xf32>
    %11 = tpu.matmul %9, %10, %cst_7 {dimension_numbers = #tpu.dot_dimension_numbers<[1], [0], [0], [1], [0, 0, 1, 1], [], []>} : vector<256x36xbf16>, vector<36x24xbf16>, vector<256x24xf32> -> vector<256x24xf32>
    %c0_8 = arith.constant 0 : index
    %c0_9 = arith.constant 0 : index
    %12 = vector.load %arg5[%c0_8, %c0_9] : memref<256x24xf32, #tpu.memory_space<vmem>>, vector<256x24xf32>
    tpu.vector_store %arg5[%c0_8, %c0_9], %11 {strides = array<i32>} : memref<256x24xf32, #tpu.memory_space<vmem>>, vector<256x24xf32>,
    return
  }
  func.func @transform_0(%arg0: i32) -> (i32, i32) {
    %c0_i32 = arith.constant 0 : i32
    %c0_i32_0 = arith.constant 0 : i32
    return %arg0, %c0_i32 : i32, i32
  }
  func.func @transform_1(%arg0: i32) -> (i32, i32) {
    %c0_i32 = arith.constant 0 : i32
    %c0_i32_0 = arith.constant 0 : i32
    %c0_i32_1 = arith.constant 0 : i32
    return %c0_i32, %c0_i32_0 : i32, i32
  }
  func.func @transform_2(%arg0: i32) -> (i32, i32) {
    %c0_i32 = arith.constant 0 : i32
    %c0_i32_0 = arith.constant 0 : i32
    %c0_i32_1 = arith.constant 0 : i32
    return %c0_i32, %c0_i32_0 : i32, i32
  }
  func.func @transform_3(%arg0: i32) -> (i32, i32) {
    %c0_i32 = arith.constant 0 : i32
    %c0_i32_0 = arith.constant 0 : i32
    %c0_i32_1 = arith.constant 0 : i32
    return %c0_i32, %c0_i32_0 : i32, i32
  }
  func.func @transform_4(%arg0: i32) -> (i32, i32) {
    %c0_i32 = arith.constant 0 : i32
    %c0_i32_0 = arith.constant 0 : i32
    return %arg0, %c0_i32 : i32, i32
  }
}

module attributes {stable_mosaic.version = 11 : i64} {
  func.func @kernel(%arg0: i32, %arg1: memref<256x24xf32, #tpu.memory_space<vmem>>, %arg2: memref<1x24xf32, #tpu.memory_space<vmem>>, %arg3: memref<1x24xf32, #tpu.memory_space<vmem>>, %arg4: memref<1x24xf32, #tpu.memory_space<vmem>>, %arg5: memref<1x24xf32, #tpu.memory_space<vmem>>, %arg6: memref<1x24xf32, #tpu.memory_space<vmem>>, %arg7: memref<1x24xf32, #tpu.memory_space<vmem>>) attributes {dimension_semantics = [#tpu.dimension_semantics<arbitrary>], iteration_bounds = array<i64: 2>, scalar_prefetch = 0 : i64, scratch_operands = 2 : i64, tpu.core_type = #tpu.core_type<tc>, window_params = [{transform_indices = @transform_0, window_bounds = array<i64: 256, 24>}, {pipeline_mode = #tpu.pipeline_mode<synchronous>, transform_indices = @transform_1, window_bounds = array<i64: 1, 24>}, {pipeline_mode = #tpu.pipeline_mode<synchronous>, transform_indices = @transform_2, window_bounds = array<i64: 1, 24>}, {pipeline_mode = #tpu.pipeline_mode<synchronous>, transform_indices = @transform_3, window_bounds = array<i64: 1, 24>}, {pipeline_mode = #tpu.pipeline_mode<synchronous>, transform_indices = @transform_4, window_bounds = array<i64: 1, 24>}]} {
    %c0_i32 = arith.constant 0 : i32
    %0 = arith.cmpi eq, %arg0, %c0_i32 : i32
    %1 = arith.extui %0 : i1 to i32
    %c0_i32_0 = arith.constant 0 : i32
    %2 = arith.cmpi ne, %1, %c0_i32_0 : i32
    scf.if %2 {
      %cst_12 = arith.constant 0.000000e+00 : f32
      %18 = vector.broadcast %cst_12 : f32 to vector<1x24xf32>
      %c0_13 = arith.constant 0 : index
      %c0_14 = arith.constant 0 : index
      %19 = vector.load %arg6[%c0_13, %c0_14] : memref<1x24xf32, #tpu.memory_space<vmem>>, vector<1x24xf32>
      tpu.vector_store %arg6[%c0_13, %c0_14], %18 {strides = array<i32>} : memref<1x24xf32, #tpu.memory_space<vmem>>, vector<1x24xf32>,
      %cst_15 = arith.constant 0.000000e+00 : f32
      %20 = vector.broadcast %cst_15 : f32 to vector<1x24xf32>
      %c0_16 = arith.constant 0 : index
      %c0_17 = arith.constant 0 : index
      %21 = vector.load %arg7[%c0_16, %c0_17] : memref<1x24xf32, #tpu.memory_space<vmem>>, vector<1x24xf32>
      tpu.vector_store %arg7[%c0_16, %c0_17], %20 {strides = array<i32>} : memref<1x24xf32, #tpu.memory_space<vmem>>, vector<1x24xf32>,
    } else {
    }
    %c0 = arith.constant 0 : index
    %c0_1 = arith.constant 0 : index
    %3 = vector.load %arg1[%c0, %c0_1] : memref<256x24xf32, #tpu.memory_space<vmem>>, vector<256x24xf32>
    %c0_2 = arith.constant 0 : index
    %c0_3 = arith.constant 0 : index
    %4 = vector.load %arg6[%c0_2, %c0_3] : memref<1x24xf32, #tpu.memory_space<vmem>>, vector<1x24xf32>
    %cst = arith.constant dense<0.000000e+00> : vector<24xf32>
    %5 = vector.multi_reduction <add>, %3, %cst [0] : vector<256x24xf32> to vector<24xf32>
    %6 = vector.shape_cast %5 : vector<24xf32> to vector<1x24xf32>
    %7 = arith.addf %4, %6 : vector<1x24xf32>
    %c0_4 = arith.constant 0 : index
    %c0_5 = arith.constant 0 : index
    %8 = vector.load %arg6[%c0_4, %c0_5] : memref<1x24xf32, #tpu.memory_space<vmem>>, vector<1x24xf32>
    tpu.vector_store %arg6[%c0_4, %c0_5], %7 {strides = array<i32>} : memref<1x24xf32, #tpu.memory_space<vmem>>, vector<1x24xf32>,
    %c0_6 = arith.constant 0 : index
    %c0_7 = arith.constant 0 : index
    %9 = vector.load %arg7[%c0_6, %c0_7] : memref<1x24xf32, #tpu.memory_space<vmem>>, vector<1x24xf32>
    %10 = arith.mulf %3, %3 : vector<256x24xf32>
    %cst_8 = arith.constant dense<0.000000e+00> : vector<24xf32>
    %11 = vector.multi_reduction <add>, %10, %cst_8 [0] : vector<256x24xf32> to vector<24xf32>
    %12 = vector.shape_cast %11 : vector<24xf32> to vector<1x24xf32>
    %13 = arith.addf %9, %12 : vector<1x24xf32>
    %c0_9 = arith.constant 0 : index
    %c0_10 = arith.constant 0 : index
    %14 = vector.load %arg7[%c0_9, %c0_10] : memref<1x24xf32, #tpu.memory_space<vmem>>, vector<1x24xf32>
    tpu.vector_store %arg7[%c0_9, %c0_10], %13 {strides = array<i32>} : memref<1x24xf32, #tpu.memory_space<vmem>>, vector<1x24xf32>,
    %c1_i32 = arith.constant 1 : i32
    %15 = arith.cmpi eq, %arg0, %c1_i32 : i32
    %16 = arith.extui %15 : i1 to i32
    %c0_i32_11 = arith.constant 0 : i32
    %17 = arith.cmpi ne, %16, %c0_i32_11 : i32
    scf.if %17 {
      %c0_12 = arith.constant 0 : index
      %c0_13 = arith.constant 0 : index
      %18 = vector.load %arg6[%c0_12, %c0_13] : memref<1x24xf32, #tpu.memory_space<vmem>>, vector<1x24xf32>
      %cst_14 = arith.constant 0.001953125 : f32
      %19 = vector.broadcast %cst_14 : f32 to vector<1x24xf32>
      %20 = arith.mulf %18, %19 : vector<1x24xf32>
      %c0_15 = arith.constant 0 : index
      %c0_16 = arith.constant 0 : index
      %21 = vector.load %arg7[%c0_15, %c0_16] : memref<1x24xf32, #tpu.memory_space<vmem>>, vector<1x24xf32>
      %cst_17 = arith.constant 0.001953125 : f32
      %22 = vector.broadcast %cst_17 : f32 to vector<1x24xf32>
      %23 = arith.mulf %21, %22 : vector<1x24xf32>
      %24 = arith.mulf %20, %20 : vector<1x24xf32>
      %25 = arith.subf %23, %24 : vector<1x24xf32>
      %c0_18 = arith.constant 0 : index
      %c0_19 = arith.constant 0 : index
      %26 = vector.load %arg2[%c0_18, %c0_19] : memref<1x24xf32, #tpu.memory_space<vmem>>, vector<1x24xf32>
      %cst_20 = arith.constant 9.99999974E-6 : f32
      %27 = vector.broadcast %cst_20 : f32 to vector<1x24xf32>
      %28 = arith.addf %25, %27 : vector<1x24xf32>
      %29 = math.rsqrt %28 : vector<1x24xf32>
      %30 = arith.mulf %26, %29 : vector<1x24xf32>
      %c0_21 = arith.constant 0 : index
      %c0_22 = arith.constant 0 : index
      %31 = vector.load %arg4[%c0_21, %c0_22] : memref<1x24xf32, #tpu.memory_space<vmem>>, vector<1x24xf32>
      tpu.vector_store %arg4[%c0_21, %c0_22], %30 {strides = array<i32>} : memref<1x24xf32, #tpu.memory_space<vmem>>, vector<1x24xf32>,
      %c0_23 = arith.constant 0 : index
      %c0_24 = arith.constant 0 : index
      %32 = vector.load %arg3[%c0_23, %c0_24] : memref<1x24xf32, #tpu.memory_space<vmem>>, vector<1x24xf32>
      %33 = arith.mulf %20, %30 : vector<1x24xf32>
      %34 = arith.subf %32, %33 : vector<1x24xf32>
      %c0_25 = arith.constant 0 : index
      %c0_26 = arith.constant 0 : index
      %35 = vector.load %arg5[%c0_25, %c0_26] : memref<1x24xf32, #tpu.memory_space<vmem>>, vector<1x24xf32>
      tpu.vector_store %arg5[%c0_25, %c0_26], %34 {strides = array<i32>} : memref<1x24xf32, #tpu.memory_space<vmem>>, vector<1x24xf32>,
    } else {
    }
    return
  }
  func.func @transform_0(%arg0: i32) -> (i32, i32) {
    %c0_i32 = arith.constant 0 : i32
    %c0_i32_0 = arith.constant 0 : i32
    return %arg0, %c0_i32 : i32, i32
  }
  func.func @transform_1(%arg0: i32) -> (i32, i32) {
    %c0_i32 = arith.constant 0 : i32
    %c0_i32_0 = arith.constant 0 : i32
    %c0_i32_1 = arith.constant 0 : i32
    return %c0_i32, %c0_i32_0 : i32, i32
  }
  func.func @transform_2(%arg0: i32) -> (i32, i32) {
    %c0_i32 = arith.constant 0 : i32
    %c0_i32_0 = arith.constant 0 : i32
    %c0_i32_1 = arith.constant 0 : i32
    return %c0_i32, %c0_i32_0 : i32, i32
  }
  func.func @transform_3(%arg0: i32) -> (i32, i32) {
    %c0_i32 = arith.constant 0 : i32
    %c0_i32_0 = arith.constant 0 : i32
    %c0_i32_1 = arith.constant 0 : i32
    return %c0_i32, %c0_i32_0 : i32, i32
  }
  func.func @transform_4(%arg0: i32) -> (i32, i32) {
    %c0_i32 = arith.constant 0 : i32
    %c0_i32_0 = arith.constant 0 : i32
    %c0_i32_1 = arith.constant 0 : i32
    return %c0_i32, %c0_i32_0 : i32, i32
  }
}

module attributes {stable_mosaic.version = 11 : i64} {
  func.func @kernel(%arg0: i32, %arg1: memref<256x4xf32, #tpu.memory_space<vmem>>, %arg2: memref<4x24xbf16, #tpu.memory_space<vmem>>, %arg3: memref<1x4xf32, #tpu.memory_space<vmem>>, %arg4: memref<1x4xf32, #tpu.memory_space<vmem>>, %arg5: memref<256x24xf32, #tpu.memory_space<vmem>>) attributes {dimension_semantics = [#tpu.dimension_semantics<parallel>], iteration_bounds = array<i64: 2>, scalar_prefetch = 0 : i64, scratch_operands = 0 : i64, tpu.core_type = #tpu.core_type<tc>, window_params = [{transform_indices = @transform_0, window_bounds = array<i64: 256, 4>}, {pipeline_mode = #tpu.pipeline_mode<synchronous>, transform_indices = @transform_1, window_bounds = array<i64: 4, 24>}, {pipeline_mode = #tpu.pipeline_mode<synchronous>, transform_indices = @transform_2, window_bounds = array<i64: 1, 4>}, {pipeline_mode = #tpu.pipeline_mode<synchronous>, transform_indices = @transform_3, window_bounds = array<i64: 1, 4>}, {transform_indices = @transform_4, window_bounds = array<i64: 256, 24>}]} {
    %c0 = arith.constant 0 : index
    %c0_0 = arith.constant 0 : index
    %0 = vector.load %arg1[%c0, %c0_0] : memref<256x4xf32, #tpu.memory_space<vmem>>, vector<256x4xf32>
    %c0_1 = arith.constant 0 : index
    %c0_2 = arith.constant 0 : index
    %1 = vector.load %arg3[%c0_1, %c0_2] : memref<1x4xf32, #tpu.memory_space<vmem>>, vector<1x4xf32>
    %2 = vector.broadcast %1 : vector<1x4xf32> to vector<256x4xf32>
    %3 = arith.mulf %0, %2 : vector<256x4xf32>
    %c0_3 = arith.constant 0 : index
    %c0_4 = arith.constant 0 : index
    %4 = vector.load %arg4[%c0_3, %c0_4] : memref<1x4xf32, #tpu.memory_space<vmem>>, vector<1x4xf32>
    %5 = vector.broadcast %4 : vector<1x4xf32> to vector<256x4xf32>
    %6 = arith.addf %3, %5 : vector<256x4xf32>
    %cst = arith.constant 0.000000e+00 : f32
    %7 = vector.broadcast %cst : f32 to vector<256x4xf32>
    %8 = arith.maximumf %6, %7 : vector<256x4xf32>
    %9 = arith.truncf %8 : vector<256x4xf32> to vector<256x4xbf16>
    %c0_5 = arith.constant 0 : index
    %c0_6 = arith.constant 0 : index
    %10 = vector.load %arg2[%c0_5, %c0_6] : memref<4x24xbf16, #tpu.memory_space<vmem>>, vector<4x24xbf16>
    %cst_7 = arith.constant dense<0.000000e+00> : vector<256x24xf32>
    %11 = tpu.matmul %9, %10, %cst_7 {dimension_numbers = #tpu.dot_dimension_numbers<[1], [0], [0], [1], [0, 0, 1, 1], [], []>} : vector<256x4xbf16>, vector<4x24xbf16>, vector<256x24xf32> -> vector<256x24xf32>
    %c0_8 = arith.constant 0 : index
    %c0_9 = arith.constant 0 : index
    %12 = vector.load %arg5[%c0_8, %c0_9] : memref<256x24xf32, #tpu.memory_space<vmem>>, vector<256x24xf32>
    tpu.vector_store %arg5[%c0_8, %c0_9], %11 {strides = array<i32>} : memref<256x24xf32, #tpu.memory_space<vmem>>, vector<256x24xf32>,
    return
  }
  func.func @transform_0(%arg0: i32) -> (i32, i32) {
    %c0_i32 = arith.constant 0 : i32
    %c0_i32_0 = arith.constant 0 : i32
    return %arg0, %c0_i32 : i32, i32
  }
  func.func @transform_1(%arg0: i32) -> (i32, i32) {
    %c0_i32 = arith.constant 0 : i32
    %c0_i32_0 = arith.constant 0 : i32
    %c0_i32_1 = arith.constant 0 : i32
    return %c0_i32, %c0_i32_0 : i32, i32
  }
  func.func @transform_2(%arg0: i32) -> (i32, i32) {
    %c0_i32 = arith.constant 0 : i32
    %c0_i32_0 = arith.constant 0 : i32
    %c0_i32_1 = arith.constant 0 : i32
    return %c0_i32, %c0_i32_0 : i32, i32
  }
  func.func @transform_3(%arg0: i32) -> (i32, i32) {
    %c0_i32 = arith.constant 0 : i32
    %c0_i32_0 = arith.constant 0 : i32
    %c0_i32_1 = arith.constant 0 : i32
    return %c0_i32, %c0_i32_0 : i32, i32
  }
  func.func @transform_4(%arg0: i32) -> (i32, i32) {
    %c0_i32 = arith.constant 0 : i32
    %c0_i32_0 = arith.constant 0 : i32
    return %arg0, %c0_i32 : i32, i32
  }
}

module attributes {stable_mosaic.version = 11 : i64} {
  func.func @kernel(%arg0: i32, %arg1: memref<256x216xf32, #tpu.memory_space<vmem>>, %arg2: memref<216x24xbf16, #tpu.memory_space<vmem>>, %arg3: memref<1x216xf32, #tpu.memory_space<vmem>>, %arg4: memref<1x216xf32, #tpu.memory_space<vmem>>, %arg5: memref<256x24xf32, #tpu.memory_space<vmem>>, %arg6: memref<256x24xf32, #tpu.memory_space<vmem>>) attributes {dimension_semantics = [#tpu.dimension_semantics<parallel>], iteration_bounds = array<i64: 2>, scalar_prefetch = 0 : i64, scratch_operands = 0 : i64, tpu.core_type = #tpu.core_type<tc>, window_params = [{transform_indices = @transform_0, window_bounds = array<i64: 256, 216>}, {pipeline_mode = #tpu.pipeline_mode<synchronous>, transform_indices = @transform_1, window_bounds = array<i64: 216, 24>}, {pipeline_mode = #tpu.pipeline_mode<synchronous>, transform_indices = @transform_2, window_bounds = array<i64: 1, 216>}, {pipeline_mode = #tpu.pipeline_mode<synchronous>, transform_indices = @transform_3, window_bounds = array<i64: 1, 216>}, {transform_indices = @transform_4, window_bounds = array<i64: 256, 24>}, {transform_indices = @transform_5, window_bounds = array<i64: 256, 24>}]} {
    %c0 = arith.constant 0 : index
    %c0_0 = arith.constant 0 : index
    %0 = vector.load %arg1[%c0, %c0_0] : memref<256x216xf32, #tpu.memory_space<vmem>>, vector<256x216xf32>
    %c0_1 = arith.constant 0 : index
    %c0_2 = arith.constant 0 : index
    %1 = vector.load %arg3[%c0_1, %c0_2] : memref<1x216xf32, #tpu.memory_space<vmem>>, vector<1x216xf32>
    %2 = vector.broadcast %1 : vector<1x216xf32> to vector<256x216xf32>
    %3 = arith.mulf %0, %2 : vector<256x216xf32>
    %c0_3 = arith.constant 0 : index
    %c0_4 = arith.constant 0 : index
    %4 = vector.load %arg4[%c0_3, %c0_4] : memref<1x216xf32, #tpu.memory_space<vmem>>, vector<1x216xf32>
    %5 = vector.broadcast %4 : vector<1x216xf32> to vector<256x216xf32>
    %6 = arith.addf %3, %5 : vector<256x216xf32>
    %cst = arith.constant 0.000000e+00 : f32
    %7 = vector.broadcast %cst : f32 to vector<256x216xf32>
    %8 = arith.maximumf %6, %7 : vector<256x216xf32>
    %9 = arith.truncf %8 : vector<256x216xf32> to vector<256x216xbf16>
    %c0_5 = arith.constant 0 : index
    %c0_6 = arith.constant 0 : index
    %10 = vector.load %arg2[%c0_5, %c0_6] : memref<216x24xbf16, #tpu.memory_space<vmem>>, vector<216x24xbf16>
    %cst_7 = arith.constant dense<0.000000e+00> : vector<256x24xf32>
    %11 = tpu.matmul %9, %10, %cst_7 {dimension_numbers = #tpu.dot_dimension_numbers<[1], [0], [0], [1], [0, 0, 1, 1], [], []>} : vector<256x216xbf16>, vector<216x24xbf16>, vector<256x24xf32> -> vector<256x24xf32>
    %cst_8 = arith.constant 2.000000e-01 : f32
    %12 = vector.broadcast %cst_8 : f32 to vector<256x24xf32>
    %13 = arith.mulf %12, %11 : vector<256x24xf32>
    %c0_9 = arith.constant 0 : index
    %c0_10 = arith.constant 0 : index
    %14 = vector.load %arg5[%c0_9, %c0_10] : memref<256x24xf32, #tpu.memory_space<vmem>>, vector<256x24xf32>
    %15 = arith.addf %13, %14 : vector<256x24xf32>
    %c0_11 = arith.constant 0 : index
    %c0_12 = arith.constant 0 : index
    %16 = vector.load %arg6[%c0_11, %c0_12] : memref<256x24xf32, #tpu.memory_space<vmem>>, vector<256x24xf32>
    tpu.vector_store %arg6[%c0_11, %c0_12], %15 {strides = array<i32>} : memref<256x24xf32, #tpu.memory_space<vmem>>, vector<256x24xf32>,
    return
  }
  func.func @transform_0(%arg0: i32) -> (i32, i32) {
    %c0_i32 = arith.constant 0 : i32
    %c0_i32_0 = arith.constant 0 : i32
    return %arg0, %c0_i32 : i32, i32
  }
  func.func @transform_1(%arg0: i32) -> (i32, i32) {
    %c0_i32 = arith.constant 0 : i32
    %c0_i32_0 = arith.constant 0 : i32
    %c0_i32_1 = arith.constant 0 : i32
    return %c0_i32, %c0_i32_0 : i32, i32
  }
  func.func @transform_2(%arg0: i32) -> (i32, i32) {
    %c0_i32 = arith.constant 0 : i32
    %c0_i32_0 = arith.constant 0 : i32
    %c0_i32_1 = arith.constant 0 : i32
    return %c0_i32, %c0_i32_0 : i32, i32
  }
  func.func @transform_3(%arg0: i32) -> (i32, i32) {
    %c0_i32 = arith.constant 0 : i32
    %c0_i32_0 = arith.constant 0 : i32
    %c0_i32_1 = arith.constant 0 : i32
    return %c0_i32, %c0_i32_0 : i32, i32
  }
  func.func @transform_4(%arg0: i32) -> (i32, i32) {
    %c0_i32 = arith.constant 0 : i32
    %c0_i32_0 = arith.constant 0 : i32
    return %arg0, %c0_i32 : i32, i32
  }
  func.func @transform_5(%arg0: i32) -> (i32, i32) {
    %c0_i32 = arith.constant 0 : i32
    %c0_i32_0 = arith.constant 0 : i32
    return %arg0, %c0_i32 : i32, i32
  }
}

module attributes {stable_mosaic.version = 11 : i64} {
  func.func @kernel(%arg0: i32, %arg1: memref<128x24xf32, #tpu.memory_space<vmem>>, %arg2: memref<24x48xbf16, #tpu.memory_space<vmem>>, %arg3: memref<1x24xf32, #tpu.memory_space<vmem>>, %arg4: memref<1x24xf32, #tpu.memory_space<vmem>>, %arg5: memref<128x48xf32, #tpu.memory_space<vmem>>) attributes {dimension_semantics = [#tpu.dimension_semantics<parallel>], iteration_bounds = array<i64: 1>, scalar_prefetch = 0 : i64, scratch_operands = 0 : i64, tpu.core_type = #tpu.core_type<tc>, window_params = [{transform_indices = @transform_0, window_bounds = array<i64: 128, 24>}, {pipeline_mode = #tpu.pipeline_mode<synchronous>, transform_indices = @transform_1, window_bounds = array<i64: 24, 48>}, {pipeline_mode = #tpu.pipeline_mode<synchronous>, transform_indices = @transform_2, window_bounds = array<i64: 1, 24>}, {pipeline_mode = #tpu.pipeline_mode<synchronous>, transform_indices = @transform_3, window_bounds = array<i64: 1, 24>}, {transform_indices = @transform_4, window_bounds = array<i64: 128, 48>}]} {
    %c0 = arith.constant 0 : index
    %c0_0 = arith.constant 0 : index
    %0 = vector.load %arg1[%c0, %c0_0] : memref<128x24xf32, #tpu.memory_space<vmem>>, vector<128x24xf32>
    %c0_1 = arith.constant 0 : index
    %c0_2 = arith.constant 0 : index
    %1 = vector.load %arg3[%c0_1, %c0_2] : memref<1x24xf32, #tpu.memory_space<vmem>>, vector<1x24xf32>
    %2 = vector.broadcast %1 : vector<1x24xf32> to vector<128x24xf32>
    %3 = arith.mulf %0, %2 : vector<128x24xf32>
    %c0_3 = arith.constant 0 : index
    %c0_4 = arith.constant 0 : index
    %4 = vector.load %arg4[%c0_3, %c0_4] : memref<1x24xf32, #tpu.memory_space<vmem>>, vector<1x24xf32>
    %5 = vector.broadcast %4 : vector<1x24xf32> to vector<128x24xf32>
    %6 = arith.addf %3, %5 : vector<128x24xf32>
    %cst = arith.constant 0.000000e+00 : f32
    %7 = vector.broadcast %cst : f32 to vector<128x24xf32>
    %8 = arith.maximumf %6, %7 : vector<128x24xf32>
    %9 = arith.truncf %8 : vector<128x24xf32> to vector<128x24xbf16>
    %c0_5 = arith.constant 0 : index
    %c0_6 = arith.constant 0 : index
    %10 = vector.load %arg2[%c0_5, %c0_6] : memref<24x48xbf16, #tpu.memory_space<vmem>>, vector<24x48xbf16>
    %cst_7 = arith.constant dense<0.000000e+00> : vector<128x48xf32>
    %11 = tpu.matmul %9, %10, %cst_7 {dimension_numbers = #tpu.dot_dimension_numbers<[1], [0], [0], [1], [0, 0, 1, 1], [], []>} : vector<128x24xbf16>, vector<24x48xbf16>, vector<128x48xf32> -> vector<128x48xf32>
    %c0_8 = arith.constant 0 : index
    %c0_9 = arith.constant 0 : index
    %12 = vector.load %arg5[%c0_8, %c0_9] : memref<128x48xf32, #tpu.memory_space<vmem>>, vector<128x48xf32>
    tpu.vector_store %arg5[%c0_8, %c0_9], %11 {strides = array<i32>} : memref<128x48xf32, #tpu.memory_space<vmem>>, vector<128x48xf32>,
    return
  }
  func.func @transform_0(%arg0: i32) -> (i32, i32) {
    %c0_i32 = arith.constant 0 : i32
    %c0_i32_0 = arith.constant 0 : i32
    return %arg0, %c0_i32 : i32, i32
  }
  func.func @transform_1(%arg0: i32) -> (i32, i32) {
    %c0_i32 = arith.constant 0 : i32
    %c0_i32_0 = arith.constant 0 : i32
    %c0_i32_1 = arith.constant 0 : i32
    return %c0_i32, %c0_i32_0 : i32, i32
  }
  func.func @transform_2(%arg0: i32) -> (i32, i32) {
    %c0_i32 = arith.constant 0 : i32
    %c0_i32_0 = arith.constant 0 : i32
    %c0_i32_1 = arith.constant 0 : i32
    return %c0_i32, %c0_i32_0 : i32, i32
  }
  func.func @transform_3(%arg0: i32) -> (i32, i32) {
    %c0_i32 = arith.constant 0 : i32
    %c0_i32_0 = arith.constant 0 : i32
    %c0_i32_1 = arith.constant 0 : i32
    return %c0_i32, %c0_i32_0 : i32, i32
  }
  func.func @transform_4(%arg0: i32) -> (i32, i32) {
    %c0_i32 = arith.constant 0 : i32
    %c0_i32_0 = arith.constant 0 : i32
    return %arg0, %c0_i32 : i32, i32
  }
}

module attributes {stable_mosaic.version = 11 : i64} {
  func.func @kernel(%arg0: i32, %arg1: memref<128x216xf32, #tpu.memory_space<vmem>>, %arg2: memref<216x48xbf16, #tpu.memory_space<vmem>>, %arg3: memref<1x216xf32, #tpu.memory_space<vmem>>, %arg4: memref<1x216xf32, #tpu.memory_space<vmem>>, %arg5: memref<128x48xf32, #tpu.memory_space<vmem>>) attributes {dimension_semantics = [#tpu.dimension_semantics<parallel>], iteration_bounds = array<i64: 1>, scalar_prefetch = 0 : i64, scratch_operands = 0 : i64, tpu.core_type = #tpu.core_type<tc>, window_params = [{transform_indices = @transform_0, window_bounds = array<i64: 128, 216>}, {pipeline_mode = #tpu.pipeline_mode<synchronous>, transform_indices = @transform_1, window_bounds = array<i64: 216, 48>}, {pipeline_mode = #tpu.pipeline_mode<synchronous>, transform_indices = @transform_2, window_bounds = array<i64: 1, 216>}, {pipeline_mode = #tpu.pipeline_mode<synchronous>, transform_indices = @transform_3, window_bounds = array<i64: 1, 216>}, {transform_indices = @transform_4, window_bounds = array<i64: 128, 48>}]} {
    %c0 = arith.constant 0 : index
    %c0_0 = arith.constant 0 : index
    %0 = vector.load %arg1[%c0, %c0_0] : memref<128x216xf32, #tpu.memory_space<vmem>>, vector<128x216xf32>
    %c0_1 = arith.constant 0 : index
    %c0_2 = arith.constant 0 : index
    %1 = vector.load %arg3[%c0_1, %c0_2] : memref<1x216xf32, #tpu.memory_space<vmem>>, vector<1x216xf32>
    %2 = vector.broadcast %1 : vector<1x216xf32> to vector<128x216xf32>
    %3 = arith.mulf %0, %2 : vector<128x216xf32>
    %c0_3 = arith.constant 0 : index
    %c0_4 = arith.constant 0 : index
    %4 = vector.load %arg4[%c0_3, %c0_4] : memref<1x216xf32, #tpu.memory_space<vmem>>, vector<1x216xf32>
    %5 = vector.broadcast %4 : vector<1x216xf32> to vector<128x216xf32>
    %6 = arith.addf %3, %5 : vector<128x216xf32>
    %cst = arith.constant 0.000000e+00 : f32
    %7 = vector.broadcast %cst : f32 to vector<128x216xf32>
    %8 = arith.maximumf %6, %7 : vector<128x216xf32>
    %9 = arith.truncf %8 : vector<128x216xf32> to vector<128x216xbf16>
    %c0_5 = arith.constant 0 : index
    %c0_6 = arith.constant 0 : index
    %10 = vector.load %arg2[%c0_5, %c0_6] : memref<216x48xbf16, #tpu.memory_space<vmem>>, vector<216x48xbf16>
    %cst_7 = arith.constant dense<0.000000e+00> : vector<128x48xf32>
    %11 = tpu.matmul %9, %10, %cst_7 {dimension_numbers = #tpu.dot_dimension_numbers<[1], [0], [0], [1], [0, 0, 1, 1], [], []>} : vector<128x216xbf16>, vector<216x48xbf16>, vector<128x48xf32> -> vector<128x48xf32>
    %c0_8 = arith.constant 0 : index
    %c0_9 = arith.constant 0 : index
    %12 = vector.load %arg5[%c0_8, %c0_9] : memref<128x48xf32, #tpu.memory_space<vmem>>, vector<128x48xf32>
    tpu.vector_store %arg5[%c0_8, %c0_9], %11 {strides = array<i32>} : memref<128x48xf32, #tpu.memory_space<vmem>>, vector<128x48xf32>,
    return
  }
  func.func @transform_0(%arg0: i32) -> (i32, i32) {
    %c0_i32 = arith.constant 0 : i32
    %c0_i32_0 = arith.constant 0 : i32
    return %arg0, %c0_i32 : i32, i32
  }
  func.func @transform_1(%arg0: i32) -> (i32, i32) {
    %c0_i32 = arith.constant 0 : i32
    %c0_i32_0 = arith.constant 0 : i32
    %c0_i32_1 = arith.constant 0 : i32
    return %c0_i32, %c0_i32_0 : i32, i32
  }
  func.func @transform_2(%arg0: i32) -> (i32, i32) {
    %c0_i32 = arith.constant 0 : i32
    %c0_i32_0 = arith.constant 0 : i32
    %c0_i32_1 = arith.constant 0 : i32
    return %c0_i32, %c0_i32_0 : i32, i32
  }
  func.func @transform_3(%arg0: i32) -> (i32, i32) {
    %c0_i32 = arith.constant 0 : i32
    %c0_i32_0 = arith.constant 0 : i32
    %c0_i32_1 = arith.constant 0 : i32
    return %c0_i32, %c0_i32_0 : i32, i32
  }
  func.func @transform_4(%arg0: i32) -> (i32, i32) {
    %c0_i32 = arith.constant 0 : i32
    %c0_i32_0 = arith.constant 0 : i32
    return %arg0, %c0_i32 : i32, i32
  }
}

module attributes {stable_mosaic.version = 11 : i64} {
  func.func @kernel(%arg0: i32, %arg1: memref<128x48xf32, #tpu.memory_space<vmem>>, %arg2: memref<1x48xf32, #tpu.memory_space<vmem>>, %arg3: memref<1x48xf32, #tpu.memory_space<vmem>>, %arg4: memref<1x48xf32, #tpu.memory_space<vmem>>, %arg5: memref<1x48xf32, #tpu.memory_space<vmem>>, %arg6: memref<1x48xf32, #tpu.memory_space<vmem>>, %arg7: memref<1x48xf32, #tpu.memory_space<vmem>>) attributes {dimension_semantics = [#tpu.dimension_semantics<arbitrary>], iteration_bounds = array<i64: 1>, scalar_prefetch = 0 : i64, scratch_operands = 2 : i64, tpu.core_type = #tpu.core_type<tc>, window_params = [{transform_indices = @transform_0, window_bounds = array<i64: 128, 48>}, {pipeline_mode = #tpu.pipeline_mode<synchronous>, transform_indices = @transform_1, window_bounds = array<i64: 1, 48>}, {pipeline_mode = #tpu.pipeline_mode<synchronous>, transform_indices = @transform_2, window_bounds = array<i64: 1, 48>}, {pipeline_mode = #tpu.pipeline_mode<synchronous>, transform_indices = @transform_3, window_bounds = array<i64: 1, 48>}, {pipeline_mode = #tpu.pipeline_mode<synchronous>, transform_indices = @transform_4, window_bounds = array<i64: 1, 48>}]} {
    %c0_i32 = arith.constant 0 : i32
    %0 = arith.cmpi eq, %arg0, %c0_i32 : i32
    %1 = arith.extui %0 : i1 to i32
    %c0_i32_0 = arith.constant 0 : i32
    %2 = arith.cmpi ne, %1, %c0_i32_0 : i32
    scf.if %2 {
      %cst_13 = arith.constant 0.000000e+00 : f32
      %18 = vector.broadcast %cst_13 : f32 to vector<1x48xf32>
      %c0_14 = arith.constant 0 : index
      %c0_15 = arith.constant 0 : index
      %19 = vector.load %arg6[%c0_14, %c0_15] : memref<1x48xf32, #tpu.memory_space<vmem>>, vector<1x48xf32>
      tpu.vector_store %arg6[%c0_14, %c0_15], %18 {strides = array<i32>} : memref<1x48xf32, #tpu.memory_space<vmem>>, vector<1x48xf32>,
      %cst_16 = arith.constant 0.000000e+00 : f32
      %20 = vector.broadcast %cst_16 : f32 to vector<1x48xf32>
      %c0_17 = arith.constant 0 : index
      %c0_18 = arith.constant 0 : index
      %21 = vector.load %arg7[%c0_17, %c0_18] : memref<1x48xf32, #tpu.memory_space<vmem>>, vector<1x48xf32>
      tpu.vector_store %arg7[%c0_17, %c0_18], %20 {strides = array<i32>} : memref<1x48xf32, #tpu.memory_space<vmem>>, vector<1x48xf32>,
    } else {
    }
    %c0 = arith.constant 0 : index
    %c0_1 = arith.constant 0 : index
    %3 = vector.load %arg1[%c0, %c0_1] : memref<128x48xf32, #tpu.memory_space<vmem>>, vector<128x48xf32>
    %c0_2 = arith.constant 0 : index
    %c0_3 = arith.constant 0 : index
    %4 = vector.load %arg6[%c0_2, %c0_3] : memref<1x48xf32, #tpu.memory_space<vmem>>, vector<1x48xf32>
    %cst = arith.constant dense<0.000000e+00> : vector<48xf32>
    %5 = vector.multi_reduction <add>, %3, %cst [0] : vector<128x48xf32> to vector<48xf32>
    %6 = vector.shape_cast %5 : vector<48xf32> to vector<1x48xf32>
    %7 = arith.addf %4, %6 : vector<1x48xf32>
    %c0_4 = arith.constant 0 : index
    %c0_5 = arith.constant 0 : index
    %8 = vector.load %arg6[%c0_4, %c0_5] : memref<1x48xf32, #tpu.memory_space<vmem>>, vector<1x48xf32>
    tpu.vector_store %arg6[%c0_4, %c0_5], %7 {strides = array<i32>} : memref<1x48xf32, #tpu.memory_space<vmem>>, vector<1x48xf32>,
    %c0_6 = arith.constant 0 : index
    %c0_7 = arith.constant 0 : index
    %9 = vector.load %arg7[%c0_6, %c0_7] : memref<1x48xf32, #tpu.memory_space<vmem>>, vector<1x48xf32>
    %10 = arith.mulf %3, %3 : vector<128x48xf32>
    %cst_8 = arith.constant dense<0.000000e+00> : vector<48xf32>
    %11 = vector.multi_reduction <add>, %10, %cst_8 [0] : vector<128x48xf32> to vector<48xf32>
    %12 = vector.shape_cast %11 : vector<48xf32> to vector<1x48xf32>
    %13 = arith.addf %9, %12 : vector<1x48xf32>
    %c0_9 = arith.constant 0 : index
    %c0_10 = arith.constant 0 : index
    %14 = vector.load %arg7[%c0_9, %c0_10] : memref<1x48xf32, #tpu.memory_space<vmem>>, vector<1x48xf32>
    tpu.vector_store %arg7[%c0_9, %c0_10], %13 {strides = array<i32>} : memref<1x48xf32, #tpu.memory_space<vmem>>, vector<1x48xf32>,
    %c0_i32_11 = arith.constant 0 : i32
    %15 = arith.cmpi eq, %arg0, %c0_i32_11 : i32
    %16 = arith.extui %15 : i1 to i32
    %c0_i32_12 = arith.constant 0 : i32
    %17 = arith.cmpi ne, %16, %c0_i32_12 : i32
    scf.if %17 {
      %c0_13 = arith.constant 0 : index
      %c0_14 = arith.constant 0 : index
      %18 = vector.load %arg6[%c0_13, %c0_14] : memref<1x48xf32, #tpu.memory_space<vmem>>, vector<1x48xf32>
      %cst_15 = arith.constant 7.812500e-03 : f32
      %19 = vector.broadcast %cst_15 : f32 to vector<1x48xf32>
      %20 = arith.mulf %18, %19 : vector<1x48xf32>
      %c0_16 = arith.constant 0 : index
      %c0_17 = arith.constant 0 : index
      %21 = vector.load %arg7[%c0_16, %c0_17] : memref<1x48xf32, #tpu.memory_space<vmem>>, vector<1x48xf32>
      %cst_18 = arith.constant 7.812500e-03 : f32
      %22 = vector.broadcast %cst_18 : f32 to vector<1x48xf32>
      %23 = arith.mulf %21, %22 : vector<1x48xf32>
      %24 = arith.mulf %20, %20 : vector<1x48xf32>
      %25 = arith.subf %23, %24 : vector<1x48xf32>
      %c0_19 = arith.constant 0 : index
      %c0_20 = arith.constant 0 : index
      %26 = vector.load %arg2[%c0_19, %c0_20] : memref<1x48xf32, #tpu.memory_space<vmem>>, vector<1x48xf32>
      %cst_21 = arith.constant 9.99999974E-6 : f32
      %27 = vector.broadcast %cst_21 : f32 to vector<1x48xf32>
      %28 = arith.addf %25, %27 : vector<1x48xf32>
      %29 = math.rsqrt %28 : vector<1x48xf32>
      %30 = arith.mulf %26, %29 : vector<1x48xf32>
      %c0_22 = arith.constant 0 : index
      %c0_23 = arith.constant 0 : index
      %31 = vector.load %arg4[%c0_22, %c0_23] : memref<1x48xf32, #tpu.memory_space<vmem>>, vector<1x48xf32>
      tpu.vector_store %arg4[%c0_22, %c0_23], %30 {strides = array<i32>} : memref<1x48xf32, #tpu.memory_space<vmem>>, vector<1x48xf32>,
      %c0_24 = arith.constant 0 : index
      %c0_25 = arith.constant 0 : index
      %32 = vector.load %arg3[%c0_24, %c0_25] : memref<1x48xf32, #tpu.memory_space<vmem>>, vector<1x48xf32>
      %33 = arith.mulf %20, %30 : vector<1x48xf32>
      %34 = arith.subf %32, %33 : vector<1x48xf32>
      %c0_26 = arith.constant 0 : index
      %c0_27 = arith.constant 0 : index
      %35 = vector.load %arg5[%c0_26, %c0_27] : memref<1x48xf32, #tpu.memory_space<vmem>>, vector<1x48xf32>
      tpu.vector_store %arg5[%c0_26, %c0_27], %34 {strides = array<i32>} : memref<1x48xf32, #tpu.memory_space<vmem>>, vector<1x48xf32>,
    } else {
    }
    return
  }
  func.func @transform_0(%arg0: i32) -> (i32, i32) {
    %c0_i32 = arith.constant 0 : i32
    %c0_i32_0 = arith.constant 0 : i32
    return %arg0, %c0_i32 : i32, i32
  }
  func.func @transform_1(%arg0: i32) -> (i32, i32) {
    %c0_i32 = arith.constant 0 : i32
    %c0_i32_0 = arith.constant 0 : i32
    %c0_i32_1 = arith.constant 0 : i32
    return %c0_i32, %c0_i32_0 : i32, i32
  }
  func.func @transform_2(%arg0: i32) -> (i32, i32) {
    %c0_i32 = arith.constant 0 : i32
    %c0_i32_0 = arith.constant 0 : i32
    %c0_i32_1 = arith.constant 0 : i32
    return %c0_i32, %c0_i32_0 : i32, i32
  }
  func.func @transform_3(%arg0: i32) -> (i32, i32) {
    %c0_i32 = arith.constant 0 : i32
    %c0_i32_0 = arith.constant 0 : i32
    %c0_i32_1 = arith.constant 0 : i32
    return %c0_i32, %c0_i32_0 : i32, i32
  }
  func.func @transform_4(%arg0: i32) -> (i32, i32) {
    %c0_i32 = arith.constant 0 : i32
    %c0_i32_0 = arith.constant 0 : i32
    %c0_i32_1 = arith.constant 0 : i32
    return %c0_i32, %c0_i32_0 : i32, i32
  }
}

module attributes {stable_mosaic.version = 11 : i64} {
  func.func @kernel(%arg0: i32, %arg1: memref<128x432xf32, #tpu.memory_space<vmem>>, %arg2: memref<432x48xbf16, #tpu.memory_space<vmem>>, %arg3: memref<1x432xf32, #tpu.memory_space<vmem>>, %arg4: memref<1x432xf32, #tpu.memory_space<vmem>>, %arg5: memref<128x48xf32, #tpu.memory_space<vmem>>, %arg6: memref<128x48xf32, #tpu.memory_space<vmem>>) attributes {dimension_semantics = [#tpu.dimension_semantics<parallel>], iteration_bounds = array<i64: 1>, scalar_prefetch = 0 : i64, scratch_operands = 0 : i64, tpu.core_type = #tpu.core_type<tc>, window_params = [{transform_indices = @transform_0, window_bounds = array<i64: 128, 432>}, {pipeline_mode = #tpu.pipeline_mode<synchronous>, transform_indices = @transform_1, window_bounds = array<i64: 432, 48>}, {pipeline_mode = #tpu.pipeline_mode<synchronous>, transform_indices = @transform_2, window_bounds = array<i64: 1, 432>}, {pipeline_mode = #tpu.pipeline_mode<synchronous>, transform_indices = @transform_3, window_bounds = array<i64: 1, 432>}, {transform_indices = @transform_4, window_bounds = array<i64: 128, 48>}, {transform_indices = @transform_5, window_bounds = array<i64: 128, 48>}]} {
    %c0 = arith.constant 0 : index
    %c0_0 = arith.constant 0 : index
    %0 = vector.load %arg1[%c0, %c0_0] : memref<128x432xf32, #tpu.memory_space<vmem>>, vector<128x432xf32>
    %c0_1 = arith.constant 0 : index
    %c0_2 = arith.constant 0 : index
    %1 = vector.load %arg3[%c0_1, %c0_2] : memref<1x432xf32, #tpu.memory_space<vmem>>, vector<1x432xf32>
    %2 = vector.broadcast %1 : vector<1x432xf32> to vector<128x432xf32>
    %3 = arith.mulf %0, %2 : vector<128x432xf32>
    %c0_3 = arith.constant 0 : index
    %c0_4 = arith.constant 0 : index
    %4 = vector.load %arg4[%c0_3, %c0_4] : memref<1x432xf32, #tpu.memory_space<vmem>>, vector<1x432xf32>
    %5 = vector.broadcast %4 : vector<1x432xf32> to vector<128x432xf32>
    %6 = arith.addf %3, %5 : vector<128x432xf32>
    %cst = arith.constant 0.000000e+00 : f32
    %7 = vector.broadcast %cst : f32 to vector<128x432xf32>
    %8 = arith.maximumf %6, %7 : vector<128x432xf32>
    %9 = arith.truncf %8 : vector<128x432xf32> to vector<128x432xbf16>
    %c0_5 = arith.constant 0 : index
    %c0_6 = arith.constant 0 : index
    %10 = vector.load %arg2[%c0_5, %c0_6] : memref<432x48xbf16, #tpu.memory_space<vmem>>, vector<432x48xbf16>
    %cst_7 = arith.constant dense<0.000000e+00> : vector<128x48xf32>
    %11 = tpu.matmul %9, %10, %cst_7 {dimension_numbers = #tpu.dot_dimension_numbers<[1], [0], [0], [1], [0, 0, 1, 1], [], []>} : vector<128x432xbf16>, vector<432x48xbf16>, vector<128x48xf32> -> vector<128x48xf32>
    %cst_8 = arith.constant 2.000000e-01 : f32
    %12 = vector.broadcast %cst_8 : f32 to vector<128x48xf32>
    %13 = arith.mulf %12, %11 : vector<128x48xf32>
    %c0_9 = arith.constant 0 : index
    %c0_10 = arith.constant 0 : index
    %14 = vector.load %arg5[%c0_9, %c0_10] : memref<128x48xf32, #tpu.memory_space<vmem>>, vector<128x48xf32>
    %15 = arith.addf %13, %14 : vector<128x48xf32>
    %c0_11 = arith.constant 0 : index
    %c0_12 = arith.constant 0 : index
    %16 = vector.load %arg6[%c0_11, %c0_12] : memref<128x48xf32, #tpu.memory_space<vmem>>, vector<128x48xf32>
    tpu.vector_store %arg6[%c0_11, %c0_12], %15 {strides = array<i32>} : memref<128x48xf32, #tpu.memory_space<vmem>>, vector<128x48xf32>,
    return
  }
  func.func @transform_0(%arg0: i32) -> (i32, i32) {
    %c0_i32 = arith.constant 0 : i32
    %c0_i32_0 = arith.constant 0 : i32
    return %arg0, %c0_i32 : i32, i32
  }
  func.func @transform_1(%arg0: i32) -> (i32, i32) {
    %c0_i32 = arith.constant 0 : i32
    %c0_i32_0 = arith.constant 0 : i32
    %c0_i32_1 = arith.constant 0 : i32
    return %c0_i32, %c0_i32_0 : i32, i32
  }
  func.func @transform_2(%arg0: i32) -> (i32, i32) {
    %c0_i32 = arith.constant 0 : i32
    %c0_i32_0 = arith.constant 0 : i32
    %c0_i32_1 = arith.constant 0 : i32
    return %c0_i32, %c0_i32_0 : i32, i32
  }
  func.func @transform_3(%arg0: i32) -> (i32, i32) {
    %c0_i32 = arith.constant 0 : i32
    %c0_i32_0 = arith.constant 0 : i32
    %c0_i32_1 = arith.constant 0 : i32
    return %c0_i32, %c0_i32_0 : i32, i32
  }
  func.func @transform_4(%arg0: i32) -> (i32, i32) {
    %c0_i32 = arith.constant 0 : i32
    %c0_i32_0 = arith.constant 0 : i32
    return %arg0, %c0_i32 : i32, i32
  }
  func.func @transform_5(%arg0: i32) -> (i32, i32) {
    %c0_i32 = arith.constant 0 : i32
    %c0_i32_0 = arith.constant 0 : i32
    return %arg0, %c0_i32 : i32, i32
  }
}

module attributes {stable_mosaic.version = 11 : i64} {
  func.func @kernel(%arg0: i32, %arg1: memref<32x48xf32, #tpu.memory_space<vmem>>, %arg2: memref<48x96xbf16, #tpu.memory_space<vmem>>, %arg3: memref<1x48xf32, #tpu.memory_space<vmem>>, %arg4: memref<1x48xf32, #tpu.memory_space<vmem>>, %arg5: memref<32x96xf32, #tpu.memory_space<vmem>>) attributes {dimension_semantics = [#tpu.dimension_semantics<parallel>], iteration_bounds = array<i64: 1>, scalar_prefetch = 0 : i64, scratch_operands = 0 : i64, tpu.core_type = #tpu.core_type<tc>, window_params = [{transform_indices = @transform_0, window_bounds = array<i64: 32, 48>}, {pipeline_mode = #tpu.pipeline_mode<synchronous>, transform_indices = @transform_1, window_bounds = array<i64: 48, 96>}, {pipeline_mode = #tpu.pipeline_mode<synchronous>, transform_indices = @transform_2, window_bounds = array<i64: 1, 48>}, {pipeline_mode = #tpu.pipeline_mode<synchronous>, transform_indices = @transform_3, window_bounds = array<i64: 1, 48>}, {transform_indices = @transform_4, window_bounds = array<i64: 32, 96>}]} {
    %c0 = arith.constant 0 : index
    %c0_0 = arith.constant 0 : index
    %0 = vector.load %arg1[%c0, %c0_0] : memref<32x48xf32, #tpu.memory_space<vmem>>, vector<32x48xf32>
    %c0_1 = arith.constant 0 : index
    %c0_2 = arith.constant 0 : index
    %1 = vector.load %arg3[%c0_1, %c0_2] : memref<1x48xf32, #tpu.memory_space<vmem>>, vector<1x48xf32>
    %2 = vector.broadcast %1 : vector<1x48xf32> to vector<32x48xf32>
    %3 = arith.mulf %0, %2 : vector<32x48xf32>
    %c0_3 = arith.constant 0 : index
    %c0_4 = arith.constant 0 : index
    %4 = vector.load %arg4[%c0_3, %c0_4] : memref<1x48xf32, #tpu.memory_space<vmem>>, vector<1x48xf32>
    %5 = vector.broadcast %4 : vector<1x48xf32> to vector<32x48xf32>
    %6 = arith.addf %3, %5 : vector<32x48xf32>
    %cst = arith.constant 0.000000e+00 : f32
    %7 = vector.broadcast %cst : f32 to vector<32x48xf32>
    %8 = arith.maximumf %6, %7 : vector<32x48xf32>
    %9 = arith.truncf %8 : vector<32x48xf32> to vector<32x48xbf16>
    %c0_5 = arith.constant 0 : index
    %c0_6 = arith.constant 0 : index
    %10 = vector.load %arg2[%c0_5, %c0_6] : memref<48x96xbf16, #tpu.memory_space<vmem>>, vector<48x96xbf16>
    %cst_7 = arith.constant dense<0.000000e+00> : vector<32x96xf32>
    %11 = tpu.matmul %9, %10, %cst_7 {dimension_numbers = #tpu.dot_dimension_numbers<[1], [0], [0], [1], [0, 0, 1, 1], [], []>} : vector<32x48xbf16>, vector<48x96xbf16>, vector<32x96xf32> -> vector<32x96xf32>
    %c0_8 = arith.constant 0 : index
    %c0_9 = arith.constant 0 : index
    %12 = vector.load %arg5[%c0_8, %c0_9] : memref<32x96xf32, #tpu.memory_space<vmem>>, vector<32x96xf32>
    tpu.vector_store %arg5[%c0_8, %c0_9], %11 {strides = array<i32>} : memref<32x96xf32, #tpu.memory_space<vmem>>, vector<32x96xf32>,
    return
  }
  func.func @transform_0(%arg0: i32) -> (i32, i32) {
    %c0_i32 = arith.constant 0 : i32
    %c0_i32_0 = arith.constant 0 : i32
    return %arg0, %c0_i32 : i32, i32
  }
  func.func @transform_1(%arg0: i32) -> (i32, i32) {
    %c0_i32 = arith.constant 0 : i32
    %c0_i32_0 = arith.constant 0 : i32
    %c0_i32_1 = arith.constant 0 : i32
    return %c0_i32, %c0_i32_0 : i32, i32
  }
  func.func @transform_2(%arg0: i32) -> (i32, i32) {
    %c0_i32 = arith.constant 0 : i32
    %c0_i32_0 = arith.constant 0 : i32
    %c0_i32_1 = arith.constant 0 : i32
    return %c0_i32, %c0_i32_0 : i32, i32
  }
  func.func @transform_3(%arg0: i32) -> (i32, i32) {
    %c0_i32 = arith.constant 0 : i32
    %c0_i32_0 = arith.constant 0 : i32
    %c0_i32_1 = arith.constant 0 : i32
    return %c0_i32, %c0_i32_0 : i32, i32
  }
  func.func @transform_4(%arg0: i32) -> (i32, i32) {
    %c0_i32 = arith.constant 0 : i32
    %c0_i32_0 = arith.constant 0 : i32
    return %arg0, %c0_i32 : i32, i32
  }
}

module attributes {stable_mosaic.version = 11 : i64} {
  func.func @kernel(%arg0: i32, %arg1: memref<32x432xf32, #tpu.memory_space<vmem>>, %arg2: memref<432x96xbf16, #tpu.memory_space<vmem>>, %arg3: memref<1x432xf32, #tpu.memory_space<vmem>>, %arg4: memref<1x432xf32, #tpu.memory_space<vmem>>, %arg5: memref<32x96xf32, #tpu.memory_space<vmem>>) attributes {dimension_semantics = [#tpu.dimension_semantics<parallel>], iteration_bounds = array<i64: 1>, scalar_prefetch = 0 : i64, scratch_operands = 0 : i64, tpu.core_type = #tpu.core_type<tc>, window_params = [{transform_indices = @transform_0, window_bounds = array<i64: 32, 432>}, {pipeline_mode = #tpu.pipeline_mode<synchronous>, transform_indices = @transform_1, window_bounds = array<i64: 432, 96>}, {pipeline_mode = #tpu.pipeline_mode<synchronous>, transform_indices = @transform_2, window_bounds = array<i64: 1, 432>}, {pipeline_mode = #tpu.pipeline_mode<synchronous>, transform_indices = @transform_3, window_bounds = array<i64: 1, 432>}, {transform_indices = @transform_4, window_bounds = array<i64: 32, 96>}]} {
    %c0 = arith.constant 0 : index
    %c0_0 = arith.constant 0 : index
    %0 = vector.load %arg1[%c0, %c0_0] : memref<32x432xf32, #tpu.memory_space<vmem>>, vector<32x432xf32>
    %c0_1 = arith.constant 0 : index
    %c0_2 = arith.constant 0 : index
    %1 = vector.load %arg3[%c0_1, %c0_2] : memref<1x432xf32, #tpu.memory_space<vmem>>, vector<1x432xf32>
    %2 = vector.broadcast %1 : vector<1x432xf32> to vector<32x432xf32>
    %3 = arith.mulf %0, %2 : vector<32x432xf32>
    %c0_3 = arith.constant 0 : index
    %c0_4 = arith.constant 0 : index
    %4 = vector.load %arg4[%c0_3, %c0_4] : memref<1x432xf32, #tpu.memory_space<vmem>>, vector<1x432xf32>
    %5 = vector.broadcast %4 : vector<1x432xf32> to vector<32x432xf32>
    %6 = arith.addf %3, %5 : vector<32x432xf32>
    %cst = arith.constant 0.000000e+00 : f32
    %7 = vector.broadcast %cst : f32 to vector<32x432xf32>
    %8 = arith.maximumf %6, %7 : vector<32x432xf32>
    %9 = arith.truncf %8 : vector<32x432xf32> to vector<32x432xbf16>
    %c0_5 = arith.constant 0 : index
    %c0_6 = arith.constant 0 : index
    %10 = vector.load %arg2[%c0_5, %c0_6] : memref<432x96xbf16, #tpu.memory_space<vmem>>, vector<432x96xbf16>
    %cst_7 = arith.constant dense<0.000000e+00> : vector<32x96xf32>
    %11 = tpu.matmul %9, %10, %cst_7 {dimension_numbers = #tpu.dot_dimension_numbers<[1], [0], [0], [1], [0, 0, 1, 1], [], []>} : vector<32x432xbf16>, vector<432x96xbf16>, vector<32x96xf32> -> vector<32x96xf32>
    %c0_8 = arith.constant 0 : index
    %c0_9 = arith.constant 0 : index
    %12 = vector.load %arg5[%c0_8, %c0_9] : memref<32x96xf32, #tpu.memory_space<vmem>>, vector<32x96xf32>
    tpu.vector_store %arg5[%c0_8, %c0_9], %11 {strides = array<i32>} : memref<32x96xf32, #tpu.memory_space<vmem>>, vector<32x96xf32>,
    return
  }
  func.func @transform_0(%arg0: i32) -> (i32, i32) {
    %c0_i32 = arith.constant 0 : i32
    %c0_i32_0 = arith.constant 0 : i32
    return %arg0, %c0_i32 : i32, i32
  }
  func.func @transform_1(%arg0: i32) -> (i32, i32) {
    %c0_i32 = arith.constant 0 : i32
    %c0_i32_0 = arith.constant 0 : i32
    %c0_i32_1 = arith.constant 0 : i32
    return %c0_i32, %c0_i32_0 : i32, i32
  }
  func.func @transform_2(%arg0: i32) -> (i32, i32) {
    %c0_i32 = arith.constant 0 : i32
    %c0_i32_0 = arith.constant 0 : i32
    %c0_i32_1 = arith.constant 0 : i32
    return %c0_i32, %c0_i32_0 : i32, i32
  }
  func.func @transform_3(%arg0: i32) -> (i32, i32) {
    %c0_i32 = arith.constant 0 : i32
    %c0_i32_0 = arith.constant 0 : i32
    %c0_i32_1 = arith.constant 0 : i32
    return %c0_i32, %c0_i32_0 : i32, i32
  }
  func.func @transform_4(%arg0: i32) -> (i32, i32) {
    %c0_i32 = arith.constant 0 : i32
    %c0_i32_0 = arith.constant 0 : i32
    return %arg0, %c0_i32 : i32, i32
  }
}

module attributes {stable_mosaic.version = 11 : i64} {
  func.func @kernel(%arg0: i32, %arg1: memref<32x96xf32, #tpu.memory_space<vmem>>, %arg2: memref<1x96xf32, #tpu.memory_space<vmem>>, %arg3: memref<1x96xf32, #tpu.memory_space<vmem>>, %arg4: memref<1x96xf32, #tpu.memory_space<vmem>>, %arg5: memref<1x96xf32, #tpu.memory_space<vmem>>, %arg6: memref<1x96xf32, #tpu.memory_space<vmem>>, %arg7: memref<1x96xf32, #tpu.memory_space<vmem>>) attributes {dimension_semantics = [#tpu.dimension_semantics<arbitrary>], iteration_bounds = array<i64: 1>, scalar_prefetch = 0 : i64, scratch_operands = 2 : i64, tpu.core_type = #tpu.core_type<tc>, window_params = [{transform_indices = @transform_0, window_bounds = array<i64: 32, 96>}, {pipeline_mode = #tpu.pipeline_mode<synchronous>, transform_indices = @transform_1, window_bounds = array<i64: 1, 96>}, {pipeline_mode = #tpu.pipeline_mode<synchronous>, transform_indices = @transform_2, window_bounds = array<i64: 1, 96>}, {pipeline_mode = #tpu.pipeline_mode<synchronous>, transform_indices = @transform_3, window_bounds = array<i64: 1, 96>}, {pipeline_mode = #tpu.pipeline_mode<synchronous>, transform_indices = @transform_4, window_bounds = array<i64: 1, 96>}]} {
    %c0_i32 = arith.constant 0 : i32
    %0 = arith.cmpi eq, %arg0, %c0_i32 : i32
    %1 = arith.extui %0 : i1 to i32
    %c0_i32_0 = arith.constant 0 : i32
    %2 = arith.cmpi ne, %1, %c0_i32_0 : i32
    scf.if %2 {
      %cst_13 = arith.constant 0.000000e+00 : f32
      %18 = vector.broadcast %cst_13 : f32 to vector<1x96xf32>
      %c0_14 = arith.constant 0 : index
      %c0_15 = arith.constant 0 : index
      %19 = vector.load %arg6[%c0_14, %c0_15] : memref<1x96xf32, #tpu.memory_space<vmem>>, vector<1x96xf32>
      tpu.vector_store %arg6[%c0_14, %c0_15], %18 {strides = array<i32>} : memref<1x96xf32, #tpu.memory_space<vmem>>, vector<1x96xf32>,
      %cst_16 = arith.constant 0.000000e+00 : f32
      %20 = vector.broadcast %cst_16 : f32 to vector<1x96xf32>
      %c0_17 = arith.constant 0 : index
      %c0_18 = arith.constant 0 : index
      %21 = vector.load %arg7[%c0_17, %c0_18] : memref<1x96xf32, #tpu.memory_space<vmem>>, vector<1x96xf32>
      tpu.vector_store %arg7[%c0_17, %c0_18], %20 {strides = array<i32>} : memref<1x96xf32, #tpu.memory_space<vmem>>, vector<1x96xf32>,
    } else {
    }
    %c0 = arith.constant 0 : index
    %c0_1 = arith.constant 0 : index
    %3 = vector.load %arg1[%c0, %c0_1] : memref<32x96xf32, #tpu.memory_space<vmem>>, vector<32x96xf32>
    %c0_2 = arith.constant 0 : index
    %c0_3 = arith.constant 0 : index
    %4 = vector.load %arg6[%c0_2, %c0_3] : memref<1x96xf32, #tpu.memory_space<vmem>>, vector<1x96xf32>
    %cst = arith.constant dense<0.000000e+00> : vector<96xf32>
    %5 = vector.multi_reduction <add>, %3, %cst [0] : vector<32x96xf32> to vector<96xf32>
    %6 = vector.shape_cast %5 : vector<96xf32> to vector<1x96xf32>
    %7 = arith.addf %4, %6 : vector<1x96xf32>
    %c0_4 = arith.constant 0 : index
    %c0_5 = arith.constant 0 : index
    %8 = vector.load %arg6[%c0_4, %c0_5] : memref<1x96xf32, #tpu.memory_space<vmem>>, vector<1x96xf32>
    tpu.vector_store %arg6[%c0_4, %c0_5], %7 {strides = array<i32>} : memref<1x96xf32, #tpu.memory_space<vmem>>, vector<1x96xf32>,
    %c0_6 = arith.constant 0 : index
    %c0_7 = arith.constant 0 : index
    %9 = vector.load %arg7[%c0_6, %c0_7] : memref<1x96xf32, #tpu.memory_space<vmem>>, vector<1x96xf32>
    %10 = arith.mulf %3, %3 : vector<32x96xf32>
    %cst_8 = arith.constant dense<0.000000e+00> : vector<96xf32>
    %11 = vector.multi_reduction <add>, %10, %cst_8 [0] : vector<32x96xf32> to vector<96xf32>
    %12 = vector.shape_cast %11 : vector<96xf32> to vector<1x96xf32>
    %13 = arith.addf %9, %12 : vector<1x96xf32>
    %c0_9 = arith.constant 0 : index
    %c0_10 = arith.constant 0 : index
    %14 = vector.load %arg7[%c0_9, %c0_10] : memref<1x96xf32, #tpu.memory_space<vmem>>, vector<1x96xf32>
    tpu.vector_store %arg7[%c0_9, %c0_10], %13 {strides = array<i32>} : memref<1x96xf32, #tpu.memory_space<vmem>>, vector<1x96xf32>,
    %c0_i32_11 = arith.constant 0 : i32
    %15 = arith.cmpi eq, %arg0, %c0_i32_11 : i32
    %16 = arith.extui %15 : i1 to i32
    %c0_i32_12 = arith.constant 0 : i32
    %17 = arith.cmpi ne, %16, %c0_i32_12 : i32
    scf.if %17 {
      %c0_13 = arith.constant 0 : index
      %c0_14 = arith.constant 0 : index
      %18 = vector.load %arg6[%c0_13, %c0_14] : memref<1x96xf32, #tpu.memory_space<vmem>>, vector<1x96xf32>
      %cst_15 = arith.constant 3.125000e-02 : f32
      %19 = vector.broadcast %cst_15 : f32 to vector<1x96xf32>
      %20 = arith.mulf %18, %19 : vector<1x96xf32>
      %c0_16 = arith.constant 0 : index
      %c0_17 = arith.constant 0 : index
      %21 = vector.load %arg7[%c0_16, %c0_17] : memref<1x96xf32, #tpu.memory_space<vmem>>, vector<1x96xf32>
      %cst_18 = arith.constant 3.125000e-02 : f32
      %22 = vector.broadcast %cst_18 : f32 to vector<1x96xf32>
      %23 = arith.mulf %21, %22 : vector<1x96xf32>
      %24 = arith.mulf %20, %20 : vector<1x96xf32>
      %25 = arith.subf %23, %24 : vector<1x96xf32>
      %c0_19 = arith.constant 0 : index
      %c0_20 = arith.constant 0 : index
      %26 = vector.load %arg2[%c0_19, %c0_20] : memref<1x96xf32, #tpu.memory_space<vmem>>, vector<1x96xf32>
      %cst_21 = arith.constant 9.99999974E-6 : f32
      %27 = vector.broadcast %cst_21 : f32 to vector<1x96xf32>
      %28 = arith.addf %25, %27 : vector<1x96xf32>
      %29 = math.rsqrt %28 : vector<1x96xf32>
      %30 = arith.mulf %26, %29 : vector<1x96xf32>
      %c0_22 = arith.constant 0 : index
      %c0_23 = arith.constant 0 : index
      %31 = vector.load %arg4[%c0_22, %c0_23] : memref<1x96xf32, #tpu.memory_space<vmem>>, vector<1x96xf32>
      tpu.vector_store %arg4[%c0_22, %c0_23], %30 {strides = array<i32>} : memref<1x96xf32, #tpu.memory_space<vmem>>, vector<1x96xf32>,
      %c0_24 = arith.constant 0 : index
      %c0_25 = arith.constant 0 : index
      %32 = vector.load %arg3[%c0_24, %c0_25] : memref<1x96xf32, #tpu.memory_space<vmem>>, vector<1x96xf32>
      %33 = arith.mulf %20, %30 : vector<1x96xf32>
      %34 = arith.subf %32, %33 : vector<1x96xf32>
      %c0_26 = arith.constant 0 : index
      %c0_27 = arith.constant 0 : index
      %35 = vector.load %arg5[%c0_26, %c0_27] : memref<1x96xf32, #tpu.memory_space<vmem>>, vector<1x96xf32>
      tpu.vector_store %arg5[%c0_26, %c0_27], %34 {strides = array<i32>} : memref<1x96xf32, #tpu.memory_space<vmem>>, vector<1x96xf32>,
    } else {
    }
    return
  }
  func.func @transform_0(%arg0: i32) -> (i32, i32) {
    %c0_i32 = arith.constant 0 : i32
    %c0_i32_0 = arith.constant 0 : i32
    return %arg0, %c0_i32 : i32, i32
  }
  func.func @transform_1(%arg0: i32) -> (i32, i32) {
    %c0_i32 = arith.constant 0 : i32
    %c0_i32_0 = arith.constant 0 : i32
    %c0_i32_1 = arith.constant 0 : i32
    return %c0_i32, %c0_i32_0 : i32, i32
  }
  func.func @transform_2(%arg0: i32) -> (i32, i32) {
    %c0_i32 = arith.constant 0 : i32
    %c0_i32_0 = arith.constant 0 : i32
    %c0_i32_1 = arith.constant 0 : i32
    return %c0_i32, %c0_i32_0 : i32, i32
  }
  func.func @transform_3(%arg0: i32) -> (i32, i32) {
    %c0_i32 = arith.constant 0 : i32
    %c0_i32_0 = arith.constant 0 : i32
    %c0_i32_1 = arith.constant 0 : i32
    return %c0_i32, %c0_i32_0 : i32, i32
  }
  func.func @transform_4(%arg0: i32) -> (i32, i32) {
    %c0_i32 = arith.constant 0 : i32
    %c0_i32_0 = arith.constant 0 : i32
    %c0_i32_1 = arith.constant 0 : i32
    return %c0_i32, %c0_i32_0 : i32, i32
  }
}

module attributes {stable_mosaic.version = 11 : i64} {
  func.func @kernel(%arg0: i32, %arg1: memref<32x864xf32, #tpu.memory_space<vmem>>, %arg2: memref<864x96xbf16, #tpu.memory_space<vmem>>, %arg3: memref<1x864xf32, #tpu.memory_space<vmem>>, %arg4: memref<1x864xf32, #tpu.memory_space<vmem>>, %arg5: memref<32x96xf32, #tpu.memory_space<vmem>>, %arg6: memref<32x96xf32, #tpu.memory_space<vmem>>) attributes {dimension_semantics = [#tpu.dimension_semantics<parallel>], iteration_bounds = array<i64: 1>, scalar_prefetch = 0 : i64, scratch_operands = 0 : i64, tpu.core_type = #tpu.core_type<tc>, window_params = [{transform_indices = @transform_0, window_bounds = array<i64: 32, 864>}, {pipeline_mode = #tpu.pipeline_mode<synchronous>, transform_indices = @transform_1, window_bounds = array<i64: 864, 96>}, {pipeline_mode = #tpu.pipeline_mode<synchronous>, transform_indices = @transform_2, window_bounds = array<i64: 1, 864>}, {pipeline_mode = #tpu.pipeline_mode<synchronous>, transform_indices = @transform_3, window_bounds = array<i64: 1, 864>}, {transform_indices = @transform_4, window_bounds = array<i64: 32, 96>}, {transform_indices = @transform_5, window_bounds = array<i64: 32, 96>}]} {
    %c0 = arith.constant 0 : index
    %c0_0 = arith.constant 0 : index
    %0 = vector.load %arg1[%c0, %c0_0] : memref<32x864xf32, #tpu.memory_space<vmem>>, vector<32x864xf32>
    %c0_1 = arith.constant 0 : index
    %c0_2 = arith.constant 0 : index
    %1 = vector.load %arg3[%c0_1, %c0_2] : memref<1x864xf32, #tpu.memory_space<vmem>>, vector<1x864xf32>
    %2 = vector.broadcast %1 : vector<1x864xf32> to vector<32x864xf32>
    %3 = arith.mulf %0, %2 : vector<32x864xf32>
    %c0_3 = arith.constant 0 : index
    %c0_4 = arith.constant 0 : index
    %4 = vector.load %arg4[%c0_3, %c0_4] : memref<1x864xf32, #tpu.memory_space<vmem>>, vector<1x864xf32>
    %5 = vector.broadcast %4 : vector<1x864xf32> to vector<32x864xf32>
    %6 = arith.addf %3, %5 : vector<32x864xf32>
    %cst = arith.constant 0.000000e+00 : f32
    %7 = vector.broadcast %cst : f32 to vector<32x864xf32>
    %8 = arith.maximumf %6, %7 : vector<32x864xf32>
    %9 = arith.truncf %8 : vector<32x864xf32> to vector<32x864xbf16>
    %c0_5 = arith.constant 0 : index
    %c0_6 = arith.constant 0 : index
    %10 = vector.load %arg2[%c0_5, %c0_6] : memref<864x96xbf16, #tpu.memory_space<vmem>>, vector<864x96xbf16>
    %cst_7 = arith.constant dense<0.000000e+00> : vector<32x96xf32>
    %11 = tpu.matmul %9, %10, %cst_7 {dimension_numbers = #tpu.dot_dimension_numbers<[1], [0], [0], [1], [0, 0, 1, 1], [], []>} : vector<32x864xbf16>, vector<864x96xbf16>, vector<32x96xf32> -> vector<32x96xf32>
    %cst_8 = arith.constant 2.000000e-01 : f32
    %12 = vector.broadcast %cst_8 : f32 to vector<32x96xf32>
    %13 = arith.mulf %12, %11 : vector<32x96xf32>
    %c0_9 = arith.constant 0 : index
    %c0_10 = arith.constant 0 : index
    %14 = vector.load %arg5[%c0_9, %c0_10] : memref<32x96xf32, #tpu.memory_space<vmem>>, vector<32x96xf32>
    %15 = arith.addf %13, %14 : vector<32x96xf32>
    %c0_11 = arith.constant 0 : index
    %c0_12 = arith.constant 0 : index
    %16 = vector.load %arg6[%c0_11, %c0_12] : memref<32x96xf32, #tpu.memory_space<vmem>>, vector<32x96xf32>
    tpu.vector_store %arg6[%c0_11, %c0_12], %15 {strides = array<i32>} : memref<32x96xf32, #tpu.memory_space<vmem>>, vector<32x96xf32>,
    return
  }
  func.func @transform_0(%arg0: i32) -> (i32, i32) {
    %c0_i32 = arith.constant 0 : i32
    %c0_i32_0 = arith.constant 0 : i32
    return %arg0, %c0_i32 : i32, i32
  }
  func.func @transform_1(%arg0: i32) -> (i32, i32) {
    %c0_i32 = arith.constant 0 : i32
    %c0_i32_0 = arith.constant 0 : i32
    %c0_i32_1 = arith.constant 0 : i32
    return %c0_i32, %c0_i32_0 : i32, i32
  }
  func.func @transform_2(%arg0: i32) -> (i32, i32) {
    %c0_i32 = arith.constant 0 : i32
    %c0_i32_0 = arith.constant 0 : i32
    %c0_i32_1 = arith.constant 0 : i32
    return %c0_i32, %c0_i32_0 : i32, i32
  }
  func.func @transform_3(%arg0: i32) -> (i32, i32) {
    %c0_i32 = arith.constant 0 : i32
    %c0_i32_0 = arith.constant 0 : i32
    %c0_i32_1 = arith.constant 0 : i32
    return %c0_i32, %c0_i32_0 : i32, i32
  }
  func.func @transform_4(%arg0: i32) -> (i32, i32) {
    %c0_i32 = arith.constant 0 : i32
    %c0_i32_0 = arith.constant 0 : i32
    return %arg0, %c0_i32 : i32, i32
  }
  func.func @transform_5(%arg0: i32) -> (i32, i32) {
    %c0_i32 = arith.constant 0 : i32
    %c0_i32_0 = arith.constant 0 : i32
    return %arg0, %c0_i32 : i32, i32
  }
}

module attributes {stable_mosaic.version = 11 : i64} {
  func.func @kernel(%arg0: i32, %arg1: memref<2x16x96xf32, #tpu.memory_space<vmem>>, %arg2: memref<1x1x96xf32, #tpu.memory_space<vmem>>, %arg3: memref<1x1x96xf32, #tpu.memory_space<vmem>>, %arg4: memref<96x10xf32, #tpu.memory_space<vmem>>, %arg5: memref<1x10xf32, #tpu.memory_space<vmem>>, %arg6: memref<2x10xf32, #tpu.memory_space<vmem>>) attributes {dimension_semantics = [#tpu.dimension_semantics<arbitrary>], iteration_bounds = array<i64: 1>, scalar_prefetch = 0 : i64, scratch_operands = 0 : i64, tpu.core_type = #tpu.core_type<tc>, window_params = [{pipeline_mode = #tpu.pipeline_mode<synchronous>, transform_indices = @transform_0, window_bounds = array<i64: 2, 16, 96>}, {pipeline_mode = #tpu.pipeline_mode<synchronous>, transform_indices = @transform_1, window_bounds = array<i64: 1, 1, 96>}, {pipeline_mode = #tpu.pipeline_mode<synchronous>, transform_indices = @transform_2, window_bounds = array<i64: 1, 1, 96>}, {pipeline_mode = #tpu.pipeline_mode<synchronous>, transform_indices = @transform_3, window_bounds = array<i64: 96, 10>}, {pipeline_mode = #tpu.pipeline_mode<synchronous>, transform_indices = @transform_4, window_bounds = array<i64: 1, 10>}, {pipeline_mode = #tpu.pipeline_mode<synchronous>, transform_indices = @transform_5, window_bounds = array<i64: 2, 10>}]} {
    %c0 = arith.constant 0 : index
    %c0_0 = arith.constant 0 : index
    %c0_1 = arith.constant 0 : index
    %0 = vector.load %arg1[%c0, %c0_0, %c0_1] : memref<2x16x96xf32, #tpu.memory_space<vmem>>, vector<2x16x96xf32>
    %c0_2 = arith.constant 0 : index
    %c0_3 = arith.constant 0 : index
    %c0_4 = arith.constant 0 : index
    %1 = vector.load %arg2[%c0_2, %c0_3, %c0_4] : memref<1x1x96xf32, #tpu.memory_space<vmem>>, vector<1x1x96xf32>
    %2 = vector.broadcast %1 : vector<1x1x96xf32> to vector<2x16x96xf32>
    %3 = arith.mulf %0, %2 : vector<2x16x96xf32>
    %c0_5 = arith.constant 0 : index
    %c0_6 = arith.constant 0 : index
    %c0_7 = arith.constant 0 : index
    %4 = vector.load %arg3[%c0_5, %c0_6, %c0_7] : memref<1x1x96xf32, #tpu.memory_space<vmem>>, vector<1x1x96xf32>
    %5 = vector.broadcast %4 : vector<1x1x96xf32> to vector<2x16x96xf32>
    %6 = arith.addf %3, %5 : vector<2x16x96xf32>
    %cst = arith.constant 0.000000e+00 : f32
    %7 = vector.broadcast %cst : f32 to vector<2x16x96xf32>
    %8 = arith.maximumf %6, %7 : vector<2x16x96xf32>
    %cst_8 = arith.constant dense<0.000000e+00> : vector<2x96xf32>
    %9 = vector.multi_reduction <add>, %8, %cst_8 [1] : vector<2x16x96xf32> to vector<2x96xf32>
    %cst_9 = arith.constant 6.250000e-02 : f32
    %10 = vector.broadcast %cst_9 : f32 to vector<2x96xf32>
    %11 = arith.mulf %9, %10 : vector<2x96xf32>
    %c0_10 = arith.constant 0 : index
    %c0_11 = arith.constant 0 : index
    %12 = vector.load %arg4[%c0_10, %c0_11] : memref<96x10xf32, #tpu.memory_space<vmem>>, vector<96x10xf32>
    %cst_12 = arith.constant dense<0.000000e+00> : vector<2x10xf32>
    %13 = tpu.matmul %11, %12, %cst_12 {dimension_numbers = #tpu.dot_dimension_numbers<[1], [0], [0], [1], [0, 0, 1, 1], [], []>} : vector<2x96xf32>, vector<96x10xf32>, vector<2x10xf32> -> vector<2x10xf32>
    %c0_13 = arith.constant 0 : index
    %c0_14 = arith.constant 0 : index
    %14 = vector.load %arg5[%c0_13, %c0_14] : memref<1x10xf32, #tpu.memory_space<vmem>>, vector<1x10xf32>
    %15 = vector.broadcast %14 : vector<1x10xf32> to vector<2x10xf32>
    %16 = arith.addf %13, %15 : vector<2x10xf32>
    %c0_15 = arith.constant 0 : index
    %c0_16 = arith.constant 0 : index
    %17 = vector.load %arg6[%c0_15, %c0_16] : memref<2x10xf32, #tpu.memory_space<vmem>>, vector<2x10xf32>
    tpu.vector_store %arg6[%c0_15, %c0_16], %16 {strides = array<i32>} : memref<2x10xf32, #tpu.memory_space<vmem>>, vector<2x10xf32>,
    return
  }
  func.func @transform_0(%arg0: i32) -> (i32, i32, i32) {
    %c0_i32 = arith.constant 0 : i32
    %c0_i32_0 = arith.constant 0 : i32
    %c0_i32_1 = arith.constant 0 : i32
    %c0_i32_2 = arith.constant 0 : i32
    return %c0_i32, %c0_i32_0, %c0_i32_1 : i32, i32, i32
  }
  func.func @transform_1(%arg0: i32) -> (i32, i32, i32) {
    %c0_i32 = arith.constant 0 : i32
    %c0_i32_0 = arith.constant 0 : i32
    %c0_i32_1 = arith.constant 0 : i32
    %c0_i32_2 = arith.constant 0 : i32
    return %c0_i32, %c0_i32_0, %c0_i32_1 : i32, i32, i32
  }
  func.func @transform_2(%arg0: i32) -> (i32, i32, i32) {
    %c0_i32 = arith.constant 0 : i32
    %c0_i32_0 = arith.constant 0 : i32
    %c0_i32_1 = arith.constant 0 : i32
    %c0_i32_2 = arith.constant 0 : i32
    return %c0_i32, %c0_i32_0, %c0_i32_1 : i32, i32, i32
  }
  func.func @transform_3(%arg0: i32) -> (i32, i32) {
    %c0_i32 = arith.constant 0 : i32
    %c0_i32_0 = arith.constant 0 : i32
    %c0_i32_1 = arith.constant 0 : i32
    return %c0_i32, %c0_i32_0 : i32, i32
  }
  func.func @transform_4(%arg0: i32) -> (i32, i32) {
    %c0_i32 = arith.constant 0 : i32
    %c0_i32_0 = arith.constant 0 : i32
    %c0_i32_1 = arith.constant 0 : i32
    return %c0_i32, %c0_i32_0 : i32, i32
  }
  func.func @transform_5(%arg0: i32) -> (i32, i32) {
    %c0_i32 = arith.constant 0 : i32
    %c0_i32_0 = arith.constant 0 : i32
    %c0_i32_1 = arith.constant 0 : i32
    return %c0_i32, %c0_i32_0 : i32, i32
  }
}

</mosaic_0001>

<bundles_post_ra>
// kernel: _lambda_.19
= control target key start
LH: loop header
LB: loop body
LE: loop exit
PB: predicated region body
PF: predicated region fallthrough
CT: control target
= control target key end

     0   :  { %s508_s15 = smov 0   ;;  %s641_s0 = inlined_call_operand.vmem [shape: f32[512,4], index: 0, kind: input, shape index: {}]   ;;  %s642_s1 = inlined_call_operand.vmem [shape: f32[1,4], index: 1, kind: input, shape index: {}]   ;;  %s643_s2 = inlined_call_operand.vmem [shape: f32[1,4], index: 2, kind: input, shape index: {}]   ;;  %s644_s3 = inlined_call_operand.vmem [shape: f32[1,4], index: 3, kind: output, shape index: {0}]   ;;  %s645_s4 = inlined_call_operand.vmem [shape: f32[1,4], index: 4, kind: output, shape index: {1}]  }
   0x1 LB: > { %s514_s16 = sadd.s32 4294967295, %s480_s15   ;;  %p456_p0 = scmp.ge.s32.totalorder %s480_s15, 1  ;;  %s480_s15 = sphi %s508_s15, %s15_s15  }
   0x2   : > { %p156_p1 = scmp.lt.s32.totalorder %s480_s15, 3 }
   0x4   : > { %p157_p2 = pnand %p456_p0, %p156_p1 }
   0x5   : > { %s457_s17 = sshll.u32 (!%p157_p2), %s514_s16, 5  ;;  %p459_p4 = scmp.ne.s32.totalorder (!%p157_p2), %s514_s16, 0 }
   0x6   : > { %160 = sbr.rel (%p157_p2) target bundleno = 135 (0x87), region = 32  ;;  %p178_p3 = scmp.lt.s32.totalorder (!%p157_p2), %s457_s17, 63 }
   0xd   : > { %s647_s17 = smov (!%p178_p3, %s457_s17), 63  ;;  %186 = sbr.rel (%p459_p4) target bundleno = 20 (0x14), region = 36 }
   0xe   : > { %s458_s18 = sshll.u32 %s647_s17, 3  ;;  %vm187_vm0 = vcmask (!%p459_p4), 24576   ;;  %v482_v0 = vmov (!%p459_p4), 0.0  }
   0xf   : > { %s522_s21 = scalar_lea.vmem %s641_s0, %s458_s18  ;;  %188 = vst.msk [vmem:[#allocation2] sm:$0x1] (!%p459_p4), %vm187_vm0, %v482_v0  ;;  %189 = vst.msk [vmem:[#allocation3] sm:$0x1] (!%p459_p4), %vm187_vm0, %v482_v0 }
  0x14 PF: > { %v190_v1 = vld [vmem:[%s522_s21] sm:$0xff]  ;;  %v191_v2 = vld [vmem:[%s522_s21 + $0x8] sm:$0xff]  ;;  %v192_v3 = vld [vmem:[%s522_s21 + $0x10] sm:$0xff]  ;;  %vm223_vm1 = vcmask 31744   ;;  %vm294_vm2 = vcmask 24576   ;;  %p460_p5 = scmp.ne.s32.totalorder %s514_s16, 1 }
  0x15   : > { %v224_v4 = vsel %vm223_vm1, %v190_v1, 0.0  ;;  %v225_v5 = vsel %vm223_vm1, %v191_v2, 0.0  ;;  %v227_v6 = vsel %vm223_vm1, %v192_v3, 0.0  ;;  %v193_v7 = vld [vmem:[%s522_s21 + $0x18] sm:$0xff]  ;;  %v194_v10 = vld [vmem:[%s522_s21 + $0x20] sm:$0xff]  ;;  %v195_v13 = vld [vmem:[%s522_s21 + $0x28] sm:$0xff]  ;;  %v297_v28 = vmul.f32 %v190_v1, %v190_v1 }
  0x16   : > { %v226_v8 = vadd.f32 %v225_v5, %v224_v4  ;;  %v229_v9 = vsel %vm223_vm1, %v193_v7, 0.0  ;;  %v231_v12 = vsel %vm223_vm1, %v194_v10, 0.0  ;;  %v233_v15 = vsel %vm223_vm1, %v195_v13, 0.0  ;;  %v196_v16 = vld [vmem:[%s522_s21 + $0x30] sm:$0xff]  ;;  %v197_v19 = vld [vmem:[%s522_s21 + $0x38] sm:$0xff]  ;;  %v198_v22 = vld [vmem:[%s522_s21 + $0x40] sm:$0xff] }
  0x17   : > { %v235_v18 = vsel %vm223_vm1, %v196_v16, 0.0  ;;  %v237_v21 = vsel %vm223_vm1, %v197_v19, 0.0  ;;  %v239_v24 = vsel %vm223_vm1, %v198_v22, 0.0  ;;  %v199_v25 = vld [vmem:[%s522_s21 + $0x48] sm:$0xff]  ;;  %v298_v29 = vmul.f32 %v191_v2, %v191_v2  ;;  %v200_v31 = vld [vmem:[%s522_s21 + $0x50] sm:$0xff]  ;;  %v201_v33 = vld [vmem:[%s522_s21 + $0x58] sm:$0xff] }
  0x18   : > { %v228_v11 = vadd.f32 %v227_v6, %v226_v8  ;;  %v241_v27 = vsel %vm223_vm1, %v199_v25, 0.0  ;;  %v299_v30 = vmul.f32 %v192_v3, %v192_v3  ;;  %v243_v34 = vsel %vm223_vm1, %v200_v31, 0.0  ;;  %v202_v42 = vld [vmem:[%s522_s21 + $0x60] sm:$0xff]  ;;  %v203_v48 = vld [vmem:[%s522_s21 + $0x68] sm:$0xff]  ;;  %v204_v54 = vld [vmem:[%s522_s21 + $0x70] sm:$0xff] }
  0x19   : > { %v300_v35 = vmul.f32 %v193_v7, %v193_v7  ;;  %v245_v37 = vsel %vm223_vm1, %v201_v33, 0.0  ;;  %v301_v38 = vmul.f32 %v194_v10, %v194_v10  ;;  %v329_v39 = vsel %vm223_vm1, %v297_v28, 0.0  ;;  %v205_v60 = vld [vmem:[%s522_s21 + $0x78] sm:$0xff]  ;;  %v206_v2 = vld [vmem:[%s522_s21 + $0x80] sm:$0xff]  ;;  %v207_v8 = vld [vmem:[%s522_s21 + $0x88] sm:$0xff] }
  0x1a   : > { %v230_v14 = vadd.f32 %v229_v9, %v228_v11  ;;  %v330_v40 = vsel %vm223_vm1, %v298_v29, 0.0  ;;  %v332_v41 = vsel %vm223_vm1, %v299_v30, 0.0  ;;  %v247_v45 = vsel %vm223_vm1, %v202_v42, 0.0 }
  0x1b   : > { %v331_v44 = vadd.f32 %v330_v40, %v329_v39  ;;  %v302_v46 = vmul.f32 %v195_v13, %v195_v13  ;;  %v334_v47 = vsel %vm223_vm1, %v300_v35, 0.0  ;;  %v249_v51 = vsel %vm223_vm1, %v203_v48, 0.0 }
  0x1c   : > { %v232_v17 = vadd.f32 %v231_v12, %v230_v14  ;;  %v303_v52 = vmul.f32 %v196_v16, %v196_v16  ;;  %v336_v53 = vsel %vm223_vm1, %v301_v38, 0.0  ;;  %v251_v57 = vsel %vm223_vm1, %v204_v54, 0.0  ;;  %v208_v14 = vld [vmem:[%s522_s21 + $0x90] sm:$0xff] }
  0x1d   : > { %v333_v50 = vadd.f32 %v332_v41, %v331_v44  ;;  %v304_v58 = vmul.f32 %v197_v19, %v197_v19  ;;  %v338_v59 = vsel %vm223_vm1, %v302_v46, 0.0  ;;  %v253_v63 = vsel %vm223_vm1, %v205_v60, 0.0  ;;  %v212_v38 = vld [vmem:[%s522_s21 + $0xb0] sm:$0xff]  ;;  %v213_v44 = vld [vmem:[%s522_s21 + $0xb8] sm:$0xff] }
  0x1e   : > { %v234_v20 = vadd.f32 %v233_v15, %v232_v17  ;;  %v305_v0 = vmul.f32 %v198_v22, %v198_v22  ;;  %v340_v1 = vsel %vm223_vm1, %v303_v52, 0.0  ;;  %v255_v5 = vsel %vm223_vm1, %v206_v2, 0.0 }
  0x1f   : > { %v335_v56 = vadd.f32 %v334_v47, %v333_v50  ;;  %v306_v6 = vmul.f32 %v199_v25, %v199_v25  ;;  %v342_v7 = vsel %vm223_vm1, %v304_v58, 0.0  ;;  %v257_v11 = vsel %vm223_vm1, %v207_v8, 0.0  ;;  %v214_v50 = vld [vmem:[%s522_s21 + $0xc0] sm:$0xff] }
  0x20   : > { %v236_v23 = vadd.f32 %v235_v18, %v234_v20  ;;  %v307_v12 = vmul.f32 %v200_v31, %v200_v31  ;;  %v344_v13 = vsel %vm223_vm1, %v305_v0, 0.0  ;;  %v259_v17 = vsel %vm223_vm1, %v208_v14, 0.0  ;;  %v209_v20 = vld [vmem:[%s522_s21 + $0x98] sm:$0xff] }
  0x21   : > { %v337_v62 = vadd.f32 %v336_v53, %v335_v56  ;;  %v308_v18 = vmul.f32 %v201_v33, %v201_v33  ;;  %v346_v19 = vsel %vm223_vm1, %v306_v6, 0.0  ;;  %v310_v30 = vmul.f32 %v203_v48, %v203_v48  ;;  %v215_v56 = vld [vmem:[%s522_s21 + $0xc8] sm:$0xff] }
  0x22   : > { %v238_v26 = vadd.f32 %v237_v21, %v236_v23  ;;  %v261_v23 = vsel %vm223_vm1, %v209_v20, 0.0  ;;  %v348_v25 = vsel %vm223_vm1, %v307_v12, 0.0  ;;  %v267_v41 = vsel %vm223_vm1, %v212_v38, 0.0 }
  0x23   : > { %v339_v4 = vadd.f32 %v338_v59, %v337_v62  ;;  %v350_v31 = vsel %vm223_vm1, %v308_v18, 0.0  ;;  %v269_v47 = vsel %vm223_vm1, %v213_v44, 0.0  ;;  %v313_v48 = vmul.f32 %v206_v2, %v206_v2  ;;  %v216_v62 = vld [vmem:[%s522_s21 + $0xd0] sm:$0xff] }
  0x24   : > { %v240_v32 = vadd.f32 %v239_v24, %v238_v26  ;;  %v309_v24 = vmul.f32 %v202_v42, %v202_v42  ;;  %v210_v26 = vld [vmem:[%s522_s21 + $0xa0] sm:$0xff]  ;;  %v312_v42 = vmul.f32 %v205_v60, %v205_v60  ;;  %v271_v53 = vsel %vm223_vm1, %v214_v50, 0.0 }
  0x25   : > { %v341_v10 = vadd.f32 %v340_v1, %v339_v4  ;;  %v263_v29 = vsel %vm223_vm1, %v210_v26, 0.0  ;;  %v273_v59 = vsel %vm223_vm1, %v215_v56, 0.0  ;;  %v315_v60 = vmul.f32 %v208_v14, %v208_v14  ;;  %v217_v4 = vld [vmem:[%s522_s21 + $0xd8] sm:$0xff] }
  0x26   : > { %v242_v36 = vadd.f32 %v241_v27, %v240_v32  ;;  %v211_v32 = vld [vmem:[%s522_s21 + $0xa8] sm:$0xff]  ;;  %v275_v1 = vsel %vm223_vm1, %v216_v62, 0.0  ;;  %v316_v2 = vmul.f32 %v209_v20, %v209_v20  ;;  %v319_v20 = vmul.f32 %v212_v38, %v212_v38 }
  0x27   : > { %v343_v16 = vadd.f32 %v342_v7, %v341_v10  ;;  %v265_v35 = vsel %vm223_vm1, %v211_v32, 0.0  ;;  %v277_v7 = vsel %vm223_vm1, %v217_v4, 0.0  ;;  %v218_v10 = vld [vmem:[%s522_s21 + $0xe0] sm:$0xff]  ;;  %v318_v14 = vmul.f32 %v211_v32, %v211_v32 }
  0x28   : > { %v244_v43 = vadd.f32 %v243_v34, %v242_v36  ;;  %v311_v36 = vmul.f32 %v204_v54, %v204_v54  ;;  %v314_v54 = vmul.f32 %v207_v8, %v207_v8  ;;  %v317_v8 = vmul.f32 %v210_v26, %v210_v26 }
  0x29   : > { %v345_v22 = vadd.f32 %v344_v13, %v343_v16  ;;  %v279_v13 = vsel %vm223_vm1, %v218_v10, 0.0  ;;  %v219_v16 = vld [vmem:[%s522_s21 + $0xe8] sm:$0xff]  ;;  %v320_v26 = vmul.f32 %v213_v44, %v213_v44  ;;  %v321_v32 = vmul.f32 %v214_v50, %v214_v50 }
  0x2a   : > { %v246_v49 = vadd.f32 %v245_v37, %v244_v43  ;;  %v352_v37 = vsel %vm223_vm1, %v309_v24, 0.0  ;;  %v354_v43 = vsel %vm223_vm1, %v310_v30, 0.0  ;;  %v324_v44 = vmul.f32 %v217_v4, %v217_v4 }
  0x2b   : > { %v347_v28 = vadd.f32 %v346_v19, %v345_v22  ;;  %v281_v19 = vsel %vm223_vm1, %v219_v16, 0.0  ;;  %v220_v22 = vld [vmem:[%s522_s21 + $0xf0] sm:$0xff] }
  0x2c   : > { %v248_v55 = vadd.f32 %v247_v45, %v246_v49  ;;  %v356_v49 = vsel %vm223_vm1, %v311_v36, 0.0  ;;  %v322_v36 = vmul.f32 %v215_v56, %v215_v56  ;;  %v327_v56 = vmul.f32 %v220_v22, %v220_v22 }
  0x2d   : > { %v349_v34 = vadd.f32 %v348_v25, %v347_v28  ;;  %v283_v25 = vsel %vm223_vm1, %v220_v22, 0.0  ;;  %v221_v28 = vld [vmem:[%s522_s21 + $0xf8] sm:$0xff]  ;;  %v410_v22 = vld [vmem:[%s642_s1] sm:$0x1] (!%p460_p5) }
  0x2e   : > { %v250_v61 = vadd.f32 %v249_v51, %v248_v55  ;;  %v358_v55 = vsel %vm223_vm1, %v312_v42, 0.0 }
  0x2f   : > { %v351_v40 = vadd.f32 %v350_v31, %v349_v34  ;;  %v285_v31 = vsel %vm223_vm1, %v221_v28, 0.0 }
  0x30   : > { %v252_v3 = vadd.f32 %v251_v57, %v250_v61  ;;  %v360_v61 = vsel %vm223_vm1, %v313_v48, 0.0  ;;  %v325_v48 = vmul.f32 %v218_v10, %v218_v10 }
  0x31   : > { %v353_v46 = vadd.f32 %v352_v37, %v351_v40  ;;  %v374_v37 = vsel %vm223_vm1, %v320_v26, 0.0  ;;  %v323_v40 = vmul.f32 %v216_v62, %v216_v62 }
  0x32   : > { %v254_v9 = vadd.f32 %v253_v63, %v252_v3  ;;  %v362_v3 = vsel %vm223_vm1, %v314_v54, 0.0 }
  0x33   : > { %v355_v52 = vadd.f32 %v354_v43, %v353_v46 }
  0x34   : > { %v256_v15 = vadd.f32 %v255_v5, %v254_v9  ;;  %v364_v9 = vsel %vm223_vm1, %v315_v60, 0.0  ;;  %v222_v60 = vld [vmem:[#allocation2] sm:$0x1] }
  0x35   : > { %v357_v58 = vadd.f32 %v356_v49, %v355_v52  ;;  %v380_v49 = vsel %vm223_vm1, %v323_v40, 0.0  ;;  %v326_v52 = vmul.f32 %v219_v16, %v219_v16 }
  0x36   : > { %v258_v21 = vadd.f32 %v257_v11, %v256_v15  ;;  %v366_v15 = vsel %vm223_vm1, %v316_v2, 0.0 }
  0x37   : > { %v359_v0 = vadd.f32 %v358_v55, %v357_v58  ;;  %v386_v62 = vsel %vm223_vm1, %v326_v52, 0.0 }
  0x38   : > { %v260_v27 = vadd.f32 %v259_v17, %v258_v21  ;;  %v368_v21 = vsel %vm223_vm1, %v317_v8, 0.0 }
  0x39   : > { %v361_v6 = vadd.f32 %v360_v61, %v359_v0  ;;  %v328_v61 = vmul.f32 %v221_v28, %v221_v28 }
  0x3a   : > { %v262_v33 = vadd.f32 %v261_v23, %v260_v27  ;;  %v370_v27 = vsel %vm223_vm1, %v318_v14, 0.0 }
  0x3b   : > { %v363_v12 = vadd.f32 %v362_v3, %v361_v6  ;;  %v390_v4 = vsel %vm223_vm1, %v328_v61, 0.0 }
  0x3c   : > { %v264_v39 = vadd.f32 %v263_v29, %v262_v33  ;;  %v372_v33 = vsel %vm223_vm1, %v319_v20, 0.0 }
  0x3d   : > { %v365_v18 = vadd.f32 %v364_v9, %v363_v12  ;;  %v296_v12 = vld [vmem:[#allocation3] sm:$0x1] }
  0x3e   : > { %v266_v45 = vadd.f32 %v265_v35, %v264_v39 }
  0x3f   : > { %v367_v24 = vadd.f32 %v366_v15, %v365_v18 }
  0x40   : > { %v268_v51 = vadd.f32 %v267_v41, %v266_v45  ;;  %v376_v41 = vsel %vm223_vm1, %v321_v32, 0.0  ;;  %v378_v45 = vsel %vm223_vm1, %v322_v36, 0.0 }
  0x41   : > { %v369_v30 = vadd.f32 %v368_v21, %v367_v24 }
  0x42   : > { %v270_v57 = vadd.f32 %v269_v47, %v268_v51 }
  0x43   : > { %v371_v35 = vadd.f32 %v370_v27, %v369_v30 }
  0x44   : > { %v272_v63 = vadd.f32 %v271_v53, %v270_v57  ;;  %v382_v53 = vsel %vm223_vm1, %v324_v44, 0.0  ;;  %v384_v57 = vsel %vm223_vm1, %v325_v48, 0.0 }
  0x45   : > { %v373_v39 = vadd.f32 %v372_v33, %v371_v35 }
  0x46   : > { %v274_v5 = vadd.f32 %v273_v59, %v272_v63 }
  0x47   : > { %v375_v43 = vadd.f32 %v374_v37, %v373_v39 }
  0x48   : > { %v276_v11 = vadd.f32 %v275_v1, %v274_v5  ;;  %v388_v1 = vsel %vm223_vm1, %v327_v56, 0.0 }
  0x49   : > { %v377_v47 = vadd.f32 %v376_v41, %v375_v43 }
  0x4a   : > { %v278_v17 = vadd.f32 %v277_v7, %v276_v11 }
  0x4b   : > { %v379_v51 = vadd.f32 %v378_v45, %v377_v47 }
  0x4c   : > { %v280_v23 = vadd.f32 %v279_v13, %v278_v17 }
  0x4d   : > { %v381_v55 = vadd.f32 %v380_v49, %v379_v51 }
  0x4e   : > { %v282_v29 = vadd.f32 %v281_v19, %v280_v23 }
  0x4f   : > { %v383_v59 = vadd.f32 %v382_v53, %v381_v55 }
  0x50   : > { %v284_v34 = vadd.f32 %v283_v25, %v282_v29  ;;  %v415_v25 = vld [vmem:[%s643_s2] sm:$0x1] (!%p460_p5) }
  0x51   : > { %v385_v0 = vadd.f32 %v384_v57, %v383_v59 }
  0x52   : > { %v286_v38 = vadd.f32 %v285_v31, %v284_v34 }
  0x53   : > { %v387_v3 = vadd.f32 %v386_v62, %v385_v0 }
  0x54   : > { %v287_v42 = vrot.slane %v286_v38, 4 }
  0x55   : > { %v389_v5 = vadd.f32 %v388_v1, %v387_v3 }
  0x56   : > { %v288_v46 = vadd.f32 %v287_v42, %v286_v38 }
  0x57   : > { %v391_v6 = vadd.f32 %v390_v4, %v389_v5 }
  0x58   : > { %v289_v50 = vrot.slane %v288_v46, 2 }
  0x59   : > { %v392_v7 = vrot.slane %v391_v6, 4 }
  0x5a   : > { %v290_v54 = vadd.f32 %v289_v50, %v288_v46 }
  0x5b   : > { %v393_v8 = vadd.f32 %v392_v7, %v391_v6 }
  0x5c   : > { %v291_v58 = vrot.slane %v290_v54, 1 }
  0x5d   : > { %v394_v9 = vrot.slane %v393_v8, 2 }
  0x5e   : > { %v292_v63 = vadd.f32 %v291_v58, %v290_v54 }
  0x5f   : > { %v395_v10 = vadd.f32 %v394_v9, %v393_v8 }
  0x60   : > { %v293_v2 = vadd.f32 %v292_v63, %v222_v60 }
  0x61   : > { %v396_v11 = vrot.slane %v395_v10, 1  ;;  %403 = sbr.rel (%p460_p5) target bundleno = 135 (0x87), region = 40 }
  0x62   : > { %295 = vst.msk [vmem:[#allocation2] sm:$0x1] %vm294_vm2, %v293_v2 }
  0x63   : > { %v397_v13 = vadd.f32 %v396_v11, %v395_v10 }
  0x65   : > { %v398_v14 = vadd.f32 %v397_v13, %v296_v12 }
  0x67   : > { %399 = vst.msk [vmem:[#allocation3] sm:$0x1] %vm294_vm2, %v398_v14 }
  0x69   : > { %v404_v15 = vld [vmem:[#allocation2] sm:$0x1] }
  0x6a   : > { %v405_v17 = vmul.f32 0.001953125, %v404_v15 }
  0x6c   : > { %v408_v19 = vmul.f32 %v405_v17, %v405_v17 }
  0x6e   : > { %v406_v16 = vld [vmem:[#allocation3] sm:$0x1] }
  0x6f   : > { %v407_v18 = vmul.f32 0.001953125, %v406_v16 }
  0x71   : > { %v409_v20 = vsub.f32 %v407_v18, %v408_v19 }
  0x73   : > { %v411_v21 = vadd.f32 1e-05, %v409_v20 }
  0x75   : > { %472 = vrsqrt.f32 %v411_v21 }
  0x7f   : > { %v473_v23 = vpop.eup %472 }
  0x80   : > { %v413_v24 = vmul.f32 %v473_v23, %v410_v22 }
  0x82   : > { %414 = vst.msk [vmem:[%s644_s3] sm:$0x1] %vm294_vm2, %v413_v24  ;;  %v416_v26 = vmul.f32 %v413_v24, %v405_v17 }
  0x84   : > { %v417_v27 = vsub.f32 %v415_v25, %v416_v26 }
  0x86   : > { %418 = vst.msk [vmem:[%s645_s4] sm:$0x1] %vm294_vm2, %v417_v27 }
  0x87 PF: > { %s15_s15 = sadd.s32 1, %s480_s15  }
  0x88   : > { %p12_p6 = scmp.ge.s32.totalorder %s15_s15, 4  }
  0x8a   :  { %14 = sbr.rel (!%p12_p6) target bundleno = 1 (0x1), region = 74 }

// kernel: _lambda_.18
= control target key start
LH: loop header
LB: loop body
LE: loop exit
PB: predicated region body
PF: predicated region fallthrough
CT: control target
= control target key end

     0   :  { %s720_s9 = smov 0   ;;  %s844_s0 = inlined_call_operand.vmem [shape: bf16[512,9], index: 0, kind: input, shape index: {}]   ;;  %s845_s1 = inlined_call_operand.vmem [shape: bf16[9,4], index: 1, kind: input, shape index: {}]   ;;  %s846_s2 = inlined_call_operand.vmem [shape: f32[512,4], index: 2, kind: output, shape index: {}]  }
   0x1 LB: > { %s573_s10 = sadd.s32 4294967295, %s702_s9   ;;  %p577_p0 = scmp.ge.s32.totalorder %s702_s9, 1  ;;  %s702_s9 = sphi %s720_s9, %s12_s9  }
   0x2   : > { %p113_p1 = scmp.lt.s32.totalorder %s702_s9, 3 }
   0x4   : > { %p114_p2 = pnand %p577_p0, %p113_p1 }
   0x5   : > { %v679_v0 = vld [vmem:[%s845_s1] sm:$0x1f] (!%p114_p2)   ;;  %vm316_vm0 = vcmask (!%p114_p2), 1043456   ;;  %vm317_vm1 = vcmask (!%p114_p2), 1044480   ;;  %s578_s13 = sshll.u32 (!%p114_p2), %s573_s10, 5  ;;  %v704_v1 = vmov (!%p114_p2), 65535  }
   0x6   : > { %117 = sbr.rel (%p114_p2) target bundleno = 259 (0x103), region = 28  ;;  %v318_v2 = vsel (!%p114_p2), %vm316_vm0, 4294967295, %v704_v1  ;;  %p136_p3 = scmp.lt.s32.totalorder (!%p114_p2), %s578_s13, 63  ;;  %vm267_vm2 = vcmask (!%p114_p2), 72704   ;;  %vm484_vm3 = vcmask (!%p114_p2), 31744  }
   0x7   : > { %v319_v3 = vsel (!%p114_p2), %vm317_vm1, %v318_v2, 0 }
   0x8   : > { %v321_v4 = vand.u32 (!%p114_p2), %v679_v0, %v319_v3 }
   0xa   : > { %634 = vmatprep.subr.bf16.mxu0 (!%p114_p2), %v321_v4  ;;  %668 = vmatprep.subr.bf16.mxu1 (!%p114_p2), %v321_v4 }
   0xb   : > { %635 = vmatpush3.bf16.msra.mxu0 (!%p114_p2), %v321_v4  ;;  %669 = vmatpush3.bf16.msra.mxu1 (!%p114_p2), %v321_v4 }
   0xd   : > { %s848_s13 = smov (!%p136_p3, %s578_s13), 63 }
   0xe   : > { %s579_s14 = sshll.u32 %s848_s13, 2  ;;  %s581_s18 = sshll.u32 %s848_s13, 3 }
   0xf   : > { %s737_s17 = scalar_lea.vmem %s844_s0, %s579_s14  ;;  %s775_s21 = scalar_lea.vmem %s846_s2, %s581_s18 }
  0x10   : > { %v680_v5 = vld [vmem:[%s737_s17] sm:$0xff]   ;;  %v682_v7 = vld [vmem:[%s737_s17 + $0x8] sm:$0xff]   ;;  %v684_v9 = vld [vmem:[%s737_s17 + $0x10] sm:$0xff]  }
  0x11   : > { %v681_v6 = vld [vmem:[%s737_s17 + $0x40] sm:$0xff]   ;;  %636 = vmatprep.mubr.msk.bf16.mxu0 %vm267_vm2, %v680_v5  ;;  %v683_v8 = vld [vmem:[%s737_s17 + $0x48] sm:$0xff]   ;;  %v685_v10 = vld [vmem:[%s737_s17 + $0x50] sm:$0xff]  }
  0x12   : > { %652 = vmatprep.mubr.msk.bf16.mxu1 %vm267_vm2, %v681_v6  ;;  %637 = vmatmul.mubr.msk.bf16.vlgmr.msra.gmra.mrb[0].mxu0 %vm267_vm2, %v682_v7  ;;  %v686_v11 = vld [vmem:[%s737_s17 + $0x18] sm:$0xff]   ;;  %v688_v13 = vld [vmem:[%s737_s17 + $0x20] sm:$0xff]   ;;  %v690_v15 = vld [vmem:[%s737_s17 + $0x28] sm:$0xff]  }
  0x13   : > { %653 = vmatmul.mubr.msk.bf16.vlgmr.msra.gmra.mrb[0].mxu1 %vm267_vm2, %v683_v8  ;;  %640 = vmatprep.mubr.msk.bf16.mxu0 %vm267_vm2, %v684_v9  ;;  %v687_v12 = vld [vmem:[%s737_s17 + $0x58] sm:$0xff]   ;;  %v689_v14 = vld [vmem:[%s737_s17 + $0x60] sm:$0xff]   ;;  %v691_v16 = vld [vmem:[%s737_s17 + $0x68] sm:$0xff]  }
  0x14   : > { %656 = vmatprep.mubr.msk.bf16.mxu1 %vm267_vm2, %v685_v10  ;;  %v692_v17 = vld [vmem:[%s737_s17 + $0x30] sm:$0xff]   ;;  %v694_v19 = vld [vmem:[%s737_s17 + $0x38] sm:$0xff]  }
  0x15   : > { %v693_v18 = vld [vmem:[%s737_s17 + $0x70] sm:$0xff]   ;;  %v695_v20 = vld [vmem:[%s737_s17 + $0x78] sm:$0xff]  }
  0x1a   : > { %641 = vmatmul.mubr.msk.bf16.gmra.mrb[4].mxu0 %vm267_vm2, %v686_v11 }
  0x1b   : > { %657 = vmatmul.mubr.msk.bf16.gmra.mrb[4].mxu1 %vm267_vm2, %v687_v12  ;;  %644 = vmatprep.mubr.msk.bf16.mxu0 %vm267_vm2, %v688_v13 }
  0x1c   : > { %660 = vmatprep.mubr.msk.bf16.mxu1 %vm267_vm2, %v689_v14 }
  0x22   : > { %645 = vmatmul.mubr.msk.bf16.gmra.mrb[8].mxu0 %vm267_vm2, %v690_v15 }
  0x23   : > { %661 = vmatmul.mubr.msk.bf16.gmra.mrb[8].mxu1 %vm267_vm2, %v691_v16  ;;  %648 = vmatprep.mubr.msk.bf16.mxu0 %vm267_vm2, %v692_v17 }
  0x24   : > { %664 = vmatprep.mubr.msk.bf16.mxu1 %vm267_vm2, %v693_v18 }
  0x2a   : > { %649 = vmatmul.mubr.msk.bf16.gmra.mrb[12].mxu0 %vm267_vm2, %v694_v19 }
  0x2b   : > { %665 = vmatmul.mubr.msk.bf16.gmra.mrb[12].mxu1 %vm267_vm2, %v695_v20 }
  0xe5   : > { %v638_v21 = vpop.f32.mrb[0].mxu0 }
  0xe6   : > { %487 = vst.msk [vmem:[%s775_s21 + $0x10] sm:$0xff] %vm484_vm3, %v638_v21  ;;  %v654_v22 = vpop.f32.mrb[0].mxu1  ;;  %v357_v23 = vpop.f32.mrb[1].mxu0 }
  0xe7   : > { %503 = vst.msk [vmem:[%s775_s21 + $0x90] sm:$0xff] %vm484_vm3, %v654_v22  ;;  %485 = vst.msk [vmem:[%s775_s21] sm:$0xff] %vm484_vm3, %v357_v23  ;;  %v421_v24 = vpop.f32.mrb[1].mxu1  ;;  %v639_v25 = vpop.f32.mrb[2].mxu0 }
  0xe8   : > { %501 = vst.msk [vmem:[%s775_s21 + $0x80] sm:$0xff] %vm484_vm3, %v421_v24  ;;  %488 = vst.msk [vmem:[%s775_s21 + $0x18] sm:$0xff] %vm484_vm3, %v639_v25  ;;  %v655_v26 = vpop.f32.mrb[2].mxu1  ;;  %v360_v27 = vpop.f32.mrb[3].mxu0 }
  0xe9   : > { %504 = vst.msk [vmem:[%s775_s21 + $0x98] sm:$0xff] %vm484_vm3, %v655_v26  ;;  %486 = vst.msk [vmem:[%s775_s21 + $0x8] sm:$0xff] %vm484_vm3, %v360_v27  ;;  %v424_v28 = vpop.f32.mrb[3].mxu1 }
  0xea   : > { %502 = vst.msk [vmem:[%s775_s21 + $0x88] sm:$0xff] %vm484_vm3, %v424_v28 }
  0xed   : > { %v642_v29 = vpop.f32.mrb[4].mxu0 }
  0xee   : > { %491 = vst.msk [vmem:[%s775_s21 + $0x30] sm:$0xff] %vm484_vm3, %v642_v29  ;;  %v658_v30 = vpop.f32.mrb[4].mxu1  ;;  %v373_v31 = vpop.f32.mrb[5].mxu0 }
  0xef   : > { %507 = vst.msk [vmem:[%s775_s21 + $0xb0] sm:$0xff] %vm484_vm3, %v658_v30  ;;  %489 = vst.msk [vmem:[%s775_s21 + $0x20] sm:$0xff] %vm484_vm3, %v373_v31  ;;  %v437_v32 = vpop.f32.mrb[5].mxu1  ;;  %v643_v33 = vpop.f32.mrb[6].mxu0 }
  0xf0   : > { %505 = vst.msk [vmem:[%s775_s21 + $0xa0] sm:$0xff] %vm484_vm3, %v437_v32  ;;  %492 = vst.msk [vmem:[%s775_s21 + $0x38] sm:$0xff] %vm484_vm3, %v643_v33  ;;  %v659_v34 = vpop.f32.mrb[6].mxu1  ;;  %v376_v35 = vpop.f32.mrb[7].mxu0 }
  0xf1   : > { %508 = vst.msk [vmem:[%s775_s21 + $0xb8] sm:$0xff] %vm484_vm3, %v659_v34  ;;  %490 = vst.msk [vmem:[%s775_s21 + $0x28] sm:$0xff] %vm484_vm3, %v376_v35  ;;  %v440_v36 = vpop.f32.mrb[7].mxu1 }
  0xf2   : > { %506 = vst.msk [vmem:[%s775_s21 + $0xa8] sm:$0xff] %vm484_vm3, %v440_v36 }
  0xf5   : > { %v646_v37 = vpop.f32.mrb[8].mxu0 }
  0xf6   : > { %495 = vst.msk [vmem:[%s775_s21 + $0x50] sm:$0xff] %vm484_vm3, %v646_v37  ;;  %v662_v38 = vpop.f32.mrb[8].mxu1  ;;  %v389_v39 = vpop.f32.mrb[9].mxu0 }
  0xf7   : > { %511 = vst.msk [vmem:[%s775_s21 + $0xd0] sm:$0xff] %vm484_vm3, %v662_v38  ;;  %493 = vst.msk [vmem:[%s775_s21 + $0x40] sm:$0xff] %vm484_vm3, %v389_v39  ;;  %v453_v40 = vpop.f32.mrb[9].mxu1  ;;  %v647_v41 = vpop.f32.mrb[10].mxu0 }
  0xf8   : > { %509 = vst.msk [vmem:[%s775_s21 + $0xc0] sm:$0xff] %vm484_vm3, %v453_v40  ;;  %496 = vst.msk [vmem:[%s775_s21 + $0x58] sm:$0xff] %vm484_vm3, %v647_v41  ;;  %v663_v42 = vpop.f32.mrb[10].mxu1  ;;  %v392_v43 = vpop.f32.mrb[11].mxu0 }
  0xf9   : > { %512 = vst.msk [vmem:[%s775_s21 + $0xd8] sm:$0xff] %vm484_vm3, %v663_v42  ;;  %494 = vst.msk [vmem:[%s775_s21 + $0x48] sm:$0xff] %vm484_vm3, %v392_v43  ;;  %v456_v44 = vpop.f32.mrb[11].mxu1 }
  0xfa   : > { %510 = vst.msk [vmem:[%s775_s21 + $0xc8] sm:$0xff] %vm484_vm3, %v456_v44 }
  0xfd   : > { %v650_v45 = vpop.f32.mrb[12].mxu0 }
  0xfe   : > { %499 = vst.msk [vmem:[%s775_s21 + $0x70] sm:$0xff] %vm484_vm3, %v650_v45  ;;  %v666_v46 = vpop.f32.mrb[12].mxu1  ;;  %v405_v47 = vpop.f32.mrb[13].mxu0 }
  0xff   : > { %515 = vst.msk [vmem:[%s775_s21 + $0xf0] sm:$0xff] %vm484_vm3, %v666_v46  ;;  %497 = vst.msk [vmem:[%s775_s21 + $0x60] sm:$0xff] %vm484_vm3, %v405_v47  ;;  %v469_v48 = vpop.f32.mrb[13].mxu1  ;;  %v651_v49 = vpop.f32.mrb[14].mxu0 }
 0x100   : > { %513 = vst.msk [vmem:[%s775_s21 + $0xe0] sm:$0xff] %vm484_vm3, %v469_v48  ;;  %500 = vst.msk [vmem:[%s775_s21 + $0x78] sm:$0xff] %vm484_vm3, %v651_v49  ;;  %v667_v50 = vpop.f32.mrb[14].mxu1  ;;  %v408_v51 = vpop.f32.mrb[15].mxu0 }
 0x101   : > { %516 = vst.msk [vmem:[%s775_s21 + $0xf8] sm:$0xff] %vm484_vm3, %v667_v50  ;;  %498 = vst.msk [vmem:[%s775_s21 + $0x68] sm:$0xff] %vm484_vm3, %v408_v51  ;;  %v472_v52 = vpop.f32.mrb[15].mxu1 }
 0x102   : > { %514 = vst.msk [vmem:[%s775_s21 + $0xe8] sm:$0xff] %vm484_vm3, %v472_v52 }
 0x103 PF: > { %s12_s9 = sadd.s32 1, %s702_s9  }
 0x104   : > { %p9_p4 = scmp.ge.s32.totalorder %s12_s9, 4  }
 0x106   :  { %11 = sbr.rel (!%p9_p4) target bundleno = 1 (0x1), region = 58 }

// kernel: _lambda_.20
= control target key start
LH: loop header
LB: loop body
LE: loop exit
PB: predicated region body
PF: predicated region fallthrough
CT: control target
= control target key end

     0   :  { %s824_s15 = smov 0   ;;  %s1047_s0 = inlined_call_operand.vmem [shape: f32[512,36], index: 0, kind: input, shape index: {}]   ;;  %s1048_s1 = inlined_call_operand.vmem [shape: bf16[36,24], index: 1, kind: input, shape index: {}]   ;;  %s1049_s2 = inlined_call_operand.vmem [shape: f32[1,36], index: 2, kind: input, shape index: {}]   ;;  %s1050_s3 = inlined_call_operand.vmem [shape: f32[1,36], index: 3, kind: input, shape index: {}]   ;;  %s1051_s4 = inlined_call_operand.vmem [shape: f32[512,24], index: 4, kind: output, shape index: {}]  }
   0x1 LB: > { %s683_s16 = sadd.s32 4294967295, %s797_s15   ;;  %p687_p0 = scmp.ge.s32.totalorder %s797_s15, 1  ;;  %s797_s15 = sphi %s824_s15, %s14_s15  }
   0x2   : > { %p163_p1 = scmp.lt.s32.totalorder %s797_s15, 3 }
   0x4   : > { %p164_p2 = pnand %p687_p0, %p163_p1 }
   0x5   : > { %v788_v0 = vld [vmem:[%s1048_s1] sm:$0xff] (!%p164_p2)   ;;  %v789_v1 = vld [vmem:[%s1048_s1 + $0x8] sm:$0xff] (!%p164_p2)   ;;  %s688_s21 = sshll.u32 (!%p164_p2), %s683_s16, 5  ;;  %v790_v2 = vld [vmem:[%s1048_s1 + $0x10] ss:$0 sps:$4 sm:$0x33] (!%p164_p2)  }
   0x6   : > { %167 = sbr.rel (%p164_p2) target bundleno = 268 (0x10c), region = 36  ;;  %734 = vmatprep.subr.bf16.mxu0 (!%p164_p2), %v788_v0  ;;  %772 = vmatprep.subr.bf16.mxu1 (!%p164_p2), %v788_v0  ;;  %p190_p3 = scmp.lt.s32.totalorder (!%p164_p2), %s688_s21, 63  ;;  %vm429_vm0 = vcmask (!%p164_p2), 1041408   ;;  %v847_v3 = vld [vmem:[%s1049_s2] ss:$0 sm:$0xff] (!%p164_p2)  ;;  %vm380_vm1 = vcmask (!%p164_p2), 293888  }
   0x7   : > { %735 = vmatpush3.bf16.msra.mxu0 (!%p164_p2), %v788_v0  ;;  %775 = vmatpush3.bf16.msra.mxu1 (!%p164_p2), %v788_v0  ;;  %v859_v4 = vld [vmem:[%s1050_s3] ss:$0 sm:$0xff] (!%p164_p2)  ;;  %v431_v5 = vsel (!%p164_p2), %vm429_vm0, %v790_v2, 0  ;;  %vm594_vm2 = vcmask (!%p164_p2), 195584  }
   0x8   : > { %736 = vmatprep.subr.bf16.mxu0 (!%p164_p2), %v789_v1  ;;  %773 = vmatprep.subr.bf16.mxu1 (!%p164_p2), %v789_v1 }
   0xb   : > { %737 = vmatpush3.bf16.msra.mxu0 (!%p164_p2), %v789_v1  ;;  %776 = vmatpush3.bf16.msra.mxu1 (!%p164_p2), %v789_v1 }
   0xc   : > { %778 = vmatprep.subr.msk.bf16.mxu0 (!%p164_p2), %vm429_vm0, %v790_v2  ;;  %779 = vmatprep.subr.msk.bf16.mxu1 (!%p164_p2), %vm429_vm0, %v790_v2 }
   0xd   : > { %s1053_s21 = smov (!%p190_p3, %s688_s21), 63 }
   0xe   : > { %s689_s24 = sshll.u32 %s1053_s21, 3 }
   0xf   : > { %s854_s29 = scalar_lea.vmem %s1047_s0, %s689_s24  ;;  %739 = vmatpush3.bf16.msra.mxu0 %v431_v5  ;;  %777 = vmatpush3.bf16.msra.mxu1 %v431_v5  ;;  %s978_s8 = scalar_lea.vmem %s1051_s4, %s689_s24 }
  0x10   : > { %v202_v6 = vld [vmem:[%s854_s29] sm:$0xff]  ;;  %v203_v7 = vld [vmem:[%s854_s29 + $0x8] sm:$0xff]  ;;  %v204_v13 = vld [vmem:[%s854_s29 + $0x10] sm:$0xff] }
  0x11   : > { %v218_v8 = vld [vmem:[%s854_s29 + $0x80] sm:$0xff]  ;;  %v241_v9 = vmul.f32 %v847_v3, %v202_v6  ;;  %v242_v10 = vmul.f32 %v847_v3, %v203_v7  ;;  %v219_v11 = vld [vmem:[%s854_s29 + $0x88] sm:$0xff]  ;;  %v205_v14 = vld [vmem:[%s854_s29 + $0x18] sm:$0xff]  ;;  %v243_v16 = vmul.f32 %v847_v3, %v204_v13 }
  0x12   : > { %v257_v12 = vmul.f32 %v847_v3, %v218_v8  ;;  %v258_v15 = vmul.f32 %v847_v3, %v219_v11  ;;  %v244_v17 = vmul.f32 %v847_v3, %v205_v14  ;;  %v220_v18 = vld [vmem:[%s854_s29 + $0x90] sm:$0xff]  ;;  %v221_v19 = vld [vmem:[%s854_s29 + $0x98] sm:$0xff]  ;;  %v206_v27 = vld [vmem:[%s854_s29 + $0x20] sm:$0xff] }
  0x13   : > { %v280_v20 = vadd.f32 %v859_v4, %v241_v9  ;;  %v281_v21 = vadd.f32 %v859_v4, %v242_v10  ;;  %v282_v24 = vadd.f32 %v859_v4, %v243_v16  ;;  %v259_v26 = vmul.f32 %v847_v3, %v220_v18  ;;  %v207_v28 = vld [vmem:[%s854_s29 + $0x28] sm:$0xff]  ;;  %v222_v33 = vld [vmem:[%s854_s29 + $0xa0] sm:$0xff]  ;;  %v208_v43 = vld [vmem:[%s854_s29 + $0x30] sm:$0xff] }
  0x14   : > { %v296_v22 = vadd.f32 %v859_v4, %v257_v12  ;;  %v297_v23 = vadd.f32 %v859_v4, %v258_v15  ;;  %v283_v25 = vadd.f32 %v859_v4, %v244_v17  ;;  %v260_v32 = vmul.f32 %v847_v3, %v221_v19  ;;  %v223_v38 = vld [vmem:[%s854_s29 + $0xa8] sm:$0xff]  ;;  %v209_v44 = vld [vmem:[%s854_s29 + $0x38] sm:$0xff]  ;;  %v224_v53 = vld [vmem:[%s854_s29 + $0xb0] sm:$0xff] }
  0x15   : > { %v312_v29 = vmax.f32 %v280_v20, 0.0  ;;  %v313_v30 = vmax.f32 %v281_v21, 0.0  ;;  %v314_v35 = vmax.f32 %v282_v24, 0.0  ;;  %v298_v37 = vadd.f32 %v859_v4, %v259_v26  ;;  %v225_v57 = vld [vmem:[%s854_s29 + $0xb8] sm:$0xff]  ;;  %v210_v58 = vld [vmem:[%s854_s29 + $0x40] sm:$0xff]  ;;  %v211_v63 = vld [vmem:[%s854_s29 + $0x48] sm:$0xff] }
  0x16   : > { %v328_v31 = vmax.f32 %v296_v22, 0.0  ;;  %v329_v34 = vmax.f32 %v297_v23, 0.0  ;;  %v315_v36 = vmax.f32 %v283_v25, 0.0  ;;  %v299_v40 = vadd.f32 %v859_v4, %v260_v32  ;;  %v226_v6 = vld [vmem:[%s854_s29 + $0xc0] sm:$0xff]  ;;  %v227_v11 = vld [vmem:[%s854_s29 + $0xc8] sm:$0xff]  ;;  %v212_v16 = vld [vmem:[%s854_s29 + $0x50] sm:$0xff] }
  0x17   : > { %v344_v39 = vpack.c.bf16 %v313_v30, %v312_v29  ;;  %v245_v41 = vmul.f32 %v847_v3, %v206_v27  ;;  %v246_v42 = vmul.f32 %v847_v3, %v207_v28  ;;  %v330_v47 = vmax.f32 %v298_v37, 0.0  ;;  %v213_v21 = vld [vmem:[%s854_s29 + $0x58] sm:$0xff]  ;;  %v228_v22 = vld [vmem:[%s854_s29 + $0xd0] sm:$0xff]  ;;  %v215_v37 = vld [vmem:[%s854_s29 + $0x68] sm:$0xff] }
  0x18   : > { %v352_v45 = vpack.c.bf16 %v329_v34, %v328_v31  ;;  %v345_v46 = vpack.c.bf16 %v315_v36, %v314_v35  ;;  %v261_v48 = vmul.f32 %v847_v3, %v222_v33  ;;  %v331_v49 = vmax.f32 %v299_v40, 0.0  ;;  %v229_v27 = vld [vmem:[%s854_s29 + $0xd8] sm:$0xff]  ;;  %v214_v36 = vld [vmem:[%s854_s29 + $0x60] sm:$0xff] }
  0x19   : > { %740 = vmatprep.mubr.msk.bf16.mxu0 %vm380_vm1, %v344_v39  ;;  %v284_v50 = vadd.f32 %v859_v4, %v245_v41  ;;  %v285_v51 = vadd.f32 %v859_v4, %v246_v42  ;;  %v262_v52 = vmul.f32 %v847_v3, %v223_v38  ;;  %v247_v55 = vmul.f32 %v847_v3, %v208_v43  ;;  %v230_v42 = vld [vmem:[%s854_s29 + $0xe0] sm:$0xff] }
  0x1a   : > { %756 = vmatprep.mubr.msk.bf16.mxu1 %vm380_vm1, %v352_v45  ;;  %741 = vmatmul.mubr.msk.bf16.vlgmr.msra.gmra.mrb[0].mxu0 %vm380_vm1, %v345_v46  ;;  %v300_v54 = vadd.f32 %v859_v4, %v261_v48  ;;  %v248_v56 = vmul.f32 %v847_v3, %v209_v44  ;;  %v353_v59 = vpack.c.bf16 %v331_v49, %v330_v47  ;;  %v231_v47 = vld [vmem:[%s854_s29 + $0xe8] sm:$0xff] }
  0x1b   : > { %v316_v60 = vmax.f32 %v284_v50, 0.0  ;;  %v317_v61 = vmax.f32 %v285_v51, 0.0  ;;  %v301_v62 = vadd.f32 %v859_v4, %v262_v52  ;;  %v286_v1 = vadd.f32 %v859_v4, %v247_v55  ;;  %v216_v52 = vld [vmem:[%s854_s29 + $0x70] sm:$0xff] }
  0x1c   : > { %v332_v0 = vmax.f32 %v300_v54, 0.0  ;;  %v287_v2 = vadd.f32 %v859_v4, %v248_v56  ;;  %v263_v5 = vmul.f32 %v847_v3, %v224_v53  ;;  %757 = vmatmul.mubr.msk.bf16.vlgmr.msra.gmra.mrb[0].mxu1 %vm380_vm1, %v353_v59  ;;  %v264_v9 = vmul.f32 %v847_v3, %v225_v57  ;;  %v217_v53 = vld [vmem:[%s854_s29 + $0x78] sm:$0xff] }
  0x1d   : > { %v346_v7 = vpack.c.bf16 %v317_v61, %v316_v60  ;;  %v333_v8 = vmax.f32 %v301_v62, 0.0  ;;  %v249_v10 = vmul.f32 %v847_v3, %v210_v58  ;;  %v318_v12 = vmax.f32 %v286_v1, 0.0  ;;  %v232_v62 = vld [vmem:[%s854_s29 + $0xf0] sm:$0xff] }
  0x1e   : > { %v319_v13 = vmax.f32 %v287_v2, 0.0  ;;  %v302_v14 = vadd.f32 %v859_v4, %v263_v5  ;;  %v250_v15 = vmul.f32 %v847_v3, %v211_v63  ;;  %v303_v18 = vadd.f32 %v859_v4, %v264_v9  ;;  %v233_v5 = vld [vmem:[%s854_s29 + $0xf8] sm:$0xff] }
  0x1f   : > { %744 = vmatprep.mubr.msk.bf16.mxu0 %vm380_vm1, %v346_v7  ;;  %v354_v17 = vpack.c.bf16 %v333_v8, %v332_v0  ;;  %v288_v19 = vadd.f32 %v859_v4, %v249_v10  ;;  %v265_v20 = vmul.f32 %v847_v3, %v226_v6  ;;  %v266_v26 = vmul.f32 %v847_v3, %v227_v11 }
  0x20   : > { %v347_v23 = vpack.c.bf16 %v319_v13, %v318_v12  ;;  %v334_v24 = vmax.f32 %v302_v14, 0.0  ;;  %v289_v25 = vadd.f32 %v859_v4, %v250_v15  ;;  %v335_v28 = vmax.f32 %v303_v18, 0.0 }
  0x21   : > { %760 = vmatprep.mubr.msk.bf16.mxu1 %vm380_vm1, %v354_v17  ;;  %v320_v29 = vmax.f32 %v288_v19, 0.0  ;;  %v304_v30 = vadd.f32 %v859_v4, %v265_v20  ;;  %v251_v31 = vmul.f32 %v847_v3, %v212_v16  ;;  %v305_v33 = vadd.f32 %v859_v4, %v266_v26 }
  0x22   : > { %745 = vmatmul.mubr.msk.bf16.gmra.mrb[4].mxu0 %vm380_vm1, %v347_v23  ;;  %v321_v32 = vmax.f32 %v289_v25, 0.0  ;;  %v252_v34 = vmul.f32 %v847_v3, %v213_v21  ;;  %v267_v35 = vmul.f32 %v847_v3, %v228_v22  ;;  %v355_v38 = vpack.c.bf16 %v335_v28, %v334_v24 }
  0x23   : > { %v336_v39 = vmax.f32 %v304_v30, 0.0  ;;  %v290_v40 = vadd.f32 %v859_v4, %v251_v31  ;;  %v268_v41 = vmul.f32 %v847_v3, %v229_v27  ;;  %v337_v44 = vmax.f32 %v305_v33, 0.0 }
  0x24   : > { %v348_v43 = vpack.c.bf16 %v321_v32, %v320_v29  ;;  %v291_v45 = vadd.f32 %v859_v4, %v252_v34  ;;  %v306_v46 = vadd.f32 %v859_v4, %v267_v35  ;;  %761 = vmatmul.mubr.msk.bf16.gmra.mrb[4].mxu1 %vm380_vm1, %v355_v38  ;;  %v253_v50 = vmul.f32 %v847_v3, %v214_v36 }
  0x25   : > { %v322_v48 = vmax.f32 %v290_v40, 0.0  ;;  %v307_v49 = vadd.f32 %v859_v4, %v268_v41  ;;  %v254_v51 = vmul.f32 %v847_v3, %v215_v37  ;;  %v356_v54 = vpack.c.bf16 %v337_v44, %v336_v39 }
  0x26   : > { %748 = vmatprep.mubr.msk.bf16.mxu0 %vm380_vm1, %v348_v43  ;;  %v323_v55 = vmax.f32 %v291_v45, 0.0  ;;  %v338_v56 = vmax.f32 %v306_v46, 0.0  ;;  %v269_v57 = vmul.f32 %v847_v3, %v230_v42  ;;  %v292_v59 = vadd.f32 %v859_v4, %v253_v50 }
  0x27   : > { %v339_v58 = vmax.f32 %v307_v49, 0.0  ;;  %v293_v60 = vadd.f32 %v859_v4, %v254_v51  ;;  %v270_v61 = vmul.f32 %v847_v3, %v231_v47  ;;  %764 = vmatprep.mubr.msk.bf16.mxu1 %vm380_vm1, %v356_v54  ;;  %v255_v1 = vmul.f32 %v847_v3, %v216_v52 }
  0x28   : > { %v349_v63 = vpack.c.bf16 %v323_v55, %v322_v48  ;;  %v308_v0 = vadd.f32 %v859_v4, %v269_v57  ;;  %v256_v2 = vmul.f32 %v847_v3, %v217_v53  ;;  %v324_v7 = vmax.f32 %v292_v59, 0.0 }
  0x29   : > { %v357_v6 = vpack.c.bf16 %v339_v58, %v338_v56  ;;  %v325_v8 = vmax.f32 %v293_v60, 0.0  ;;  %v309_v9 = vadd.f32 %v859_v4, %v270_v61  ;;  %v294_v11 = vadd.f32 %v859_v4, %v255_v1 }
  0x2a   : > { %749 = vmatmul.mubr.msk.bf16.gmra.mrb[8].mxu0 %vm380_vm1, %v349_v63  ;;  %v340_v10 = vmax.f32 %v308_v0, 0.0  ;;  %v295_v12 = vadd.f32 %v859_v4, %v256_v2  ;;  %v271_v13 = vmul.f32 %v847_v3, %v232_v62  ;;  %v272_v16 = vmul.f32 %v847_v3, %v233_v5 }
  0x2b   : > { %v350_v14 = vpack.c.bf16 %v325_v8, %v324_v7  ;;  %v341_v15 = vmax.f32 %v309_v9, 0.0  ;;  %v326_v17 = vmax.f32 %v294_v11, 0.0 }
  0x2c   : > { %v327_v18 = vmax.f32 %v295_v12, 0.0  ;;  %v310_v19 = vadd.f32 %v859_v4, %v271_v13  ;;  %765 = vmatmul.mubr.msk.bf16.gmra.mrb[8].mxu1 %vm380_vm1, %v357_v6  ;;  %v311_v21 = vadd.f32 %v859_v4, %v272_v16 }
  0x2d   : > { %752 = vmatprep.mubr.msk.bf16.mxu0 %vm380_vm1, %v350_v14  ;;  %v358_v20 = vpack.c.bf16 %v341_v15, %v340_v10 }
  0x2e   : > { %v351_v22 = vpack.c.bf16 %v327_v18, %v326_v17  ;;  %v342_v23 = vmax.f32 %v310_v19, 0.0  ;;  %v343_v24 = vmax.f32 %v311_v21, 0.0 }
  0x2f   : > { %768 = vmatprep.mubr.msk.bf16.mxu1 %vm380_vm1, %v358_v20 }
  0x30   : > { %v359_v25 = vpack.c.bf16 %v343_v24, %v342_v23 }
  0x32   : > { %753 = vmatmul.mubr.msk.bf16.gmra.mrb[12].mxu0 %vm380_vm1, %v351_v22 }
  0x34   : > { %769 = vmatmul.mubr.msk.bf16.gmra.mrb[12].mxu1 %vm380_vm1, %v359_v25 }
  0xed   : > { %v742_v3 = vpop.f32.mrb[0].mxu0 }
  0xee   : > { %597 = vst.msk [vmem:[%s978_s8 + $0x10] sm:$0xff] %vm594_vm2, %v742_v3  ;;  %v467_v4 = vpop.f32.mrb[1].mxu0 }
  0xef   : > { %595 = vst.msk [vmem:[%s978_s8] sm:$0xff] %vm594_vm2, %v467_v4  ;;  %v743_v26 = vpop.f32.mrb[2].mxu0  ;;  %v758_v27 = vpop.f32.mrb[0].mxu1 }
  0xf0   : > { %598 = vst.msk [vmem:[%s978_s8 + $0x18] sm:$0xff] %vm594_vm2, %v743_v26  ;;  %v470_v28 = vpop.f32.mrb[3].mxu0  ;;  %613 = vst.msk [vmem:[%s978_s8 + $0x90] sm:$0xff] %vm594_vm2, %v758_v27  ;;  %v531_v29 = vpop.f32.mrb[1].mxu1 }
  0xf1   : > { %596 = vst.msk [vmem:[%s978_s8 + $0x8] sm:$0xff] %vm594_vm2, %v470_v28  ;;  %611 = vst.msk [vmem:[%s978_s8 + $0x80] sm:$0xff] %vm594_vm2, %v531_v29  ;;  %v759_v30 = vpop.f32.mrb[2].mxu1 }
  0xf2   : > { %614 = vst.msk [vmem:[%s978_s8 + $0x98] sm:$0xff] %vm594_vm2, %v759_v30  ;;  %v534_v31 = vpop.f32.mrb[3].mxu1 }
  0xf3   : > { %612 = vst.msk [vmem:[%s978_s8 + $0x88] sm:$0xff] %vm594_vm2, %v534_v31 }
  0xf5   : > { %v746_v32 = vpop.f32.mrb[4].mxu0 }
  0xf6   : > { %601 = vst.msk [vmem:[%s978_s8 + $0x30] sm:$0xff] %vm594_vm2, %v746_v32  ;;  %v483_v33 = vpop.f32.mrb[5].mxu0 }
  0xf7   : > { %599 = vst.msk [vmem:[%s978_s8 + $0x20] sm:$0xff] %vm594_vm2, %v483_v33  ;;  %v747_v34 = vpop.f32.mrb[6].mxu0  ;;  %v762_v35 = vpop.f32.mrb[4].mxu1 }
  0xf8   : > { %602 = vst.msk [vmem:[%s978_s8 + $0x38] sm:$0xff] %vm594_vm2, %v747_v34  ;;  %v486_v36 = vpop.f32.mrb[7].mxu0  ;;  %617 = vst.msk [vmem:[%s978_s8 + $0xb0] sm:$0xff] %vm594_vm2, %v762_v35  ;;  %v547_v37 = vpop.f32.mrb[5].mxu1 }
  0xf9   : > { %600 = vst.msk [vmem:[%s978_s8 + $0x28] sm:$0xff] %vm594_vm2, %v486_v36  ;;  %615 = vst.msk [vmem:[%s978_s8 + $0xa0] sm:$0xff] %vm594_vm2, %v547_v37  ;;  %v763_v38 = vpop.f32.mrb[6].mxu1 }
  0xfa   : > { %618 = vst.msk [vmem:[%s978_s8 + $0xb8] sm:$0xff] %vm594_vm2, %v763_v38  ;;  %v550_v39 = vpop.f32.mrb[7].mxu1 }
  0xfb   : > { %616 = vst.msk [vmem:[%s978_s8 + $0xa8] sm:$0xff] %vm594_vm2, %v550_v39 }
  0xfd   : > { %v750_v40 = vpop.f32.mrb[8].mxu0 }
  0xfe   : > { %605 = vst.msk [vmem:[%s978_s8 + $0x50] sm:$0xff] %vm594_vm2, %v750_v40  ;;  %v499_v41 = vpop.f32.mrb[9].mxu0 }
  0xff   : > { %603 = vst.msk [vmem:[%s978_s8 + $0x40] sm:$0xff] %vm594_vm2, %v499_v41  ;;  %v751_v42 = vpop.f32.mrb[10].mxu0  ;;  %v766_v43 = vpop.f32.mrb[8].mxu1 }
 0x100   : > { %606 = vst.msk [vmem:[%s978_s8 + $0x58] sm:$0xff] %vm594_vm2, %v751_v42  ;;  %v502_v44 = vpop.f32.mrb[11].mxu0  ;;  %621 = vst.msk [vmem:[%s978_s8 + $0xd0] sm:$0xff] %vm594_vm2, %v766_v43  ;;  %v563_v45 = vpop.f32.mrb[9].mxu1 }
 0x101   : > { %604 = vst.msk [vmem:[%s978_s8 + $0x48] sm:$0xff] %vm594_vm2, %v502_v44  ;;  %619 = vst.msk [vmem:[%s978_s8 + $0xc0] sm:$0xff] %vm594_vm2, %v563_v45  ;;  %v767_v46 = vpop.f32.mrb[10].mxu1 }
 0x102   : > { %622 = vst.msk [vmem:[%s978_s8 + $0xd8] sm:$0xff] %vm594_vm2, %v767_v46  ;;  %v566_v47 = vpop.f32.mrb[11].mxu1 }
 0x103   : > { %620 = vst.msk [vmem:[%s978_s8 + $0xc8] sm:$0xff] %vm594_vm2, %v566_v47 }
 0x105   : > { %v754_v48 = vpop.f32.mrb[12].mxu0 }
 0x106   : > { %609 = vst.msk [vmem:[%s978_s8 + $0x70] sm:$0xff] %vm594_vm2, %v754_v48  ;;  %v515_v49 = vpop.f32.mrb[13].mxu0 }
 0x107   : > { %607 = vst.msk [vmem:[%s978_s8 + $0x60] sm:$0xff] %vm594_vm2, %v515_v49  ;;  %v755_v50 = vpop.f32.mrb[14].mxu0  ;;  %v770_v51 = vpop.f32.mrb[12].mxu1 }
 0x108   : > { %610 = vst.msk [vmem:[%s978_s8 + $0x78] sm:$0xff] %vm594_vm2, %v755_v50  ;;  %v518_v52 = vpop.f32.mrb[15].mxu0  ;;  %625 = vst.msk [vmem:[%s978_s8 + $0xf0] sm:$0xff] %vm594_vm2, %v770_v51  ;;  %v579_v53 = vpop.f32.mrb[13].mxu1 }
 0x109   : > { %608 = vst.msk [vmem:[%s978_s8 + $0x68] sm:$0xff] %vm594_vm2, %v518_v52  ;;  %623 = vst.msk [vmem:[%s978_s8 + $0xe0] sm:$0xff] %vm594_vm2, %v579_v53  ;;  %v771_v54 = vpop.f32.mrb[14].mxu1 }
 0x10a   : > { %626 = vst.msk [vmem:[%s978_s8 + $0xf8] sm:$0xff] %vm594_vm2, %v771_v54  ;;  %v582_v55 = vpop.f32.mrb[15].mxu1 }
 0x10b   : > { %624 = vst.msk [vmem:[%s978_s8 + $0xe8] sm:$0xff] %vm594_vm2, %v582_v55 }
 0x10c PF: > { %s14_s15 = sadd.s32 1, %s797_s15  }
 0x10d   : > { %p11_p4 = scmp.ge.s32.totalorder %s14_s15, 4  }
 0x10f   :  { %13 = sbr.rel (!%p11_p4) target bundleno = 1 (0x1), region = 66 }

// kernel: _lambda_.21
= control target key start
LH: loop header
LB: loop body
LE: loop exit
PB: predicated region body
PF: predicated region fallthrough
CT: control target
= control target key end

     0   :  { %s508_s15 = smov 0   ;;  %s641_s0 = inlined_call_operand.vmem [shape: f32[512,24], index: 0, kind: input, shape index: {}]   ;;  %s642_s1 = inlined_call_operand.vmem [shape: f32[1,24], index: 1, kind: input, shape index: {}]   ;;  %s643_s2 = inlined_call_operand.vmem [shape: f32[1,24], index: 2, kind: input, shape index: {}]   ;;  %s644_s3 = inlined_call_operand.vmem [shape: f32[1,24], index: 3, kind: output, shape index: {0}]   ;;  %s645_s4 = inlined_call_operand.vmem [shape: f32[1,24], index: 4, kind: output, shape index: {1}]  }
   0x1 LB: > { %s514_s16 = sadd.s32 4294967295, %s480_s15   ;;  %p456_p0 = scmp.ge.s32.totalorder %s480_s15, 1  ;;  %s480_s15 = sphi %s508_s15, %s15_s15  }
   0x2   : > { %p156_p1 = scmp.lt.s32.totalorder %s480_s15, 3 }
   0x4   : > { %p157_p2 = pnand %p456_p0, %p156_p1 }
   0x5   : > { %s457_s17 = sshll.u32 (!%p157_p2), %s514_s16, 5  ;;  %p459_p4 = scmp.ne.s32.totalorder (!%p157_p2), %s514_s16, 0 }
   0x6   : > { %160 = sbr.rel (%p157_p2) target bundleno = 135 (0x87), region = 32  ;;  %p178_p3 = scmp.lt.s32.totalorder (!%p157_p2), %s457_s17, 63 }
   0xd   : > { %s647_s17 = smov (!%p178_p3, %s457_s17), 63  ;;  %186 = sbr.rel (%p459_p4) target bundleno = 20 (0x14), region = 36 }
   0xe   : > { %s458_s18 = sshll.u32 %s647_s17, 3  ;;  %vm187_vm0 = vcmask (!%p459_p4), 188416   ;;  %v482_v0 = vmov (!%p459_p4), 0.0  }
   0xf   : > { %s522_s21 = scalar_lea.vmem %s641_s0, %s458_s18  ;;  %188 = vst.msk [vmem:[#allocation2] sm:$0x1] (!%p459_p4), %vm187_vm0, %v482_v0  ;;  %189 = vst.msk [vmem:[#allocation3] sm:$0x1] (!%p459_p4), %vm187_vm0, %v482_v0 }
  0x14 PF: > { %v190_v1 = vld [vmem:[%s522_s21] sm:$0xff]  ;;  %v191_v2 = vld [vmem:[%s522_s21 + $0x8] sm:$0xff]  ;;  %v192_v3 = vld [vmem:[%s522_s21 + $0x10] sm:$0xff]  ;;  %vm223_vm1 = vcmask 195584   ;;  %vm294_vm2 = vcmask 188416   ;;  %p460_p5 = scmp.ne.s32.totalorder %s514_s16, 1 }
  0x15   : > { %v224_v4 = vsel %vm223_vm1, %v190_v1, 0.0  ;;  %v225_v5 = vsel %vm223_vm1, %v191_v2, 0.0  ;;  %v227_v6 = vsel %vm223_vm1, %v192_v3, 0.0  ;;  %v193_v7 = vld [vmem:[%s522_s21 + $0x18] sm:$0xff]  ;;  %v194_v10 = vld [vmem:[%s522_s21 + $0x20] sm:$0xff]  ;;  %v195_v13 = vld [vmem:[%s522_s21 + $0x28] sm:$0xff]  ;;  %v297_v28 = vmul.f32 %v190_v1, %v190_v1 }
  0x16   : > { %v226_v8 = vadd.f32 %v225_v5, %v224_v4  ;;  %v229_v9 = vsel %vm223_vm1, %v193_v7, 0.0  ;;  %v231_v12 = vsel %vm223_vm1, %v194_v10, 0.0  ;;  %v233_v15 = vsel %vm223_vm1, %v195_v13, 0.0  ;;  %v196_v16 = vld [vmem:[%s522_s21 + $0x30] sm:$0xff]  ;;  %v197_v19 = vld [vmem:[%s522_s21 + $0x38] sm:$0xff]  ;;  %v198_v22 = vld [vmem:[%s522_s21 + $0x40] sm:$0xff] }
  0x17   : > { %v235_v18 = vsel %vm223_vm1, %v196_v16, 0.0  ;;  %v237_v21 = vsel %vm223_vm1, %v197_v19, 0.0  ;;  %v239_v24 = vsel %vm223_vm1, %v198_v22, 0.0  ;;  %v199_v25 = vld [vmem:[%s522_s21 + $0x48] sm:$0xff]  ;;  %v298_v29 = vmul.f32 %v191_v2, %v191_v2  ;;  %v200_v31 = vld [vmem:[%s522_s21 + $0x50] sm:$0xff]  ;;  %v201_v33 = vld [vmem:[%s522_s21 + $0x58] sm:$0xff] }
  0x18   : > { %v228_v11 = vadd.f32 %v227_v6, %v226_v8  ;;  %v241_v27 = vsel %vm223_vm1, %v199_v25, 0.0  ;;  %v299_v30 = vmul.f32 %v192_v3, %v192_v3  ;;  %v243_v34 = vsel %vm223_vm1, %v200_v31, 0.0  ;;  %v202_v42 = vld [vmem:[%s522_s21 + $0x60] sm:$0xff]  ;;  %v203_v48 = vld [vmem:[%s522_s21 + $0x68] sm:$0xff]  ;;  %v204_v54 = vld [vmem:[%s522_s21 + $0x70] sm:$0xff] }
  0x19   : > { %v300_v35 = vmul.f32 %v193_v7, %v193_v7  ;;  %v245_v37 = vsel %vm223_vm1, %v201_v33, 0.0  ;;  %v301_v38 = vmul.f32 %v194_v10, %v194_v10  ;;  %v329_v39 = vsel %vm223_vm1, %v297_v28, 0.0  ;;  %v205_v60 = vld [vmem:[%s522_s21 + $0x78] sm:$0xff]  ;;  %v206_v2 = vld [vmem:[%s522_s21 + $0x80] sm:$0xff]  ;;  %v207_v8 = vld [vmem:[%s522_s21 + $0x88] sm:$0xff] }
  0x1a   : > { %v230_v14 = vadd.f32 %v229_v9, %v228_v11  ;;  %v330_v40 = vsel %vm223_vm1, %v298_v29, 0.0  ;;  %v332_v41 = vsel %vm223_vm1, %v299_v30, 0.0  ;;  %v247_v45 = vsel %vm223_vm1, %v202_v42, 0.0 }
  0x1b   : > { %v331_v44 = vadd.f32 %v330_v40, %v329_v39  ;;  %v302_v46 = vmul.f32 %v195_v13, %v195_v13  ;;  %v334_v47 = vsel %vm223_vm1, %v300_v35, 0.0  ;;  %v249_v51 = vsel %vm223_vm1, %v203_v48, 0.0 }
  0x1c   : > { %v232_v17 = vadd.f32 %v231_v12, %v230_v14  ;;  %v303_v52 = vmul.f32 %v196_v16, %v196_v16  ;;  %v336_v53 = vsel %vm223_vm1, %v301_v38, 0.0  ;;  %v251_v57 = vsel %vm223_vm1, %v204_v54, 0.0  ;;  %v208_v14 = vld [vmem:[%s522_s21 + $0x90] sm:$0xff] }
  0x1d   : > { %v333_v50 = vadd.f32 %v332_v41, %v331_v44  ;;  %v304_v58 = vmul.f32 %v197_v19, %v197_v19  ;;  %v338_v59 = vsel %vm223_vm1, %v302_v46, 0.0  ;;  %v253_v63 = vsel %vm223_vm1, %v205_v60, 0.0  ;;  %v212_v38 = vld [vmem:[%s522_s21 + $0xb0] sm:$0xff]  ;;  %v213_v44 = vld [vmem:[%s522_s21 + $0xb8] sm:$0xff] }
  0x1e   : > { %v234_v20 = vadd.f32 %v233_v15, %v232_v17  ;;  %v305_v0 = vmul.f32 %v198_v22, %v198_v22  ;;  %v340_v1 = vsel %vm223_vm1, %v303_v52, 0.0  ;;  %v255_v5 = vsel %vm223_vm1, %v206_v2, 0.0 }
  0x1f   : > { %v335_v56 = vadd.f32 %v334_v47, %v333_v50  ;;  %v306_v6 = vmul.f32 %v199_v25, %v199_v25  ;;  %v342_v7 = vsel %vm223_vm1, %v304_v58, 0.0  ;;  %v257_v11 = vsel %vm223_vm1, %v207_v8, 0.0  ;;  %v214_v50 = vld [vmem:[%s522_s21 + $0xc0] sm:$0xff] }
  0x20   : > { %v236_v23 = vadd.f32 %v235_v18, %v234_v20  ;;  %v307_v12 = vmul.f32 %v200_v31, %v200_v31  ;;  %v344_v13 = vsel %vm223_vm1, %v305_v0, 0.0  ;;  %v259_v17 = vsel %vm223_vm1, %v208_v14, 0.0  ;;  %v209_v20 = vld [vmem:[%s522_s21 + $0x98] sm:$0xff] }
  0x21   : > { %v337_v62 = vadd.f32 %v336_v53, %v335_v56  ;;  %v308_v18 = vmul.f32 %v201_v33, %v201_v33  ;;  %v346_v19 = vsel %vm223_vm1, %v306_v6, 0.0  ;;  %v310_v30 = vmul.f32 %v203_v48, %v203_v48  ;;  %v215_v56 = vld [vmem:[%s522_s21 + $0xc8] sm:$0xff] }
  0x22   : > { %v238_v26 = vadd.f32 %v237_v21, %v236_v23  ;;  %v261_v23 = vsel %vm223_vm1, %v209_v20, 0.0  ;;  %v348_v25 = vsel %vm223_vm1, %v307_v12, 0.0  ;;  %v267_v41 = vsel %vm223_vm1, %v212_v38, 0.0 }
  0x23   : > { %v339_v4 = vadd.f32 %v338_v59, %v337_v62  ;;  %v350_v31 = vsel %vm223_vm1, %v308_v18, 0.0  ;;  %v269_v47 = vsel %vm223_vm1, %v213_v44, 0.0  ;;  %v313_v48 = vmul.f32 %v206_v2, %v206_v2  ;;  %v216_v62 = vld [vmem:[%s522_s21 + $0xd0] sm:$0xff] }
  0x24   : > { %v240_v32 = vadd.f32 %v239_v24, %v238_v26  ;;  %v309_v24 = vmul.f32 %v202_v42, %v202_v42  ;;  %v210_v26 = vld [vmem:[%s522_s21 + $0xa0] sm:$0xff]  ;;  %v312_v42 = vmul.f32 %v205_v60, %v205_v60  ;;  %v271_v53 = vsel %vm223_vm1, %v214_v50, 0.0 }
  0x25   : > { %v341_v10 = vadd.f32 %v340_v1, %v339_v4  ;;  %v263_v29 = vsel %vm223_vm1, %v210_v26, 0.0  ;;  %v273_v59 = vsel %vm223_vm1, %v215_v56, 0.0  ;;  %v315_v60 = vmul.f32 %v208_v14, %v208_v14  ;;  %v217_v4 = vld [vmem:[%s522_s21 + $0xd8] sm:$0xff] }
  0x26   : > { %v242_v36 = vadd.f32 %v241_v27, %v240_v32  ;;  %v211_v32 = vld [vmem:[%s522_s21 + $0xa8] sm:$0xff]  ;;  %v275_v1 = vsel %vm223_vm1, %v216_v62, 0.0  ;;  %v316_v2 = vmul.f32 %v209_v20, %v209_v20  ;;  %v319_v20 = vmul.f32 %v212_v38, %v212_v38 }
  0x27   : > { %v343_v16 = vadd.f32 %v342_v7, %v341_v10  ;;  %v265_v35 = vsel %vm223_vm1, %v211_v32, 0.0  ;;  %v277_v7 = vsel %vm223_vm1, %v217_v4, 0.0  ;;  %v218_v10 = vld [vmem:[%s522_s21 + $0xe0] sm:$0xff]  ;;  %v318_v14 = vmul.f32 %v211_v32, %v211_v32 }
  0x28   : > { %v244_v43 = vadd.f32 %v243_v34, %v242_v36  ;;  %v311_v36 = vmul.f32 %v204_v54, %v204_v54  ;;  %v314_v54 = vmul.f32 %v207_v8, %v207_v8  ;;  %v317_v8 = vmul.f32 %v210_v26, %v210_v26 }
  0x29   : > { %v345_v22 = vadd.f32 %v344_v13, %v343_v16  ;;  %v279_v13 = vsel %vm223_vm1, %v218_v10, 0.0  ;;  %v219_v16 = vld [vmem:[%s522_s21 + $0xe8] sm:$0xff]  ;;  %v320_v26 = vmul.f32 %v213_v44, %v213_v44  ;;  %v321_v32 = vmul.f32 %v214_v50, %v214_v50 }
  0x2a   : > { %v246_v49 = vadd.f32 %v245_v37, %v244_v43  ;;  %v352_v37 = vsel %vm223_vm1, %v309_v24, 0.0  ;;  %v354_v43 = vsel %vm223_vm1, %v310_v30, 0.0  ;;  %v324_v44 = vmul.f32 %v217_v4, %v217_v4 }
  0x2b   : > { %v347_v28 = vadd.f32 %v346_v19, %v345_v22  ;;  %v281_v19 = vsel %vm223_vm1, %v219_v16, 0.0  ;;  %v220_v22 = vld [vmem:[%s522_s21 + $0xf0] sm:$0xff] }
  0x2c   : > { %v248_v55 = vadd.f32 %v247_v45, %v246_v49  ;;  %v356_v49 = vsel %vm223_vm1, %v311_v36, 0.0  ;;  %v322_v36 = vmul.f32 %v215_v56, %v215_v56  ;;  %v327_v56 = vmul.f32 %v220_v22, %v220_v22 }
  0x2d   : > { %v349_v34 = vadd.f32 %v348_v25, %v347_v28  ;;  %v283_v25 = vsel %vm223_vm1, %v220_v22, 0.0  ;;  %v221_v28 = vld [vmem:[%s522_s21 + $0xf8] sm:$0xff]  ;;  %v410_v22 = vld [vmem:[%s642_s1] sm:$0x1] (!%p460_p5) }
  0x2e   : > { %v250_v61 = vadd.f32 %v249_v51, %v248_v55  ;;  %v358_v55 = vsel %vm223_vm1, %v312_v42, 0.0 }
  0x2f   : > { %v351_v40 = vadd.f32 %v350_v31, %v349_v34  ;;  %v285_v31 = vsel %vm223_vm1, %v221_v28, 0.0 }
  0x30   : > { %v252_v3 = vadd.f32 %v251_v57, %v250_v61  ;;  %v360_v61 = vsel %vm223_vm1, %v313_v48, 0.0  ;;  %v325_v48 = vmul.f32 %v218_v10, %v218_v10 }
  0x31   : > { %v353_v46 = vadd.f32 %v352_v37, %v351_v40  ;;  %v374_v37 = vsel %vm223_vm1, %v320_v26, 0.0  ;;  %v323_v40 = vmul.f32 %v216_v62, %v216_v62 }
  0x32   : > { %v254_v9 = vadd.f32 %v253_v63, %v252_v3  ;;  %v362_v3 = vsel %vm223_vm1, %v314_v54, 0.0 }
  0x33   : > { %v355_v52 = vadd.f32 %v354_v43, %v353_v46 }
  0x34   : > { %v256_v15 = vadd.f32 %v255_v5, %v254_v9  ;;  %v364_v9 = vsel %vm223_vm1, %v315_v60, 0.0  ;;  %v222_v60 = vld [vmem:[#allocation2] sm:$0x1] }
  0x35   : > { %v357_v58 = vadd.f32 %v356_v49, %v355_v52  ;;  %v380_v49 = vsel %vm223_vm1, %v323_v40, 0.0  ;;  %v326_v52 = vmul.f32 %v219_v16, %v219_v16 }
  0x36   : > { %v258_v21 = vadd.f32 %v257_v11, %v256_v15  ;;  %v366_v15 = vsel %vm223_vm1, %v316_v2, 0.0 }
  0x37   : > { %v359_v0 = vadd.f32 %v358_v55, %v357_v58  ;;  %v386_v62 = vsel %vm223_vm1, %v326_v52, 0.0 }
  0x38   : > { %v260_v27 = vadd.f32 %v259_v17, %v258_v21  ;;  %v368_v21 = vsel %vm223_vm1, %v317_v8, 0.0 }
  0x39   : > { %v361_v6 = vadd.f32 %v360_v61, %v359_v0  ;;  %v328_v61 = vmul.f32 %v221_v28, %v221_v28 }
  0x3a   : > { %v262_v33 = vadd.f32 %v261_v23, %v260_v27  ;;  %v370_v27 = vsel %vm223_vm1, %v318_v14, 0.0 }
  0x3b   : > { %v363_v12 = vadd.f32 %v362_v3, %v361_v6  ;;  %v390_v4 = vsel %vm223_vm1, %v328_v61, 0.0 }
  0x3c   : > { %v264_v39 = vadd.f32 %v263_v29, %v262_v33  ;;  %v372_v33 = vsel %vm223_vm1, %v319_v20, 0.0 }
  0x3d   : > { %v365_v18 = vadd.f32 %v364_v9, %v363_v12  ;;  %v296_v12 = vld [vmem:[#allocation3] sm:$0x1] }
  0x3e   : > { %v266_v45 = vadd.f32 %v265_v35, %v264_v39 }
  0x3f   : > { %v367_v24 = vadd.f32 %v366_v15, %v365_v18 }
  0x40   : > { %v268_v51 = vadd.f32 %v267_v41, %v266_v45  ;;  %v376_v41 = vsel %vm223_vm1, %v321_v32, 0.0  ;;  %v378_v45 = vsel %vm223_vm1, %v322_v36, 0.0 }
  0x41   : > { %v369_v30 = vadd.f32 %v368_v21, %v367_v24 }
  0x42   : > { %v270_v57 = vadd.f32 %v269_v47, %v268_v51 }
  0x43   : > { %v371_v35 = vadd.f32 %v370_v27, %v369_v30 }
  0x44   : > { %v272_v63 = vadd.f32 %v271_v53, %v270_v57  ;;  %v382_v53 = vsel %vm223_vm1, %v324_v44, 0.0  ;;  %v384_v57 = vsel %vm223_vm1, %v325_v48, 0.0 }
  0x45   : > { %v373_v39 = vadd.f32 %v372_v33, %v371_v35 }
  0x46   : > { %v274_v5 = vadd.f32 %v273_v59, %v272_v63 }
  0x47   : > { %v375_v43 = vadd.f32 %v374_v37, %v373_v39 }
  0x48   : > { %v276_v11 = vadd.f32 %v275_v1, %v274_v5  ;;  %v388_v1 = vsel %vm223_vm1, %v327_v56, 0.0 }
  0x49   : > { %v377_v47 = vadd.f32 %v376_v41, %v375_v43 }
  0x4a   : > { %v278_v17 = vadd.f32 %v277_v7, %v276_v11 }
  0x4b   : > { %v379_v51 = vadd.f32 %v378_v45, %v377_v47 }
  0x4c   : > { %v280_v23 = vadd.f32 %v279_v13, %v278_v17 }
  0x4d   : > { %v381_v55 = vadd.f32 %v380_v49, %v379_v51 }
  0x4e   : > { %v282_v29 = vadd.f32 %v281_v19, %v280_v23 }
  0x4f   : > { %v383_v59 = vadd.f32 %v382_v53, %v381_v55 }
  0x50   : > { %v284_v34 = vadd.f32 %v283_v25, %v282_v29  ;;  %v415_v25 = vld [vmem:[%s643_s2] sm:$0x1] (!%p460_p5) }
  0x51   : > { %v385_v0 = vadd.f32 %v384_v57, %v383_v59 }
  0x52   : > { %v286_v38 = vadd.f32 %v285_v31, %v284_v34 }
  0x53   : > { %v387_v3 = vadd.f32 %v386_v62, %v385_v0 }
  0x54   : > { %v287_v42 = vrot.slane %v286_v38, 4 }
  0x55   : > { %v389_v5 = vadd.f32 %v388_v1, %v387_v3 }
  0x56   : > { %v288_v46 = vadd.f32 %v287_v42, %v286_v38 }
  0x57   : > { %v391_v6 = vadd.f32 %v390_v4, %v389_v5 }
  0x58   : > { %v289_v50 = vrot.slane %v288_v46, 2 }
  0x59   : > { %v392_v7 = vrot.slane %v391_v6, 4 }
  0x5a   : > { %v290_v54 = vadd.f32 %v289_v50, %v288_v46 }
  0x5b   : > { %v393_v8 = vadd.f32 %v392_v7, %v391_v6 }
  0x5c   : > { %v291_v58 = vrot.slane %v290_v54, 1 }
  0x5d   : > { %v394_v9 = vrot.slane %v393_v8, 2 }
  0x5e   : > { %v292_v63 = vadd.f32 %v291_v58, %v290_v54 }
  0x5f   : > { %v395_v10 = vadd.f32 %v394_v9, %v393_v8 }
  0x60   : > { %v293_v2 = vadd.f32 %v292_v63, %v222_v60 }
  0x61   : > { %v396_v11 = vrot.slane %v395_v10, 1  ;;  %403 = sbr.rel (%p460_p5) target bundleno = 135 (0x87), region = 40 }
  0x62   : > { %295 = vst.msk [vmem:[#allocation2] sm:$0x1] %vm294_vm2, %v293_v2 }
  0x63   : > { %v397_v13 = vadd.f32 %v396_v11, %v395_v10 }
  0x65   : > { %v398_v14 = vadd.f32 %v397_v13, %v296_v12 }
  0x67   : > { %399 = vst.msk [vmem:[#allocation3] sm:$0x1] %vm294_vm2, %v398_v14 }
  0x69   : > { %v404_v15 = vld [vmem:[#allocation2] sm:$0x1] }
  0x6a   : > { %v405_v17 = vmul.f32 0.001953125, %v404_v15 }
  0x6c   : > { %v408_v19 = vmul.f32 %v405_v17, %v405_v17 }
  0x6e   : > { %v406_v16 = vld [vmem:[#allocation3] sm:$0x1] }
  0x6f   : > { %v407_v18 = vmul.f32 0.001953125, %v406_v16 }
  0x71   : > { %v409_v20 = vsub.f32 %v407_v18, %v408_v19 }
  0x73   : > { %v411_v21 = vadd.f32 1e-05, %v409_v20 }
  0x75   : > { %472 = vrsqrt.f32 %v411_v21 }
  0x7f   : > { %v473_v23 = vpop.eup %472 }
  0x80   : > { %v413_v24 = vmul.f32 %v473_v23, %v410_v22 }
  0x82   : > { %414 = vst.msk [vmem:[%s644_s3] sm:$0x1] %vm294_vm2, %v413_v24  ;;  %v416_v26 = vmul.f32 %v413_v24, %v405_v17 }
  0x84   : > { %v417_v27 = vsub.f32 %v415_v25, %v416_v26 }
  0x86   : > { %418 = vst.msk [vmem:[%s645_s4] sm:$0x1] %vm294_vm2, %v417_v27 }
  0x87 PF: > { %s15_s15 = sadd.s32 1, %s480_s15  }
  0x88   : > { %p12_p6 = scmp.ge.s32.totalorder %s15_s15, 4  }
  0x8a   :  { %14 = sbr.rel (!%p12_p6) target bundleno = 1 (0x1), region = 74 }

// kernel: _lambda_.22
= control target key start
LH: loop header
LB: loop body
LE: loop exit
PB: predicated region body
PF: predicated region fallthrough
CT: control target
= control target key end

     0   :  { %s789_s15 = smov 0   ;;  %s1006_s0 = inlined_call_operand.vmem [shape: f32[512,4], index: 0, kind: input, shape index: {}]   ;;  %s1007_s1 = inlined_call_operand.vmem [shape: bf16[4,24], index: 1, kind: input, shape index: {}]   ;;  %s1008_s2 = inlined_call_operand.vmem [shape: f32[1,4], index: 2, kind: input, shape index: {}]   ;;  %s1009_s3 = inlined_call_operand.vmem [shape: f32[1,4], index: 3, kind: input, shape index: {}]   ;;  %s1010_s4 = inlined_call_operand.vmem [shape: f32[512,24], index: 4, kind: output, shape index: {}]  }
   0x1 LB: > { %s664_s16 = sadd.s32 4294967295, %s762_s15   ;;  %p668_p0 = scmp.ge.s32.totalorder %s762_s15, 1  ;;  %s762_s15 = sphi %s789_s15, %s14_s15  }
   0x2   : > { %p163_p1 = scmp.lt.s32.totalorder %s762_s15, 3 }
   0x4   : > { %p164_p2 = pnand %p668_p0, %p163_p1 }
   0x5   : > { %v360_v0 = vld [vmem:[%s1007_s1] sm:$0x3] (!%p164_p2)  ;;  %vm410_vm0 = vcmask (!%p164_p2), 1041408   ;;  %s669_s19 = sshll.u32 (!%p164_p2), %s664_s16, 5  ;;  %vm361_vm1 = vcmask (!%p164_p2), 31744   ;;  %vm575_vm2 = vcmask (!%p164_p2), 195584  }
   0x6   : > { %167 = sbr.rel (%p164_p2) target bundleno = 268 (0x10c), region = 36  ;;  %746 = vmatprep.subr.msk.bf16.mxu0 (!%p164_p2), %vm410_vm0, %v360_v0  ;;  %747 = vmatprep.subr.msk.bf16.mxu1 (!%p164_p2), %vm410_vm0, %v360_v0  ;;  %v412_v1 = vsel (!%p164_p2), %vm410_vm0, %v360_v0, 0  ;;  %p190_p3 = scmp.lt.s32.totalorder (!%p164_p2), %s669_s19, 63  ;;  %v806_v2 = vld [vmem:[%s1008_s2] ss:$0 sm:$0xff] (!%p164_p2) }
   0x7   : > { %711 = vmatpush3.bf16.msra.mxu0 (!%p164_p2), %v412_v1  ;;  %745 = vmatpush3.bf16.msra.mxu1 (!%p164_p2), %v412_v1  ;;  %v818_v3 = vld [vmem:[%s1009_s3] ss:$0 sm:$0xff] (!%p164_p2) }
   0xd   : > { %s1012_s19 = smov (!%p190_p3, %s669_s19), 63 }
   0xe   : > { %s670_s20 = sshll.u32 %s1012_s19, 3 }
   0xf   : > { %s813_s25 = scalar_lea.vmem %s1006_s0, %s670_s20  ;;  %s937_s30 = scalar_lea.vmem %s1010_s4, %s670_s20 }
  0x10   : > { %v202_v4 = vld [vmem:[%s813_s25] sm:$0xff]  ;;  %v203_v5 = vld [vmem:[%s813_s25 + $0x8] sm:$0xff]  ;;  %v204_v11 = vld [vmem:[%s813_s25 + $0x10] sm:$0xff] }
  0x11   : > { %v218_v6 = vld [vmem:[%s813_s25 + $0x80] sm:$0xff]  ;;  %v241_v7 = vmul.f32 %v806_v2, %v202_v4  ;;  %v242_v8 = vmul.f32 %v806_v2, %v203_v5  ;;  %v219_v9 = vld [vmem:[%s813_s25 + $0x88] sm:$0xff]  ;;  %v205_v12 = vld [vmem:[%s813_s25 + $0x18] sm:$0xff]  ;;  %v243_v14 = vmul.f32 %v806_v2, %v204_v11 }
  0x12   : > { %v257_v10 = vmul.f32 %v806_v2, %v218_v6  ;;  %v258_v13 = vmul.f32 %v806_v2, %v219_v9  ;;  %v244_v15 = vmul.f32 %v806_v2, %v205_v12  ;;  %v220_v16 = vld [vmem:[%s813_s25 + $0x90] sm:$0xff]  ;;  %v221_v17 = vld [vmem:[%s813_s25 + $0x98] sm:$0xff]  ;;  %v206_v26 = vld [vmem:[%s813_s25 + $0x20] sm:$0xff] }
  0x13   : > { %v280_v18 = vadd.f32 %v818_v3, %v241_v7  ;;  %v281_v19 = vadd.f32 %v818_v3, %v242_v8  ;;  %v259_v21 = vmul.f32 %v806_v2, %v220_v16  ;;  %v282_v23 = vadd.f32 %v818_v3, %v243_v14  ;;  %v207_v27 = vld [vmem:[%s813_s25 + $0x28] sm:$0xff]  ;;  %v222_v32 = vld [vmem:[%s813_s25 + $0xa0] sm:$0xff]  ;;  %v208_v38 = vld [vmem:[%s813_s25 + $0x30] sm:$0xff] }
  0x14   : > { %v296_v20 = vadd.f32 %v818_v3, %v257_v10  ;;  %v297_v22 = vadd.f32 %v818_v3, %v258_v13  ;;  %v283_v24 = vadd.f32 %v818_v3, %v244_v15  ;;  %v260_v25 = vmul.f32 %v806_v2, %v221_v17  ;;  %v223_v37 = vld [vmem:[%s813_s25 + $0xa8] sm:$0xff]  ;;  %v209_v43 = vld [vmem:[%s813_s25 + $0x38] sm:$0xff]  ;;  %v224_v52 = vld [vmem:[%s813_s25 + $0xb0] sm:$0xff] }
  0x15   : > { %v312_v28 = vmax.f32 %v280_v18, 0.0  ;;  %v313_v29 = vmax.f32 %v281_v19, 0.0  ;;  %v298_v31 = vadd.f32 %v818_v3, %v259_v21  ;;  %v314_v34 = vmax.f32 %v282_v23, 0.0  ;;  %v225_v53 = vld [vmem:[%s813_s25 + $0xb8] sm:$0xff]  ;;  %v210_v57 = vld [vmem:[%s813_s25 + $0x40] sm:$0xff]  ;;  %v211_v62 = vld [vmem:[%s813_s25 + $0x48] sm:$0xff] }
  0x16   : > { %v328_v30 = vmax.f32 %v296_v20, 0.0  ;;  %v329_v33 = vmax.f32 %v297_v22, 0.0  ;;  %v315_v35 = vmax.f32 %v283_v24, 0.0  ;;  %v299_v36 = vadd.f32 %v818_v3, %v260_v25  ;;  %v226_v5 = vld [vmem:[%s813_s25 + $0xc0] sm:$0xff]  ;;  %v227_v6 = vld [vmem:[%s813_s25 + $0xc8] sm:$0xff]  ;;  %v212_v15 = vld [vmem:[%s813_s25 + $0x50] sm:$0xff] }
  0x17   : > { %v344_v39 = vpack.c.bf16 %v313_v29, %v312_v28  ;;  %v330_v40 = vmax.f32 %v298_v31, 0.0  ;;  %v245_v41 = vmul.f32 %v806_v2, %v206_v26  ;;  %v246_v42 = vmul.f32 %v806_v2, %v207_v27  ;;  %v213_v20 = vld [vmem:[%s813_s25 + $0x58] sm:$0xff]  ;;  %v228_v21 = vld [vmem:[%s813_s25 + $0xd0] sm:$0xff]  ;;  %v214_v31 = vld [vmem:[%s813_s25 + $0x60] sm:$0xff] }
  0x18   : > { %v352_v44 = vpack.c.bf16 %v329_v33, %v328_v30  ;;  %v345_v45 = vpack.c.bf16 %v315_v35, %v314_v34  ;;  %v331_v46 = vmax.f32 %v299_v36, 0.0  ;;  %v261_v47 = vmul.f32 %v806_v2, %v222_v32  ;;  %v229_v26 = vld [vmem:[%s813_s25 + $0xd8] sm:$0xff]  ;;  %v215_v36 = vld [vmem:[%s813_s25 + $0x68] sm:$0xff] }
  0x19   : > { %712 = vmatprep.mubr.msk.bf16.mxu0 %vm361_vm1, %v344_v39  ;;  %v284_v48 = vadd.f32 %v818_v3, %v245_v41  ;;  %v285_v49 = vadd.f32 %v818_v3, %v246_v42  ;;  %v262_v50 = vmul.f32 %v806_v2, %v223_v37  ;;  %v247_v51 = vmul.f32 %v806_v2, %v208_v38  ;;  %v230_v41 = vld [vmem:[%s813_s25 + $0xe0] sm:$0xff] }
  0x1a   : > { %728 = vmatprep.mubr.msk.bf16.mxu1 %vm361_vm1, %v352_v44  ;;  %713 = vmatmul.mubr.msk.bf16.vlgmr.msra.gmra.mrb[0].mxu0 %vm361_vm1, %v345_v45  ;;  %v353_v54 = vpack.c.bf16 %v331_v46, %v330_v40  ;;  %v300_v55 = vadd.f32 %v818_v3, %v261_v47  ;;  %v248_v56 = vmul.f32 %v806_v2, %v209_v43  ;;  %v231_v46 = vld [vmem:[%s813_s25 + $0xe8] sm:$0xff]  ;;  %v216_v47 = vld [vmem:[%s813_s25 + $0x70] sm:$0xff] }
  0x1b   : > { %v316_v58 = vmax.f32 %v284_v48, 0.0  ;;  %v317_v59 = vmax.f32 %v285_v49, 0.0  ;;  %v301_v60 = vadd.f32 %v818_v3, %v262_v50  ;;  %v286_v61 = vadd.f32 %v818_v3, %v247_v51 }
  0x1c   : > { %729 = vmatmul.mubr.msk.bf16.vlgmr.msra.gmra.mrb[0].mxu1 %vm361_vm1, %v353_v54  ;;  %v332_v63 = vmax.f32 %v300_v55, 0.0  ;;  %v287_v0 = vadd.f32 %v818_v3, %v248_v56  ;;  %v263_v1 = vmul.f32 %v806_v2, %v224_v52  ;;  %v264_v4 = vmul.f32 %v806_v2, %v225_v53  ;;  %v217_v52 = vld [vmem:[%s813_s25 + $0x78] sm:$0xff] }
  0x1d   : > { %v346_v7 = vpack.c.bf16 %v317_v59, %v316_v58  ;;  %v333_v8 = vmax.f32 %v301_v60, 0.0  ;;  %v318_v9 = vmax.f32 %v286_v61, 0.0  ;;  %v249_v10 = vmul.f32 %v806_v2, %v210_v57  ;;  %v232_v61 = vld [vmem:[%s813_s25 + $0xf0] sm:$0xff] }
  0x1e   : > { %v319_v11 = vmax.f32 %v287_v0, 0.0  ;;  %v302_v12 = vadd.f32 %v818_v3, %v263_v1  ;;  %v303_v13 = vadd.f32 %v818_v3, %v264_v4  ;;  %v250_v14 = vmul.f32 %v806_v2, %v211_v62  ;;  %v233_v62 = vld [vmem:[%s813_s25 + $0xf8] sm:$0xff] }
  0x1f   : > { %716 = vmatprep.mubr.msk.bf16.mxu0 %vm361_vm1, %v346_v7  ;;  %v354_v16 = vpack.c.bf16 %v333_v8, %v332_v63  ;;  %v288_v17 = vadd.f32 %v818_v3, %v249_v10  ;;  %v265_v18 = vmul.f32 %v806_v2, %v226_v5  ;;  %v266_v19 = vmul.f32 %v806_v2, %v227_v6 }
  0x20   : > { %v347_v22 = vpack.c.bf16 %v319_v11, %v318_v9  ;;  %v334_v23 = vmax.f32 %v302_v12, 0.0  ;;  %v335_v24 = vmax.f32 %v303_v13, 0.0  ;;  %v289_v25 = vadd.f32 %v818_v3, %v250_v14 }
  0x21   : > { %732 = vmatprep.mubr.msk.bf16.mxu1 %vm361_vm1, %v354_v16  ;;  %v320_v27 = vmax.f32 %v288_v17, 0.0  ;;  %v304_v28 = vadd.f32 %v818_v3, %v265_v18  ;;  %v305_v29 = vadd.f32 %v818_v3, %v266_v19  ;;  %v251_v30 = vmul.f32 %v806_v2, %v212_v15 }
  0x22   : > { %717 = vmatmul.mubr.msk.bf16.gmra.mrb[4].mxu0 %vm361_vm1, %v347_v22  ;;  %v355_v32 = vpack.c.bf16 %v335_v24, %v334_v23  ;;  %v321_v33 = vmax.f32 %v289_v25, 0.0  ;;  %v252_v34 = vmul.f32 %v806_v2, %v213_v20  ;;  %v267_v35 = vmul.f32 %v806_v2, %v228_v21 }
  0x23   : > { %v336_v37 = vmax.f32 %v304_v28, 0.0  ;;  %v337_v38 = vmax.f32 %v305_v29, 0.0  ;;  %v290_v39 = vadd.f32 %v818_v3, %v251_v30  ;;  %v268_v40 = vmul.f32 %v806_v2, %v229_v26 }
  0x24   : > { %733 = vmatmul.mubr.msk.bf16.gmra.mrb[4].mxu1 %vm361_vm1, %v355_v32  ;;  %v348_v42 = vpack.c.bf16 %v321_v33, %v320_v27  ;;  %v291_v43 = vadd.f32 %v818_v3, %v252_v34  ;;  %v306_v44 = vadd.f32 %v818_v3, %v267_v35  ;;  %v253_v45 = vmul.f32 %v806_v2, %v214_v31 }
  0x25   : > { %v356_v48 = vpack.c.bf16 %v337_v38, %v336_v37  ;;  %v322_v49 = vmax.f32 %v290_v39, 0.0  ;;  %v307_v50 = vadd.f32 %v818_v3, %v268_v40  ;;  %v254_v51 = vmul.f32 %v806_v2, %v215_v36 }
  0x26   : > { %720 = vmatprep.mubr.msk.bf16.mxu0 %vm361_vm1, %v348_v42  ;;  %v323_v53 = vmax.f32 %v291_v43, 0.0  ;;  %v338_v54 = vmax.f32 %v306_v44, 0.0  ;;  %v292_v55 = vadd.f32 %v818_v3, %v253_v45  ;;  %v269_v56 = vmul.f32 %v806_v2, %v230_v41 }
  0x27   : > { %736 = vmatprep.mubr.msk.bf16.mxu1 %vm361_vm1, %v356_v48  ;;  %v339_v57 = vmax.f32 %v307_v50, 0.0  ;;  %v293_v58 = vadd.f32 %v818_v3, %v254_v51  ;;  %v270_v59 = vmul.f32 %v806_v2, %v231_v46  ;;  %v255_v60 = vmul.f32 %v806_v2, %v216_v47 }
  0x28   : > { %v349_v63 = vpack.c.bf16 %v323_v53, %v322_v49  ;;  %v324_v0 = vmax.f32 %v292_v55, 0.0  ;;  %v308_v1 = vadd.f32 %v818_v3, %v269_v56  ;;  %v256_v4 = vmul.f32 %v806_v2, %v217_v52 }
  0x29   : > { %v357_v5 = vpack.c.bf16 %v339_v57, %v338_v54  ;;  %v325_v6 = vmax.f32 %v293_v58, 0.0  ;;  %v309_v7 = vadd.f32 %v818_v3, %v270_v59  ;;  %v294_v8 = vadd.f32 %v818_v3, %v255_v60 }
  0x2a   : > { %721 = vmatmul.mubr.msk.bf16.gmra.mrb[8].mxu0 %vm361_vm1, %v349_v63  ;;  %v340_v9 = vmax.f32 %v308_v1, 0.0  ;;  %v295_v10 = vadd.f32 %v818_v3, %v256_v4  ;;  %v271_v11 = vmul.f32 %v806_v2, %v232_v61  ;;  %v272_v12 = vmul.f32 %v806_v2, %v233_v62 }
  0x2b   : > { %v350_v13 = vpack.c.bf16 %v325_v6, %v324_v0  ;;  %v341_v14 = vmax.f32 %v309_v7, 0.0  ;;  %v326_v15 = vmax.f32 %v294_v8, 0.0 }
  0x2c   : > { %737 = vmatmul.mubr.msk.bf16.gmra.mrb[8].mxu1 %vm361_vm1, %v357_v5  ;;  %v327_v16 = vmax.f32 %v295_v10, 0.0  ;;  %v310_v17 = vadd.f32 %v818_v3, %v271_v11  ;;  %v311_v18 = vadd.f32 %v818_v3, %v272_v12 }
  0x2d   : > { %724 = vmatprep.mubr.msk.bf16.mxu0 %vm361_vm1, %v350_v13  ;;  %v358_v19 = vpack.c.bf16 %v341_v14, %v340_v9 }
  0x2e   : > { %v351_v20 = vpack.c.bf16 %v327_v16, %v326_v15  ;;  %v342_v21 = vmax.f32 %v310_v17, 0.0  ;;  %v343_v22 = vmax.f32 %v311_v18, 0.0 }
  0x2f   : > { %740 = vmatprep.mubr.msk.bf16.mxu1 %vm361_vm1, %v358_v19 }
  0x30   : > { %v359_v2 = vpack.c.bf16 %v343_v22, %v342_v21 }
  0x32   : > { %725 = vmatmul.mubr.msk.bf16.gmra.mrb[12].mxu0 %vm361_vm1, %v351_v20 }
  0x34   : > { %741 = vmatmul.mubr.msk.bf16.gmra.mrb[12].mxu1 %vm361_vm1, %v359_v2 }
  0xed   : > { %v714_v3 = vpop.f32.mrb[0].mxu0 }
  0xee   : > { %578 = vst.msk [vmem:[%s937_s30 + $0x10] sm:$0xff] %vm575_vm2, %v714_v3  ;;  %v448_v23 = vpop.f32.mrb[1].mxu0 }
  0xef   : > { %v730_v24 = vpop.f32.mrb[0].mxu1  ;;  %576 = vst.msk [vmem:[%s937_s30] sm:$0xff] %vm575_vm2, %v448_v23  ;;  %v715_v25 = vpop.f32.mrb[2].mxu0 }
  0xf0   : > { %594 = vst.msk [vmem:[%s937_s30 + $0x90] sm:$0xff] %vm575_vm2, %v730_v24  ;;  %v512_v26 = vpop.f32.mrb[1].mxu1  ;;  %579 = vst.msk [vmem:[%s937_s30 + $0x18] sm:$0xff] %vm575_vm2, %v715_v25  ;;  %v451_v27 = vpop.f32.mrb[3].mxu0 }
  0xf1   : > { %592 = vst.msk [vmem:[%s937_s30 + $0x80] sm:$0xff] %vm575_vm2, %v512_v26  ;;  %v731_v28 = vpop.f32.mrb[2].mxu1  ;;  %577 = vst.msk [vmem:[%s937_s30 + $0x8] sm:$0xff] %vm575_vm2, %v451_v27 }
  0xf2   : > { %595 = vst.msk [vmem:[%s937_s30 + $0x98] sm:$0xff] %vm575_vm2, %v731_v28  ;;  %v515_v29 = vpop.f32.mrb[3].mxu1 }
  0xf3   : > { %593 = vst.msk [vmem:[%s937_s30 + $0x88] sm:$0xff] %vm575_vm2, %v515_v29 }
  0xf5   : > { %v718_v30 = vpop.f32.mrb[4].mxu0 }
  0xf6   : > { %582 = vst.msk [vmem:[%s937_s30 + $0x30] sm:$0xff] %vm575_vm2, %v718_v30  ;;  %v464_v31 = vpop.f32.mrb[5].mxu0 }
  0xf7   : > { %v734_v32 = vpop.f32.mrb[4].mxu1  ;;  %580 = vst.msk [vmem:[%s937_s30 + $0x20] sm:$0xff] %vm575_vm2, %v464_v31  ;;  %v719_v33 = vpop.f32.mrb[6].mxu0 }
  0xf8   : > { %598 = vst.msk [vmem:[%s937_s30 + $0xb0] sm:$0xff] %vm575_vm2, %v734_v32  ;;  %v528_v34 = vpop.f32.mrb[5].mxu1  ;;  %583 = vst.msk [vmem:[%s937_s30 + $0x38] sm:$0xff] %vm575_vm2, %v719_v33  ;;  %v467_v35 = vpop.f32.mrb[7].mxu0 }
  0xf9   : > { %596 = vst.msk [vmem:[%s937_s30 + $0xa0] sm:$0xff] %vm575_vm2, %v528_v34  ;;  %v735_v36 = vpop.f32.mrb[6].mxu1  ;;  %581 = vst.msk [vmem:[%s937_s30 + $0x28] sm:$0xff] %vm575_vm2, %v467_v35 }
  0xfa   : > { %599 = vst.msk [vmem:[%s937_s30 + $0xb8] sm:$0xff] %vm575_vm2, %v735_v36  ;;  %v531_v37 = vpop.f32.mrb[7].mxu1 }
  0xfb   : > { %597 = vst.msk [vmem:[%s937_s30 + $0xa8] sm:$0xff] %vm575_vm2, %v531_v37 }
  0xfd   : > { %v722_v38 = vpop.f32.mrb[8].mxu0 }
  0xfe   : > { %586 = vst.msk [vmem:[%s937_s30 + $0x50] sm:$0xff] %vm575_vm2, %v722_v38  ;;  %v480_v39 = vpop.f32.mrb[9].mxu0 }
  0xff   : > { %v738_v40 = vpop.f32.mrb[8].mxu1  ;;  %584 = vst.msk [vmem:[%s937_s30 + $0x40] sm:$0xff] %vm575_vm2, %v480_v39  ;;  %v723_v41 = vpop.f32.mrb[10].mxu0 }
 0x100   : > { %602 = vst.msk [vmem:[%s937_s30 + $0xd0] sm:$0xff] %vm575_vm2, %v738_v40  ;;  %v544_v42 = vpop.f32.mrb[9].mxu1  ;;  %587 = vst.msk [vmem:[%s937_s30 + $0x58] sm:$0xff] %vm575_vm2, %v723_v41  ;;  %v483_v43 = vpop.f32.mrb[11].mxu0 }
 0x101   : > { %600 = vst.msk [vmem:[%s937_s30 + $0xc0] sm:$0xff] %vm575_vm2, %v544_v42  ;;  %v739_v44 = vpop.f32.mrb[10].mxu1  ;;  %585 = vst.msk [vmem:[%s937_s30 + $0x48] sm:$0xff] %vm575_vm2, %v483_v43 }
 0x102   : > { %603 = vst.msk [vmem:[%s937_s30 + $0xd8] sm:$0xff] %vm575_vm2, %v739_v44  ;;  %v547_v45 = vpop.f32.mrb[11].mxu1 }
 0x103   : > { %601 = vst.msk [vmem:[%s937_s30 + $0xc8] sm:$0xff] %vm575_vm2, %v547_v45 }
 0x105   : > { %v726_v46 = vpop.f32.mrb[12].mxu0 }
 0x106   : > { %590 = vst.msk [vmem:[%s937_s30 + $0x70] sm:$0xff] %vm575_vm2, %v726_v46  ;;  %v496_v47 = vpop.f32.mrb[13].mxu0 }
 0x107   : > { %v742_v48 = vpop.f32.mrb[12].mxu1  ;;  %588 = vst.msk [vmem:[%s937_s30 + $0x60] sm:$0xff] %vm575_vm2, %v496_v47  ;;  %v727_v49 = vpop.f32.mrb[14].mxu0 }
 0x108   : > { %606 = vst.msk [vmem:[%s937_s30 + $0xf0] sm:$0xff] %vm575_vm2, %v742_v48  ;;  %v560_v50 = vpop.f32.mrb[13].mxu1  ;;  %591 = vst.msk [vmem:[%s937_s30 + $0x78] sm:$0xff] %vm575_vm2, %v727_v49  ;;  %v499_v51 = vpop.f32.mrb[15].mxu0 }
 0x109   : > { %604 = vst.msk [vmem:[%s937_s30 + $0xe0] sm:$0xff] %vm575_vm2, %v560_v50  ;;  %v743_v52 = vpop.f32.mrb[14].mxu1  ;;  %589 = vst.msk [vmem:[%s937_s30 + $0x68] sm:$0xff] %vm575_vm2, %v499_v51 }
 0x10a   : > { %607 = vst.msk [vmem:[%s937_s30 + $0xf8] sm:$0xff] %vm575_vm2, %v743_v52  ;;  %v563_v53 = vpop.f32.mrb[15].mxu1 }
 0x10b   : > { %605 = vst.msk [vmem:[%s937_s30 + $0xe8] sm:$0xff] %vm575_vm2, %v563_v53 }
 0x10c PF: > { %s14_s15 = sadd.s32 1, %s762_s15  }
 0x10d   : > { %p11_p4 = scmp.ge.s32.totalorder %s14_s15, 4  }
 0x10f   :  { %13 = sbr.rel (!%p11_p4) target bundleno = 1 (0x1), region = 66 }

// kernel: _lambda_.23
= control target key start
LH: loop header
LB: loop body
LE: loop exit
PB: predicated region body
PF: predicated region fallthrough
CT: control target
= control target key end

     0   :  { %s1220_s18 = smov 0   ;;  %s1694_s0 = inlined_call_operand.vmem [shape: f32[512,216], index: 0, kind: input, shape index: {}]   ;;  %s1695_s1 = inlined_call_operand.vmem [shape: bf16[216,24], index: 1, kind: input, shape index: {}]   ;;  %s1696_s2 = inlined_call_operand.vmem [shape: f32[1,216], index: 2, kind: input, shape index: {}]   ;;  %s1697_s3 = inlined_call_operand.vmem [shape: f32[1,216], index: 3, kind: input, shape index: {}]   ;;  %s1698_s4 = inlined_call_operand.vmem [shape: f32[512,24], index: 4, kind: input, shape index: {}]   ;;  %s1699_s5 = inlined_call_operand.vmem [shape: f32[512,24], index: 5, kind: output, shape index: {}]  }
   0x1 LB: > { %s1085_s19 = sadd.s32 4294967295, %s1187_s18   ;;  %p1089_p0 = scmp.ge.s32.totalorder %s1187_s18, 1  ;;  %s1187_s18 = sphi %s1220_s18, %s15_s18  }
   0x2   : > { %p200_p1 = scmp.lt.s32.totalorder %s1187_s18, 3 }
   0x4   : > { %p201_p2 = pnand %p1089_p0, %p200_p1 }
   0x5   : > { %v1167_v0 = vld [vmem:[%s1695_s1] sm:$0xff] (!%p201_p2)   ;;  %v1189_v1 = vmov (!%p201_p2), 0   ;;  %v1168_v2 = vld [vmem:[%s1695_s1 + $0x8] sm:$0xff] (!%p201_p2)   ;;  %s1090_s24 = sshll.u32 (!%p201_p2), %s1085_s19, 5  ;;  %v320_v3 = vlaneseq (!%p201_p2)  ;;  %v1169_v4 = vld [vmem:[%s1695_s1 + $0x10] sm:$0xff] (!%p201_p2)   ;;  %vm674_vm0 = vcmask (!%p201_p2), 719872  }
   0x6   : > { %204 = sbr.rel (%p201_p2) target bundleno = 337 (0x151), region = 40  ;;  %727 = vmatprep.subr.bf16.mxu0 (!%p201_p2), %v1189_v1  ;;  %1130 = vmatprep.subr.bf16.mxu1 (!%p201_p2), %v1189_v1  ;;  %p235_p3 = scmp.lt.s32.totalorder (!%p201_p2), %s1090_s24, 63  ;;  %v1170_v6 = vld [vmem:[%s1695_s1 + $0x18] sm:$0xff] (!%p201_p2)   ;;  %v1171_v8 = vld [vmem:[%s1695_s1 + $0x20] sm:$0xff] (!%p201_p2)   ;;  %v1172_v21 = vld [vmem:[%s1695_s1 + $0x28] sm:$0xff] (!%p201_p2)   ;;  %vm723_vm1 = vcmask (!%p201_p2), 1043456  }
   0x7   : > { %728 = vmatpush1.bf16.msra.mxu0 (!%p201_p2), %v1167_v0  ;;  %1144 = vmatpush1.bf16.msra.mxu1 (!%p201_p2), %v1167_v0  ;;  %v1246_v5 = vshrl.u32 (!%p201_p2), %v320_v3, 7  ;;  %v318_v11 = vld [vmem:[%s1696_s2] sm:$0x3] (!%p201_p2)  ;;  %v1173_v29 = vld [vmem:[%s1695_s1 + $0x30] sm:$0xff] (!%p201_p2)   ;;  %v1174_v34 = vld [vmem:[%s1695_s1 + $0x38] sm:$0xff] (!%p201_p2)   ;;  %vm984_vm2 = vcmask (!%p201_p2), 195584  }
   0x8   : > { %729 = vmatprep.subr.bf16.mxu0 (!%p201_p2), %v1189_v1  ;;  %1131 = vmatprep.subr.bf16.mxu1 (!%p201_p2), %v1189_v1  ;;  %v394_v12 = vld [vmem:[%s1697_s3] sm:$0x3] (!%p201_p2)  ;;  %v1176_v48 = vld [vmem:[%s1695_s1 + $0x48] sm:$0xff] (!%p201_p2)  }
   0x9   : > { %v326_v7 = vsub.s32 (!%p201_p2), 1, %v1246_v5  ;;  %v322_v33 = vsub.s32 (!%p201_p2), 0, %v1246_v5  ;;  %v1175_v36 = vld [vmem:[%s1695_s1 + $0x40] sm:$0xff] (!%p201_p2)  }
   0xb   : > { %730 = vmatpush1.bf16.msra.mxu0 (!%p201_p2), %v1168_v2  ;;  %1145 = vmatpush1.bf16.msra.mxu1 (!%p201_p2), %v1168_v2  ;;  %v1272_v13 = vrot.slane (!%p201_p2), %v318_v11, %v326_v7  ;;  %v1276_v16 = vrot.slane (!%p201_p2), %v394_v12, %v326_v7  ;;  %v1304_v35 = vrot.slane (!%p201_p2), %v318_v11, %v322_v33  ;;  %v1177_v2 = vld [vmem:[%s1695_s1 + $0x50] sm:$0xff] (!%p201_p2)  }
   0xc   : > { %731 = vmatprep.subr.bf16.mxu0 (!%p201_p2), %v1189_v1  ;;  %1132 = vmatprep.subr.bf16.mxu1 (!%p201_p2), %v1189_v1  ;;  %v1316_v42 = vrot.slane (!%p201_p2), %v394_v12, %v322_v33 }
   0xd   : > { %s1701_s24 = smov (!%p235_p3, %s1090_s24), 63 }
   0xe   : > { %s1129_s27 = sshll.u32 %s1701_s24, 4 }
   0xf   : > { %732 = vmatpush1.bf16.msra.mxu0 %v1169_v4  ;;  %1146 = vmatpush1.bf16.msra.mxu1 %v1169_v4  ;;  %s1254_s7 = scalar_lea.vmem %s1694_s0, %s1129_s27 }
  0x10   : > { %733 = vmatprep.subr.bf16.mxu0 %v1189_v1  ;;  %1133 = vmatprep.subr.bf16.mxu1 %v1189_v1  ;;  %v255_v9 = vld [vmem:[%s1254_s7 + $0x8] sm:$0xff]  ;;  %v257_v10 = vld [vmem:[%s1254_s7 + $0x18] sm:$0xff]  ;;  %v254_v37 = vld [vmem:[%s1254_s7] sm:$0xff] }
  0x11   : > { %v287_v14 = vld [vmem:[%s1254_s7 + $0x108] sm:$0xff]  ;;  %v289_v15 = vld [vmem:[%s1254_s7 + $0x118] sm:$0xff]  ;;  %v331_v17 = vmul.f32 %v1272_v13, %v255_v9  ;;  %v333_v18 = vmul.f32 %v1272_v13, %v257_v10  ;;  %v256_v38 = vld [vmem:[%s1254_s7 + $0x10] sm:$0xff]  ;;  %v330_v43 = vmul.f32 %v1304_v35, %v254_v37 }
  0x12   : > { %v363_v19 = vmul.f32 %v1272_v13, %v287_v14  ;;  %v365_v20 = vmul.f32 %v1272_v13, %v289_v15  ;;  %v286_v39 = vld [vmem:[%s1254_s7 + $0x100] sm:$0xff]  ;;  %v288_v40 = vld [vmem:[%s1254_s7 + $0x110] sm:$0xff]  ;;  %v259_v41 = vld [vmem:[%s1254_s7 + $0x28] sm:$0xff]  ;;  %v332_v44 = vmul.f32 %v1304_v35, %v256_v38 }
  0x13   : > { %734 = vmatpush1.bf16.msra.mxu0 %v1170_v6  ;;  %1147 = vmatpush1.bf16.msra.mxu1 %v1170_v6  ;;  %v407_v22 = vadd.f32 %v1276_v16, %v331_v17  ;;  %v409_v23 = vadd.f32 %v1276_v16, %v333_v18  ;;  %v261_v45 = vld [vmem:[%s1254_s7 + $0x38] sm:$0xff]  ;;  %v291_v46 = vld [vmem:[%s1254_s7 + $0x128] sm:$0xff]  ;;  %v362_v49 = vmul.f32 %v1304_v35, %v286_v39  ;;  %v258_v50 = vld [vmem:[%s1254_s7 + $0x20] sm:$0xff] }
  0x14   : > { %735 = vmatprep.subr.bf16.mxu0 %v1189_v1  ;;  %1134 = vmatprep.subr.bf16.mxu1 %v1189_v1  ;;  %v439_v24 = vadd.f32 %v1276_v16, %v363_v19  ;;  %v441_v25 = vadd.f32 %v1276_v16, %v365_v20  ;;  %v293_v47 = vld [vmem:[%s1254_s7 + $0x138] sm:$0xff]  ;;  %v260_v51 = vld [vmem:[%s1254_s7 + $0x30] sm:$0xff]  ;;  %v364_v52 = vmul.f32 %v1304_v35, %v288_v40  ;;  %v290_v53 = vld [vmem:[%s1254_s7 + $0x120] sm:$0xff] }
  0x15   : > { %v471_v26 = vmax.f32 %v407_v22, 0.0  ;;  %v473_v27 = vmax.f32 %v409_v23, 0.0  ;;  %v292_v54 = vld [vmem:[%s1254_s7 + $0x130] sm:$0xff]  ;;  %v335_v55 = vmul.f32 %v1272_v13, %v259_v41  ;;  %v337_v56 = vmul.f32 %v1272_v13, %v261_v45  ;;  %v263_v59 = vld [vmem:[%s1254_s7 + $0x48] sm:$0xff]  ;;  %v265_v60 = vld [vmem:[%s1254_s7 + $0x58] sm:$0xff] }
  0x16   : > { %v503_v28 = vmax.f32 %v439_v24, 0.0  ;;  %v505_v30 = vmax.f32 %v441_v25, 0.0  ;;  %v367_v57 = vmul.f32 %v1272_v13, %v291_v46  ;;  %v369_v58 = vmul.f32 %v1272_v13, %v293_v47  ;;  %v295_v9 = vld [vmem:[%s1254_s7 + $0x148] sm:$0xff]  ;;  %v297_v15 = vld [vmem:[%s1254_s7 + $0x158] sm:$0xff]  ;;  %v294_v33 = vld [vmem:[%s1254_s7 + $0x140] sm:$0xff] }
  0x17   : > { %736 = vmatpush1.bf16.msra.mxu0 %v1171_v8  ;;  %1148 = vmatpush1.bf16.msra.mxu1 %v1171_v8  ;;  %v535_v31 = vpack.c.bf16 %v473_v27, %v471_v26  ;;  %v1341_v61 = vadd.f32 %v1316_v42, %v330_v43  ;;  %v1344_v62 = vadd.f32 %v1316_v42, %v332_v44  ;;  %v262_v26 = vld [vmem:[%s1254_s7 + $0x40] sm:$0xff]  ;;  %v264_v27 = vld [vmem:[%s1254_s7 + $0x50] sm:$0xff] }
  0x18   : > { %737 = vmatprep.subr.bf16.mxu0 %v1189_v1  ;;  %1135 = vmatprep.subr.bf16.mxu1 %v1189_v1  ;;  %v551_v32 = vpack.c.bf16 %v505_v30, %v503_v28  ;;  %v334_v63 = vmul.f32 %v1304_v35, %v258_v50  ;;  %v336_v0 = vmul.f32 %v1304_v35, %v260_v51  ;;  %v1180_v28 = vld [vmem:[%s1695_s1 + $0x68] ss:$0 sps:$4 sm:$0xff]   ;;  %v296_v44 = vld [vmem:[%s1254_s7 + $0x150] sm:$0xff]  ;;  %v1179_v45 = vld [vmem:[%s1695_s1 + $0x60] sm:$0xff]  }
  0x19   : > { %1111 = vmatprep.mubr.msk.bf16.mxu0 %vm674_vm0, %v535_v31  ;;  %v438_v3 = vadd.f32 %v1316_v42, %v362_v49  ;;  %v366_v4 = vmul.f32 %v1304_v35, %v290_v53  ;;  %v368_v5 = vmul.f32 %v1304_v35, %v292_v54  ;;  %v440_v6 = vadd.f32 %v1316_v42, %v364_v52  ;;  %v275_v54 = vld [vmem:[%s1254_s7 + $0xa8] sm:$0xff] }
  0x1a   : > { %1119 = vmatprep.mubr.msk.bf16.mxu1 %vm674_vm0, %v551_v32  ;;  %v339_v7 = vmul.f32 %v1272_v13, %v263_v59  ;;  %v341_v8 = vmul.f32 %v1272_v13, %v265_v60  ;;  %v411_v10 = vadd.f32 %v1276_v16, %v335_v55  ;;  %v413_v11 = vadd.f32 %v1276_v16, %v337_v56  ;;  %v267_v59 = vld [vmem:[%s1254_s7 + $0x68] sm:$0xff]  ;;  %v277_v60 = vld [vmem:[%s1254_s7 + $0xb8] sm:$0xff] }
  0x1b   : > { %738 = vmatpush1.bf16.msra.mxu0 %v1172_v21  ;;  %1149 = vmatpush1.bf16.msra.mxu1 %v1172_v21  ;;  %v443_v12 = vadd.f32 %v1276_v16, %v367_v57  ;;  %v445_v14 = vadd.f32 %v1276_v16, %v369_v58  ;;  %v470_v17 = vmax.f32 %v1341_v61, 0.0  ;;  %v472_v18 = vmax.f32 %v1344_v62, 0.0  ;;  %v1178_v21 = vld [vmem:[%s1695_s1 + $0x58] sm:$0xff]  }
  0x1c   : > { %739 = vmatprep.subr.bf16.mxu0 %v1189_v1  ;;  %1136 = vmatprep.subr.bf16.mxu1 %v1189_v1  ;;  %v410_v19 = vadd.f32 %v1316_v42, %v334_v63  ;;  %v412_v20 = vadd.f32 %v1316_v42, %v336_v0  ;;  %v502_v22 = vmax.f32 %v438_v3, 0.0  ;;  %v442_v23 = vadd.f32 %v1316_v42, %v366_v4  ;;  %v307_v3 = vld [vmem:[%s1254_s7 + $0x1a8] sm:$0xff] }
  0x1d   : > { %v444_v24 = vadd.f32 %v1316_v42, %v368_v5  ;;  %v371_v25 = vmul.f32 %v1272_v13, %v295_v9  ;;  %v415_v30 = vadd.f32 %v1276_v16, %v339_v7  ;;  %v417_v31 = vadd.f32 %v1276_v16, %v341_v8  ;;  %v309_v8 = vld [vmem:[%s1254_s7 + $0x1b8] sm:$0xff] }
  0x1e   : > { %v373_v32 = vmul.f32 %v1272_v13, %v297_v15  ;;  %v507_v37 = vmax.f32 %v443_v12, 0.0  ;;  %v509_v38 = vmax.f32 %v445_v14, 0.0  ;;  %v474_v39 = vmax.f32 %v410_v19, 0.0  ;;  %v299_v12 = vld [vmem:[%s1254_s7 + $0x168] sm:$0xff] }
  0x1f   : > { %740 = vmatpush1.bf16.msra.mxu0 %v1173_v29  ;;  %1150 = vmatpush1.bf16.msra.mxu1 %v1173_v29  ;;  %v504_v29 = vmax.f32 %v440_v6, 0.0  ;;  %v476_v40 = vmax.f32 %v412_v20, 0.0  ;;  %v338_v41 = vmul.f32 %v1304_v35, %v262_v26  ;;  %v340_v43 = vmul.f32 %v1304_v35, %v264_v27 }
  0x20   : > { %741 = vmatprep.subr.bf16.mxu0 %v1189_v1  ;;  %1137 = vmatprep.subr.bf16.mxu1 %v1189_v1  ;;  %v506_v46 = vmax.f32 %v442_v23, 0.0  ;;  %v508_v47 = vmax.f32 %v444_v24, 0.0  ;;  %v370_v49 = vmul.f32 %v1304_v35, %v294_v33  ;;  %v725_v50 = vsel %vm723_vm1, %v1180_v28, 0  ;;  %v279_v28 = vld [vmem:[%s1254_s7 + $0xc8] sm:$0xff] }
  0x21   : > { %v479_v51 = vmax.f32 %v415_v30, 0.0  ;;  %v481_v52 = vmax.f32 %v417_v31, 0.0  ;;  %v449_v53 = vadd.f32 %v1276_v16, %v373_v32  ;;  %v534_v55 = vpack.c.bf16 %v472_v18, %v470_v17  ;;  %v266_v31 = vld [vmem:[%s1254_s7 + $0x60] sm:$0xff] }
  0x22   : > { %v550_v56 = vpack.c.bf16 %v504_v29, %v502_v22  ;;  %v372_v58 = vmul.f32 %v1304_v35, %v296_v44  ;;  %v553_v61 = vpack.c.bf16 %v509_v38, %v507_v37  ;;  %v1402_v62 = vpack.c.bf16 %v476_v40, %v474_v39  ;;  %v311_v40 = vld [vmem:[%s1254_s7 + $0x1c8] sm:$0xff] }
  0x23   : > { %742 = vmatpush1.bf16.msra.mxu0 %v1174_v34  ;;  %1151 = vmatpush1.bf16.msra.mxu1 %v1174_v34  ;;  %v475_v34 = vmax.f32 %v411_v10, 0.0  ;;  %v414_v63 = vadd.f32 %v1316_v42, %v338_v41  ;;  %v416_v0 = vadd.f32 %v1316_v42, %v340_v43  ;;  %v1408_v4 = vpack.c.bf16 %v508_v47, %v506_v46  ;;  %v313_v46 = vld [vmem:[%s1254_s7 + $0x1d8] sm:$0xff] }
  0x24   : > { %743 = vmatprep.subr.bf16.mxu0 %v1189_v1  ;;  %1138 = vmatprep.subr.bf16.mxu1 %v1189_v1  ;;  %v446_v6 = vadd.f32 %v1316_v42, %v370_v49  ;;  %v351_v7 = vmul.f32 %v1272_v13, %v275_v54  ;;  %v1415_v9 = vpack.c.bf16 %v481_v52, %v479_v51  ;;  %v513_v10 = vmax.f32 %v449_v53, 0.0 }
  0x25   : > { %v353_v14 = vmul.f32 %v1272_v13, %v277_v60  ;;  %v448_v15 = vadd.f32 %v1316_v42, %v372_v58  ;;  %v383_v19 = vmul.f32 %v1272_v13, %v307_v3  ;;  %v478_v20 = vmax.f32 %v414_v63, 0.0  ;;  %v300_v58 = vld [vmem:[%s1254_s7 + $0x170] sm:$0xff] }
  0x26   : > { %v427_v18 = vadd.f32 %v1276_v16, %v351_v7  ;;  %v385_v23 = vmul.f32 %v1272_v13, %v309_v8  ;;  %v510_v24 = vmax.f32 %v446_v6, 0.0  ;;  %v342_v49 = vmul.f32 %v1304_v35, %v266_v31  ;;  %v283_v6 = vld [vmem:[%s1254_s7 + $0xe8] sm:$0xff] }
  0x27   : > { %744 = vmatpush1.bf16.msra.mxu0 %v1175_v36  ;;  %1152 = vmatpush1.bf16.msra.mxu1 %v1175_v36  ;;  %v477_v36 = vmax.f32 %v413_v11, 0.0  ;;  %v343_v11 = vmul.f32 %v1272_v13, %v267_v59  ;;  %v429_v22 = vadd.f32 %v1276_v16, %v353_v14  ;;  %v459_v27 = vadd.f32 %v1276_v16, %v383_v19  ;;  %v271_v59 = vld [vmem:[%s1254_s7 + $0x88] sm:$0xff] }
  0x28   : > { %745 = vmatprep.subr.bf16.mxu0 %v1189_v1  ;;  %1139 = vmatprep.subr.bf16.mxu1 %v1189_v1  ;;  %v491_v26 = vmax.f32 %v427_v18, 0.0  ;;  %v461_v33 = vadd.f32 %v1276_v16, %v385_v23  ;;  %v387_v54 = vmul.f32 %v1272_v13, %v311_v40  ;;  %v1474_v8 = vadd.f32 %v1316_v42, %v342_v49 }
  0x29   : > { %v537_v57 = vpack.c.bf16 %v477_v36, %v475_v34  ;;  %v1433_v30 = vadd.f32 %v1276_v16, %v343_v11  ;;  %v493_v32 = vmax.f32 %v429_v22, 0.0  ;;  %v281_v34 = vld [vmem:[%s1254_s7 + $0xd8] sm:$0xff]  ;;  %v512_v36 = vmax.f32 %v448_v15, 0.0 }
  0x2a   : > { %v523_v39 = vmax.f32 %v459_v27, 0.0  ;;  %v525_v44 = vmax.f32 %v461_v33, 0.0  ;;  %v305_v11 = vld [vmem:[%s1254_s7 + $0x198] sm:$0xff]  ;;  %v376_v18 = vmul.f32 %v1304_v35, %v300_v58  ;;  %v347_v19 = vmul.f32 %v1272_v13, %v271_v59 }
  0x2b   : > { %746 = vmatpush1.bf16.msra.mxu0 %v1176_v48  ;;  %1153 = vmatpush1.bf16.msra.mxu1 %v1176_v48  ;;  %v447_v48 = vadd.f32 %v1276_v16, %v371_v25  ;;  %v375_v25 = vmul.f32 %v1272_v13, %v299_v12  ;;  %v1445_v43 = vpack.c.bf16 %v493_v32, %v491_v26  ;;  %v483_v51 = vmax.f32 %v1433_v30, 0.0  ;;  %v285_v15 = vld [vmem:[%s1254_s7 + $0xf8] sm:$0xff] }
  0x2c   : > { %747 = vmatprep.subr.bf16.mxu0 %v1189_v1  ;;  %1140 = vmatprep.subr.bf16.mxu1 %v1189_v1  ;;  %v1456_v52 = vpack.c.bf16 %v525_v44, %v523_v39  ;;  %v361_v30 = vmul.f32 %v1272_v13, %v285_v15  ;;  %v423_v44 = vadd.f32 %v1276_v16, %v347_v19  ;;  %v482_v58 = vmax.f32 %v1474_v8, 0.0  ;;  %v306_v19 = vld [vmem:[%s1254_s7 + $0x1a0] sm:$0xff] }
  0x2d   : > { %v511_v5 = vmax.f32 %v447_v48, 0.0  ;;  %v451_v47 = vadd.f32 %v1276_v16, %v375_v25  ;;  %v268_v48 = vld [vmem:[%s1254_s7 + $0x70] sm:$0xff]  ;;  %v317_v25 = vld [vmem:[%s1254_s7 + $0x1f8] sm:$0xff] }
  0x2f   : > { %748 = vmatpush1.bf16.msra.mxu0 %v1177_v2  ;;  %1154 = vmatpush1.bf16.msra.mxu1 %v1177_v2  ;;  %v269_v2 = vld [vmem:[%s1254_s7 + $0x78] sm:$0xff]  ;;  %v1430_v29 = vpack.c.bf16 %v513_v10, %v511_v5  ;;  %v463_v5 = vadd.f32 %v1276_v16, %v387_v54  ;;  %v515_v7 = vmax.f32 %v451_v47, 0.0  ;;  %v303_v10 = vld [vmem:[%s1254_s7 + $0x188] sm:$0xff]  ;;  %v304_v47 = vld [vmem:[%s1254_s7 + $0x190] sm:$0xff] }
  0x30   : > { %749 = vmatprep.subr.bf16.mxu0 %v1189_v1  ;;  %1141 = vmatprep.subr.bf16.mxu1 %v1189_v1  ;;  %v345_v17 = vmul.f32 %v1272_v13, %v269_v2  ;;  %v273_v2 = vld [vmem:[%s1254_s7 + $0x98] sm:$0xff]  ;;  %v379_v27 = vmul.f32 %v1272_v13, %v303_v10 }
  0x32   : > { %v1439_v37 = vadd.f32 %v1276_v16, %v345_v17 }
  0x33   : > { %750 = vmatpush1.bf16.msra.mxu0 %v1178_v21  ;;  %1155 = vmatpush1.bf16.msra.mxu1 %v1178_v21  ;;  %v301_v21 = vld [vmem:[%s1254_s7 + $0x178] sm:$0xff] }
  0x34   : > { %751 = vmatprep.subr.bf16.mxu0 %v1189_v1  ;;  %1142 = vmatprep.subr.bf16.mxu1 %v1189_v1  ;;  %v377_v38 = vmul.f32 %v1272_v13, %v301_v21  ;;  %v349_v21 = vmul.f32 %v1272_v13, %v273_v2 }
  0x36   : > { %v453_v63 = vadd.f32 %v1276_v16, %v377_v38 }
  0x37   : > { %752 = vmatpush1.bf16.msra.mxu0 %v1179_v45  ;;  %1156 = vmatpush1.bf16.msra.mxu1 %v1179_v45  ;;  %v355_v45 = vmul.f32 %v1272_v13, %v279_v28  ;;  %v381_v28 = vmul.f32 %v1272_v13, %v305_v11 }
  0x38   : > { %753 = vmatprep.subr.bf16.mxu0 %v1189_v1  ;;  %1143 = vmatprep.subr.bf16.mxu1 %v1189_v1  ;;  %v480_v1 = vmax.f32 %v416_v0, 0.0  ;;  %v344_v0 = vmul.f32 %v1304_v35, %v268_v48  ;;  %v517_v26 = vmax.f32 %v453_v63, 0.0 }
  0x39   : > { %v431_v53 = vadd.f32 %v1276_v16, %v355_v45  ;;  %v272_v45 = vld [vmem:[%s1254_s7 + $0x90] sm:$0xff] }
  0x3a   : > { %v1443_v41 = vpack.c.bf16 %v480_v1, %v478_v20  ;;  %v527_v20 = vmax.f32 %v463_v5, 0.0  ;;  %v315_v1 = vld [vmem:[%s1254_s7 + $0x1e8] sm:$0xff]  ;;  %v420_v33 = vadd.f32 %v1316_v42, %v344_v0  ;;  %v557_v40 = vpack.c.bf16 %v517_v26, %v515_v7 }
  0x3b   : > { %754 = vmatpush1.bf16.msra.mxu0 %v725_v50  ;;  %1157 = vmatpush1.bf16.msra.mxu1 %v725_v50  ;;  %v357_v50 = vmul.f32 %v1272_v13, %v281_v34  ;;  %v495_v3 = vmax.f32 %v431_v53, 0.0  ;;  %v437_v34 = vadd.f32 %v1276_v16, %v361_v30  ;;  %v348_v59 = vmul.f32 %v1304_v35, %v272_v45 }
  0x3c   : > { %v484_v63 = vmax.f32 %v420_v33, 0.0 }
  0x3d   : > { %v433_v60 = vadd.f32 %v1276_v16, %v357_v50  ;;  %v501_v48 = vmax.f32 %v437_v34, 0.0  ;;  %v425_v50 = vadd.f32 %v1276_v16, %v349_v21 }
  0x3e   : > { %760 = vmatmul.mubr.bf16.vlgmr.msra.gmra.mrb[0].mxu0 %v534_v55  ;;  %824 = vmatmul.mubr.bf16.vlgmr.msra.gmra.mrb[0].mxu1 %v550_v56  ;;  %v1460_v55 = vpack.c.bf16 %v512_v36, %v510_v24  ;;  %v485_v56 = vmax.f32 %v1439_v37, 0.0  ;;  %v359_v24 = vmul.f32 %v1272_v13, %v283_v6  ;;  %v393_v36 = vmul.f32 %v1272_v13, %v317_v25 }
  0x3f   : > { %1112 = vmatprep.mubr.msk.bf16.mxu0 %vm674_vm0, %v537_v57  ;;  %1120 = vmatprep.mubr.msk.bf16.mxu1 %vm674_vm0, %v553_v61  ;;  %v298_v57 = vld [vmem:[%s1254_s7 + $0x160] sm:$0xff]  ;;  %v389_v61 = vmul.f32 %v1272_v13, %v313_v46  ;;  %v497_v12 = vmax.f32 %v433_v60, 0.0  ;;  %v452_v37 = vadd.f32 %v1316_v42, %v376_v18  ;;  %v489_v5 = vmax.f32 %v425_v50, 0.0  ;;  %v276_v18 = vld [vmem:[%s1254_s7 + $0xb0] sm:$0xff] }
  0x40   : > { %v374_v17 = vmul.f32 %v1304_v35, %v298_v57  ;;  %v541_v32 = vpack.c.bf16 %v485_v56, %v483_v51  ;;  %v302_v46 = vld [vmem:[%s1254_s7 + $0x180] sm:$0xff]  ;;  %v469_v49 = vadd.f32 %v1276_v16, %v393_v36  ;;  %v457_v51 = vadd.f32 %v1276_v16, %v381_v28 }
  0x41   : > { %v465_v14 = vadd.f32 %v1276_v16, %v389_v61  ;;  %v1485_v22 = vpack.c.bf16 %v497_v12, %v495_v3  ;;  %v378_v60 = vmul.f32 %v1304_v35, %v302_v46  ;;  %v380_v61 = vmul.f32 %v1304_v35, %v304_v47 }
  0x42   : > { %v533_v57 = vmax.f32 %v469_v49, 0.0  ;;  %v516_v0 = vmax.f32 %v452_v37, 0.0  ;;  %v487_v3 = vmax.f32 %v423_v44, 0.0  ;;  %v521_v7 = vmax.f32 %v457_v51, 0.0  ;;  %v310_v37 = vld [vmem:[%s1254_s7 + $0x1c0] sm:$0xff] }
  0x43   : > { %v529_v23 = vmax.f32 %v465_v14, 0.0  ;;  %v454_v8 = vadd.f32 %v1316_v42, %v378_v60  ;;  %v456_v10 = vadd.f32 %v1316_v42, %v380_v61  ;;  %v540_v11 = vpack.c.bf16 %v484_v63, %v482_v58  ;;  %v274_v14 = vld [vmem:[%s1254_s7 + $0xa0] sm:$0xff]  ;;  %v284_v58 = vld [vmem:[%s1254_s7 + $0xf0] sm:$0xff] }
  0x44   : > { %v543_v15 = vpack.c.bf16 %v489_v5, %v487_v3  ;;  %v350_v25 = vmul.f32 %v1304_v35, %v274_v14  ;;  %v352_v26 = vmul.f32 %v1304_v35, %v276_v18  ;;  %v316_v60 = vld [vmem:[%s1254_s7 + $0x1f0] sm:$0xff] }
  0x45   : > { %v1498_v31 = vpack.c.bf16 %v529_v23, %v527_v20  ;;  %v308_v20 = vld [vmem:[%s1254_s7 + $0x1b0] sm:$0xff]  ;;  %v518_v23 = vmax.f32 %v454_v8, 0.0  ;;  %v392_v5 = vmul.f32 %v1304_v35, %v316_v60 }
  0x46   : > { %768 = vmatmul.mubr.bf16.gmra.mrb[4].mxu0 %v1402_v62  ;;  %832 = vmatmul.mubr.bf16.gmra.mrb[4].mxu1 %v1408_v4  ;;  %v435_v62 = vadd.f32 %v1276_v16, %v359_v24  ;;  %v391_v4 = vmul.f32 %v1272_v13, %v315_v1  ;;  %v455_v13 = vadd.f32 %v1276_v16, %v379_v27  ;;  %v520_v24 = vmax.f32 %v456_v10, 0.0 }
  0x47   : > { %1113 = vmatprep.mubr.msk.bf16.mxu0 %vm674_vm0, %v1415_v9  ;;  %1121 = vmatprep.mubr.msk.bf16.mxu1 %vm674_vm0, %v1430_v29  ;;  %v450_v9 = vadd.f32 %v1316_v42, %v374_v17  ;;  %v270_v29 = vld [vmem:[%s1254_s7 + $0x80] sm:$0xff]  ;;  %v382_v27 = vmul.f32 %v1304_v35, %v306_v19  ;;  %v384_v28 = vmul.f32 %v1304_v35, %v308_v20 }
  0x48   : > { %v499_v38 = vmax.f32 %v435_v62, 0.0  ;;  %v467_v39 = vadd.f32 %v1276_v16, %v391_v4  ;;  %v346_v54 = vmul.f32 %v1304_v35, %v270_v29  ;;  %v519_v6 = vmax.f32 %v455_v13, 0.0  ;;  %v278_v4 = vld [vmem:[%s1254_s7 + $0xc0] sm:$0xff]  ;;  %v312_v29 = vld [vmem:[%s1254_s7 + $0x1d0] sm:$0xff] }
  0x49   : > { %v514_v16 = vmax.f32 %v450_v9, 0.0  ;;  %v558_v62 = vpack.c.bf16 %v520_v24, %v518_v23  ;;  %v428_v33 = vadd.f32 %v1316_v42, %v352_v26  ;;  %v458_v34 = vadd.f32 %v1316_v42, %v382_v27  ;;  %v280_v9 = vld [vmem:[%s1254_s7 + $0xd0] sm:$0xff] }
  0x4a   : > { %v531_v53 = vmax.f32 %v467_v39, 0.0  ;;  %v1518_v56 = vpack.c.bf16 %v501_v48, %v499_v38  ;;  %v559_v17 = vpack.c.bf16 %v521_v7, %v519_v6  ;;  %v460_v36 = vadd.f32 %v1316_v42, %v384_v28 }
  0x4b   : > { %v556_v12 = vpack.c.bf16 %v516_v0, %v514_v16  ;;  %v354_v38 = vmul.f32 %v1304_v35, %v278_v4  ;;  %v356_v39 = vmul.f32 %v1304_v35, %v280_v9  ;;  %v388_v44 = vmul.f32 %v1304_v35, %v312_v29 }
  0x4c   : > { %v1526_v2 = vpack.c.bf16 %v533_v57, %v531_v53  ;;  %v492_v46 = vmax.f32 %v428_v33, 0.0  ;;  %v522_v47 = vmax.f32 %v458_v34, 0.0  ;;  %v524_v48 = vmax.f32 %v460_v36, 0.0  ;;  %v282_v57 = vld [vmem:[%s1254_s7 + $0xe0] sm:$0xff] }
  0x4d   : > { %v430_v49 = vadd.f32 %v1316_v42, %v354_v38  ;;  %v432_v50 = vadd.f32 %v1316_v42, %v356_v39  ;;  %v464_v51 = vadd.f32 %v1316_v42, %v388_v44  ;;  %v360_v0 = vmul.f32 %v1304_v35, %v284_v58 }
  0x4e   : > { %776 = vmatmul.mubr.bf16.gmra.mrb[8].mxu0 %v1443_v41  ;;  %840 = vmatmul.mubr.bf16.gmra.mrb[8].mxu1 %v1460_v55  ;;  %v422_v41 = vadd.f32 %v1316_v42, %v346_v54  ;;  %v424_v55 = vadd.f32 %v1316_v42, %v348_v59  ;;  %v560_v54 = vpack.c.bf16 %v524_v48, %v522_v47  ;;  %v314_v59 = vld [vmem:[%s1254_s7 + $0x1e0] sm:$0xff]  ;;  %s1094_s7 = sshll.u32 %s1701_s24, 3 }
  0x4f   : > { %1114 = vmatprep.mubr.msk.bf16.mxu0 %vm674_vm0, %v541_v32  ;;  %1122 = vmatprep.mubr.msk.bf16.mxu1 %vm674_vm0, %v557_v40  ;;  %v426_v32 = vadd.f32 %v1316_v42, %v350_v25  ;;  %v386_v40 = vmul.f32 %v1304_v35, %v310_v37  ;;  %v494_v61 = vmax.f32 %v430_v49, 0.0  ;;  %v496_v63 = vmax.f32 %v432_v50, 0.0  ;;  %s1588_s12 = scalar_lea.vmem %s1698_s4, %s1094_s7  ;;  %s1595_s24 = scalar_lea.vmem %s1699_s5, %s1094_s7 }
  0x50   : > { %v486_v1 = vmax.f32 %v422_v41, 0.0  ;;  %v488_v21 = vmax.f32 %v424_v55, 0.0  ;;  %v528_v16 = vmax.f32 %v464_v51, 0.0  ;;  %v390_v3 = vmul.f32 %v1304_v35, %v314_v59  ;;  %v937_v24 = vld [vmem:[%s1588_s12 + $0x88] sm:$0xff]  ;;  %v922_v34 = vld [vmem:[%s1588_s12 + $0x10] sm:$0xff]  ;;  %v923_v44 = vld [vmem:[%s1588_s12 + $0x18] sm:$0xff] }
  0x51   : > { %v490_v45 = vmax.f32 %v426_v32, 0.0  ;;  %v462_v13 = vadd.f32 %v1316_v42, %v386_v40  ;;  %v546_v6 = vpack.c.bf16 %v496_v63, %v494_v61  ;;  %v436_v55 = vadd.f32 %v1316_v42, %v360_v0  ;;  %v938_v9 = vld [vmem:[%s1588_s12 + $0x90] sm:$0xff]  ;;  %v924_v58 = vld [vmem:[%s1588_s12 + $0x20] sm:$0xff]  ;;  %v925_v0 = vld [vmem:[%s1588_s12 + $0x28] sm:$0xff] }
  0x52   : > { %v542_v30 = vpack.c.bf16 %v488_v21, %v486_v1  ;;  %v466_v8 = vadd.f32 %v1316_v42, %v390_v3  ;;  %v468_v10 = vadd.f32 %v1316_v42, %v392_v5  ;;  %v921_v21 = vld [vmem:[%s1588_s12 + $0x8] sm:$0xff]  ;;  %v940_v60 = vld [vmem:[%s1588_s12 + $0xa0] sm:$0xff] }
  0x53   : > { %v544_v53 = vpack.c.bf16 %v492_v46, %v490_v45  ;;  %v939_v46 = vld [vmem:[%s1588_s12 + $0x98] sm:$0xff]  ;;  %v941_v5 = vld [vmem:[%s1588_s12 + $0xa8] sm:$0xff] }
  0x56   : > { %784 = vmatmul.mubr.bf16.gmra.mrb[12].mxu0 %v540_v11  ;;  %848 = vmatmul.mubr.bf16.gmra.mrb[12].mxu1 %v556_v12  ;;  %v500_v11 = vmax.f32 %v436_v55, 0.0  ;;  %v530_v12 = vmax.f32 %v466_v8, 0.0 }
  0x57   : > { %1115 = vmatprep.mubr.msk.bf16.mxu0 %vm674_vm0, %v543_v15  ;;  %1123 = vmatprep.mubr.msk.bf16.mxu1 %vm674_vm0, %v559_v17  ;;  %v920_v15 = vld [vmem:[%s1588_s12] sm:$0xff] }
  0x58   : > { %v936_v17 = vld [vmem:[%s1588_s12 + $0x80] sm:$0xff] }
  0x5e   : > { %792 = vmatmul.mubr.bf16.gmra.mrb[16].mxu0 %v542_v30  ;;  %856 = vmatmul.mubr.bf16.gmra.mrb[16].mxu1 %v558_v62 }
  0x5f   : > { %1116 = vmatprep.mubr.msk.bf16.mxu0 %vm674_vm0, %v1445_v43  ;;  %1124 = vmatprep.mubr.msk.bf16.mxu1 %vm674_vm0, %v1456_v52  ;;  %v526_v43 = vmax.f32 %v462_v13, 0.0  ;;  %v358_v52 = vmul.f32 %v1304_v35, %v282_v57 }
  0x61   : > { %v562_v7 = vpack.c.bf16 %v528_v16, %v526_v43  ;;  %v434_v41 = vadd.f32 %v1316_v42, %v358_v52 }
  0x63   : > { %v498_v35 = vmax.f32 %v434_v41, 0.0 }
  0x66   : > { %800 = vmatmul.mubr.bf16.gmra.mrb[20].mxu0 %v544_v53  ;;  %864 = vmatmul.mubr.bf16.gmra.mrb[20].mxu1 %v560_v54 }
  0x67   : > { %1117 = vmatprep.mubr.msk.bf16.mxu0 %vm674_vm0, %v1485_v22  ;;  %1125 = vmatprep.mubr.msk.bf16.mxu1 %vm674_vm0, %v1498_v31  ;;  %v532_v22 = vmax.f32 %v468_v10, 0.0  ;;  %v548_v31 = vpack.c.bf16 %v500_v11, %v498_v35 }
  0x69   : > { %v564_v14 = vpack.c.bf16 %v532_v22, %v530_v12  ;;  %v926_v22 = vld [vmem:[%s1588_s12 + $0x30] sm:$0xff] }
  0x6e   : > { %808 = vmatmul.mubr.bf16.gmra.mrb[24].mxu0 %v546_v6  ;;  %872 = vmatmul.mubr.bf16.gmra.mrb[24].mxu1 %v562_v7 }
  0x6f   : > { %1118 = vmatprep.mubr.msk.bf16.mxu0 %vm674_vm0, %v1518_v56  ;;  %1126 = vmatprep.mubr.msk.bf16.mxu1 %vm674_vm0, %v1526_v2 }
  0x76   : > { %816 = vmatmul.mubr.bf16.gmra.mrb[28].mxu0 %v548_v31  ;;  %880 = vmatmul.mubr.bf16.gmra.mrb[28].mxu1 %v564_v14  ;;  %v942_v14 = vld [vmem:[%s1588_s12 + $0xb0] sm:$0xff] }
 0x111   : > { %v761_v42 = vpop.f32.mrb[0].mxu0  ;;  %v825_v56 = vpop.f32.mrb[0].mxu1 }
 0x112   : > { %v888_v18 = vmul.f32 0.2, %v761_v42  ;;  %v904_v2 = vmul.f32 0.2, %v825_v56  ;;  %v763_v19 = vpop.f32.mrb[1].mxu0  ;;  %v827_v20 = vpop.f32.mrb[1].mxu1 }
 0x113   : > { %v764_v1 = vpop.f32.mrb[2].mxu0  ;;  %v828_v23 = vpop.f32.mrb[2].mxu1  ;;  %v943_v20 = vld [vmem:[%s1588_s12 + $0xb8] sm:$0xff] }
 0x114   : > { %v952_v25 = vadd.f32 %v920_v15, %v888_v18  ;;  %v968_v26 = vadd.f32 %v936_v17, %v904_v2  ;;  %v889_v27 = vmul.f32 0.2, %v764_v1  ;;  %v905_v28 = vmul.f32 0.2, %v828_v23  ;;  %v766_v30 = vpop.f32.mrb[3].mxu0  ;;  %v830_v62 = vpop.f32.mrb[3].mxu1 }
 0x115   : > { %v927_v2 = vld [vmem:[%s1588_s12 + $0x38] sm:$0xff]  ;;  %v928_v62 = vld [vmem:[%s1588_s12 + $0x40] sm:$0xff] }
 0x116   : > { %985 = vst.msk [vmem:[%s1595_s24] sm:$0xff] %vm984_vm2, %v952_v25  ;;  %1001 = vst.msk [vmem:[%s1595_s24 + $0x80] sm:$0xff] %vm984_vm2, %v968_v26  ;;  %v953_v4 = vadd.f32 %v921_v21, %v889_v27  ;;  %v969_v32 = vadd.f32 %v937_v24, %v905_v28 }
 0x118   : > { %986 = vst.msk [vmem:[%s1595_s24 + $0x8] sm:$0xff] %vm984_vm2, %v953_v4  ;;  %1002 = vst.msk [vmem:[%s1595_s24 + $0x88] sm:$0xff] %vm984_vm2, %v969_v32  ;;  %v944_v32 = vld [vmem:[%s1588_s12 + $0xc0] sm:$0xff] }
 0x119   : > { %v769_v33 = vpop.f32.mrb[4].mxu0  ;;  %v833_v36 = vpop.f32.mrb[4].mxu1 }
 0x11a   : > { %v890_v37 = vmul.f32 0.2, %v769_v33  ;;  %v906_v29 = vmul.f32 0.2, %v833_v36  ;;  %v771_v38 = vpop.f32.mrb[5].mxu0  ;;  %v835_v39 = vpop.f32.mrb[5].mxu1 }
 0x11b   : > { %v772_v40 = vpop.f32.mrb[6].mxu0  ;;  %v836_v45 = vpop.f32.mrb[6].mxu1  ;;  %v945_v39 = vld [vmem:[%s1588_s12 + $0xc8] sm:$0xff] }
 0x11c   : > { %v954_v47 = vadd.f32 %v922_v34, %v890_v37  ;;  %v970_v48 = vadd.f32 %v938_v9, %v906_v29  ;;  %v891_v49 = vmul.f32 0.2, %v772_v40  ;;  %v907_v50 = vmul.f32 0.2, %v836_v45  ;;  %v774_v13 = vpop.f32.mrb[7].mxu0  ;;  %v838_v51 = vpop.f32.mrb[7].mxu1 }
 0x11d   : > { %v929_v29 = vld [vmem:[%s1588_s12 + $0x48] sm:$0xff]  ;;  %v930_v51 = vld [vmem:[%s1588_s12 + $0x50] sm:$0xff] }
 0x11e   : > { %987 = vst.msk [vmem:[%s1595_s24 + $0x10] sm:$0xff] %vm984_vm2, %v954_v47  ;;  %1003 = vst.msk [vmem:[%s1595_s24 + $0x90] sm:$0xff] %vm984_vm2, %v970_v48  ;;  %v955_v53 = vadd.f32 %v923_v44, %v891_v49  ;;  %v971_v54 = vadd.f32 %v939_v46, %v907_v50 }
 0x120   : > { %988 = vst.msk [vmem:[%s1595_s24 + $0x18] sm:$0xff] %vm984_vm2, %v955_v53  ;;  %1004 = vst.msk [vmem:[%s1595_s24 + $0x98] sm:$0xff] %vm984_vm2, %v971_v54  ;;  %v946_v54 = vld [vmem:[%s1588_s12 + $0xd0] sm:$0xff] }
 0x121   : > { %v777_v57 = vpop.f32.mrb[8].mxu0  ;;  %v841_v59 = vpop.f32.mrb[8].mxu1 }
 0x122   : > { %v892_v61 = vmul.f32 0.2, %v777_v57  ;;  %v908_v63 = vmul.f32 0.2, %v841_v59  ;;  %v779_v43 = vpop.f32.mrb[9].mxu0  ;;  %v843_v16 = vpop.f32.mrb[9].mxu1 }
 0x123   : > { %v780_v52 = vpop.f32.mrb[10].mxu0  ;;  %v844_v3 = vpop.f32.mrb[10].mxu1  ;;  %v947_v16 = vld [vmem:[%s1588_s12 + $0xd8] sm:$0xff] }
 0x124   : > { %v956_v6 = vadd.f32 %v924_v58, %v892_v61  ;;  %v972_v7 = vadd.f32 %v940_v60, %v908_v63  ;;  %v893_v41 = vmul.f32 0.2, %v780_v52  ;;  %v909_v55 = vmul.f32 0.2, %v844_v3  ;;  %v782_v8 = vpop.f32.mrb[11].mxu0  ;;  %v846_v10 = vpop.f32.mrb[11].mxu1 }
 0x125   : > { %v931_v63 = vld [vmem:[%s1588_s12 + $0x58] sm:$0xff]  ;;  %v932_v10 = vld [vmem:[%s1588_s12 + $0x60] sm:$0xff] }
 0x126   : > { %989 = vst.msk [vmem:[%s1595_s24 + $0x20] sm:$0xff] %vm984_vm2, %v956_v6  ;;  %1005 = vst.msk [vmem:[%s1595_s24 + $0xa0] sm:$0xff] %vm984_vm2, %v972_v7  ;;  %v957_v35 = vadd.f32 %v925_v0, %v893_v41  ;;  %v973_v11 = vadd.f32 %v941_v5, %v909_v55 }
 0x128   : > { %990 = vst.msk [vmem:[%s1595_s24 + $0x28] sm:$0xff] %vm984_vm2, %v957_v35  ;;  %1006 = vst.msk [vmem:[%s1595_s24 + $0xa8] sm:$0xff] %vm984_vm2, %v973_v11  ;;  %v948_v11 = vld [vmem:[%s1588_s12 + $0xe0] sm:$0xff] }
 0x129   : > { %v785_v12 = vpop.f32.mrb[12].mxu0  ;;  %v849_v31 = vpop.f32.mrb[12].mxu1 }
 0x12a   : > { %v894_v42 = vmul.f32 0.2, %v785_v12  ;;  %v910_v15 = vmul.f32 0.2, %v849_v31  ;;  %v787_v56 = vpop.f32.mrb[13].mxu0  ;;  %v851_v17 = vpop.f32.mrb[13].mxu1 }
 0x12b   : > { %v788_v18 = vpop.f32.mrb[14].mxu0  ;;  %v852_v19 = vpop.f32.mrb[14].mxu1  ;;  %v949_v17 = vld [vmem:[%s1588_s12 + $0xe8] sm:$0xff] }
 0x12c   : > { %v958_v1 = vadd.f32 %v926_v22, %v894_v42  ;;  %v974_v21 = vadd.f32 %v942_v14, %v910_v15  ;;  %v895_v23 = vmul.f32 0.2, %v788_v18  ;;  %v911_v24 = vmul.f32 0.2, %v852_v19  ;;  %v790_v25 = vpop.f32.mrb[15].mxu0  ;;  %v854_v26 = vpop.f32.mrb[15].mxu1 }
 0x12d   : > { %v933_v15 = vld [vmem:[%s1588_s12 + $0x68] sm:$0xff]  ;;  %v934_v26 = vld [vmem:[%s1588_s12 + $0x70] sm:$0xff] }
 0x12e   : > { %991 = vst.msk [vmem:[%s1595_s24 + $0x30] sm:$0xff] %vm984_vm2, %v958_v1  ;;  %1007 = vst.msk [vmem:[%s1595_s24 + $0xb0] sm:$0xff] %vm984_vm2, %v974_v21  ;;  %v959_v27 = vadd.f32 %v927_v2, %v895_v23  ;;  %v975_v28 = vadd.f32 %v943_v20, %v911_v24 }
 0x130   : > { %992 = vst.msk [vmem:[%s1595_s24 + $0x38] sm:$0xff] %vm984_vm2, %v959_v27  ;;  %1008 = vst.msk [vmem:[%s1595_s24 + $0xb8] sm:$0xff] %vm984_vm2, %v975_v28  ;;  %v950_v28 = vld [vmem:[%s1588_s12 + $0xf0] sm:$0xff] }
 0x131   : > { %v793_v30 = vpop.f32.mrb[16].mxu0  ;;  %v857_v4 = vpop.f32.mrb[16].mxu1 }
 0x132   : > { %v896_v33 = vmul.f32 0.2, %v793_v30  ;;  %v912_v34 = vmul.f32 0.2, %v857_v4  ;;  %v795_v36 = vpop.f32.mrb[17].mxu0  ;;  %v859_v9 = vpop.f32.mrb[17].mxu1 }
 0x133   : > { %v796_v37 = vpop.f32.mrb[18].mxu0  ;;  %v860_v38 = vpop.f32.mrb[18].mxu1  ;;  %v951_v9 = vld [vmem:[%s1588_s12 + $0xf8] sm:$0xff] }
 0x134   : > { %v960_v40 = vadd.f32 %v928_v62, %v896_v33  ;;  %v976_v44 = vadd.f32 %v944_v32, %v912_v34  ;;  %v897_v45 = vmul.f32 0.2, %v796_v37  ;;  %v913_v46 = vmul.f32 0.2, %v860_v38  ;;  %v798_v47 = vpop.f32.mrb[19].mxu0  ;;  %v862_v48 = vpop.f32.mrb[19].mxu1 }
 0x135   : > { %v935_v34 = vld [vmem:[%s1588_s12 + $0x78] sm:$0xff] }
 0x136   : > { %993 = vst.msk [vmem:[%s1595_s24 + $0x40] sm:$0xff] %vm984_vm2, %v960_v40  ;;  %1009 = vst.msk [vmem:[%s1595_s24 + $0xc0] sm:$0xff] %vm984_vm2, %v976_v44  ;;  %v961_v49 = vadd.f32 %v929_v29, %v897_v45  ;;  %v977_v50 = vadd.f32 %v945_v39, %v913_v46 }
 0x138   : > { %994 = vst.msk [vmem:[%s1595_s24 + $0x48] sm:$0xff] %vm984_vm2, %v961_v49  ;;  %1010 = vst.msk [vmem:[%s1595_s24 + $0xc8] sm:$0xff] %vm984_vm2, %v977_v50 }
 0x139   : > { %v801_v13 = vpop.f32.mrb[20].mxu0  ;;  %v865_v53 = vpop.f32.mrb[20].mxu1 }
 0x13a   : > { %v898_v57 = vmul.f32 0.2, %v801_v13  ;;  %v914_v58 = vmul.f32 0.2, %v865_v53  ;;  %v803_v59 = vpop.f32.mrb[21].mxu0  ;;  %v867_v60 = vpop.f32.mrb[21].mxu1 }
 0x13b   : > { %v804_v61 = vpop.f32.mrb[22].mxu0  ;;  %v868_v43 = vpop.f32.mrb[22].mxu1 }
 0x13c   : > { %v962_v52 = vadd.f32 %v930_v51, %v898_v57  ;;  %v978_v0 = vadd.f32 %v946_v54, %v914_v58  ;;  %v899_v3 = vmul.f32 0.2, %v804_v61  ;;  %v915_v5 = vmul.f32 0.2, %v868_v43  ;;  %v806_v6 = vpop.f32.mrb[23].mxu0  ;;  %v870_v7 = vpop.f32.mrb[23].mxu1 }
 0x13e   : > { %995 = vst.msk [vmem:[%s1595_s24 + $0x50] sm:$0xff] %vm984_vm2, %v962_v52  ;;  %1011 = vst.msk [vmem:[%s1595_s24 + $0xd0] sm:$0xff] %vm984_vm2, %v978_v0  ;;  %v963_v41 = vadd.f32 %v931_v63, %v899_v3  ;;  %v979_v55 = vadd.f32 %v947_v16, %v915_v5 }
 0x140   : > { %996 = vst.msk [vmem:[%s1595_s24 + $0x58] sm:$0xff] %vm984_vm2, %v963_v41  ;;  %1012 = vst.msk [vmem:[%s1595_s24 + $0xd8] sm:$0xff] %vm984_vm2, %v979_v55 }
 0x141   : > { %v809_v8 = vpop.f32.mrb[24].mxu0  ;;  %v873_v35 = vpop.f32.mrb[24].mxu1 }
 0x142   : > { %v900_v12 = vmul.f32 0.2, %v809_v8  ;;  %v916_v22 = vmul.f32 0.2, %v873_v35  ;;  %v811_v31 = vpop.f32.mrb[25].mxu0  ;;  %v875_v14 = vpop.f32.mrb[25].mxu1 }
 0x143   : > { %v812_v42 = vpop.f32.mrb[26].mxu0  ;;  %v876_v56 = vpop.f32.mrb[26].mxu1 }
 0x144   : > { %v964_v18 = vadd.f32 %v932_v10, %v900_v12  ;;  %v980_v2 = vadd.f32 %v948_v11, %v916_v22  ;;  %v901_v19 = vmul.f32 0.2, %v812_v42  ;;  %v917_v20 = vmul.f32 0.2, %v876_v56  ;;  %v814_v1 = vpop.f32.mrb[27].mxu0  ;;  %v878_v21 = vpop.f32.mrb[27].mxu1 }
 0x146   : > { %997 = vst.msk [vmem:[%s1595_s24 + $0x60] sm:$0xff] %vm984_vm2, %v964_v18  ;;  %1013 = vst.msk [vmem:[%s1595_s24 + $0xe0] sm:$0xff] %vm984_vm2, %v980_v2  ;;  %v965_v23 = vadd.f32 %v933_v15, %v901_v19  ;;  %v981_v24 = vadd.f32 %v949_v17, %v917_v20 }
 0x148   : > { %998 = vst.msk [vmem:[%s1595_s24 + $0x68] sm:$0xff] %vm984_vm2, %v965_v23  ;;  %1014 = vst.msk [vmem:[%s1595_s24 + $0xe8] sm:$0xff] %vm984_vm2, %v981_v24 }
 0x149   : > { %v817_v25 = vpop.f32.mrb[28].mxu0  ;;  %v881_v27 = vpop.f32.mrb[28].mxu1 }
 0x14a   : > { %v902_v30 = vmul.f32 0.2, %v817_v25  ;;  %v918_v62 = vmul.f32 0.2, %v881_v27  ;;  %v819_v4 = vpop.f32.mrb[29].mxu0  ;;  %v883_v32 = vpop.f32.mrb[29].mxu1 }
 0x14b   : > { %v820_v33 = vpop.f32.mrb[30].mxu0  ;;  %v884_v36 = vpop.f32.mrb[30].mxu1 }
 0x14c   : > { %v966_v37 = vadd.f32 %v934_v26, %v902_v30  ;;  %v982_v29 = vadd.f32 %v950_v28, %v918_v62  ;;  %v903_v38 = vmul.f32 0.2, %v820_v33  ;;  %v919_v39 = vmul.f32 0.2, %v884_v36  ;;  %v822_v40 = vpop.f32.mrb[31].mxu0  ;;  %v886_v44 = vpop.f32.mrb[31].mxu1 }
 0x14e   : > { %999 = vst.msk [vmem:[%s1595_s24 + $0x70] sm:$0xff] %vm984_vm2, %v966_v37  ;;  %1015 = vst.msk [vmem:[%s1595_s24 + $0xf0] sm:$0xff] %vm984_vm2, %v982_v29  ;;  %v967_v45 = vadd.f32 %v935_v34, %v903_v38  ;;  %v983_v46 = vadd.f32 %v951_v9, %v919_v39 }
 0x150   : > { %1000 = vst.msk [vmem:[%s1595_s24 + $0x78] sm:$0xff] %vm984_vm2, %v967_v45  ;;  %1016 = vst.msk [vmem:[%s1595_s24 + $0xf8] sm:$0xff] %vm984_vm2, %v983_v46 }
 0x151 PF: > { %s15_s18 = sadd.s32 1, %s1187_s18  }
 0x152   : > { %p12_p4 = scmp.ge.s32.totalorder %s15_s18, 4  }
 0x154   :  { %14 = sbr.rel (!%p12_p4) target bundleno = 1 (0x1), region = 73 }

// kernel: _lambda_.27
= control target key start
LH: loop header
LB: loop body
LE: loop exit
PB: predicated region body
PF: predicated region fallthrough
CT: control target
= control target key end

     0   :  { %vm141_vm0 = vcmask 1043456   ;;  %vm116_vm1 = vcmask 195584   ;;  %vm242_vm2 = vcmask 392192   ;;  %s509_s1 = inlined_call_operand.vmem [shape: bf16[24,48], index: 1, kind: input, shape index: {}]   ;;  %s510_s0 = inlined_call_operand.vmem [shape: f32[128,24], index: 0, kind: input, shape index: {}]   ;;  %s511_s2 = inlined_call_operand.vmem [shape: f32[1,24], index: 2, kind: input, shape index: {}]   ;;  %s512_s3 = inlined_call_operand.vmem [shape: f32[1,24], index: 3, kind: input, shape index: {}]   ;;  %s513_s4 = inlined_call_operand.vmem [shape: f32[128,48], index: 4, kind: output, shape index: {}]  }
   0x1   :  { %v311_v0 = vld [vmem:[%s509_s1] sm:$0xff]   ;;  %v312_v1 = vld [vmem:[%s509_s1 + $0x8] ss:$0 sps:$4 sm:$0xff]   ;;  %v20_v10 = vld [vmem:[%s510_s0 + $0x10] sm:$0xff] }
   0x2   :  { %v18_v2 = vld [vmem:[%s510_s0] sm:$0xff]  ;;  %285 = vmatprep.subr.bf16.mxu0 %v311_v0  ;;  %305 = vmatprep.subr.bf16.mxu1 %v311_v0  ;;  %v19_v3 = vld [vmem:[%s510_s0 + $0x8] sm:$0xff]  ;;  %v143_v11 = vsel %vm141_vm0, %v312_v1, 0  ;;  %v21_v14 = vld [vmem:[%s510_s0 + $0x18] sm:$0xff] }
   0x3   :  { %v353_v4 = vld [vmem:[%s511_s2] ss:$0 sm:$0xff]  ;;  %286 = vmatpush3.bf16.msra.mxu0 %v311_v0  ;;  %307 = vmatpush3.bf16.msra.mxu1 %v311_v0  ;;  %v27_v9 = vld [vmem:[%s510_s0 + $0x48] sm:$0xff]  ;;  %v28_v16 = vld [vmem:[%s510_s0 + $0x50] sm:$0xff] }
   0x4   :  { %v358_v5 = vld [vmem:[%s512_s3] ss:$0 sm:$0xff]  ;;  %v41_v6 = vmul.f32 %v353_v4, %v18_v2  ;;  %v42_v7 = vmul.f32 %v353_v4, %v19_v3  ;;  %309 = vmatprep.subr.msk.bf16.mxu0 %vm141_vm0, %v312_v1  ;;  %310 = vmatprep.subr.msk.bf16.mxu1 %vm141_vm0, %v312_v1  ;;  %v50_v13 = vmul.f32 %v353_v4, %v27_v9  ;;  %v29_v17 = vld [vmem:[%s510_s0 + $0x58] sm:$0xff]  ;;  %v23_v31 = vld [vmem:[%s510_s0 + $0x28] sm:$0xff] }
   0x5   :  { %v26_v8 = vld [vmem:[%s510_s0 + $0x40] sm:$0xff]  ;;  %v43_v15 = vmul.f32 %v353_v4, %v20_v10  ;;  %v44_v20 = vmul.f32 %v353_v4, %v21_v14  ;;  %v51_v21 = vmul.f32 %v353_v4, %v28_v16  ;;  %v52_v25 = vmul.f32 %v353_v4, %v29_v17  ;;  %v31_v37 = vld [vmem:[%s510_s0 + $0x68] sm:$0xff]  ;;  %v24_v38 = vld [vmem:[%s510_s0 + $0x30] sm:$0xff] }
   0x6   :  { %v49_v12 = vmul.f32 %v353_v4, %v26_v8  ;;  %v64_v18 = vadd.f32 %v358_v5, %v41_v6  ;;  %v65_v19 = vadd.f32 %v358_v5, %v42_v7  ;;  %v73_v23 = vadd.f32 %v358_v5, %v50_v13  ;;  %v22_v26 = vld [vmem:[%s510_s0 + $0x20] sm:$0xff]  ;;  %v25_v43 = vld [vmem:[%s510_s0 + $0x38] sm:$0xff]  ;;  %v32_v48 = vld [vmem:[%s510_s0 + $0x70] sm:$0xff] }
   0x7   :  { %v66_v24 = vadd.f32 %v358_v5, %v43_v15  ;;  %288 = vmatpush3.bf16.msra.mxu0 %v143_v11  ;;  %308 = vmatpush3.bf16.msra.mxu1 %v143_v11  ;;  %v67_v29 = vadd.f32 %v358_v5, %v44_v20  ;;  %v74_v30 = vadd.f32 %v358_v5, %v51_v21  ;;  %v30_v32 = vld [vmem:[%s510_s0 + $0x60] sm:$0xff]  ;;  %v33_v53 = vld [vmem:[%s510_s0 + $0x78] sm:$0xff] }
   0x8   :  { %v72_v22 = vadd.f32 %v358_v5, %v49_v12  ;;  %v80_v27 = vmax.f32 %v64_v18, 0.0  ;;  %v81_v28 = vmax.f32 %v65_v19, 0.0  ;;  %v89_v34 = vmax.f32 %v73_v23, 0.0 }
   0x9   :  { %v82_v35 = vmax.f32 %v66_v24, 0.0  ;;  %v75_v36 = vadd.f32 %v358_v5, %v52_v25  ;;  %v83_v40 = vmax.f32 %v67_v29, 0.0  ;;  %v90_v41 = vmax.f32 %v74_v30, 0.0 }
   0xa   :  { %v88_v33 = vmax.f32 %v72_v22, 0.0  ;;  %v96_v39 = vpack.c.bf16 %v81_v28, %v80_v27  ;;  %v45_v42 = vmul.f32 %v353_v4, %v22_v26  ;;  %v46_v46 = vmul.f32 %v353_v4, %v23_v31 }
   0xb   :  { %v91_v45 = vmax.f32 %v75_v36, 0.0  ;;  %v53_v47 = vmul.f32 %v353_v4, %v30_v32  ;;  %v97_v49 = vpack.c.bf16 %v83_v40, %v82_v35  ;;  %v54_v51 = vmul.f32 %v353_v4, %v31_v37 }
   0xc   :  { %v100_v44 = vpack.c.bf16 %v89_v34, %v88_v33  ;;  %289 = vmatprep.mubr.msk.bf16.mxu0 %vm116_vm1, %v96_v39  ;;  %v68_v50 = vadd.f32 %v358_v5, %v45_v42  ;;  %v47_v52 = vmul.f32 %v353_v4, %v24_v38  ;;  %v69_v55 = vadd.f32 %v358_v5, %v46_v46 }
   0xd   :  { %v101_v54 = vpack.c.bf16 %v91_v45, %v90_v41  ;;  %v76_v56 = vadd.f32 %v358_v5, %v53_v47  ;;  %v48_v57 = vmul.f32 %v353_v4, %v25_v43  ;;  %290 = vmatmul.mubr.msk.bf16.vlgmr.msra.gmra.mrb[0].mxu0 %vm116_vm1, %v97_v49  ;;  %v77_v59 = vadd.f32 %v358_v5, %v54_v51 }
   0xe   :  { %297 = vmatprep.mubr.msk.bf16.mxu1 %vm116_vm1, %v100_v44  ;;  %v84_v58 = vmax.f32 %v68_v50, 0.0  ;;  %v70_v60 = vadd.f32 %v358_v5, %v47_v52  ;;  %v55_v61 = vmul.f32 %v353_v4, %v32_v48  ;;  %v85_v62 = vmax.f32 %v69_v55, 0.0 }
   0xf   :  { %298 = vmatmul.mubr.msk.bf16.vlgmr.msra.gmra.mrb[0].mxu1 %vm116_vm1, %v101_v54  ;;  %v92_v63 = vmax.f32 %v76_v56, 0.0  ;;  %v71_v0 = vadd.f32 %v358_v5, %v48_v57  ;;  %v56_v1 = vmul.f32 %v353_v4, %v33_v53  ;;  %v93_v2 = vmax.f32 %v77_v59, 0.0 }
  0x10   :  { %v86_v3 = vmax.f32 %v70_v60, 0.0  ;;  %v78_v6 = vadd.f32 %v358_v5, %v55_v61  ;;  %v98_v7 = vpack.c.bf16 %v85_v62, %v84_v58 }
  0x11   :  { %v87_v8 = vmax.f32 %v71_v0, 0.0  ;;  %v79_v9 = vadd.f32 %v358_v5, %v56_v1  ;;  %v102_v10 = vpack.c.bf16 %v93_v2, %v92_v63 }
  0x12   :  { %v94_v11 = vmax.f32 %v78_v6, 0.0  ;;  %293 = vmatprep.mubr.msk.bf16.mxu0 %vm116_vm1, %v98_v7 }
  0x13   :  { %v99_v12 = vpack.c.bf16 %v87_v8, %v86_v3  ;;  %v95_v13 = vmax.f32 %v79_v9, 0.0  ;;  %301 = vmatprep.mubr.msk.bf16.mxu1 %vm116_vm1, %v102_v10 }
  0x15   :  { %v103_v14 = vpack.c.bf16 %v95_v13, %v94_v11  ;;  %294 = vmatmul.mubr.msk.bf16.gmra.mrb[4].mxu0 %vm116_vm1, %v99_v12 }
  0x17   :  { %302 = vmatmul.mubr.msk.bf16.gmra.mrb[4].mxu1 %vm116_vm1, %v103_v14 }
  0xe0   :  { %v291_v4 = vpop.f32.mrb[0].mxu0 }
  0xe1   :  { %245 = vst.msk [vmem:[%s513_s4 + $0x10] sm:$0xff] %vm242_vm2, %v291_v4  ;;  %v179_v15 = vpop.f32.mrb[1].mxu0 }
  0xe2   :  { %v299_v5 = vpop.f32.mrb[0].mxu1  ;;  %243 = vst.msk [vmem:[%s513_s4] sm:$0xff] %vm242_vm2, %v179_v15  ;;  %v292_v17 = vpop.f32.mrb[2].mxu0 }
  0xe3   :  { %253 = vst.msk [vmem:[%s513_s4 + $0x50] sm:$0xff] %vm242_vm2, %v299_v5  ;;  %v211_v16 = vpop.f32.mrb[1].mxu1  ;;  %246 = vst.msk [vmem:[%s513_s4 + $0x18] sm:$0xff] %vm242_vm2, %v292_v17  ;;  %v182_v19 = vpop.f32.mrb[3].mxu0 }
  0xe4   :  { %251 = vst.msk [vmem:[%s513_s4 + $0x40] sm:$0xff] %vm242_vm2, %v211_v16  ;;  %v300_v18 = vpop.f32.mrb[2].mxu1  ;;  %244 = vst.msk [vmem:[%s513_s4 + $0x8] sm:$0xff] %vm242_vm2, %v182_v19 }
  0xe5   :  { %254 = vst.msk [vmem:[%s513_s4 + $0x58] sm:$0xff] %vm242_vm2, %v300_v18  ;;  %v214_v20 = vpop.f32.mrb[3].mxu1 }
  0xe6   :  { %252 = vst.msk [vmem:[%s513_s4 + $0x48] sm:$0xff] %vm242_vm2, %v214_v20 }
  0xe8   :  { %v295_v21 = vpop.f32.mrb[4].mxu0 }
  0xe9   :  { %249 = vst.msk [vmem:[%s513_s4 + $0x30] sm:$0xff] %vm242_vm2, %v295_v21  ;;  %v195_v23 = vpop.f32.mrb[5].mxu0 }
  0xea   :  { %v303_v22 = vpop.f32.mrb[4].mxu1  ;;  %247 = vst.msk [vmem:[%s513_s4 + $0x20] sm:$0xff] %vm242_vm2, %v195_v23  ;;  %v296_v25 = vpop.f32.mrb[6].mxu0 }
  0xeb   :  { %257 = vst.msk [vmem:[%s513_s4 + $0x70] sm:$0xff] %vm242_vm2, %v303_v22  ;;  %v227_v24 = vpop.f32.mrb[5].mxu1  ;;  %250 = vst.msk [vmem:[%s513_s4 + $0x38] sm:$0xff] %vm242_vm2, %v296_v25  ;;  %v198_v27 = vpop.f32.mrb[7].mxu0 }
  0xec   :  { %255 = vst.msk [vmem:[%s513_s4 + $0x60] sm:$0xff] %vm242_vm2, %v227_v24  ;;  %v304_v26 = vpop.f32.mrb[6].mxu1  ;;  %248 = vst.msk [vmem:[%s513_s4 + $0x28] sm:$0xff] %vm242_vm2, %v198_v27 }
  0xed   :  { %258 = vst.msk [vmem:[%s513_s4 + $0x78] sm:$0xff] %vm242_vm2, %v304_v26  ;;  %v230_v28 = vpop.f32.mrb[7].mxu1 }
  0xee   :  { %256 = vst.msk [vmem:[%s513_s4 + $0x68] sm:$0xff] %vm242_vm2, %v230_v28 }

// kernel: _lambda_.25
= control target key start
LH: loop header
LB: loop body
LE: loop exit
PB: predicated region body
PF: predicated region fallthrough
CT: control target
= control target key end

     0   :  { %v506_v0 = vmov 0   ;;  %v52_v3 = vlaneseq  ;;  %vm294_vm0 = vcmask 719872   ;;  %vm319_vm1 = vcmask 1043456   ;;  %s853_s1 = inlined_call_operand.vmem [shape: bf16[216,48], index: 1, kind: input, shape index: {}]   ;;  %s854_s0 = inlined_call_operand.vmem [shape: f32[128,216], index: 0, kind: input, shape index: {}]   ;;  %s855_s2 = inlined_call_operand.vmem [shape: f32[1,216], index: 2, kind: input, shape index: {}]   ;;  %s856_s3 = inlined_call_operand.vmem [shape: f32[1,216], index: 3, kind: input, shape index: {}]   ;;  %s857_s4 = inlined_call_operand.vmem [shape: f32[128,48], index: 4, kind: output, shape index: {}]  }
   0x1   :  { %323 = vmatprep.subr.bf16.mxu0 %v506_v0  ;;  %463 = vmatprep.subr.bf16.mxu1 %v506_v0  ;;  %v492_v1 = vld [vmem:[%s853_s1] sm:$0xff]   ;;  %v493_v2 = vld [vmem:[%s853_s1 + $0x8] sm:$0xff]   ;;  %v494_v4 = vld [vmem:[%s853_s1 + $0x10] sm:$0xff]   ;;  %vm420_vm2 = vcmask 392192  }
   0x2   :  { %324 = vmatpush1.bf16.msra.mxu0 %v492_v1  ;;  %477 = vmatpush1.bf16.msra.mxu1 %v492_v1  ;;  %v547_v5 = vshrl.u32 %v52_v3, 7  ;;  %v495_v6 = vld [vmem:[%s853_s1 + $0x18] sm:$0xff]   ;;  %v496_v8 = vld [vmem:[%s853_s1 + $0x20] sm:$0xff]   ;;  %v19_v9 = vld [vmem:[%s854_s0 + $0x8] sm:$0xff] }
   0x3   :  { %325 = vmatprep.subr.bf16.mxu0 %v506_v0  ;;  %464 = vmatprep.subr.bf16.mxu1 %v506_v0  ;;  %v21_v10 = vld [vmem:[%s854_s0 + $0x18] sm:$0xff]  ;;  %v50_v11 = vld [vmem:[%s855_s2] sm:$0x3]  ;;  %v35_v14 = vld [vmem:[%s854_s0 + $0x88] sm:$0xff] }
   0x4   :  { %v58_v7 = vsub.s32 1, %v547_v5  ;;  %v94_v12 = vld [vmem:[%s856_s3] sm:$0x3]  ;;  %v37_v15 = vld [vmem:[%s854_s0 + $0x98] sm:$0xff]  ;;  %v497_v21 = vld [vmem:[%s853_s1 + $0x28] sm:$0xff]   ;;  %v54_v35 = vsub.s32 0, %v547_v5 }
   0x5   :  { %v498_v29 = vld [vmem:[%s853_s1 + $0x30] sm:$0xff]   ;;  %v499_v33 = vld [vmem:[%s853_s1 + $0x38] sm:$0xff]   ;;  %v500_v34 = vld [vmem:[%s853_s1 + $0x40] sm:$0xff]  }
   0x6   :  { %326 = vmatpush1.bf16.msra.mxu0 %v493_v2  ;;  %478 = vmatpush1.bf16.msra.mxu1 %v493_v2  ;;  %v572_v13 = vrot.slane %v50_v11, %v58_v7  ;;  %v580_v16 = vrot.slane %v94_v12, %v58_v7  ;;  %v501_v36 = vld [vmem:[%s853_s1 + $0x48] sm:$0xff]   ;;  %v618_v37 = vrot.slane %v50_v11, %v54_v35  ;;  %v18_v38 = vld [vmem:[%s854_s0] sm:$0xff]  ;;  %v20_v39 = vld [vmem:[%s854_s0 + $0x10] sm:$0xff] }
   0x7   :  { %327 = vmatprep.subr.bf16.mxu0 %v506_v0  ;;  %465 = vmatprep.subr.bf16.mxu1 %v506_v0  ;;  %v34_v40 = vld [vmem:[%s854_s0 + $0x80] sm:$0xff]  ;;  %v36_v41 = vld [vmem:[%s854_s0 + $0x90] sm:$0xff]  ;;  %v23_v43 = vld [vmem:[%s854_s0 + $0x28] sm:$0xff]  ;;  %v640_v44 = vrot.slane %v94_v12, %v54_v35 }
   0x8   :  { %v63_v17 = vmul.f32 %v572_v13, %v19_v9  ;;  %v65_v18 = vmul.f32 %v572_v13, %v21_v10  ;;  %v79_v19 = vmul.f32 %v572_v13, %v35_v14  ;;  %v81_v20 = vmul.f32 %v572_v13, %v37_v15  ;;  %v502_v42 = vld [vmem:[%s853_s1 + $0x50] sm:$0xff]   ;;  %v25_v46 = vld [vmem:[%s854_s0 + $0x38] sm:$0xff]  ;;  %v39_v47 = vld [vmem:[%s854_s0 + $0xa8] sm:$0xff] }
   0x9   :  { %v62_v45 = vmul.f32 %v618_v37, %v18_v38  ;;  %v41_v48 = vld [vmem:[%s854_s0 + $0xb8] sm:$0xff]  ;;  %v64_v49 = vmul.f32 %v618_v37, %v20_v39  ;;  %v78_v50 = vmul.f32 %v618_v37, %v34_v40  ;;  %v80_v51 = vmul.f32 %v618_v37, %v36_v41  ;;  %v22_v61 = vld [vmem:[%s854_s0 + $0x20] sm:$0xff]  ;;  %v24_v62 = vld [vmem:[%s854_s0 + $0x30] sm:$0xff] }
   0xa   :  { %328 = vmatpush1.bf16.msra.mxu0 %v494_v4  ;;  %479 = vmatpush1.bf16.msra.mxu1 %v494_v4  ;;  %v107_v22 = vadd.f32 %v580_v16, %v63_v17  ;;  %v109_v23 = vadd.f32 %v580_v16, %v65_v18  ;;  %v123_v24 = vadd.f32 %v580_v16, %v79_v19  ;;  %v503_v53 = vld [vmem:[%s853_s1 + $0x58] sm:$0xff]   ;;  %v38_v63 = vld [vmem:[%s854_s0 + $0xa0] sm:$0xff]  ;;  %v40_v3 = vld [vmem:[%s854_s0 + $0xb0] sm:$0xff] }
   0xb   :  { %329 = vmatprep.subr.bf16.mxu0 %v506_v0  ;;  %466 = vmatprep.subr.bf16.mxu1 %v506_v0  ;;  %v125_v25 = vadd.f32 %v580_v16, %v81_v20  ;;  %v67_v52 = vmul.f32 %v572_v13, %v23_v43  ;;  %v69_v54 = vmul.f32 %v572_v13, %v25_v46  ;;  %v504_v1 = vld [vmem:[%s853_s1 + $0x60] sm:$0xff]   ;;  %v27_v7 = vld [vmem:[%s854_s0 + $0x48] sm:$0xff]  ;;  %v45_v17 = vld [vmem:[%s854_s0 + $0xd8] sm:$0xff] }
   0xc   :  { %v139_v26 = vmax.f32 %v107_v22, 0.0  ;;  %v141_v27 = vmax.f32 %v109_v23, 0.0  ;;  %v155_v28 = vmax.f32 %v123_v24, 0.0  ;;  %v83_v55 = vmul.f32 %v572_v13, %v39_v47  ;;  %v43_v9 = vld [vmem:[%s854_s0 + $0xc8] sm:$0xff]  ;;  %v28_v41 = vld [vmem:[%s854_s0 + $0x50] sm:$0xff] }
   0xd   :  { %v157_v30 = vmax.f32 %v125_v25, 0.0  ;;  %v85_v56 = vmul.f32 %v572_v13, %v41_v48  ;;  %v106_v57 = vadd.f32 %v640_v44, %v62_v45  ;;  %v108_v58 = vadd.f32 %v640_v44, %v64_v49  ;;  %v505_v10 = vld [vmem:[%s853_s1 + $0x68] ss:$0 sps:$4 sm:$0xff]   ;;  %v44_v43 = vld [vmem:[%s854_s0 + $0xd0] sm:$0xff] }
   0xe   :  { %330 = vmatpush1.bf16.msra.mxu0 %v495_v6  ;;  %480 = vmatpush1.bf16.msra.mxu1 %v495_v6  ;;  %v171_v31 = vpack.c.bf16 %v141_v27, %v139_v26  ;;  %v122_v59 = vadd.f32 %v640_v44, %v78_v50  ;;  %v124_v60 = vadd.f32 %v640_v44, %v80_v51  ;;  %v31_v48 = vld [vmem:[%s854_s0 + $0x68] sm:$0xff] }
   0xf   :  { %331 = vmatprep.subr.bf16.mxu0 %v506_v0  ;;  %467 = vmatprep.subr.bf16.mxu1 %v506_v0  ;;  %v179_v32 = vpack.c.bf16 %v157_v30, %v155_v28  ;;  %v111_v2 = vadd.f32 %v580_v16, %v67_v52  ;;  %v113_v4 = vadd.f32 %v580_v16, %v69_v54  ;;  %v138_v11 = vmax.f32 %v106_v57, 0.0  ;;  %v47_v54 = vld [vmem:[%s854_s0 + $0xe8] sm:$0xff] }
  0x10   :  { %455 = vmatprep.mubr.msk.bf16.mxu0 %vm294_vm0, %v171_v31  ;;  %v127_v5 = vadd.f32 %v580_v16, %v83_v55  ;;  %v129_v6 = vadd.f32 %v580_v16, %v85_v56  ;;  %v66_v12 = vmul.f32 %v618_v37, %v22_v61  ;;  %v68_v14 = vmul.f32 %v618_v37, %v24_v62  ;;  %v49_v55 = vld [vmem:[%s854_s0 + $0xf8] sm:$0xff] }
  0x11   :  { %459 = vmatprep.mubr.msk.bf16.mxu1 %vm294_vm0, %v179_v32  ;;  %v82_v15 = vmul.f32 %v618_v37, %v38_v63  ;;  %v140_v18 = vmax.f32 %v108_v58, 0.0  ;;  %v154_v19 = vmax.f32 %v122_v59, 0.0  ;;  %v156_v20 = vmax.f32 %v124_v60, 0.0 }
  0x12   :  { %332 = vmatpush1.bf16.msra.mxu0 %v496_v8  ;;  %481 = vmatpush1.bf16.msra.mxu1 %v496_v8  ;;  %v29_v8 = vld [vmem:[%s854_s0 + $0x58] sm:$0xff]  ;;  %v143_v22 = vmax.f32 %v111_v2, 0.0  ;;  %v71_v23 = vmul.f32 %v572_v13, %v27_v7  ;;  %v87_v25 = vmul.f32 %v572_v13, %v43_v9  ;;  %v145_v26 = vmax.f32 %v113_v4, 0.0 }
  0x13   :  { %333 = vmatprep.subr.bf16.mxu0 %v506_v0  ;;  %468 = vmatprep.subr.bf16.mxu1 %v506_v0  ;;  %v73_v24 = vmul.f32 %v572_v13, %v29_v8  ;;  %v159_v27 = vmax.f32 %v127_v5, 0.0  ;;  %v161_v28 = vmax.f32 %v129_v6, 0.0  ;;  %v321_v30 = vsel %vm319_vm1, %v505_v10, 0 }
  0x14   :  { %v110_v31 = vadd.f32 %v640_v44, %v66_v12  ;;  %v112_v32 = vadd.f32 %v640_v44, %v68_v14  ;;  %v178_v38 = vpack.c.bf16 %v156_v20, %v154_v19  ;;  %v115_v39 = vadd.f32 %v580_v16, %v71_v23  ;;  %v30_v14 = vld [vmem:[%s854_s0 + $0x60] sm:$0xff]  ;;  %v32_v19 = vld [vmem:[%s854_s0 + $0x70] sm:$0xff] }
  0x15   :  { %v131_v40 = vadd.f32 %v580_v16, %v87_v25  ;;  %v173_v45 = vpack.c.bf16 %v145_v26, %v143_v22  ;;  %v181_v46 = vpack.c.bf16 %v161_v28, %v159_v27  ;;  %v72_v57 = vmul.f32 %v618_v37, %v28_v41  ;;  %v46_v20 = vld [vmem:[%s854_s0 + $0xe0] sm:$0xff] }
  0x16   :  { %334 = vmatpush1.bf16.msra.mxu0 %v497_v21  ;;  %482 = vmatpush1.bf16.msra.mxu1 %v497_v21  ;;  %v84_v21 = vmul.f32 %v618_v37, %v40_v3  ;;  %v142_v49 = vmax.f32 %v110_v31, 0.0  ;;  %v144_v50 = vmax.f32 %v112_v32, 0.0  ;;  %v88_v59 = vmul.f32 %v618_v37, %v44_v43 }
  0x17   :  { %335 = vmatprep.subr.bf16.mxu0 %v506_v0  ;;  %469 = vmatprep.subr.bf16.mxu1 %v506_v0  ;;  %v147_v60 = vmax.f32 %v115_v39, 0.0  ;;  %v163_v62 = vmax.f32 %v131_v40, 0.0  ;;  %v75_v63 = vmul.f32 %v572_v13, %v31_v48  ;;  %v91_v3 = vmul.f32 %v572_v13, %v47_v54 }
  0x18   :  { %v128_v35 = vadd.f32 %v640_v44, %v84_v21  ;;  %v93_v4 = vmul.f32 %v572_v13, %v49_v55  ;;  %v116_v6 = vadd.f32 %v640_v44, %v72_v57  ;;  %v132_v8 = vadd.f32 %v640_v44, %v88_v59  ;;  %v48_v21 = vld [vmem:[%s854_s0 + $0xf0] sm:$0xff] }
  0x19   :  { %v172_v9 = vpack.c.bf16 %v144_v50, %v142_v49  ;;  %v119_v12 = vadd.f32 %v580_v16, %v75_v63  ;;  %v74_v26 = vmul.f32 %v618_v37, %v30_v14  ;;  %v90_v27 = vmul.f32 %v618_v37, %v46_v20 }
  0x1a   :  { %336 = vmatpush1.bf16.msra.mxu0 %v498_v29  ;;  %483 = vmatpush1.bf16.msra.mxu1 %v498_v29  ;;  %v89_v29 = vmul.f32 %v572_v13, %v45_v17  ;;  %v160_v56 = vmax.f32 %v128_v35, 0.0  ;;  %v135_v17 = vadd.f32 %v580_v16, %v91_v3  ;;  %v148_v23 = vmax.f32 %v116_v6, 0.0 }
  0x1b   :  { %337 = vmatprep.subr.bf16.mxu0 %v506_v0  ;;  %470 = vmatprep.subr.bf16.mxu1 %v506_v0  ;;  %v164_v25 = vmax.f32 %v132_v8, 0.0  ;;  %v92_v28 = vmul.f32 %v618_v37, %v48_v21  ;;  %v118_v35 = vadd.f32 %v640_v44, %v74_v26 }
  0x1c   :  { %v133_v47 = vadd.f32 %v580_v16, %v89_v29  ;;  %v151_v29 = vmax.f32 %v119_v12, 0.0  ;;  %v167_v31 = vmax.f32 %v135_v17, 0.0 }
  0x1d   :  { %v136_v39 = vadd.f32 %v640_v44, %v92_v28  ;;  %v150_v40 = vmax.f32 %v118_v35, 0.0 }
  0x1e   :  { %338 = vmatpush1.bf16.msra.mxu0 %v499_v33  ;;  %484 = vmatpush1.bf16.msra.mxu1 %v499_v33  ;;  %v126_v33 = vadd.f32 %v640_v44, %v82_v15 }
  0x1f   :  { %339 = vmatprep.subr.bf16.mxu0 %v506_v0  ;;  %471 = vmatprep.subr.bf16.mxu1 %v506_v0  ;;  %v168_v43 = vmax.f32 %v136_v39, 0.0 }
  0x20   :  { %v158_v51 = vmax.f32 %v126_v33, 0.0 }
  0x22   :  { %340 = vmatpush1.bf16.msra.mxu0 %v500_v34  ;;  %485 = vmatpush1.bf16.msra.mxu1 %v500_v34  ;;  %v170_v34 = vpack.c.bf16 %v140_v18, %v138_v11  ;;  %v180_v10 = vpack.c.bf16 %v160_v56, %v158_v51  ;;  %v137_v18 = vadd.f32 %v580_v16, %v93_v4 }
  0x23   :  { %341 = vmatprep.subr.bf16.mxu0 %v506_v0  ;;  %472 = vmatprep.subr.bf16.mxu1 %v506_v0 }
  0x24   :  { %v169_v32 = vmax.f32 %v137_v18, 0.0 }
  0x26   :  { %342 = vmatpush1.bf16.msra.mxu0 %v501_v36  ;;  %486 = vmatpush1.bf16.msra.mxu1 %v501_v36  ;;  %v26_v36 = vld [vmem:[%s854_s0 + $0x40] sm:$0xff] }
  0x27   :  { %343 = vmatprep.subr.bf16.mxu0 %v506_v0  ;;  %473 = vmatprep.subr.bf16.mxu1 %v506_v0  ;;  %v70_v52 = vmul.f32 %v618_v37, %v26_v36 }
  0x29   :  { %v114_v5 = vadd.f32 %v640_v44, %v70_v52 }
  0x2a   :  { %344 = vmatpush1.bf16.msra.mxu0 %v502_v42  ;;  %487 = vmatpush1.bf16.msra.mxu1 %v502_v42  ;;  %v42_v42 = vld [vmem:[%s854_s0 + $0xc0] sm:$0xff] }
  0x2b   :  { %345 = vmatprep.subr.bf16.mxu0 %v506_v0  ;;  %474 = vmatprep.subr.bf16.mxu1 %v506_v0  ;;  %v86_v58 = vmul.f32 %v618_v37, %v42_v42  ;;  %v146_v22 = vmax.f32 %v114_v5, 0.0 }
  0x2d   :  { %v130_v7 = vadd.f32 %v640_v44, %v86_v58  ;;  %v174_v33 = vpack.c.bf16 %v148_v23, %v146_v22 }
  0x2e   :  { %346 = vmatpush1.bf16.msra.mxu0 %v503_v53  ;;  %488 = vmatpush1.bf16.msra.mxu1 %v503_v53  ;;  %v33_v53 = vld [vmem:[%s854_s0 + $0x78] sm:$0xff] }
  0x2f   :  { %347 = vmatprep.subr.bf16.mxu0 %v506_v0  ;;  %475 = vmatprep.subr.bf16.mxu1 %v506_v0  ;;  %v77_v2 = vmul.f32 %v572_v13, %v33_v53 }
  0x31   :  { %v121_v13 = vadd.f32 %v580_v16, %v77_v2 }
  0x32   :  { %348 = vmatpush1.bf16.msra.mxu0 %v504_v1  ;;  %489 = vmatpush1.bf16.msra.mxu1 %v504_v1  ;;  %v165_v1 = vmax.f32 %v133_v47, 0.0 }
  0x33   :  { %349 = vmatprep.subr.bf16.mxu0 %v506_v0  ;;  %476 = vmatprep.subr.bf16.mxu1 %v506_v0  ;;  %v117_v0 = vadd.f32 %v580_v16, %v73_v24  ;;  %v162_v24 = vmax.f32 %v130_v7, 0.0  ;;  %v76_v16 = vmul.f32 %v618_v37, %v32_v19  ;;  %v185_v37 = vpack.c.bf16 %v169_v32, %v167_v31 }
  0x34   :  { %v183_v15 = vpack.c.bf16 %v165_v1, %v163_v62 }
  0x35   :  { %v149_v61 = vmax.f32 %v117_v0, 0.0  ;;  %v120_v36 = vadd.f32 %v640_v44, %v76_v16 }
  0x36   :  { %350 = vmatpush1.bf16.msra.mxu0 %v321_v30  ;;  %490 = vmatpush1.bf16.msra.mxu1 %v321_v30  ;;  %v153_v30 = vmax.f32 %v121_v13, 0.0 }
  0x37   :  { %v175_v11 = vpack.c.bf16 %v149_v61, %v147_v60  ;;  %v152_v41 = vmax.f32 %v120_v36, 0.0 }
  0x38   :  { %v177_v0 = vpack.c.bf16 %v153_v30, %v151_v29 }
  0x39   :  { %356 = vmatmul.mubr.bf16.vlgmr.msra.gmra.mrb[0].mxu0 %v170_v34  ;;  %388 = vmatmul.mubr.bf16.vlgmr.msra.gmra.mrb[0].mxu1 %v178_v38  ;;  %v182_v34 = vpack.c.bf16 %v164_v25, %v162_v24  ;;  %v134_v38 = vadd.f32 %v640_v44, %v90_v27 }
  0x3a   :  { %456 = vmatprep.mubr.msk.bf16.mxu0 %vm294_vm0, %v173_v45  ;;  %460 = vmatprep.mubr.msk.bf16.mxu1 %vm294_vm0, %v181_v46  ;;  %v176_v45 = vpack.c.bf16 %v152_v41, %v150_v40 }
  0x3b   :  { %v166_v42 = vmax.f32 %v134_v38, 0.0 }
  0x3d   :  { %v184_v46 = vpack.c.bf16 %v168_v43, %v166_v42 }
  0x41   :  { %364 = vmatmul.mubr.bf16.gmra.mrb[4].mxu0 %v172_v9  ;;  %396 = vmatmul.mubr.bf16.gmra.mrb[4].mxu1 %v180_v10 }
  0x42   :  { %457 = vmatprep.mubr.msk.bf16.mxu0 %vm294_vm0, %v175_v11  ;;  %461 = vmatprep.mubr.msk.bf16.mxu1 %vm294_vm0, %v183_v15 }
  0x49   :  { %372 = vmatmul.mubr.bf16.gmra.mrb[8].mxu0 %v174_v33  ;;  %404 = vmatmul.mubr.bf16.gmra.mrb[8].mxu1 %v182_v34 }
  0x4a   :  { %458 = vmatprep.mubr.msk.bf16.mxu0 %vm294_vm0, %v177_v0  ;;  %462 = vmatprep.mubr.msk.bf16.mxu1 %vm294_vm0, %v185_v37 }
  0x51   :  { %380 = vmatmul.mubr.bf16.gmra.mrb[12].mxu0 %v176_v45  ;;  %412 = vmatmul.mubr.bf16.gmra.mrb[12].mxu1 %v184_v46 }
 0x10c   :  { %v357_v47 = vpop.f32.mrb[0].mxu0  ;;  %v389_v48 = vpop.f32.mrb[0].mxu1 }
 0x10d   :  { %421 = vst.msk [vmem:[%s857_s4] sm:$0xff] %vm420_vm2, %v357_v47  ;;  %429 = vst.msk [vmem:[%s857_s4 + $0x40] sm:$0xff] %vm420_vm2, %v389_v48  ;;  %v359_v44 = vpop.f32.mrb[1].mxu0  ;;  %v391_v49 = vpop.f32.mrb[1].mxu1 }
 0x10e   :  { %v360_v50 = vpop.f32.mrb[2].mxu0  ;;  %v392_v51 = vpop.f32.mrb[2].mxu1 }
 0x10f   :  { %422 = vst.msk [vmem:[%s857_s4 + $0x8] sm:$0xff] %vm420_vm2, %v360_v50  ;;  %430 = vst.msk [vmem:[%s857_s4 + $0x48] sm:$0xff] %vm420_vm2, %v392_v51  ;;  %v362_v52 = vpop.f32.mrb[3].mxu0  ;;  %v394_v53 = vpop.f32.mrb[3].mxu1 }
 0x114   :  { %v365_v54 = vpop.f32.mrb[4].mxu0  ;;  %v397_v55 = vpop.f32.mrb[4].mxu1 }
 0x115   :  { %423 = vst.msk [vmem:[%s857_s4 + $0x10] sm:$0xff] %vm420_vm2, %v365_v54  ;;  %431 = vst.msk [vmem:[%s857_s4 + $0x50] sm:$0xff] %vm420_vm2, %v397_v55  ;;  %v367_v56 = vpop.f32.mrb[5].mxu0  ;;  %v399_v57 = vpop.f32.mrb[5].mxu1 }
 0x116   :  { %v368_v58 = vpop.f32.mrb[6].mxu0  ;;  %v400_v59 = vpop.f32.mrb[6].mxu1 }
 0x117   :  { %424 = vst.msk [vmem:[%s857_s4 + $0x18] sm:$0xff] %vm420_vm2, %v368_v58  ;;  %432 = vst.msk [vmem:[%s857_s4 + $0x58] sm:$0xff] %vm420_vm2, %v400_v59  ;;  %v370_v60 = vpop.f32.mrb[7].mxu0  ;;  %v402_v61 = vpop.f32.mrb[7].mxu1 }
 0x11c   :  { %v373_v62 = vpop.f32.mrb[8].mxu0  ;;  %v405_v63 = vpop.f32.mrb[8].mxu1 }
 0x11d   :  { %425 = vst.msk [vmem:[%s857_s4 + $0x20] sm:$0xff] %vm420_vm2, %v373_v62  ;;  %433 = vst.msk [vmem:[%s857_s4 + $0x60] sm:$0xff] %vm420_vm2, %v405_v63  ;;  %v375_v1 = vpop.f32.mrb[9].mxu0  ;;  %v407_v2 = vpop.f32.mrb[9].mxu1 }
 0x11e   :  { %v376_v3 = vpop.f32.mrb[10].mxu0  ;;  %v408_v4 = vpop.f32.mrb[10].mxu1 }
 0x11f   :  { %426 = vst.msk [vmem:[%s857_s4 + $0x28] sm:$0xff] %vm420_vm2, %v376_v3  ;;  %434 = vst.msk [vmem:[%s857_s4 + $0x68] sm:$0xff] %vm420_vm2, %v408_v4  ;;  %v378_v5 = vpop.f32.mrb[11].mxu0  ;;  %v410_v6 = vpop.f32.mrb[11].mxu1 }
 0x124   :  { %v381_v7 = vpop.f32.mrb[12].mxu0  ;;  %v413_v8 = vpop.f32.mrb[12].mxu1 }
 0x125   :  { %427 = vst.msk [vmem:[%s857_s4 + $0x30] sm:$0xff] %vm420_vm2, %v381_v7  ;;  %435 = vst.msk [vmem:[%s857_s4 + $0x70] sm:$0xff] %vm420_vm2, %v413_v8  ;;  %v383_v9 = vpop.f32.mrb[13].mxu0  ;;  %v415_v10 = vpop.f32.mrb[13].mxu1 }
 0x126   :  { %v384_v11 = vpop.f32.mrb[14].mxu0  ;;  %v416_v12 = vpop.f32.mrb[14].mxu1 }
 0x127   :  { %428 = vst.msk [vmem:[%s857_s4 + $0x38] sm:$0xff] %vm420_vm2, %v384_v11  ;;  %436 = vst.msk [vmem:[%s857_s4 + $0x78] sm:$0xff] %vm420_vm2, %v416_v12  ;;  %v386_v14 = vpop.f32.mrb[15].mxu0  ;;  %v418_v15 = vpop.f32.mrb[15].mxu1 }

// kernel: _lambda_.26
= control target key start
LH: loop header
LB: loop body
LE: loop exit
PB: predicated region body
PF: predicated region fallthrough
CT: control target
= control target key end

     0   :  { %vm20_vm0 = vcmask 385024   ;;  %vm40_vm1 = vcmask 392192   ;;  %v166_v0 = vmov 0.0   ;;  %s290_s0 = inlined_call_operand.vmem [shape: f32[128,48], index: 0, kind: input, shape index: {}]   ;;  %s291_s1 = inlined_call_operand.vmem [shape: f32[1,48], index: 1, kind: input, shape index: {}]   ;;  %s292_s2 = inlined_call_operand.vmem [shape: f32[1,48], index: 2, kind: input, shape index: {}]   ;;  %s293_s3 = inlined_call_operand.vmem [shape: f32[1,48], index: 3, kind: output, shape index: {0}]   ;;  %s294_s4 = inlined_call_operand.vmem [shape: f32[1,48], index: 4, kind: output, shape index: {1}]  }
   0x1   :  { %21 = vst.msk [vmem:[#allocation2] sm:$0x1] %vm20_vm0, %v166_v0  ;;  %22 = vst.msk [vmem:[#allocation3] sm:$0x1] %vm20_vm0, %v166_v0  ;;  %v23_v1 = vld [vmem:[%s290_s0] sm:$0xff]  ;;  %v24_v2 = vld [vmem:[%s290_s0 + $0x8] sm:$0xff] }
   0x2   :  { %v25_v3 = vld [vmem:[%s290_s0 + $0x10] sm:$0xff]  ;;  %v26_v4 = vld [vmem:[%s290_s0 + $0x18] sm:$0xff]  ;;  %v41_v5 = vsel %vm40_vm1, %v23_v1, 0.0  ;;  %v42_v6 = vsel %vm40_vm1, %v24_v2, 0.0  ;;  %v27_v8 = vld [vmem:[%s290_s0 + $0x20] sm:$0xff]  ;;  %v82_v16 = vmul.f32 %v23_v1, %v23_v1  ;;  %v83_v17 = vmul.f32 %v24_v2, %v24_v2 }
   0x3   :  { %v44_v7 = vsel %vm40_vm1, %v25_v3, 0.0  ;;  %v43_v9 = vadd.f32 %v42_v6, %v41_v5  ;;  %v46_v10 = vsel %vm40_vm1, %v26_v4, 0.0  ;;  %v28_v11 = vld [vmem:[%s290_s0 + $0x28] sm:$0xff]  ;;  %v48_v13 = vsel %vm40_vm1, %v27_v8, 0.0  ;;  %v29_v14 = vld [vmem:[%s290_s0 + $0x30] sm:$0xff]  ;;  %v30_v20 = vld [vmem:[%s290_s0 + $0x38] sm:$0xff] }
   0x4   :  { %v84_v18 = vmul.f32 %v25_v3, %v25_v3  ;;  %v50_v19 = vsel %vm40_vm1, %v28_v11, 0.0  ;;  %v85_v22 = vmul.f32 %v26_v4, %v26_v4  ;;  %v52_v23 = vsel %vm40_vm1, %v29_v14, 0.0  ;;  %v31_v25 = vld [vmem:[%s290_s0 + $0x40] sm:$0xff]  ;;  %v32_v32 = vld [vmem:[%s290_s0 + $0x48] sm:$0xff]  ;;  %v33_v38 = vld [vmem:[%s290_s0 + $0x50] sm:$0xff] }
   0x5   :  { %v45_v12 = vadd.f32 %v44_v7, %v43_v9  ;;  %v86_v24 = vmul.f32 %v27_v8, %v27_v8  ;;  %v98_v27 = vsel %vm40_vm1, %v82_v16, 0.0  ;;  %v99_v28 = vsel %vm40_vm1, %v83_v17, 0.0  ;;  %v34_v44 = vld [vmem:[%s290_s0 + $0x58] sm:$0xff]  ;;  %v35_v50 = vld [vmem:[%s290_s0 + $0x60] sm:$0xff]  ;;  %v36_v56 = vld [vmem:[%s290_s0 + $0x68] sm:$0xff] }
   0x6   :  { %v101_v29 = vsel %vm40_vm1, %v84_v18, 0.0  ;;  %v54_v30 = vsel %vm40_vm1, %v30_v20, 0.0  ;;  %v100_v31 = vadd.f32 %v99_v28, %v98_v27  ;;  %v87_v34 = vmul.f32 %v28_v11, %v28_v11  ;;  %v37_v62 = vld [vmem:[%s290_s0 + $0x70] sm:$0xff]  ;;  %v38_v4 = vld [vmem:[%s290_s0 + $0x78] sm:$0xff] }
   0x7   :  { %v47_v15 = vadd.f32 %v46_v10, %v45_v12  ;;  %v103_v35 = vsel %vm40_vm1, %v85_v22, 0.0  ;;  %v56_v36 = vsel %vm40_vm1, %v31_v25, 0.0  ;;  %v88_v40 = vmul.f32 %v29_v14, %v29_v14 }
   0x8   :  { %v102_v37 = vadd.f32 %v101_v29, %v100_v31  ;;  %v105_v41 = vsel %vm40_vm1, %v86_v24, 0.0  ;;  %v58_v42 = vsel %vm40_vm1, %v32_v32, 0.0  ;;  %v89_v46 = vmul.f32 %v30_v20, %v30_v20 }
   0x9   :  { %v49_v21 = vadd.f32 %v48_v13, %v47_v15  ;;  %v107_v47 = vsel %vm40_vm1, %v87_v34, 0.0  ;;  %v60_v48 = vsel %vm40_vm1, %v33_v38, 0.0  ;;  %v90_v52 = vmul.f32 %v31_v25, %v31_v25 }
   0xa   :  { %v104_v43 = vadd.f32 %v103_v35, %v102_v37  ;;  %v109_v53 = vsel %vm40_vm1, %v88_v40, 0.0  ;;  %v62_v54 = vsel %vm40_vm1, %v34_v44, 0.0  ;;  %v91_v58 = vmul.f32 %v32_v32, %v32_v32 }
   0xb   :  { %v51_v26 = vadd.f32 %v50_v19, %v49_v21  ;;  %v111_v59 = vsel %vm40_vm1, %v89_v46, 0.0  ;;  %v64_v60 = vsel %vm40_vm1, %v35_v50, 0.0  ;;  %v92_v0 = vmul.f32 %v33_v38, %v33_v38 }
   0xc   :  { %v106_v49 = vadd.f32 %v105_v41, %v104_v43  ;;  %v113_v1 = vsel %vm40_vm1, %v90_v52, 0.0  ;;  %v66_v2 = vsel %vm40_vm1, %v36_v56, 0.0  ;;  %v93_v6 = vmul.f32 %v34_v44, %v34_v44  ;;  %v81_v44 = vld [vmem:[#allocation3] sm:$0x1] }
   0xd   :  { %v53_v33 = vadd.f32 %v52_v23, %v51_v26  ;;  %v115_v7 = vsel %vm40_vm1, %v91_v58, 0.0  ;;  %v68_v8 = vsel %vm40_vm1, %v37_v62, 0.0  ;;  %v94_v11 = vmul.f32 %v35_v50, %v35_v50 }
   0xe   :  { %v108_v55 = vadd.f32 %v107_v47, %v106_v49  ;;  %v117_v12 = vsel %vm40_vm1, %v92_v0, 0.0  ;;  %v70_v13 = vsel %vm40_vm1, %v38_v4, 0.0  ;;  %v95_v16 = vmul.f32 %v36_v56, %v36_v56 }
   0xf   :  { %v55_v39 = vadd.f32 %v54_v30, %v53_v33  ;;  %v119_v17 = vsel %vm40_vm1, %v93_v6, 0.0  ;;  %v96_v20 = vmul.f32 %v37_v62, %v37_v62  ;;  %v121_v21 = vsel %vm40_vm1, %v94_v11, 0.0 }
  0x10   :  { %v110_v61 = vadd.f32 %v109_v53, %v108_v55  ;;  %v97_v24 = vmul.f32 %v38_v4, %v38_v4  ;;  %v123_v25 = vsel %vm40_vm1, %v95_v16, 0.0 }
  0x11   :  { %v57_v45 = vadd.f32 %v56_v36, %v55_v39  ;;  %v125_v28 = vsel %vm40_vm1, %v96_v20, 0.0  ;;  %v39_v36 = vld [vmem:[#allocation2] sm:$0x1] }
  0x12   :  { %v112_v3 = vadd.f32 %v111_v59, %v110_v61  ;;  %v127_v31 = vsel %vm40_vm1, %v97_v24, 0.0 }
  0x13   :  { %v59_v51 = vadd.f32 %v58_v42, %v57_v45 }
  0x14   :  { %v114_v9 = vadd.f32 %v113_v1, %v112_v3 }
  0x15   :  { %v61_v57 = vadd.f32 %v60_v48, %v59_v51 }
  0x16   :  { %v116_v14 = vadd.f32 %v115_v7, %v114_v9 }
  0x17   :  { %v63_v63 = vadd.f32 %v62_v54, %v61_v57  ;;  %v146_v54 = vld [vmem:[%s291_s1] sm:$0x1] }
  0x18   :  { %v118_v18 = vadd.f32 %v117_v12, %v116_v14  ;;  %v151_v57 = vld [vmem:[%s292_s2] sm:$0x1] }
  0x19   :  { %v65_v5 = vadd.f32 %v64_v60, %v63_v63 }
  0x1a   :  { %v120_v22 = vadd.f32 %v119_v17, %v118_v18 }
  0x1b   :  { %v67_v10 = vadd.f32 %v66_v2, %v65_v5 }
  0x1c   :  { %v122_v26 = vadd.f32 %v121_v21, %v120_v22 }
  0x1d   :  { %v69_v15 = vadd.f32 %v68_v8, %v67_v10 }
  0x1e   :  { %v124_v29 = vadd.f32 %v123_v25, %v122_v26 }
  0x1f   :  { %v71_v19 = vadd.f32 %v70_v13, %v69_v15 }
  0x20   :  { %v126_v32 = vadd.f32 %v125_v28, %v124_v29 }
  0x21   :  { %v72_v23 = vrot.slane %v71_v19, 4 }
  0x22   :  { %v128_v34 = vadd.f32 %v127_v31, %v126_v32 }
  0x23   :  { %v73_v27 = vadd.f32 %v72_v23, %v71_v19 }
  0x24   :  { %v129_v37 = vrot.slane %v128_v34, 4 }
  0x25   :  { %v74_v30 = vrot.slane %v73_v27, 2 }
  0x26   :  { %v130_v39 = vadd.f32 %v129_v37, %v128_v34 }
  0x27   :  { %v75_v33 = vadd.f32 %v74_v30, %v73_v27 }
  0x28   :  { %v131_v41 = vrot.slane %v130_v39, 2 }
  0x29   :  { %v76_v35 = vrot.slane %v75_v33, 1 }
  0x2a   :  { %v132_v42 = vadd.f32 %v131_v41, %v130_v39 }
  0x2b   :  { %v77_v38 = vadd.f32 %v76_v35, %v75_v33 }
  0x2c   :  { %v133_v43 = vrot.slane %v132_v42, 1 }
  0x2d   :  { %v78_v40 = vadd.f32 %v77_v38, %v39_v36 }
  0x2e   :  { %v134_v45 = vadd.f32 %v133_v43, %v132_v42 }
  0x2f   :  { %80 = vst.msk [vmem:[#allocation2] sm:$0x1] %vm20_vm0, %v78_v40 }
  0x30   :  { %v135_v46 = vadd.f32 %v134_v45, %v81_v44 }
  0x32   :  { %136 = vst.msk [vmem:[#allocation3] sm:$0x1] %vm20_vm0, %v135_v46 }
  0x36   :  { %v140_v47 = vld [vmem:[#allocation2] sm:$0x1] }
  0x37   :  { %v141_v48 = vmul.f32 0.0078125, %v140_v47 }
  0x39   :  { %v144_v49 = vmul.f32 %v141_v48, %v141_v48  ;;  %v142_v50 = vld [vmem:[#allocation3] sm:$0x1] }
  0x3a   :  { %v143_v51 = vmul.f32 0.0078125, %v142_v50 }
  0x3c   :  { %v145_v52 = vsub.f32 %v143_v51, %v144_v49 }
  0x3e   :  { %v147_v53 = vadd.f32 1e-05, %v145_v52 }
  0x40   :  { %164 = vrsqrt.f32 %v147_v53 }
  0x4a   :  { %v165_v55 = vpop.eup %164 }
  0x4b   :  { %v149_v56 = vmul.f32 %v165_v55, %v146_v54 }
  0x4d   :  { %150 = vst.msk [vmem:[%s293_s3] sm:$0x1] %vm20_vm0, %v149_v56  ;;  %v152_v58 = vmul.f32 %v149_v56, %v141_v48 }
  0x4f   :  { %v153_v59 = vsub.f32 %v151_v57, %v152_v58 }
  0x51   :  { %154 = vst.msk [vmem:[%s294_s4] sm:$0x1] %vm20_vm0, %v153_v59 }

// kernel: _lambda_.32
= control target key start
LH: loop header
LB: loop body
LE: loop exit
PB: predicated region body
PF: predicated region fallthrough
CT: control target
= control target key end

     0   :  { %vm74_vm0 = vcmask 392192   ;;  %vm130_vm1 = vcmask 785408   ;;  %s228_s1 = inlined_call_operand.vmem [shape: bf16[48,96], index: 1, kind: input, shape index: {}]   ;;  %s229_s0 = inlined_call_operand.vmem [shape: f32[32,48], index: 0, kind: input, shape index: {}]   ;;  %s230_s2 = inlined_call_operand.vmem [shape: f32[1,48], index: 2, kind: input, shape index: {}]   ;;  %s231_s3 = inlined_call_operand.vmem [shape: f32[1,48], index: 3, kind: input, shape index: {}]   ;;  %s232_s4 = inlined_call_operand.vmem [shape: f32[32,96], index: 4, kind: output, shape index: {}]  }
   0x1   :  { %v161_v0 = vld [vmem:[%s228_s1] sm:$0xff]   ;;  %v162_v1 = vld [vmem:[%s228_s1 + $0x8] sm:$0xff]   ;;  %v163_v2 = vld [vmem:[%s228_s1 + $0x10] sm:$0xff]  }
   0x2   :  { %151 = vmatprep.subr.bf16.mxu0 %v161_v0  ;;  %v18_v3 = vld [vmem:[%s229_s0] sm:$0xff]  ;;  %v19_v4 = vld [vmem:[%s229_s0 + $0x8] sm:$0xff]  ;;  %v20_v9 = vld [vmem:[%s229_s0 + $0x10] sm:$0xff] }
   0x3   :  { %152 = vmatpush3.bf16.msra.mxu0 %v161_v0  ;;  %v139_v5 = vld [vmem:[%s230_s2] ss:$0 sm:$0xff]  ;;  %v21_v10 = vld [vmem:[%s229_s0 + $0x18] sm:$0xff] }
   0x4   :  { %153 = vmatprep.subr.bf16.mxu0 %v162_v1  ;;  %v29_v6 = vmul.f32 %v139_v5, %v18_v3  ;;  %v30_v7 = vmul.f32 %v139_v5, %v19_v4  ;;  %v140_v8 = vld [vmem:[%s231_s3] ss:$0 sm:$0xff]  ;;  %v31_v11 = vmul.f32 %v139_v5, %v20_v9  ;;  %v32_v12 = vmul.f32 %v139_v5, %v21_v10 }
   0x6   :  { %v40_v13 = vadd.f32 %v140_v8, %v29_v6  ;;  %v41_v14 = vadd.f32 %v140_v8, %v30_v7  ;;  %v42_v15 = vadd.f32 %v140_v8, %v31_v11  ;;  %v43_v16 = vadd.f32 %v140_v8, %v32_v12 }
   0x7   :  { %154 = vmatpush3.bf16.msra.mxu0 %v162_v1 }
   0x8   :  { %155 = vmatprep.subr.bf16.mxu0 %v163_v2  ;;  %v44_v17 = vmax.f32 %v40_v13, 0.0  ;;  %v45_v18 = vmax.f32 %v41_v14, 0.0  ;;  %v46_v19 = vmax.f32 %v42_v15, 0.0  ;;  %v47_v20 = vmax.f32 %v43_v16, 0.0 }
   0xa   :  { %v48_v21 = vpack.c.bf16 %v45_v18, %v44_v17  ;;  %v49_v22 = vpack.c.bf16 %v47_v20, %v46_v19 }
   0xb   :  { %156 = vmatpush3.bf16.msra.mxu0 %v163_v2 }
   0xc   :  { %157 = vmatprep.mubr.msk.bf16.mxu0 %vm74_vm0, %v48_v21 }
   0xe   :  { %158 = vmatmul.mubr.msk.bf16.vlgmr.msra.gmra.mrb[0].mxu0 %vm74_vm0, %v49_v22 }
  0xe1   :  { %v159_v23 = vpop.f32.mrb[0].mxu0 }
  0xe2   :  { %133 = vst.msk [vmem:[%s232_s4 + $0x10] sm:$0xff] %vm130_vm1, %v159_v23  ;;  %v115_v24 = vpop.f32.mrb[1].mxu0 }
  0xe3   :  { %131 = vst.msk [vmem:[%s232_s4] sm:$0xff] %vm130_vm1, %v115_v24  ;;  %v160_v25 = vpop.f32.mrb[2].mxu0 }
  0xe4   :  { %134 = vst.msk [vmem:[%s232_s4 + $0x18] sm:$0xff] %vm130_vm1, %v160_v25  ;;  %v118_v26 = vpop.f32.mrb[3].mxu0 }
  0xe5   :  { %132 = vst.msk [vmem:[%s232_s4 + $0x8] sm:$0xff] %vm130_vm1, %v118_v26 }

// kernel: _lambda_.28
= control target key start
LH: loop header
LB: loop body
LE: loop exit
PB: predicated region body
PF: predicated region fallthrough
CT: control target
= control target key end

     0   :  { %v983_v0 = vmov 0   ;;  %v87_v13 = vlaneseq  ;;  %vm569_vm0 = vcmask 392192   ;;  %s1568_s1 = inlined_call_operand.vmem [shape: bf16[432,48], index: 1, kind: input, shape index: {}]   ;;  %s1569_s0 = inlined_call_operand.vmem [shape: f32[128,432], index: 0, kind: input, shape index: {}]   ;;  %s1570_s2 = inlined_call_operand.vmem [shape: f32[1,432], index: 2, kind: input, shape index: {}]   ;;  %s1571_s3 = inlined_call_operand.vmem [shape: f32[1,432], index: 3, kind: input, shape index: {}]   ;;  %s1572_s4 = inlined_call_operand.vmem [shape: f32[128,48], index: 4, kind: input, shape index: {}]   ;;  %s1573_s5 = inlined_call_operand.vmem [shape: f32[128,48], index: 5, kind: output, shape index: {}]  }
   0x1   :  { %691 = vmatprep.subr.bf16.mxu1 %v983_v0  ;;  %v956_v1 = vld [vmem:[%s1568_s1 + $0x80] sm:$0xff]   ;;  %v957_v2 = vld [vmem:[%s1568_s1 + $0x88] sm:$0xff]   ;;  %v960_v5 = vld [vmem:[%s1568_s1 + $0x90] sm:$0xff]  }
   0x2   :  { %692 = vmatpush1.bf16.msra.mxu1 %v956_v1  ;;  %v958_v3 = vld [vmem:[%s1568_s1 + $0x40] sm:$0xff]   ;;  %v961_v6 = vld [vmem:[%s1568_s1 + $0x48] sm:$0xff]   ;;  %v964_v8 = vld [vmem:[%s1568_s1 + $0x50] sm:$0xff]   ;;  %v88_v17 = vshrl.u32 %v87_v13, 7 }
   0x3   :  { %693 = vmatprep.subr.bf16.mxu1 %v983_v0  ;;  %v959_v4 = vld [vmem:[%s1568_s1] sm:$0xff]   ;;  %891 = vmatprep.subr.bf16.mxu0 %v958_v3  ;;  %v962_v7 = vld [vmem:[%s1568_s1 + $0x8] sm:$0xff]   ;;  %v965_v9 = vld [vmem:[%s1568_s1 + $0x10] sm:$0xff]  }
   0x4   :  { %892 = vmatpush3.bf16.msra.mxu0 %v959_v4  ;;  %v963_v10 = vld [vmem:[%s1568_s1 + $0x98] sm:$0xff]   ;;  %v966_v12 = vld [vmem:[%s1568_s1 + $0xa0] sm:$0xff]   ;;  %v969_v16 = vld [vmem:[%s1568_s1 + $0xa8] sm:$0xff]   ;;  %v93_v21 = vsub.s32 1, %v88_v17  ;;  %v89_v23 = vsub.s32 0, %v88_v17  ;;  %v101_v25 = vsub.s32 3, %v88_v17 }
   0x5   :  { %893 = vmatprep.subr.bf16.mxu0 %v961_v6  ;;  %v967_v11 = vld [vmem:[%s1568_s1 + $0x58] sm:$0xff]   ;;  %v970_v15 = vld [vmem:[%s1568_s1 + $0x60] sm:$0xff]   ;;  %v973_v19 = vld [vmem:[%s1568_s1 + $0x68] sm:$0xff]   ;;  %v97_v27 = vsub.s32 2, %v88_v17 }
   0x6   :  { %694 = vmatpush1.bf16.msra.mxu1 %v957_v2  ;;  %v968_v14 = vld [vmem:[%s1568_s1 + $0x18] sm:$0xff]   ;;  %v971_v18 = vld [vmem:[%s1568_s1 + $0x20] sm:$0xff]   ;;  %v972_v20 = vld [vmem:[%s1568_s1 + $0xb0] sm:$0xff]  }
   0x7   :  { %695 = vmatprep.subr.bf16.mxu1 %v983_v0  ;;  %v974_v22 = vld [vmem:[%s1568_s1 + $0x28] sm:$0xff]   ;;  %v976_v24 = vld [vmem:[%s1568_s1 + $0x70] sm:$0xff]   ;;  %v975_v28 = vld [vmem:[%s1568_s1 + $0xb8] sm:$0xff]  }
   0x8   :  { %894 = vmatpush3.bf16.msra.mxu0 %v962_v7  ;;  %v977_v26 = vld [vmem:[%s1568_s1 + $0x30] sm:$0xff]   ;;  %v979_v29 = vld [vmem:[%s1568_s1 + $0x78] sm:$0xff]   ;;  %v22_v30 = vld [vmem:[%s1569_s0 + $0x8] sm:$0xff] }
   0x9   :  { %895 = vmatprep.subr.bf16.mxu0 %v964_v8  ;;  %v26_v31 = vld [vmem:[%s1569_s0 + $0x28] sm:$0xff]  ;;  %v85_v32 = vld [vmem:[%s1570_s2] sm:$0xf]  ;;  %v980_v42 = vld [vmem:[%s1568_s1 + $0x38] sm:$0xff]  }
   0xa   :  { %696 = vmatpush1.bf16.msra.mxu1 %v960_v5  ;;  %v1099_v33 = vrot.slane %v85_v32, %v93_v21  ;;  %v171_v34 = vld [vmem:[%s1571_s3] sm:$0xf]  ;;  %v1104_v35 = vrot.slane %v85_v32, %v89_v23  ;;  %v1117_v40 = vrot.slane %v85_v32, %v101_v25  ;;  %v1119_v41 = vrot.slane %v85_v32, %v97_v27  ;;  %v24_v47 = vld [vmem:[%s1569_s0 + $0x18] sm:$0xff]  ;;  %v23_v50 = vld [vmem:[%s1569_s0 + $0x10] sm:$0xff] }
   0xb   :  { %697 = vmatprep.subr.bf16.mxu1 %v983_v0  ;;  %v1107_v36 = vrot.slane %v171_v34, %v93_v21  ;;  %v21_v37 = vld [vmem:[%s1569_s0] sm:$0xff]  ;;  %v1115_v39 = vrot.slane %v171_v34, %v89_v23  ;;  %v28_v48 = vld [vmem:[%s1569_s0 + $0x38] sm:$0xff]  ;;  %v1134_v49 = vrot.slane %v171_v34, %v101_v25  ;;  %v1139_v51 = vrot.slane %v171_v34, %v97_v27  ;;  %v27_v56 = vld [vmem:[%s1569_s0 + $0x30] sm:$0xff] }
   0xc   :  { %896 = vmatpush3.bf16.msra.mxu0 %v965_v9  ;;  %v25_v38 = vld [vmem:[%s1569_s0 + $0x20] sm:$0xff]  ;;  %v108_v43 = vmul.f32 %v1099_v33, %v22_v30  ;;  %v112_v44 = vmul.f32 %v1099_v33, %v26_v31  ;;  %v107_v45 = vmul.f32 %v1104_v35, %v21_v37  ;;  %v110_v58 = vmul.f32 %v1117_v40, %v24_v47  ;;  %v30_v61 = vld [vmem:[%s1569_s0 + $0x48] sm:$0xff]  ;;  %v35_v30 = vld [vmem:[%s1569_s0 + $0x70] sm:$0xff] }
   0xd   :  { %897 = vmatprep.subr.bf16.mxu0 %v967_v11  ;;  %v111_v46 = vmul.f32 %v1104_v35, %v25_v38  ;;  %v978_v52 = vld [vmem:[%s1568_s1 + $0xc0] sm:$0xff]   ;;  %v114_v59 = vmul.f32 %v1117_v40, %v28_v48  ;;  %v109_v60 = vmul.f32 %v1119_v41, %v23_v50  ;;  %v34_v62 = vld [vmem:[%s1569_s0 + $0x68] sm:$0xff]  ;;  %v113_v3 = vmul.f32 %v1119_v41, %v27_v56  ;;  %v982_v31 = vld [vmem:[%s1568_s1 + $0xd0] sm:$0xff]  }
   0xe   :  { %698 = vmatpush1.bf16.msra.mxu1 %v963_v10  ;;  %v194_v53 = vadd.f32 %v1107_v36, %v108_v43  ;;  %v198_v54 = vadd.f32 %v1107_v36, %v112_v44  ;;  %v193_v55 = vadd.f32 %v1115_v39, %v107_v45  ;;  %v981_v4 = vld [vmem:[%s1568_s1 + $0xc8] sm:$0xff]   ;;  %v196_v6 = vadd.f32 %v1134_v49, %v110_v58  ;;  %v29_v9 = vld [vmem:[%s1569_s0 + $0x40] sm:$0xff] }
   0xf   :  { %699 = vmatprep.subr.bf16.mxu1 %v983_v0  ;;  %v197_v57 = vadd.f32 %v1115_v39, %v111_v46  ;;  %v200_v7 = vadd.f32 %v1134_v49, %v114_v59  ;;  %v195_v8 = vadd.f32 %v1139_v51, %v109_v60  ;;  %v199_v11 = vadd.f32 %v1139_v51, %v113_v3  ;;  %v42_v46 = vld [vmem:[%s1569_s0 + $0xa8] sm:$0xff] }
  0x10   :  { %898 = vmatpush3.bf16.msra.mxu0 %v968_v14  ;;  %v258_v63 = vmax.f32 %v194_v53, 0.0  ;;  %v262_v1 = vmax.f32 %v198_v54, 0.0  ;;  %v257_v2 = vmax.f32 %v193_v55, 0.0  ;;  %v120_v13 = vmul.f32 %v1099_v33, %v34_v62  ;;  %v33_v14 = vld [vmem:[%s1569_s0 + $0x60] sm:$0xff]  ;;  %v44_v62 = vld [vmem:[%s1569_s0 + $0xb8] sm:$0xff] }
  0x11   :  { %899 = vmatprep.subr.bf16.mxu0 %v970_v15  ;;  %v261_v5 = vmax.f32 %v197_v57, 0.0  ;;  %v32_v15 = vld [vmem:[%s1569_s0 + $0x58] sm:$0xff]  ;;  %v263_v21 = vmax.f32 %v199_v11, 0.0  ;;  %v41_v57 = vld [vmem:[%s1569_s0 + $0xa0] sm:$0xff]  ;;  %v128_v60 = vmul.f32 %v1099_v33, %v42_v46 }
  0x12   :  { %700 = vmatpush1.bf16.msra.mxu1 %v966_v12  ;;  %v322_v10 = vpack.c.bf16 %v262_v1, %v258_v63  ;;  %v116_v12 = vmul.f32 %v1099_v33, %v30_v61  ;;  %v206_v23 = vadd.f32 %v1107_v36, %v120_v13  ;;  %v118_v27 = vmul.f32 %v1117_v40, %v32_v15  ;;  %v40_v61 = vld [vmem:[%s1569_s0 + $0x98] sm:$0xff] }
  0x13   :  { %701 = vmatprep.subr.bf16.mxu1 %v983_v0  ;;  %v321_v17 = vpack.c.bf16 %v261_v5, %v257_v2  ;;  %v130_v13 = vmul.f32 %v1117_v40, %v44_v62 }
  0x14   :  { %900 = vmatpush3.bf16.msra.mxu0 %v971_v18  ;;  %v260_v18 = vmax.f32 %v196_v6, 0.0  ;;  %626 = vmatprep.mubr.bf16.mxu0 %v322_v10  ;;  %v270_v37 = vmax.f32 %v206_v23, 0.0  ;;  %v204_v44 = vadd.f32 %v1134_v49, %v118_v27 }
  0x15   :  { %901 = vmatprep.subr.bf16.mxu0 %v973_v19  ;;  %v264_v19 = vmax.f32 %v200_v7, 0.0  ;;  %v214_v7 = vadd.f32 %v1107_v36, %v128_v60 }
  0x16   :  { %702 = vmatpush1.bf16.msra.mxu1 %v969_v16  ;;  %v36_v16 = vld [vmem:[%s1569_s0 + $0x78] sm:$0xff]  ;;  %v268_v54 = vmax.f32 %v204_v44, 0.0 }
  0x17   :  { %703 = vmatprep.subr.bf16.mxu1 %v983_v0  ;;  %v324_v25 = vpack.c.bf16 %v264_v19, %v260_v18  ;;  %v50_v19 = vld [vmem:[%s1569_s0 + $0xe8] sm:$0xff] }
  0x18   :  { %902 = vmatpush3.bf16.msra.mxu0 %v974_v22  ;;  %v202_v22 = vadd.f32 %v1107_v36, %v116_v12  ;;  %v126_v12 = vmul.f32 %v1117_v40, %v40_v61  ;;  %v58_v61 = vld [vmem:[%s1569_s0 + $0x128] sm:$0xff] }
  0x19   :  { %903 = vmatprep.subr.bf16.mxu0 %v976_v24  ;;  %v115_v24 = vmul.f32 %v1104_v35, %v29_v9  ;;  %883 = vmatprep.mubr.msk.bf16.mxu1 %vm569_vm0, %v324_v25  ;;  %v43_v9 = vld [vmem:[%s1569_s0 + $0xb0] sm:$0xff] }
  0x1a   :  { %704 = vmatpush1.bf16.msra.mxu1 %v972_v20  ;;  %v259_v20 = vmax.f32 %v195_v8, 0.0  ;;  %v266_v34 = vmax.f32 %v202_v22, 0.0  ;;  %v127_v8 = vmul.f32 %v1104_v35, %v41_v57  ;;  %v216_v22 = vadd.f32 %v1134_v49, %v130_v13  ;;  %v56_v13 = vld [vmem:[%s1569_s0 + $0x118] sm:$0xff] }
  0x1b   :  { %705 = vmatprep.subr.bf16.mxu1 %v983_v0  ;;  %v201_v38 = vadd.f32 %v1115_v39, %v115_v24  ;;  %v129_v23 = vmul.f32 %v1119_v41, %v43_v9  ;;  %v45_v24 = vld [vmem:[%s1569_s0 + $0xc0] sm:$0xff] }
  0x1c   :  { %904 = vmatpush3.bf16.msra.mxu0 %v977_v26  ;;  %v119_v26 = vmul.f32 %v1104_v35, %v33_v14  ;;  %v323_v32 = vpack.c.bf16 %v263_v21, %v259_v20  ;;  %v326_v47 = vpack.c.bf16 %v270_v37, %v266_v34  ;;  %v46_v14 = vld [vmem:[%s1569_s0 + $0xc8] sm:$0xff]  ;;  %v212_v21 = vadd.f32 %v1134_v49, %v126_v12  ;;  %v48_v37 = vld [vmem:[%s1569_s0 + $0xd8] sm:$0xff] }
  0x1d   :  { %905 = vmatprep.subr.bf16.mxu0 %v979_v29  ;;  %v31_v29 = vld [vmem:[%s1569_s0 + $0x50] sm:$0xff]  ;;  %v265_v48 = vmax.f32 %v201_v38, 0.0  ;;  %v136_v34 = vmul.f32 %v1099_v33, %v50_v19  ;;  %v52_v38 = vld [vmem:[%s1569_s0 + $0xf8] sm:$0xff]  ;;  %v131_v44 = vmul.f32 %v1104_v35, %v45_v24  ;;  %v144_v12 = vmul.f32 %v1099_v33, %v58_v61 }
  0x1e   :  { %706 = vmatpush1.bf16.msra.mxu1 %v975_v28  ;;  %v122_v28 = vmul.f32 %v1117_v40, %v36_v16  ;;  %v205_v43 = vadd.f32 %v1115_v39, %v119_v26  ;;  %v117_v50 = vmul.f32 %v1119_v41, %v31_v29  ;;  %v278_v16 = vmax.f32 %v214_v7, 0.0  ;;  %v49_v29 = vld [vmem:[%s1569_s0 + $0xe0] sm:$0xff]  ;;  %v55_v19 = vld [vmem:[%s1569_s0 + $0x110] sm:$0xff] }
  0x1f   :  { %707 = vmatprep.subr.bf16.mxu1 %v983_v0  ;;  %v59_v24 = vld [vmem:[%s1569_s0 + $0x130] sm:$0xff] }
  0x20   :  { %906 = vmatpush3.bf16.msra.mxu0 %v980_v42  ;;  %v38_v42 = vld [vmem:[%s1569_s0 + $0x88] sm:$0xff]  ;;  %v208_v45 = vadd.f32 %v1134_v49, %v122_v28  ;;  %v269_v53 = vmax.f32 %v205_v43, 0.0  ;;  %v203_v58 = vadd.f32 %v1139_v51, %v117_v50  ;;  %v132_v28 = vmul.f32 %v1099_v33, %v46_v14  ;;  %v60_v14 = vld [vmem:[%s1569_s0 + $0x138] sm:$0xff] }
  0x21   :  { %v124_v56 = vmul.f32 %v1099_v33, %v38_v42  ;;  %v135_v50 = vmul.f32 %v1104_v35, %v49_v29  ;;  %v62_v29 = vld [vmem:[%s1569_s0 + $0x148] sm:$0xff] }
  0x22   :  { %708 = vmatpush1.bf16.msra.mxu1 %v978_v52  ;;  %v121_v52 = vmul.f32 %v1119_v41, %v35_v30  ;;  %v272_v55 = vmax.f32 %v208_v45, 0.0  ;;  %v325_v63 = vpack.c.bf16 %v269_v53, %v265_v48  ;;  %v267_v5 = vmax.f32 %v203_v58, 0.0  ;;  %v47_v45 = vld [vmem:[%s1569_s0 + $0xd0] sm:$0xff] }
  0x23   :  { %709 = vmatprep.subr.bf16.mxu1 %v983_v0  ;;  %627 = vmatmul.mubr.bf16.vlgmr.msra.gmra.mrb[0].mxu0 %v321_v17  ;;  %v210_v2 = vadd.f32 %v1107_v36, %v124_v56  ;;  %v213_v17 = vadd.f32 %v1115_v39, %v127_v8  ;;  %v276_v30 = vmax.f32 %v212_v21, 0.0  ;;  %v218_v43 = vadd.f32 %v1107_v36, %v132_v28  ;;  %v54_v56 = vld [vmem:[%s1569_s0 + $0x108] sm:$0xff]  ;;  %v57_v8 = vld [vmem:[%s1569_s0 + $0x120] sm:$0xff] }
  0x24   :  { %634 = vmatprep.mubr.bf16.mxu0 %v326_v47  ;;  %v207_v59 = vadd.f32 %v1139_v51, %v121_v52  ;;  %v328_v1 = vpack.c.bf16 %v272_v55, %v268_v54  ;;  %v222_v48 = vadd.f32 %v1107_v36, %v136_v34  ;;  %v51_v52 = vld [vmem:[%s1569_s0 + $0xf0] sm:$0xff]  ;;  %v217_v53 = vadd.f32 %v1115_v39, %v131_v44 }
  0x25   :  { %v274_v10 = vmax.f32 %v210_v2, 0.0  ;;  %v277_v26 = vmax.f32 %v213_v17, 0.0  ;;  %v134_v54 = vmul.f32 %v1117_v40, %v48_v37  ;;  %v138_v55 = vmul.f32 %v1117_v40, %v52_v38  ;;  %v66_v37 = vld [vmem:[%s1569_s0 + $0x168] sm:$0xff] }
  0x26   :  { %710 = vmatpush1.bf16.msra.mxu1 %v981_v4  ;;  %v39_v4 = vld [vmem:[%s1569_s0 + $0x90] sm:$0xff]  ;;  %v271_v6 = vmax.f32 %v207_v59, 0.0  ;;  %v286_v58 = vmax.f32 %v222_v48, 0.0  ;;  %v221_v59 = vadd.f32 %v1115_v39, %v135_v50  ;;  %v133_v60 = vmul.f32 %v1119_v41, %v47_v45  ;;  %v61_v45 = vld [vmem:[%s1569_s0 + $0x140] sm:$0xff] }
  0x27   :  { %711 = vmatprep.subr.bf16.mxu1 %v983_v0  ;;  %v37_v0 = vld [vmem:[%s1569_s0 + $0x80] sm:$0xff]  ;;  %v125_v18 = vmul.f32 %v1119_v41, %v39_v4  ;;  %v330_v25 = vpack.c.bf16 %v278_v16, %v274_v10  ;;  %v281_v62 = vmax.f32 %v217_v53, 0.0  ;;  %v137_v2 = vmul.f32 %v1119_v41, %v51_v52 }
  0x28   :  { %v123_v3 = vmul.f32 %v1104_v35, %v37_v0  ;;  %v327_v15 = vpack.c.bf16 %v271_v6, %v267_v5  ;;  %v282_v0 = vmax.f32 %v218_v43, 0.0  ;;  %v285_v5 = vmax.f32 %v221_v59, 0.0  ;;  %v65_v52 = vld [vmem:[%s1569_s0 + $0x160] sm:$0xff] }
  0x29   :  { %v211_v27 = vadd.f32 %v1139_v51, %v125_v18  ;;  %v219_v6 = vadd.f32 %v1139_v51, %v133_v60  ;;  %v140_v7 = vmul.f32 %v1099_v33, %v54_v56  ;;  %v146_v28 = vmul.f32 %v1117_v40, %v60_v14  ;;  %v64_v56 = vld [vmem:[%s1569_s0 + $0x158] sm:$0xff]  ;;  %v74_v14 = vld [vmem:[%s1569_s0 + $0x1a8] sm:$0xff] }
  0x2a   :  { %712 = vmatpush1.bf16.msra.mxu1 %v982_v31  ;;  %v209_v11 = vadd.f32 %v1115_v39, %v123_v3  ;;  %v280_v31 = vmax.f32 %v216_v22, 0.0  ;;  %v53_v3 = vld [vmem:[%s1569_s0 + $0x100] sm:$0xff]  ;;  %v334_v4 = vpack.c.bf16 %v286_v58, %v282_v0  ;;  %v333_v16 = vpack.c.bf16 %v285_v5, %v281_v62  ;;  %v63_v62 = vld [vmem:[%s1569_s0 + $0x150] sm:$0xff] }
  0x2b   :  { %635 = vmatmul.mubr.bf16.gmra.mrb[4].mxu0 %v325_v63  ;;  %v275_v47 = vmax.f32 %v211_v27, 0.0  ;;  %v220_v63 = vadd.f32 %v1134_v49, %v134_v54  ;;  %v226_v17 = vadd.f32 %v1107_v36, %v140_v7  ;;  %v139_v18 = vmul.f32 %v1104_v35, %v53_v3 }
  0x2c   :  { %v273_v20 = vmax.f32 %v209_v11, 0.0  ;;  %642 = vmatprep.mubr.bf16.mxu0 %v330_v25  ;;  %v332_v46 = vpack.c.bf16 %v280_v31, %v276_v30  ;;  %v223_v11 = vadd.f32 %v1139_v51, %v137_v2  ;;  %v283_v21 = vmax.f32 %v219_v6, 0.0 }
  0x2d   :  { %724 = vmatmul.mubr.bf16.vlgmr.msra.gmra.mrb[0].mxu1 %v323_v32  ;;  %v215_v32 = vadd.f32 %v1139_v51, %v129_v23  ;;  %v284_v9 = vmax.f32 %v220_v63, 0.0  ;;  %v230_v22 = vadd.f32 %v1107_v36, %v144_v12  ;;  %v143_v23 = vmul.f32 %v1104_v35, %v57_v8 }
  0x2e   :  { %884 = vmatprep.mubr.msk.bf16.mxu1 %vm569_vm0, %v328_v1  ;;  %v329_v42 = vpack.c.bf16 %v277_v26, %v273_v20  ;;  %v224_v1 = vadd.f32 %v1134_v49, %v138_v55  ;;  %v290_v25 = vmax.f32 %v226_v17, 0.0  ;;  %v225_v26 = vadd.f32 %v1115_v39, %v139_v18 }
  0x2f   :  { %v279_v57 = vmax.f32 %v215_v32, 0.0  ;;  %v142_v27 = vmul.f32 %v1117_v40, %v56_v13  ;;  %v287_v30 = vmax.f32 %v223_v11, 0.0  ;;  %v294_v31 = vmax.f32 %v230_v22, 0.0 }
  0x30   :  { %v288_v10 = vmax.f32 %v224_v1, 0.0  ;;  %v229_v32 = vadd.f32 %v1115_v39, %v143_v23  ;;  %v141_v34 = vmul.f32 %v1119_v41, %v55_v19  ;;  %v289_v38 = vmax.f32 %v225_v26, 0.0  ;;  %v69_v19 = vld [vmem:[%s1569_s0 + $0x180] sm:$0xff] }
  0x31   :  { %v232_v43 = vadd.f32 %v1134_v49, %v146_v28  ;;  %v145_v44 = vmul.f32 %v1119_v41, %v59_v24  ;;  %v148_v50 = vmul.f32 %v1099_v33, %v62_v29  ;;  %v152_v55 = vmul.f32 %v1099_v33, %v66_v37  ;;  %v73_v23 = vld [vmem:[%s1569_s0 + $0x1a0] sm:$0xff]  ;;  %v72_v28 = vld [vmem:[%s1569_s0 + $0x198] sm:$0xff] }
  0x32   :  { %v336_v20 = vpack.c.bf16 %v288_v10, %v284_v9  ;;  %v227_v48 = vadd.f32 %v1139_v51, %v141_v34  ;;  %v335_v58 = vpack.c.bf16 %v287_v30, %v283_v21  ;;  %v147_v61 = vmul.f32 %v1104_v35, %v61_v45  ;;  %v70_v9 = vld [vmem:[%s1569_s0 + $0x188] sm:$0xff]  ;;  %v76_v29 = vld [vmem:[%s1569_s0 + $0x1b8] sm:$0xff] }
  0x33   :  { %643 = vmatmul.mubr.bf16.gmra.mrb[8].mxu0 %v329_v42  ;;  %v228_v42 = vadd.f32 %v1134_v49, %v142_v27  ;;  %v296_v53 = vmax.f32 %v232_v43, 0.0  ;;  %v231_v54 = vadd.f32 %v1139_v51, %v145_v44  ;;  %v234_v60 = vadd.f32 %v1107_v36, %v148_v50  ;;  %v71_v43 = vld [vmem:[%s1569_s0 + $0x190] sm:$0xff]  ;;  %v78_v50 = vld [vmem:[%s1569_s0 + $0x1c8] sm:$0xff] }
  0x34   :  { %650 = vmatprep.mubr.bf16.mxu0 %v334_v4  ;;  %v291_v1 = vmax.f32 %v227_v48, 0.0  ;;  %v238_v2 = vadd.f32 %v1107_v36, %v152_v55  ;;  %v151_v3 = vmul.f32 %v1104_v35, %v65_v52  ;;  %v67_v4 = vld [vmem:[%s1569_s0 + $0x170] sm:$0xff]  ;;  %v233_v6 = vadd.f32 %v1115_v39, %v147_v61  ;;  %v82_v55 = vld [vmem:[%s1569_s0 + $0x1e8] sm:$0xff] }
  0x35   :  { %732 = vmatmul.mubr.bf16.gmra.mrb[4].mxu1 %v327_v15  ;;  %v331_v15 = vpack.c.bf16 %v279_v57, %v275_v47  ;;  %v293_v47 = vmax.f32 %v229_v32, 0.0  ;;  %v292_v0 = vmax.f32 %v228_v42, 0.0  ;;  %v68_v57 = vld [vmem:[%s1569_s0 + $0x178] sm:$0xff]  ;;  %v298_v5 = vmax.f32 %v234_v60, 0.0  ;;  %v75_v48 = vld [vmem:[%s1569_s0 + $0x1b0] sm:$0xff]  ;;  %v77_v60 = vld [vmem:[%s1569_s0 + $0x1c0] sm:$0xff] }
  0x36   :  { %885 = vmatprep.mubr.msk.bf16.mxu1 %vm569_vm0, %v332_v46  ;;  %v338_v46 = vpack.c.bf16 %v294_v31, %v290_v25  ;;  %v150_v7 = vmul.f32 %v1117_v40, %v64_v56  ;;  %v154_v8 = vmul.f32 %v1117_v40, %v68_v57  ;;  %v295_v10 = vmax.f32 %v231_v54, 0.0 }
  0x37   :  { %v337_v59 = vpack.c.bf16 %v293_v47, %v289_v38  ;;  %v340_v63 = vpack.c.bf16 %v296_v53, %v292_v0  ;;  %v302_v11 = vmax.f32 %v238_v2, 0.0  ;;  %v237_v12 = vadd.f32 %v1115_v39, %v151_v3 }
  0x38   :  { %v149_v13 = vmul.f32 %v1119_v41, %v63_v62  ;;  %v240_v17 = vadd.f32 %v1134_v49, %v154_v8  ;;  %v153_v18 = vmul.f32 %v1119_v41, %v67_v4  ;;  %v156_v22 = vmul.f32 %v1099_v33, %v70_v9 }
  0x39   :  { %v301_v21 = vmax.f32 %v237_v12, 0.0  ;;  %v160_v27 = vmul.f32 %v1099_v33, %v74_v14  ;;  %v155_v32 = vmul.f32 %v1104_v35, %v69_v19  ;;  %v339_v34 = vpack.c.bf16 %v295_v10, %v291_v1  ;;  %v81_v1 = vld [vmem:[%s1569_s0 + $0x1e0] sm:$0xff] }
  0x3a   :  { %v304_v25 = vmax.f32 %v240_v17, 0.0  ;;  %v235_v26 = vadd.f32 %v1139_v51, %v149_v13  ;;  %v239_v30 = vadd.f32 %v1139_v51, %v153_v18  ;;  %v242_v31 = vadd.f32 %v1107_v36, %v156_v22 }
  0x3b   :  { %651 = vmatmul.mubr.bf16.gmra.mrb[12].mxu0 %v333_v16  ;;  %v236_v16 = vadd.f32 %v1134_v49, %v150_v7  ;;  %v246_v38 = vadd.f32 %v1107_v36, %v160_v27  ;;  %v159_v42 = vmul.f32 %v1104_v35, %v73_v23  ;;  %v241_v45 = vadd.f32 %v1115_v39, %v155_v32 }
  0x3c   :  { %658 = vmatprep.mubr.bf16.mxu0 %v338_v46  ;;  %v306_v44 = vmax.f32 %v242_v31, 0.0  ;;  %v158_v46 = vmul.f32 %v1117_v40, %v72_v28  ;;  %v162_v47 = vmul.f32 %v1117_v40, %v76_v29  ;;  %v299_v0 = vmax.f32 %v235_v26, 0.0 }
  0x3d   :  { %740 = vmatmul.mubr.bf16.gmra.mrb[8].mxu1 %v331_v15  ;;  %v297_v15 = vmax.f32 %v233_v6, 0.0  ;;  %v300_v24 = vmax.f32 %v236_v16, 0.0  ;;  %v310_v53 = vmax.f32 %v246_v38, 0.0  ;;  %v245_v54 = vadd.f32 %v1115_v39, %v159_v42  ;;  %v84_v6 = vld [vmem:[%s1569_s0 + $0x1f8] sm:$0xff] }
  0x3e   :  { %886 = vmatprep.mubr.msk.bf16.mxu1 %vm569_vm0, %v336_v20  ;;  %v342_v20 = vpack.c.bf16 %v302_v11, %v298_v5  ;;  %v303_v56 = vmax.f32 %v239_v30, 0.0  ;;  %v244_v57 = vadd.f32 %v1134_v49, %v158_v46  ;;  %v161_v62 = vmul.f32 %v1119_v41, %v75_v48  ;;  %v80_v5 = vld [vmem:[%s1569_s0 + $0x1d8] sm:$0xff] }
  0x3f   :  { %v341_v37 = vpack.c.bf16 %v301_v21, %v297_v15  ;;  %v344_v52 = vpack.c.bf16 %v304_v25, %v300_v24  ;;  %v346_v61 = vpack.c.bf16 %v310_v53, %v306_v44  ;;  %v305_v2 = vmax.f32 %v241_v45, 0.0  ;;  %v83_v24 = vld [vmem:[%s1569_s0 + $0x1f0] sm:$0xff] }
  0x40   :  { %v309_v3 = vmax.f32 %v245_v54, 0.0  ;;  %v168_v4 = vmul.f32 %v1099_v33, %v82_v55  ;;  %v308_v7 = vmax.f32 %v244_v57, 0.0  ;;  %v163_v10 = vmul.f32 %v1104_v35, %v77_v60  ;;  %v804_v55 = vld [vmem:[%s1572_s4] sm:$0xff] }
  0x41   :  { %v343_v11 = vpack.c.bf16 %v303_v56, %v299_v0  ;;  %v167_v13 = vmul.f32 %v1104_v35, %v81_v1  ;;  %v247_v14 = vadd.f32 %v1139_v51, %v161_v62  ;;  %v166_v16 = vmul.f32 %v1117_v40, %v80_v5  ;;  %v79_v35 = vld [vmem:[%s1569_s0 + $0x1d0] sm:$0xff] }
  0x42   :  { %v254_v12 = vadd.f32 %v1107_v36, %v168_v4  ;;  %v170_v17 = vmul.f32 %v1117_v40, %v84_v6  ;;  %v345_v18 = vpack.c.bf16 %v309_v3, %v305_v2  ;;  %v165_v28 = vmul.f32 %v1119_v41, %v79_v35 }
  0x43   :  { %659 = vmatmul.mubr.bf16.gmra.mrb[16].mxu0 %v337_v59  ;;  %v157_v59 = vmul.f32 %v1119_v41, %v71_v43  ;;  %v253_v21 = vadd.f32 %v1115_v39, %v167_v13  ;;  %v252_v23 = vadd.f32 %v1134_v49, %v166_v16  ;;  %v311_v26 = vmax.f32 %v247_v14, 0.0 }
  0x44   :  { %666 = vmatprep.mubr.bf16.mxu0 %v342_v20  ;;  %v318_v19 = vmax.f32 %v254_v12, 0.0  ;;  %v249_v20 = vadd.f32 %v1115_v39, %v163_v10  ;;  %v169_v29 = vmul.f32 %v1119_v41, %v83_v24  ;;  %v806_v10 = vld [vmem:[%s1572_s4 + $0x10] sm:$0xff] }
  0x45   :  { %748 = vmatmul.mubr.bf16.gmra.mrb[12].mxu1 %v335_v58  ;;  %v248_v58 = vadd.f32 %v1134_v49, %v162_v47  ;;  %v317_v39 = vmax.f32 %v253_v21, 0.0 }
  0x46   :  { %887 = vmatprep.mubr.msk.bf16.mxu1 %vm569_vm0, %v340_v63  ;;  %v164_v63 = vmul.f32 %v1099_v33, %v78_v50  ;;  %v243_v33 = vadd.f32 %v1139_v51, %v157_v59  ;;  %v313_v27 = vmax.f32 %v249_v20, 0.0 }
  0x47   :  { %v312_v8 = vmax.f32 %v248_v58, 0.0 }
  0x48   :  { %v250_v9 = vadd.f32 %v1107_v36, %v164_v63  ;;  %v256_v36 = vadd.f32 %v1134_v49, %v170_v17  ;;  %v307_v25 = vmax.f32 %v243_v33, 0.0  ;;  %v316_v49 = vmax.f32 %v252_v23, 0.0  ;;  %v805_v63 = vld [vmem:[%s1572_s4 + $0x8] sm:$0xff]  ;;  %v807_v17 = vld [vmem:[%s1572_s4 + $0x18] sm:$0xff] }
  0x49   :  { %v348_v22 = vpack.c.bf16 %v312_v8, %v308_v7  ;;  %v349_v32 = vpack.c.bf16 %v317_v39, %v313_v27 }
  0x4a   :  { %v314_v15 = vmax.f32 %v250_v9, 0.0  ;;  %v320_v30 = vmax.f32 %v256_v36, 0.0  ;;  %v347_v31 = vpack.c.bf16 %v311_v26, %v307_v25 }
  0x4b   :  { %667 = vmatmul.mubr.bf16.gmra.mrb[20].mxu0 %v341_v37  ;;  %v255_v37 = vadd.f32 %v1139_v51, %v169_v29 }
  0x4c   :  { %674 = vmatprep.mubr.bf16.mxu0 %v346_v61  ;;  %v350_v40 = vpack.c.bf16 %v318_v19, %v314_v15  ;;  %v352_v38 = vpack.c.bf16 %v320_v30, %v316_v49  ;;  %v809_v30 = vld [vmem:[%s1572_s4 + $0x28] sm:$0xff] }
  0x4d   :  { %756 = vmatmul.mubr.bf16.gmra.mrb[16].mxu1 %v339_v34  ;;  %v251_v34 = vadd.f32 %v1139_v51, %v165_v28  ;;  %v319_v43 = vmax.f32 %v255_v37, 0.0 }
  0x4e   :  { %888 = vmatprep.mubr.msk.bf16.mxu1 %vm569_vm0, %v344_v52 }
  0x4f   :  { %v315_v42 = vmax.f32 %v251_v34, 0.0 }
  0x51   :  { %v351_v44 = vpack.c.bf16 %v319_v43, %v315_v42 }
  0x53   :  { %675 = vmatmul.mubr.bf16.gmra.mrb[24].mxu0 %v345_v18 }
  0x54   :  { %682 = vmatprep.mubr.bf16.mxu0 %v350_v40  ;;  %v808_v40 = vld [vmem:[%s1572_s4 + $0x20] sm:$0xff] }
  0x55   :  { %764 = vmatmul.mubr.bf16.gmra.mrb[20].mxu1 %v343_v11 }
  0x56   :  { %889 = vmatprep.mubr.msk.bf16.mxu1 %vm569_vm0, %v348_v22 }
  0x5b   :  { %683 = vmatmul.mubr.bf16.gmra.mrb[28].mxu0 %v349_v32 }
  0x5d   :  { %772 = vmatmul.mubr.bf16.gmra.mrb[24].mxu1 %v347_v31 }
  0x5e   :  { %890 = vmatprep.mubr.msk.bf16.mxu1 %vm569_vm0, %v352_v38 }
  0x65   :  { %780 = vmatmul.mubr.bf16.gmra.mrb[28].mxu1 %v351_v44 }
  0xf6   :  { %v907_v41 = vpop.f32.mrb[0].mxu0 }
  0xf7   :  { %v908_v45 = vpop.f32.mrb[1].mxu0 }
  0xf8   :  { %v909_v46 = vadd.f32 %v908_v45, %v907_v41  ;;  %v910_v47 = vpop.f32.mrb[2].mxu0  ;;  %v810_v45 = vld [vmem:[%s1572_s4 + $0x30] sm:$0xff] }
  0xf9   :  { %v911_v48 = vpop.f32.mrb[3].mxu0 }
  0xfa   :  { %v912_v50 = vadd.f32 %v911_v48, %v910_v47 }
  0xfe   :  { %v913_v0 = vpop.f32.mrb[4].mxu0 }
  0xff   :  { %v914_v51 = vpop.f32.mrb[5].mxu0 }
 0x100   :  { %v725_v52 = vpop.f32.mrb[0].mxu1  ;;  %v915_v57 = vadd.f32 %v914_v51, %v913_v0  ;;  %v916_v58 = vpop.f32.mrb[6].mxu0 }
 0x101   :  { %v726_v53 = vadd.f32 %v909_v46, %v725_v52  ;;  %v727_v54 = vpop.f32.mrb[1].mxu1  ;;  %v917_v62 = vpop.f32.mrb[7].mxu0 }
 0x102   :  { %v728_v56 = vpop.f32.mrb[2].mxu1  ;;  %v918_v1 = vadd.f32 %v917_v62, %v916_v58  ;;  %v811_v54 = vld [vmem:[%s1572_s4 + $0x38] sm:$0xff] }
 0x103   :  { %v788_v59 = vmul.f32 0.2, %v726_v53  ;;  %v729_v60 = vadd.f32 %v912_v50, %v728_v56  ;;  %v730_v61 = vpop.f32.mrb[3].mxu1 }
 0x105   :  { %v820_v2 = vadd.f32 %v804_v55, %v788_v59  ;;  %v789_v3 = vmul.f32 0.2, %v729_v60 }
 0x106   :  { %v919_v6 = vpop.f32.mrb[8].mxu0 }
 0x107   :  { %836 = vst.msk [vmem:[%s1573_s5] sm:$0xff] %vm569_vm0, %v820_v2  ;;  %v821_v4 = vadd.f32 %v805_v63, %v789_v3  ;;  %v920_v9 = vpop.f32.mrb[9].mxu0  ;;  %v812_v63 = vld [vmem:[%s1572_s4 + $0x40] sm:$0xff] }
 0x108   :  { %v733_v5 = vpop.f32.mrb[4].mxu1  ;;  %v921_v33 = vadd.f32 %v920_v9, %v919_v6  ;;  %v922_v12 = vpop.f32.mrb[10].mxu0 }
 0x109   :  { %837 = vst.msk [vmem:[%s1573_s5 + $0x8] sm:$0xff] %vm569_vm0, %v821_v4  ;;  %v734_v7 = vadd.f32 %v915_v57, %v733_v5  ;;  %v735_v8 = vpop.f32.mrb[5].mxu1  ;;  %v923_v16 = vpop.f32.mrb[11].mxu0 }
 0x10a   :  { %v736_v11 = vpop.f32.mrb[6].mxu1  ;;  %v924_v18 = vadd.f32 %v923_v16, %v922_v12  ;;  %v813_v8 = vld [vmem:[%s1572_s4 + $0x48] sm:$0xff] }
 0x10b   :  { %v790_v13 = vmul.f32 0.2, %v734_v7  ;;  %v737_v14 = vadd.f32 %v918_v1, %v736_v11  ;;  %v738_v15 = vpop.f32.mrb[7].mxu1 }
 0x10d   :  { %v822_v19 = vadd.f32 %v806_v10, %v790_v13  ;;  %v791_v20 = vmul.f32 0.2, %v737_v14 }
 0x10e   :  { %v925_v23 = vpop.f32.mrb[12].mxu0 }
 0x10f   :  { %838 = vst.msk [vmem:[%s1573_s5 + $0x10] sm:$0xff] %vm569_vm0, %v822_v19  ;;  %v823_v21 = vadd.f32 %v807_v17, %v791_v20  ;;  %v926_v24 = vpop.f32.mrb[13].mxu0  ;;  %v814_v17 = vld [vmem:[%s1572_s4 + $0x50] sm:$0xff] }
 0x110   :  { %v741_v22 = vpop.f32.mrb[8].mxu1  ;;  %v927_v26 = vadd.f32 %v926_v24, %v925_v23  ;;  %v928_v27 = vpop.f32.mrb[14].mxu0 }
 0x111   :  { %839 = vst.msk [vmem:[%s1573_s5 + $0x18] sm:$0xff] %vm569_vm0, %v823_v21  ;;  %v742_v36 = vadd.f32 %v921_v33, %v741_v22  ;;  %v743_v35 = vpop.f32.mrb[9].mxu1  ;;  %v929_v49 = vpop.f32.mrb[15].mxu0 }
 0x112   :  { %v744_v25 = vpop.f32.mrb[10].mxu1  ;;  %v930_v31 = vadd.f32 %v929_v49, %v928_v27  ;;  %v815_v35 = vld [vmem:[%s1572_s4 + $0x58] sm:$0xff] }
 0x113   :  { %v792_v39 = vmul.f32 0.2, %v742_v36  ;;  %v745_v28 = vadd.f32 %v924_v18, %v744_v25  ;;  %v746_v29 = vpop.f32.mrb[11].mxu1 }
 0x115   :  { %v824_v32 = vadd.f32 %v808_v40, %v792_v39  ;;  %v793_v34 = vmul.f32 0.2, %v745_v28 }
 0x116   :  { %v931_v42 = vpop.f32.mrb[16].mxu0 }
 0x117   :  { %840 = vst.msk [vmem:[%s1573_s5 + $0x20] sm:$0xff] %vm569_vm0, %v824_v32  ;;  %v825_v37 = vadd.f32 %v809_v30, %v793_v34  ;;  %v932_v41 = vpop.f32.mrb[17].mxu0  ;;  %v816_v30 = vld [vmem:[%s1572_s4 + $0x60] sm:$0xff] }
 0x118   :  { %v749_v38 = vpop.f32.mrb[12].mxu1  ;;  %v933_v47 = vadd.f32 %v932_v41, %v931_v42  ;;  %v934_v48 = vpop.f32.mrb[18].mxu0 }
 0x119   :  { %841 = vst.msk [vmem:[%s1573_s5 + $0x28] sm:$0xff] %vm569_vm0, %v825_v37  ;;  %v750_v43 = vadd.f32 %v927_v26, %v749_v38  ;;  %v751_v44 = vpop.f32.mrb[13].mxu1  ;;  %v935_v53 = vpop.f32.mrb[19].mxu0 }
 0x11a   :  { %v752_v46 = vpop.f32.mrb[14].mxu1  ;;  %v936_v51 = vadd.f32 %v935_v53, %v934_v48  ;;  %v817_v44 = vld [vmem:[%s1572_s4 + $0x68] sm:$0xff] }
 0x11b   :  { %v794_v50 = vmul.f32 0.2, %v750_v43  ;;  %v753_v52 = vadd.f32 %v930_v31, %v752_v46  ;;  %v754_v0 = vpop.f32.mrb[15].mxu1 }
 0x11c   :  { %v818_v0 = vld [vmem:[%s1572_s4 + $0x70] sm:$0xff] }
 0x11d   :  { %v826_v55 = vadd.f32 %v810_v45, %v794_v50  ;;  %v795_v56 = vmul.f32 0.2, %v753_v52 }
 0x11e   :  { %v937_v59 = vpop.f32.mrb[20].mxu0 }
 0x11f   :  { %842 = vst.msk [vmem:[%s1573_s5 + $0x30] sm:$0xff] %vm569_vm0, %v826_v55  ;;  %v827_v57 = vadd.f32 %v811_v54, %v795_v56  ;;  %v938_v62 = vpop.f32.mrb[21].mxu0  ;;  %v819_v56 = vld [vmem:[%s1572_s4 + $0x78] sm:$0xff] }
 0x120   :  { %v757_v58 = vpop.f32.mrb[16].mxu1  ;;  %v939_v2 = vadd.f32 %v938_v62, %v937_v59  ;;  %v940_v3 = vpop.f32.mrb[22].mxu0 }
 0x121   :  { %843 = vst.msk [vmem:[%s1573_s5 + $0x38] sm:$0xff] %vm569_vm0, %v827_v57  ;;  %v758_v60 = vadd.f32 %v933_v47, %v757_v58  ;;  %v759_v61 = vpop.f32.mrb[17].mxu1  ;;  %v941_v7 = vpop.f32.mrb[23].mxu0 }
 0x122   :  { %v760_v1 = vpop.f32.mrb[18].mxu1  ;;  %v942_v9 = vadd.f32 %v941_v7, %v940_v3 }
 0x123   :  { %v796_v4 = vmul.f32 0.2, %v758_v60  ;;  %v761_v5 = vadd.f32 %v936_v51, %v760_v1  ;;  %v762_v6 = vpop.f32.mrb[19].mxu1 }
 0x125   :  { %v828_v10 = vadd.f32 %v812_v63, %v796_v4  ;;  %v797_v11 = vmul.f32 0.2, %v761_v5 }
 0x126   :  { %v943_v13 = vpop.f32.mrb[24].mxu0 }
 0x127   :  { %844 = vst.msk [vmem:[%s1573_s5 + $0x40] sm:$0xff] %vm569_vm0, %v828_v10  ;;  %v829_v33 = vadd.f32 %v813_v8, %v797_v11  ;;  %v944_v16 = vpop.f32.mrb[25].mxu0 }
 0x128   :  { %v765_v12 = vpop.f32.mrb[20].mxu1  ;;  %v945_v19 = vadd.f32 %v944_v16, %v943_v13  ;;  %v946_v20 = vpop.f32.mrb[26].mxu0 }
 0x129   :  { %845 = vst.msk [vmem:[%s1573_s5 + $0x48] sm:$0xff] %vm569_vm0, %v829_v33  ;;  %v766_v14 = vadd.f32 %v939_v2, %v765_v12  ;;  %v767_v15 = vpop.f32.mrb[21].mxu1  ;;  %v947_v36 = vpop.f32.mrb[27].mxu0 }
 0x12a   :  { %v768_v18 = vpop.f32.mrb[22].mxu1  ;;  %v948_v24 = vadd.f32 %v947_v36, %v946_v20 }
 0x12b   :  { %v798_v21 = vmul.f32 0.2, %v766_v14  ;;  %v769_v22 = vadd.f32 %v942_v9, %v768_v18  ;;  %v770_v23 = vpop.f32.mrb[23].mxu1 }
 0x12d   :  { %v830_v40 = vadd.f32 %v814_v17, %v798_v21  ;;  %v799_v25 = vmul.f32 0.2, %v769_v22 }
 0x12e   :  { %v949_v39 = vpop.f32.mrb[28].mxu0 }
 0x12f   :  { %846 = vst.msk [vmem:[%s1573_s5 + $0x50] sm:$0xff] %vm569_vm0, %v830_v40  ;;  %v831_v26 = vadd.f32 %v815_v35, %v799_v25  ;;  %v950_v49 = vpop.f32.mrb[29].mxu0 }
 0x130   :  { %v773_v27 = vpop.f32.mrb[24].mxu1  ;;  %v951_v32 = vadd.f32 %v950_v49, %v949_v39  ;;  %v952_v34 = vpop.f32.mrb[30].mxu0 }
 0x131   :  { %847 = vst.msk [vmem:[%s1573_s5 + $0x58] sm:$0xff] %vm569_vm0, %v831_v26  ;;  %v774_v28 = vadd.f32 %v945_v19, %v773_v27  ;;  %v775_v29 = vpop.f32.mrb[25].mxu1  ;;  %v953_v43 = vpop.f32.mrb[31].mxu0 }
 0x132   :  { %v776_v31 = vpop.f32.mrb[26].mxu1  ;;  %v954_v41 = vadd.f32 %v953_v43, %v952_v34 }
 0x133   :  { %v800_v37 = vmul.f32 0.2, %v774_v28  ;;  %v777_v38 = vadd.f32 %v948_v24, %v776_v31  ;;  %v778_v42 = vpop.f32.mrb[27].mxu1 }
 0x135   :  { %v832_v45 = vadd.f32 %v816_v30, %v800_v37  ;;  %v801_v46 = vmul.f32 0.2, %v777_v38 }
 0x137   :  { %848 = vst.msk [vmem:[%s1573_s5 + $0x60] sm:$0xff] %vm569_vm0, %v832_v45  ;;  %v833_v47 = vadd.f32 %v817_v44, %v801_v46 }
 0x138   :  { %v781_v48 = vpop.f32.mrb[28].mxu1 }
 0x139   :  { %849 = vst.msk [vmem:[%s1573_s5 + $0x68] sm:$0xff] %vm569_vm0, %v833_v47  ;;  %v782_v50 = vadd.f32 %v951_v32, %v781_v48  ;;  %v783_v52 = vpop.f32.mrb[29].mxu1 }
 0x13a   :  { %v784_v53 = vpop.f32.mrb[30].mxu1 }
 0x13b   :  { %v802_v54 = vmul.f32 0.2, %v782_v50  ;;  %v785_v51 = vadd.f32 %v954_v41, %v784_v53  ;;  %v786_v55 = vpop.f32.mrb[31].mxu1 }
 0x13d   :  { %v834_v57 = vadd.f32 %v818_v0, %v802_v54  ;;  %v803_v58 = vmul.f32 0.2, %v785_v51 }
 0x13f   :  { %850 = vst.msk [vmem:[%s1573_s5 + $0x70] sm:$0xff] %vm569_vm0, %v834_v57  ;;  %v835_v59 = vadd.f32 %v819_v56, %v803_v58 }
 0x141   :  { %851 = vst.msk [vmem:[%s1573_s5 + $0x78] sm:$0xff] %vm569_vm0, %v835_v59 }

// kernel: _lambda_.30
= control target key start
LH: loop header
LB: loop body
LE: loop exit
PB: predicated region body
PF: predicated region fallthrough
CT: control target
= control target key end

     0   :  { %v549_v0 = vmov 0   ;;  %v36_v13 = vlaneseq  ;;  %vm350_vm0 = vcmask 392192   ;;  %vm455_vm1 = vcmask 785408   ;;  %s769_s1 = inlined_call_operand.vmem [shape: bf16[432,96], index: 1, kind: input, shape index: {}]   ;;  %s770_s0 = inlined_call_operand.vmem [shape: f32[32,432], index: 0, kind: input, shape index: {}]   ;;  %s771_s2 = inlined_call_operand.vmem [shape: f32[1,432], index: 2, kind: input, shape index: {}]   ;;  %s772_s3 = inlined_call_operand.vmem [shape: f32[1,432], index: 3, kind: input, shape index: {}]   ;;  %s773_s4 = inlined_call_operand.vmem [shape: f32[32,96], index: 4, kind: output, shape index: {}]  }
   0x1   :  { %406 = vmatprep.subr.bf16.mxu1 %v549_v0  ;;  %v522_v1 = vld [vmem:[%s769_s1 + $0x80] sm:$0xff]   ;;  %v523_v2 = vld [vmem:[%s769_s1 + $0x88] sm:$0xff]   ;;  %v526_v5 = vld [vmem:[%s769_s1 + $0x90] sm:$0xff]  }
   0x2   :  { %407 = vmatpush1.bf16.msra.mxu1 %v522_v1  ;;  %v524_v3 = vld [vmem:[%s769_s1 + $0x40] sm:$0xff]   ;;  %v527_v6 = vld [vmem:[%s769_s1 + $0x48] sm:$0xff]   ;;  %v530_v8 = vld [vmem:[%s769_s1 + $0x50] sm:$0xff]   ;;  %v37_v17 = vshrl.u32 %v36_v13, 7 }
   0x3   :  { %408 = vmatprep.subr.bf16.mxu1 %v549_v0  ;;  %v525_v4 = vld [vmem:[%s769_s1] sm:$0xff]   ;;  %493 = vmatprep.subr.bf16.mxu0 %v524_v3  ;;  %v528_v7 = vld [vmem:[%s769_s1 + $0x8] sm:$0xff]   ;;  %v531_v9 = vld [vmem:[%s769_s1 + $0x10] sm:$0xff]  }
   0x4   :  { %494 = vmatpush3.bf16.msra.mxu0 %v525_v4  ;;  %v529_v10 = vld [vmem:[%s769_s1 + $0x98] sm:$0xff]   ;;  %v532_v12 = vld [vmem:[%s769_s1 + $0xa0] sm:$0xff]   ;;  %v535_v16 = vld [vmem:[%s769_s1 + $0xa8] sm:$0xff]   ;;  %v42_v21 = vsub.s32 1, %v37_v17  ;;  %v38_v23 = vsub.s32 0, %v37_v17  ;;  %v50_v25 = vsub.s32 3, %v37_v17 }
   0x5   :  { %495 = vmatprep.subr.bf16.mxu0 %v527_v6  ;;  %v533_v11 = vld [vmem:[%s769_s1 + $0x58] sm:$0xff]   ;;  %v536_v15 = vld [vmem:[%s769_s1 + $0x60] sm:$0xff]   ;;  %v539_v19 = vld [vmem:[%s769_s1 + $0x68] sm:$0xff]   ;;  %v46_v27 = vsub.s32 2, %v37_v17 }
   0x6   :  { %409 = vmatpush1.bf16.msra.mxu1 %v523_v2  ;;  %v534_v14 = vld [vmem:[%s769_s1 + $0x18] sm:$0xff]   ;;  %v537_v18 = vld [vmem:[%s769_s1 + $0x20] sm:$0xff]   ;;  %v538_v20 = vld [vmem:[%s769_s1 + $0xb0] sm:$0xff]  }
   0x7   :  { %410 = vmatprep.subr.bf16.mxu1 %v549_v0  ;;  %v540_v22 = vld [vmem:[%s769_s1 + $0x28] sm:$0xff]   ;;  %v542_v24 = vld [vmem:[%s769_s1 + $0x70] sm:$0xff]   ;;  %v541_v28 = vld [vmem:[%s769_s1 + $0xb8] sm:$0xff]  }
   0x8   :  { %496 = vmatpush3.bf16.msra.mxu0 %v528_v7  ;;  %v543_v26 = vld [vmem:[%s769_s1 + $0x30] sm:$0xff]   ;;  %v545_v29 = vld [vmem:[%s769_s1 + $0x78] sm:$0xff]   ;;  %v19_v30 = vld [vmem:[%s770_s0 + $0x8] sm:$0xff] }
   0x9   :  { %497 = vmatprep.subr.bf16.mxu0 %v530_v8  ;;  %v23_v31 = vld [vmem:[%s770_s0 + $0x28] sm:$0xff]  ;;  %v34_v32 = vld [vmem:[%s771_s2] sm:$0xf]  ;;  %v546_v42 = vld [vmem:[%s769_s1 + $0x38] sm:$0xff]  }
   0xa   :  { %411 = vmatpush1.bf16.msra.mxu1 %v526_v5  ;;  %v43_v33 = vrot.slane %v34_v32, %v42_v21  ;;  %v72_v34 = vld [vmem:[%s772_s3] sm:$0xf]  ;;  %v663_v35 = vrot.slane %v34_v32, %v38_v23  ;;  %v51_v40 = vrot.slane %v34_v32, %v50_v25  ;;  %v674_v41 = vrot.slane %v34_v32, %v46_v27  ;;  %v21_v47 = vld [vmem:[%s770_s0 + $0x18] sm:$0xff]  ;;  %v20_v50 = vld [vmem:[%s770_s0 + $0x10] sm:$0xff] }
   0xb   :  { %412 = vmatprep.subr.bf16.mxu1 %v549_v0  ;;  %v81_v36 = vrot.slane %v72_v34, %v42_v21  ;;  %v18_v37 = vld [vmem:[%s770_s0] sm:$0xff]  ;;  %v672_v39 = vrot.slane %v72_v34, %v38_v23  ;;  %v25_v48 = vld [vmem:[%s770_s0 + $0x38] sm:$0xff]  ;;  %v687_v49 = vrot.slane %v72_v34, %v50_v25  ;;  %v692_v51 = vrot.slane %v72_v34, %v46_v27  ;;  %v24_v56 = vld [vmem:[%s770_s0 + $0x30] sm:$0xff] }
   0xc   :  { %498 = vmatpush3.bf16.msra.mxu0 %v531_v9  ;;  %v22_v38 = vld [vmem:[%s770_s0 + $0x20] sm:$0xff]  ;;  %v57_v43 = vmul.f32 %v43_v33, %v19_v30  ;;  %v61_v44 = vmul.f32 %v43_v33, %v23_v31  ;;  %v56_v45 = vmul.f32 %v663_v35, %v18_v37  ;;  %v59_v58 = vmul.f32 %v51_v40, %v21_v47  ;;  %v27_v61 = vld [vmem:[%s770_s0 + $0x48] sm:$0xff]  ;;  %v32_v30 = vld [vmem:[%s770_s0 + $0x70] sm:$0xff] }
   0xd   :  { %499 = vmatprep.subr.bf16.mxu0 %v533_v11  ;;  %v60_v46 = vmul.f32 %v663_v35, %v22_v38  ;;  %v544_v52 = vld [vmem:[%s769_s1 + $0xc0] sm:$0xff]   ;;  %v63_v59 = vmul.f32 %v51_v40, %v25_v48  ;;  %v58_v60 = vmul.f32 %v674_v41, %v20_v50  ;;  %v31_v62 = vld [vmem:[%s770_s0 + $0x68] sm:$0xff]  ;;  %v62_v3 = vmul.f32 %v674_v41, %v24_v56  ;;  %v548_v31 = vld [vmem:[%s769_s1 + $0xd0] sm:$0xff]  }
   0xe   :  { %413 = vmatpush1.bf16.msra.mxu1 %v529_v10  ;;  %v95_v53 = vadd.f32 %v81_v36, %v57_v43  ;;  %v99_v54 = vadd.f32 %v81_v36, %v61_v44  ;;  %v94_v55 = vadd.f32 %v672_v39, %v56_v45  ;;  %v547_v4 = vld [vmem:[%s769_s1 + $0xc8] sm:$0xff]   ;;  %v97_v6 = vadd.f32 %v687_v49, %v59_v58  ;;  %v26_v9 = vld [vmem:[%s770_s0 + $0x40] sm:$0xff] }
   0xf   :  { %414 = vmatprep.subr.bf16.mxu1 %v549_v0  ;;  %v98_v57 = vadd.f32 %v672_v39, %v60_v46  ;;  %v101_v7 = vadd.f32 %v687_v49, %v63_v59  ;;  %v96_v8 = vadd.f32 %v692_v51, %v58_v60  ;;  %v100_v11 = vadd.f32 %v692_v51, %v62_v3 }
  0x10   :  { %500 = vmatpush3.bf16.msra.mxu0 %v534_v14  ;;  %v111_v63 = vmax.f32 %v95_v53, 0.0  ;;  %v115_v1 = vmax.f32 %v99_v54, 0.0  ;;  %v110_v2 = vmax.f32 %v94_v55, 0.0  ;;  %v69_v13 = vmul.f32 %v43_v33, %v31_v62  ;;  %v30_v14 = vld [vmem:[%s770_s0 + $0x60] sm:$0xff] }
  0x11   :  { %501 = vmatprep.subr.bf16.mxu0 %v536_v15  ;;  %v114_v5 = vmax.f32 %v98_v57, 0.0  ;;  %v29_v15 = vld [vmem:[%s770_s0 + $0x58] sm:$0xff]  ;;  %v116_v21 = vmax.f32 %v100_v11, 0.0  ;;  %v70_v43 = vmul.f32 %v674_v41, %v32_v30 }
  0x12   :  { %415 = vmatpush1.bf16.msra.mxu1 %v532_v12  ;;  %v127_v10 = vpack.c.bf16 %v115_v1, %v111_v63  ;;  %v65_v12 = vmul.f32 %v43_v33, %v27_v61  ;;  %v107_v23 = vadd.f32 %v81_v36, %v69_v13  ;;  %v67_v27 = vmul.f32 %v51_v40, %v29_v15 }
  0x13   :  { %416 = vmatprep.subr.bf16.mxu1 %v549_v0  ;;  %v126_v17 = vpack.c.bf16 %v114_v5, %v110_v2 }
  0x14   :  { %502 = vmatpush3.bf16.msra.mxu0 %v537_v18  ;;  %v113_v18 = vmax.f32 %v97_v6, 0.0  ;;  %389 = vmatprep.mubr.bf16.mxu0 %v127_v10  ;;  %v123_v33 = vmax.f32 %v107_v23, 0.0 }
  0x15   :  { %503 = vmatprep.subr.bf16.mxu0 %v539_v19  ;;  %v117_v19 = vmax.f32 %v101_v7, 0.0 }
  0x16   :  { %417 = vmatpush1.bf16.msra.mxu1 %v535_v16  ;;  %v33_v16 = vld [vmem:[%s770_s0 + $0x78] sm:$0xff] }
  0x17   :  { %418 = vmatprep.subr.bf16.mxu1 %v549_v0  ;;  %v129_v25 = vpack.c.bf16 %v117_v19, %v113_v18 }
  0x18   :  { %504 = vmatpush3.bf16.msra.mxu0 %v540_v22  ;;  %v103_v22 = vadd.f32 %v81_v36, %v65_v12  ;;  %v105_v36 = vadd.f32 %v687_v49, %v67_v27 }
  0x19   :  { %505 = vmatprep.subr.bf16.mxu0 %v542_v24  ;;  %v64_v24 = vmul.f32 %v663_v35, %v26_v9  ;;  %491 = vmatprep.mubr.msk.bf16.mxu1 %vm350_vm0, %v129_v25 }
  0x1a   :  { %419 = vmatpush1.bf16.msra.mxu1 %v538_v20  ;;  %v112_v20 = vmax.f32 %v96_v8, 0.0  ;;  %v119_v32 = vmax.f32 %v103_v22, 0.0  ;;  %v121_v46 = vmax.f32 %v105_v36, 0.0 }
  0x1b   :  { %420 = vmatprep.subr.bf16.mxu1 %v549_v0  ;;  %v102_v34 = vadd.f32 %v672_v39, %v64_v24 }
  0x1c   :  { %506 = vmatpush3.bf16.msra.mxu0 %v543_v26  ;;  %v68_v26 = vmul.f32 %v663_v35, %v30_v14  ;;  %v131_v38 = vpack.c.bf16 %v123_v33, %v119_v32  ;;  %v128_v44 = vpack.c.bf16 %v116_v21, %v112_v20 }
  0x1d   :  { %507 = vmatprep.subr.bf16.mxu0 %v545_v29  ;;  %v28_v29 = vld [vmem:[%s770_s0 + $0x50] sm:$0xff] }
  0x1e   :  { %421 = vmatpush1.bf16.msra.mxu1 %v541_v28  ;;  %v71_v28 = vmul.f32 %v51_v40, %v33_v16  ;;  %v106_v35 = vadd.f32 %v672_v39, %v68_v26  ;;  %v118_v40 = vmax.f32 %v102_v34, 0.0  ;;  %v108_v39 = vadd.f32 %v692_v51, %v70_v43 }
  0x1f   :  { %422 = vmatprep.subr.bf16.mxu1 %v549_v0 }
  0x20   :  { %508 = vmatpush3.bf16.msra.mxu0 %v546_v42  ;;  %v109_v37 = vadd.f32 %v687_v49, %v71_v28  ;;  %v66_v42 = vmul.f32 %v674_v41, %v28_v29  ;;  %v122_v45 = vmax.f32 %v106_v35, 0.0 }
  0x22   :  { %423 = vmatpush1.bf16.msra.mxu1 %v544_v52  ;;  %v125_v47 = vmax.f32 %v109_v37, 0.0  ;;  %v130_v48 = vpack.c.bf16 %v122_v45, %v118_v40  ;;  %v124_v52 = vmax.f32 %v108_v39, 0.0 }
  0x23   :  { %424 = vmatprep.subr.bf16.mxu1 %v549_v0  ;;  %390 = vmatmul.mubr.bf16.vlgmr.msra.gmra.mrb[0].mxu0 %v126_v17 }
  0x24   :  { %397 = vmatprep.mubr.bf16.mxu0 %v131_v38  ;;  %v133_v50 = vpack.c.bf16 %v125_v47, %v121_v46 }
  0x26   :  { %425 = vmatpush1.bf16.msra.mxu1 %v547_v4 }
  0x27   :  { %426 = vmatprep.subr.bf16.mxu1 %v549_v0  ;;  %v104_v0 = vadd.f32 %v692_v51, %v66_v42 }
  0x29   :  { %v120_v49 = vmax.f32 %v104_v0, 0.0 }
  0x2a   :  { %427 = vmatpush1.bf16.msra.mxu1 %v548_v31 }
  0x2b   :  { %398 = vmatmul.mubr.bf16.gmra.mrb[4].mxu0 %v130_v48  ;;  %v132_v53 = vpack.c.bf16 %v124_v52, %v120_v49 }
  0x2d   :  { %439 = vmatmul.mubr.bf16.vlgmr.msra.gmra.mrb[0].mxu1 %v128_v44 }
  0x2e   :  { %492 = vmatprep.mubr.msk.bf16.mxu1 %vm350_vm0, %v133_v50 }
  0x35   :  { %447 = vmatmul.mubr.bf16.gmra.mrb[4].mxu1 %v132_v53 }
  0xf6   :  { %v509_v41 = vpop.f32.mrb[0].mxu0 }
  0xf7   :  { %v510_v54 = vpop.f32.mrb[1].mxu0 }
  0xf8   :  { %v511_v55 = vadd.f32 %v510_v54, %v509_v41  ;;  %v512_v56 = vpop.f32.mrb[2].mxu0 }
  0xf9   :  { %v513_v57 = vpop.f32.mrb[3].mxu0 }
  0xfa   :  { %v514_v58 = vadd.f32 %v513_v57, %v512_v56 }
  0xfe   :  { %v515_v60 = vpop.f32.mrb[4].mxu0 }
  0xff   :  { %v516_v62 = vpop.f32.mrb[5].mxu0 }
 0x100   :  { %v440_v59 = vpop.f32.mrb[0].mxu1  ;;  %v517_v1 = vadd.f32 %v516_v62, %v515_v60  ;;  %v518_v2 = vpop.f32.mrb[6].mxu0 }
 0x101   :  { %v441_v51 = vadd.f32 %v511_v55, %v440_v59  ;;  %v442_v61 = vpop.f32.mrb[1].mxu1  ;;  %v519_v5 = vpop.f32.mrb[7].mxu0 }
 0x102   :  { %v443_v63 = vpop.f32.mrb[2].mxu1  ;;  %v520_v6 = vadd.f32 %v519_v5, %v518_v2 }
 0x103   :  { %456 = vst.msk [vmem:[%s773_s4] sm:$0xff] %vm455_vm1, %v441_v51  ;;  %v444_v3 = vadd.f32 %v514_v58, %v443_v63  ;;  %v445_v4 = vpop.f32.mrb[3].mxu1 }
 0x105   :  { %457 = vst.msk [vmem:[%s773_s4 + $0x8] sm:$0xff] %vm455_vm1, %v444_v3 }
 0x108   :  { %v448_v7 = vpop.f32.mrb[4].mxu1 }
 0x109   :  { %v449_v8 = vadd.f32 %v517_v1, %v448_v7  ;;  %v450_v9 = vpop.f32.mrb[5].mxu1 }
 0x10a   :  { %v451_v10 = vpop.f32.mrb[6].mxu1 }
 0x10b   :  { %458 = vst.msk [vmem:[%s773_s4 + $0x10] sm:$0xff] %vm455_vm1, %v449_v8  ;;  %v452_v11 = vadd.f32 %v520_v6, %v451_v10  ;;  %v453_v12 = vpop.f32.mrb[7].mxu1 }
 0x10d   :  { %459 = vst.msk [vmem:[%s773_s4 + $0x18] sm:$0xff] %vm455_vm1, %v452_v11 }

// kernel: _lambda_.31
= control target key start
LH: loop header
LB: loop body
LE: loop exit
PB: predicated region body
PF: predicated region fallthrough
CT: control target
= control target key end

     0   :  { %vm20_vm0 = vcmask 778240   ;;  %vm28_vm1 = vcmask 785408   ;;  %v94_v0 = vmov 0.0   ;;  %s158_s0 = inlined_call_operand.vmem [shape: f32[32,96], index: 0, kind: input, shape index: {}]   ;;  %s159_s1 = inlined_call_operand.vmem [shape: f32[1,96], index: 1, kind: input, shape index: {}]   ;;  %s160_s2 = inlined_call_operand.vmem [shape: f32[1,96], index: 2, kind: input, shape index: {}]   ;;  %s161_s3 = inlined_call_operand.vmem [shape: f32[1,96], index: 3, kind: output, shape index: {0}]   ;;  %s162_s4 = inlined_call_operand.vmem [shape: f32[1,96], index: 4, kind: output, shape index: {1}]  }
   0x1   :  { %21 = vst.msk [vmem:[#allocation2] sm:$0x1] %vm20_vm0, %v94_v0  ;;  %22 = vst.msk [vmem:[#allocation3] sm:$0x1] %vm20_vm0, %v94_v0  ;;  %v23_v1 = vld [vmem:[%s158_s0] sm:$0xff]  ;;  %v24_v2 = vld [vmem:[%s158_s0 + $0x8] sm:$0xff] }
   0x2   :  { %v25_v3 = vld [vmem:[%s158_s0 + $0x10] sm:$0xff]  ;;  %v26_v4 = vld [vmem:[%s158_s0 + $0x18] sm:$0xff]  ;;  %v29_v5 = vsel %vm28_vm1, %v23_v1, 0.0  ;;  %v30_v6 = vsel %vm28_vm1, %v24_v2, 0.0  ;;  %v46_v8 = vmul.f32 %v23_v1, %v23_v1  ;;  %v47_v10 = vmul.f32 %v24_v2, %v24_v2  ;;  %v74_v46 = vld [vmem:[%s159_s1] sm:$0x1] }
   0x3   :  { %v32_v7 = vsel %vm28_vm1, %v25_v3, 0.0  ;;  %v31_v9 = vadd.f32 %v30_v6, %v29_v5  ;;  %v48_v11 = vmul.f32 %v25_v3, %v25_v3  ;;  %v34_v12 = vsel %vm28_vm1, %v26_v4, 0.0  ;;  %v79_v49 = vld [vmem:[%s160_s2] sm:$0x1] }
   0x4   :  { %v49_v13 = vmul.f32 %v26_v4, %v26_v4  ;;  %v50_v14 = vsel %vm28_vm1, %v46_v8, 0.0  ;;  %v51_v16 = vsel %vm28_vm1, %v47_v10, 0.0 }
   0x5   :  { %v33_v15 = vadd.f32 %v32_v7, %v31_v9  ;;  %v53_v17 = vsel %vm28_vm1, %v48_v11, 0.0  ;;  %v52_v18 = vadd.f32 %v51_v16, %v50_v14 }
   0x6   :  { %v55_v20 = vsel %vm28_vm1, %v49_v13, 0.0 }
   0x7   :  { %v35_v19 = vadd.f32 %v34_v12, %v33_v15  ;;  %v54_v21 = vadd.f32 %v53_v17, %v52_v18 }
   0x8   :  { %v27_v31 = vld [vmem:[#allocation2] sm:$0x1]  ;;  %v45_v36 = vld [vmem:[#allocation3] sm:$0x1] }
   0x9   :  { %v36_v22 = vrot.slane %v35_v19, 4  ;;  %v56_v23 = vadd.f32 %v55_v20, %v54_v21 }
   0xb   :  { %v37_v24 = vadd.f32 %v36_v22, %v35_v19  ;;  %v57_v25 = vrot.slane %v56_v23, 4 }
   0xd   :  { %v38_v26 = vrot.slane %v37_v24, 2  ;;  %v58_v27 = vadd.f32 %v57_v25, %v56_v23 }
   0xf   :  { %v39_v28 = vadd.f32 %v38_v26, %v37_v24  ;;  %v59_v29 = vrot.slane %v58_v27, 2 }
  0x11   :  { %v40_v30 = vrot.slane %v39_v28, 1  ;;  %v60_v32 = vadd.f32 %v59_v29, %v58_v27 }
  0x13   :  { %v41_v33 = vadd.f32 %v40_v30, %v39_v28  ;;  %v61_v34 = vrot.slane %v60_v32, 1 }
  0x15   :  { %v42_v35 = vadd.f32 %v41_v33, %v27_v31  ;;  %v62_v37 = vadd.f32 %v61_v34, %v60_v32 }
  0x17   :  { %44 = vst.msk [vmem:[#allocation2] sm:$0x1] %vm20_vm0, %v42_v35  ;;  %v63_v38 = vadd.f32 %v62_v37, %v45_v36 }
  0x19   :  { %64 = vst.msk [vmem:[#allocation3] sm:$0x1] %vm20_vm0, %v63_v38 }
  0x1e   :  { %v68_v39 = vld [vmem:[#allocation2] sm:$0x1] }
  0x1f   :  { %v69_v40 = vmul.f32 0.03125, %v68_v39 }
  0x20   :  { %v70_v41 = vld [vmem:[#allocation3] sm:$0x1] }
  0x21   :  { %v72_v42 = vmul.f32 %v69_v40, %v69_v40  ;;  %v71_v43 = vmul.f32 0.03125, %v70_v41 }
  0x23   :  { %v73_v44 = vsub.f32 %v71_v43, %v72_v42 }
  0x25   :  { %v75_v45 = vadd.f32 1e-05, %v73_v44 }
  0x27   :  { %92 = vrsqrt.f32 %v75_v45 }
  0x31   :  { %v93_v47 = vpop.eup %92 }
  0x32   :  { %v77_v48 = vmul.f32 %v93_v47, %v74_v46 }
  0x34   :  { %78 = vst.msk [vmem:[%s161_s3] sm:$0x1] %vm20_vm0, %v77_v48  ;;  %v80_v50 = vmul.f32 %v77_v48, %v69_v40 }
  0x36   :  { %v81_v51 = vsub.f32 %v79_v49, %v80_v50 }
  0x38   :  { %82 = vst.msk [vmem:[%s162_s4] sm:$0x1] %vm20_vm0, %v81_v51 }

// kernel: _lambda_.33
= control target key start
LH: loop header
LB: loop body
LE: loop exit
PB: predicated region body
PF: predicated region fallthrough
CT: control target
= control target key end

     0   :  { %v51_v19 = vlaneseq  ;;  %vm653_vm0 = vcmask 785408   ;;  %s1505_s1 = inlined_call_operand.vmem [shape: bf16[864,96], index: 1, kind: input, shape index: {}]   ;;  %s1506_s0 = inlined_call_operand.vmem [shape: f32[32,864], index: 0, kind: input, shape index: {}]   ;;  %s1507_s2 = inlined_call_operand.vmem [shape: f32[1,864], index: 2, kind: input, shape index: {}]   ;;  %s1508_s3 = inlined_call_operand.vmem [shape: f32[1,864], index: 3, kind: input, shape index: {}]   ;;  %s1509_s4 = inlined_call_operand.vmem [shape: f32[32,96], index: 4, kind: input, shape index: {}]   ;;  %s1510_s5 = inlined_call_operand.vmem [shape: f32[32,96], index: 5, kind: output, shape index: {}]  }
   0x1   :  { %v1040_v0 = vld [vmem:[%s1505_s1 + $0x40] sm:$0xff]   ;;  %v1044_v4 = vld [vmem:[%s1505_s1 + $0x48] sm:$0xff]   ;;  %v1048_v8 = vld [vmem:[%s1505_s1 + $0x50] sm:$0xff]  }
   0x2   :  { %v1041_v1 = vld [vmem:[%s1505_s1 + $0xc0] sm:$0xff]   ;;  %932 = vmatprep.subr.bf16.mxu0 %v1040_v0  ;;  %v1045_v5 = vld [vmem:[%s1505_s1 + $0xc8] sm:$0xff]   ;;  %v1049_v9 = vld [vmem:[%s1505_s1 + $0xd0] sm:$0xff]   ;;  %v1193_v24 = vshrl.u32 %v51_v19, 7 }
   0x3   :  { %v1042_v2 = vld [vmem:[%s1505_s1] sm:$0xff]   ;;  %960 = vmatprep.subr.bf16.mxu1 %v1041_v1  ;;  %v1046_v6 = vld [vmem:[%s1505_s1 + $0x8] sm:$0xff]   ;;  %v1050_v10 = vld [vmem:[%s1505_s1 + $0x10] sm:$0xff]  }
   0x4   :  { %v1043_v3 = vld [vmem:[%s1505_s1 + $0x80] sm:$0xff]   ;;  %933 = vmatpush3.bf16.msra.mxu0 %v1042_v2  ;;  %v1047_v7 = vld [vmem:[%s1505_s1 + $0x88] sm:$0xff]   ;;  %v1051_v11 = vld [vmem:[%s1505_s1 + $0x90] sm:$0xff]   ;;  %v57_v29 = vsub.s32 1, %v1193_v24  ;;  %v65_v31 = vsub.s32 3, %v1193_v24  ;;  %v53_v33 = vsub.s32 0, %v1193_v24 }
   0x5   :  { %961 = vmatpush3.bf16.msra.mxu1 %v1043_v3  ;;  %934 = vmatprep.subr.bf16.mxu0 %v1044_v4  ;;  %v1052_v12 = vld [vmem:[%s1505_s1 + $0x58] sm:$0xff]   ;;  %v1056_v16 = vld [vmem:[%s1505_s1 + $0x60] sm:$0xff]   ;;  %v1060_v21 = vld [vmem:[%s1505_s1 + $0x68] sm:$0xff]   ;;  %v61_v35 = vsub.s32 2, %v1193_v24 }
   0x6   :  { %962 = vmatprep.subr.bf16.mxu1 %v1045_v5  ;;  %v1053_v13 = vld [vmem:[%s1505_s1 + $0xd8] sm:$0xff]   ;;  %v1057_v17 = vld [vmem:[%s1505_s1 + $0xe0] sm:$0xff]   ;;  %v1061_v22 = vld [vmem:[%s1505_s1 + $0xe8] sm:$0xff]  }
   0x7   :  { %v1054_v14 = vld [vmem:[%s1505_s1 + $0x18] sm:$0xff]   ;;  %v1058_v18 = vld [vmem:[%s1505_s1 + $0x20] sm:$0xff]   ;;  %v1062_v23 = vld [vmem:[%s1505_s1 + $0x28] sm:$0xff]  }
   0x8   :  { %935 = vmatpush3.bf16.msra.mxu0 %v1046_v6  ;;  %v1055_v15 = vld [vmem:[%s1505_s1 + $0x98] sm:$0xff]   ;;  %v1059_v20 = vld [vmem:[%s1505_s1 + $0xa0] sm:$0xff]   ;;  %v1063_v25 = vld [vmem:[%s1505_s1 + $0xa8] sm:$0xff]  }
   0x9   :  { %963 = vmatpush3.bf16.msra.mxu1 %v1047_v7  ;;  %936 = vmatprep.subr.bf16.mxu0 %v1048_v8  ;;  %v1064_v26 = vld [vmem:[%s1505_s1 + $0x70] sm:$0xff]   ;;  %v1068_v32 = vld [vmem:[%s1505_s1 + $0x78] sm:$0xff]   ;;  %v22_v38 = vld [vmem:[%s1506_s0 + $0x8] sm:$0xff] }
   0xa   :  { %964 = vmatprep.subr.bf16.mxu1 %v1049_v9  ;;  %v1065_v27 = vld [vmem:[%s1505_s1 + $0xf0] sm:$0xff]   ;;  %v1069_v34 = vld [vmem:[%s1505_s1 + $0xf8] sm:$0xff]   ;;  %v29_v39 = vld [vmem:[%s1506_s0 + $0x40] sm:$0xff] }
   0xb   :  { %v1066_v28 = vld [vmem:[%s1505_s1 + $0x30] sm:$0xff]   ;;  %v1070_v36 = vld [vmem:[%s1505_s1 + $0x38] sm:$0xff]   ;;  %v1235_v40 = vld [vmem:[%s1507_s2] sm:$0x7f] }
   0xc   :  { %937 = vmatpush3.bf16.msra.mxu0 %v1050_v10  ;;  %v1067_v30 = vld [vmem:[%s1505_s1 + $0xb0] sm:$0xff]   ;;  %v1071_v37 = vld [vmem:[%s1505_s1 + $0xb8] sm:$0xff]   ;;  %v1238_v41 = vrot.slane %v1235_v40, %v57_v29  ;;  %v1243_v42 = vld [vmem:[%s1508_s3] sm:$0x7f]  ;;  %v1252_v45 = vrot.slane %v1235_v40, %v65_v31  ;;  %v1255_v46 = vrot.slane %v1235_v40, %v53_v33  ;;  %v1258_v47 = vrot.slane %v1235_v40, %v61_v35 }
   0xd   :  { %965 = vmatpush3.bf16.msra.mxu1 %v1051_v11  ;;  %938 = vmatprep.subr.bf16.mxu0 %v1052_v12  ;;  %v24_v43 = vld [vmem:[%s1506_s0 + $0x18] sm:$0xff]  ;;  %v31_v44 = vld [vmem:[%s1506_s0 + $0x50] sm:$0xff]  ;;  %v1261_v48 = vrot.slane %v1243_v42, %v57_v29  ;;  %v1264_v49 = vrot.slane %v1243_v42, %v65_v31  ;;  %v21_v50 = vld [vmem:[%s1506_s0] sm:$0xff]  ;;  %v1273_v52 = vrot.slane %v1243_v42, %v53_v33 }
   0xe   :  { %966 = vmatprep.subr.bf16.mxu1 %v1053_v13  ;;  %v28_v51 = vld [vmem:[%s1506_s0 + $0x38] sm:$0xff]  ;;  %v23_v53 = vld [vmem:[%s1506_s0 + $0x10] sm:$0xff]  ;;  %v1279_v54 = vrot.slane %v1243_v42, %v61_v35  ;;  %v87_v55 = vmul.f32 %v1238_v41, %v22_v38  ;;  %v94_v56 = vmul.f32 %v1238_v41, %v29_v39  ;;  %v89_v57 = vmul.f32 %v1252_v45, %v24_v43  ;;  %v30_v59 = vld [vmem:[%s1506_s0 + $0x48] sm:$0xff] }
   0xf   :  { %v96_v58 = vmul.f32 %v1252_v45, %v31_v44  ;;  %v86_v60 = vmul.f32 %v1255_v46, %v21_v50  ;;  %v93_v61 = vmul.f32 %v1255_v46, %v28_v51  ;;  %v88_v62 = vmul.f32 %v1258_v47, %v23_v53  ;;  %v1072_v0 = vld [vmem:[%s1505_s1 + $0x140] sm:$0xff]   ;;  %v36_v29 = vld [vmem:[%s1506_s0 + $0x78] sm:$0xff]  ;;  %v38_v33 = vld [vmem:[%s1506_s0 + $0x88] sm:$0xff] }
  0x10   :  { %939 = vmatpush3.bf16.msra.mxu0 %v1054_v14  ;;  %v95_v63 = vmul.f32 %v1258_v47, %v30_v59  ;;  %v152_v1 = vadd.f32 %v1261_v48, %v87_v55  ;;  %v159_v2 = vadd.f32 %v1261_v48, %v94_v56  ;;  %v154_v3 = vadd.f32 %v1264_v49, %v89_v57  ;;  %v1073_v13 = vld [vmem:[%s1505_s1 + $0x100] sm:$0xff]   ;;  %v1078_v35 = vld [vmem:[%s1505_s1 + $0x158] sm:$0xff]   ;;  %v1085_v43 = vld [vmem:[%s1505_s1 + $0x190] sm:$0xff]  }
  0x11   :  { %967 = vmatpush3.bf16.msra.mxu1 %v1055_v15  ;;  %940 = vmatprep.subr.bf16.mxu0 %v1056_v16  ;;  %v161_v4 = vadd.f32 %v1264_v49, %v96_v58  ;;  %v151_v5 = vadd.f32 %v1273_v52, %v86_v60  ;;  %v158_v6 = vadd.f32 %v1273_v52, %v93_v61  ;;  %v1080_v38 = vld [vmem:[%s1505_s1 + $0x118] sm:$0xff]   ;;  %v35_v44 = vld [vmem:[%s1506_s0 + $0x70] sm:$0xff]  ;;  %v73_v50 = vsub.s32 5, %v1193_v24  ;;  %v37_v56 = vld [vmem:[%s1506_s0 + $0x80] sm:$0xff] }
  0x12   :  { %968 = vmatprep.subr.bf16.mxu1 %v1057_v17  ;;  %v153_v7 = vadd.f32 %v1279_v54, %v88_v62  ;;  %v160_v8 = vadd.f32 %v1279_v54, %v95_v63  ;;  %v180_v9 = vmax.f32 %v152_v1, 0.0  ;;  %v187_v10 = vmax.f32 %v159_v2, 0.0  ;;  %v44_v57 = vld [vmem:[%s1506_s0 + $0xb8] sm:$0xff]  ;;  %v1081_v62 = vld [vmem:[%s1505_s1 + $0x160] sm:$0xff]  }
  0x13   :  { %v182_v11 = vmax.f32 %v154_v3, 0.0  ;;  %v189_v12 = vmax.f32 %v161_v4, 0.0  ;;  %v179_v14 = vmax.f32 %v151_v5, 0.0  ;;  %v186_v15 = vmax.f32 %v158_v6, 0.0 }
  0x14   :  { %941 = vmatpush3.bf16.msra.mxu0 %v1058_v18  ;;  %v181_v16 = vmax.f32 %v153_v7, 0.0  ;;  %v188_v17 = vmax.f32 %v160_v8, 0.0  ;;  %v208_v18 = vpack.c.bf16 %v187_v10, %v180_v9  ;;  %v101_v31 = vmul.f32 %v1238_v41, %v36_v29  ;;  %v1088_v7 = vld [vmem:[%s1505_s1 + $0x198] sm:$0xff]   ;;  %v1083_v8 = vld [vmem:[%s1505_s1 + $0x120] sm:$0xff]   ;;  %v1093_v29 = vld [vmem:[%s1505_s1 + $0x1a8] sm:$0xff]  }
  0x15   :  { %969 = vmatpush3.bf16.msra.mxu1 %v1059_v20  ;;  %942 = vmatprep.subr.bf16.mxu0 %v1060_v21  ;;  %v210_v19 = vpack.c.bf16 %v189_v12, %v182_v11  ;;  %v207_v20 = vpack.c.bf16 %v186_v15, %v179_v14  ;;  %v100_v55 = vmul.f32 %v1255_v46, %v35_v44  ;;  %v77_v58 = vsub.s32 6, %v1193_v24  ;;  %v1091_v11 = vld [vmem:[%s1505_s1 + $0x1a0] sm:$0xff]   ;;  %v1086_v14 = vld [vmem:[%s1505_s1 + $0x128] sm:$0xff]  }
  0x16   :  { %970 = vmatprep.subr.bf16.mxu1 %v1061_v22  ;;  %v209_v21 = vpack.c.bf16 %v188_v17, %v181_v16  ;;  %v1074_v22 = vld [vmem:[%s1505_s1 + $0x148] sm:$0xff]   ;;  %692 = vmatprep.mubr.bf16.mxu0 %v208_v18  ;;  %v166_v39 = vadd.f32 %v1261_v48, %v101_v31  ;;  %v102_v61 = vmul.f32 %v1258_v47, %v37_v56  ;;  %v1087_v18 = vld [vmem:[%s1505_s1 + $0x170] sm:$0xff]  }
  0x17   :  { %741 = vmatprep.mubr.bf16.mxu1 %v210_v19  ;;  %v165_v1 = vadd.f32 %v1273_v52, %v100_v55  ;;  %v109_v2 = vmul.f32 %v1258_v47, %v44_v57  ;;  %v1084_v47 = vld [vmem:[%s1505_s1 + $0x168] sm:$0xff]   ;;  %v1389_v10 = vrot.slane %v1235_v40, %v73_v50  ;;  %v1401_v15 = vrot.slane %v1243_v42, %v73_v50 }
  0x18   :  { %943 = vmatpush3.bf16.msra.mxu0 %v1062_v23  ;;  %v1079_v23 = vld [vmem:[%s1505_s1 + $0x180] sm:$0xff]   ;;  %v194_v59 = vmax.f32 %v166_v39, 0.0  ;;  %v167_v4 = vadd.f32 %v1279_v54, %v102_v61  ;;  %v78_v16 = vrot.slane %v1235_v40, %v77_v58  ;;  %v26_v19 = vld [vmem:[%s1506_s0 + $0x28] sm:$0xff] }
  0x19   :  { %971 = vmatpush3.bf16.msra.mxu1 %v1063_v25  ;;  %944 = vmatprep.subr.bf16.mxu0 %v1064_v26  ;;  %v1075_v25 = vld [vmem:[%s1505_s1 + $0x108] sm:$0xff]   ;;  %v1076_v26 = vld [vmem:[%s1505_s1 + $0x150] sm:$0xff]   ;;  %v193_v5 = vmax.f32 %v165_v1, 0.0  ;;  %v174_v6 = vadd.f32 %v1279_v54, %v109_v2 }
  0x1a   :  { %972 = vmatprep.subr.bf16.mxu1 %v1065_v27  ;;  %v1082_v27 = vld [vmem:[%s1505_s1 + $0x188] sm:$0xff]   ;;  %v195_v9 = vmax.f32 %v167_v4, 0.0 }
  0x1b   :  { %v202_v54 = vmax.f32 %v174_v6, 0.0 }
  0x1c   :  { %945 = vmatpush3.bf16.msra.mxu0 %v1066_v28  ;;  %v1077_v28 = vld [vmem:[%s1505_s1 + $0x110] sm:$0xff]  }
  0x1d   :  { %973 = vmatpush3.bf16.msra.mxu1 %v1067_v30  ;;  %946 = vmatprep.subr.bf16.mxu0 %v1068_v32  ;;  %v43_v30 = vld [vmem:[%s1506_s0 + $0xb0] sm:$0xff]  ;;  %v216_v17 = vpack.c.bf16 %v202_v54, %v195_v9 }
  0x1e   :  { %974 = vmatprep.subr.bf16.mxu1 %v1069_v34  ;;  %v108_v32 = vmul.f32 %v1238_v41, %v43_v30  ;;  %v45_v34 = vld [vmem:[%s1506_s0 + $0xc0] sm:$0xff]  ;;  %v27_v30 = vld [vmem:[%s1506_s0 + $0x30] sm:$0xff] }
  0x20   :  { %947 = vmatpush3.bf16.msra.mxu0 %v1070_v36  ;;  %v103_v36 = vmul.f32 %v1252_v45, %v38_v33  ;;  %v173_v41 = vadd.f32 %v1261_v48, %v108_v32  ;;  %v42_v48 = vld [vmem:[%s1506_s0 + $0xa8] sm:$0xff]  ;;  %v92_v33 = vmul.f32 %v78_v16, %v27_v30 }
  0x21   :  { %975 = vmatpush3.bf16.msra.mxu1 %v1071_v37  ;;  %988 = vmatprep.subr.bf16.mxu0 %v1072_v0  ;;  %v110_v37 = vmul.f32 %v1252_v45, %v45_v34  ;;  %v69_v45 = vsub.s32 4, %v1193_v24  ;;  %v41_v34 = vld [vmem:[%s1506_s0 + $0xa0] sm:$0xff] }
  0x22   :  { %1024 = vmatprep.subr.bf16.mxu1 %v1079_v23  ;;  %v168_v51 = vadd.f32 %v1264_v49, %v103_v36  ;;  %v201_v60 = vmax.f32 %v173_v41, 0.0  ;;  %v106_v39 = vmul.f32 %v78_v16, %v41_v34  ;;  %v40_v41 = vld [vmem:[%s1506_s0 + $0x98] sm:$0xff] }
  0x23   :  { %693 = vmatmul.mubr.bf16.vlgmr.msra.gmra.mrb[0].mxu0 %v207_v20  ;;  %v175_v53 = vadd.f32 %v1264_v49, %v110_v37  ;;  %v107_v49 = vmul.f32 %v1255_v46, %v42_v48  ;;  %v1395_v12 = vrot.slane %v1235_v40, %v69_v45  ;;  %v33_v20 = vld [vmem:[%s1506_s0 + $0x60] sm:$0xff]  ;;  %v91_v40 = vmul.f32 %v1389_v10, %v26_v19  ;;  %v1090_v48 = vld [vmem:[%s1505_s1 + $0x178] sm:$0xff]  }
  0x24   :  { %742 = vmatmul.mubr.bf16.vlgmr.msra.gmra.mrb[0].mxu1 %v209_v21  ;;  %989 = vmatpush3.bf16.msra.mxu0 %v1073_v13  ;;  %v196_v63 = vmax.f32 %v168_v51, 0.0  ;;  %v215_v24 = vpack.c.bf16 %v201_v60, %v194_v59  ;;  %v1414_v21 = vrot.slane %v1243_v42, %v69_v45  ;;  %v46_v59 = vld [vmem:[%s1506_s0 + $0xc8] sm:$0xff] }
  0x25   :  { %990 = vmatprep.subr.bf16.mxu0 %v1074_v22  ;;  %1025 = vmatpush3.bf16.msra.mxu1 %v1079_v23  ;;  %v203_v0 = vmax.f32 %v175_v53, 0.0  ;;  %v172_v3 = vadd.f32 %v1273_v52, %v107_v49  ;;  %v98_v22 = vmul.f32 %v1389_v10, %v33_v20  ;;  %v25_v23 = vld [vmem:[%s1506_s0 + $0x20] sm:$0xff]  ;;  %v156_v31 = vadd.f32 %v1401_v15, %v91_v40  ;;  %v47_v53 = vld [vmem:[%s1506_s0 + $0xd0] sm:$0xff] }
  0x26   :  { %1026 = vmatprep.subr.bf16.mxu1 %v1082_v27  ;;  %700 = vmatprep.mubr.bf16.mxu0 %v215_v24  ;;  %v112_v2 = vmul.f32 %v1389_v10, %v47_v53  ;;  %v1092_v24 = vld [vmem:[%s1505_s1 + $0x138] sm:$0xff]  }
  0x27   :  { %v217_v46 = vpack.c.bf16 %v203_v0, %v196_v63  ;;  %v200_v52 = vmax.f32 %v172_v3, 0.0  ;;  %v163_v32 = vadd.f32 %v1401_v15, %v98_v22  ;;  %v184_v44 = vmax.f32 %v156_v31, 0.0 }
  0x28   :  { %991 = vmatpush3.bf16.msra.mxu0 %v1075_v25  ;;  %v32_v25 = vld [vmem:[%s1506_s0 + $0x58] sm:$0xff] }
  0x29   :  { %992 = vmatprep.subr.bf16.mxu0 %v1076_v26  ;;  %1027 = vmatpush3.bf16.msra.mxu1 %v1082_v27  ;;  %v214_v13 = vpack.c.bf16 %v200_v52, %v193_v5  ;;  %v143_v26 = vrot.slane %v1243_v42, %v77_v58  ;;  %v90_v27 = vmul.f32 %v1395_v12, %v25_v23  ;;  %v34_v42 = vld [vmem:[%s1506_s0 + $0x68] sm:$0xff]  ;;  %v191_v50 = vmax.f32 %v163_v32, 0.0  ;;  %v39_v58 = vld [vmem:[%s1506_s0 + $0x90] sm:$0xff] }
  0x2a   :  { %1028 = vmatprep.subr.bf16.mxu1 %v1085_v43  ;;  %749 = vmatprep.mubr.bf16.mxu1 %v217_v46  ;;  %v104_v46 = vmul.f32 %v1395_v12, %v39_v58  ;;  %v111_v5 = vmul.f32 %v1395_v12, %v46_v59 }
  0x2b   :  { %701 = vmatmul.mubr.bf16.gmra.mrb[4].mxu0 %v214_v13  ;;  %v155_v36 = vadd.f32 %v1414_v21, %v90_v27  ;;  %v157_v45 = vadd.f32 %v143_v26, %v92_v33  ;;  %v171_v57 = vadd.f32 %v143_v26, %v106_v39  ;;  %v212_v60 = vpack.c.bf16 %v191_v50, %v184_v44 }
  0x2c   :  { %993 = vmatpush3.bf16.msra.mxu0 %v1077_v28  ;;  %v97_v28 = vmul.f32 %v1395_v12, %v32_v25  ;;  %750 = vmatmul.mubr.bf16.gmra.mrb[4].mxu1 %v216_v17  ;;  %v176_v54 = vadd.f32 %v1414_v21, %v111_v5 }
  0x2d   :  { %994 = vmatprep.subr.bf16.mxu0 %v1078_v35  ;;  %1029 = vmatpush3.bf16.msra.mxu1 %v1085_v43  ;;  %v48_v35 = vld [vmem:[%s1506_s0 + $0xd8] sm:$0xff]  ;;  %v1089_v43 = vld [vmem:[%s1505_s1 + $0x130] sm:$0xff]   ;;  %v183_v55 = vmax.f32 %v155_v36, 0.0  ;;  %v185_v49 = vmax.f32 %v157_v45, 0.0  ;;  %v199_v1 = vmax.f32 %v171_v57, 0.0 }
  0x2e   :  { %1030 = vmatprep.subr.bf16.mxu1 %v1088_v7  ;;  %v162_v37 = vadd.f32 %v1414_v21, %v97_v28  ;;  %v113_v51 = vmul.f32 %v78_v16, %v48_v35  ;;  %790 = vmatprep.mubr.bf16.mxu0 %v212_v60  ;;  %v204_v13 = vmax.f32 %v176_v54, 0.0 }
  0x30   :  { %995 = vmatpush3.bf16.msra.mxu0 %v1080_v38  ;;  %v99_v38 = vmul.f32 %v78_v16, %v34_v42  ;;  %v178_v61 = vadd.f32 %v143_v26, %v113_v51  ;;  %v190_v63 = vmax.f32 %v162_v37, 0.0 }
  0x31   :  { %996 = vmatprep.subr.bf16.mxu0 %v1081_v62  ;;  %1031 = vmatpush3.bf16.msra.mxu1 %v1088_v7  ;;  %v105_v62 = vmul.f32 %v1389_v10, %v40_v41  ;;  %v177_v7 = vadd.f32 %v1401_v15, %v112_v2  ;;  %v169_v10 = vadd.f32 %v1414_v21, %v104_v46 }
  0x32   :  { %1032 = vmatprep.subr.bf16.mxu1 %v1091_v11  ;;  %v164_v56 = vadd.f32 %v143_v26, %v99_v38  ;;  %v206_v3 = vmax.f32 %v178_v61, 0.0  ;;  %v211_v52 = vpack.c.bf16 %v190_v63, %v183_v55  ;;  %v860_v61 = vld [vmem:[%s1509_s4] sm:$0xff] }
  0x33   :  { %v170_v4 = vadd.f32 %v1401_v15, %v105_v62  ;;  %v205_v9 = vmax.f32 %v177_v7, 0.0  ;;  %v197_v12 = vmax.f32 %v169_v10, 0.0 }
  0x34   :  { %997 = vmatpush3.bf16.msra.mxu0 %v1083_v8  ;;  %v192_v0 = vmax.f32 %v164_v56, 0.0  ;;  %v220_v8 = vpack.c.bf16 %v206_v3, %v199_v1  ;;  %v861_v1 = vld [vmem:[%s1509_s4 + $0x8] sm:$0xff] }
  0x35   :  { %998 = vmatprep.subr.bf16.mxu0 %v1084_v47  ;;  %1033 = vmatpush3.bf16.msra.mxu1 %v1091_v11  ;;  %v198_v47 = vmax.f32 %v170_v4, 0.0 }
  0x36   :  { %1034 = vmatprep.subr.bf16.mxu1 %v1093_v29  ;;  %v213_v6 = vpack.c.bf16 %v192_v0, %v185_v49 }
  0x37   :  { %v219_v11 = vpack.c.bf16 %v205_v9, %v198_v47  ;;  %v862_v9 = vld [vmem:[%s1509_s4 + $0x10] sm:$0xff] }
  0x38   :  { %999 = vmatpush3.bf16.msra.mxu0 %v1086_v14  ;;  %1036 = vmatprep.mubr.msk.bf16.mxu1 %vm653_vm0, %v213_v6  ;;  %v218_v14 = vpack.c.bf16 %v204_v13, %v197_v12 }
  0x39   :  { %1000 = vmatprep.subr.bf16.mxu0 %v1087_v18  ;;  %1035 = vmatpush3.bf16.msra.mxu1 %v1093_v29 }
  0x3c   :  { %1001 = vmatpush3.bf16.msra.mxu0 %v1089_v43  ;;  %1037 = vmatmul.mubr.msk.bf16.vlgmr.msra.gmra.mrb[8].mxu1 %vm653_vm0, %v220_v8 }
  0x3d   :  { %1002 = vmatprep.subr.bf16.mxu0 %v1090_v48 }
  0x40   :  { %1003 = vmatpush3.bf16.msra.mxu0 %v1092_v24 }
  0x43   :  { %791 = vmatmul.mubr.bf16.vlgmr.msra.gmra.mrb[8].mxu0 %v211_v52 }
  0x44   :  { %798 = vmatprep.mubr.bf16.mxu0 %v219_v11  ;;  %v863_v11 = vld [vmem:[%s1509_s4 + $0x18] sm:$0xff] }
  0x4b   :  { %799 = vmatmul.mubr.bf16.gmra.mrb[12].mxu0 %v218_v14 }
  0xf6   :  { %v948_v15 = vpop.f32.mrb[0].mxu0 }
  0xf7   :  { %v976_v16 = vpop.f32.mrb[0].mxu1  ;;  %v949_v17 = vpop.f32.mrb[1].mxu0 }
  0xf8   :  { %v977_v18 = vpop.f32.mrb[1].mxu1  ;;  %v950_v19 = vadd.f32 %v949_v17, %v948_v15  ;;  %v951_v40 = vpop.f32.mrb[2].mxu0 }
  0xf9   :  { %v978_v20 = vadd.f32 %v977_v18, %v976_v16  ;;  %v979_v22 = vpop.f32.mrb[2].mxu1  ;;  %v952_v23 = vpop.f32.mrb[3].mxu0 }
  0xfa   :  { %v980_v21 = vpop.f32.mrb[3].mxu1  ;;  %v953_v26 = vadd.f32 %v952_v23, %v951_v40 }
  0xfb   :  { %v744_v25 = vadd.f32 %v978_v20, %v950_v19  ;;  %v981_v27 = vadd.f32 %v980_v21, %v979_v22 }
  0xfd   :  { %v747_v28 = vadd.f32 %v981_v27, %v953_v26 }
  0xfe   :  { %v954_v29 = vpop.f32.mrb[4].mxu0 }
  0xff   :  { %v982_v30 = vpop.f32.mrb[4].mxu1  ;;  %v955_v31 = vpop.f32.mrb[5].mxu0 }
 0x100   :  { %v956_v32 = vadd.f32 %v955_v31, %v954_v29  ;;  %v983_v42 = vpop.f32.mrb[5].mxu1  ;;  %v957_v33 = vpop.f32.mrb[6].mxu0 }
 0x101   :  { %v984_v34 = vadd.f32 %v983_v42, %v982_v30  ;;  %v985_v35 = vpop.f32.mrb[6].mxu1  ;;  %v958_v36 = vpop.f32.mrb[7].mxu0 }
 0x102   :  { %v959_v37 = vadd.f32 %v958_v36, %v957_v33  ;;  %v986_v38 = vpop.f32.mrb[7].mxu1 }
 0x103   :  { %v752_v39 = vadd.f32 %v984_v34, %v956_v32  ;;  %v987_v41 = vadd.f32 %v986_v38, %v985_v35 }
 0x105   :  { %v755_v43 = vadd.f32 %v987_v41, %v959_v37 }
 0x10f   :  { %v1038_v44 = vpop.f32.mrb[8].mxu1 }
 0x110   :  { %v841_v50 = vpop.f32.mrb[9].mxu1 }
 0x111   :  { %v1039_v45 = vpop.f32.mrb[10].mxu1 }
 0x112   :  { %v844_v53 = vpop.f32.mrb[11].mxu1 }
 0x116   :  { %v1004_v51 = vpop.f32.mrb[8].mxu0 }
 0x117   :  { %v1005_v48 = vpop.f32.mrb[9].mxu0 }
 0x118   :  { %v1006_v55 = vadd.f32 %v1005_v48, %v1004_v51  ;;  %v1007_v56 = vpop.f32.mrb[10].mxu0 }
 0x119   :  { %v1008_v57 = vpop.f32.mrb[11].mxu0 }
 0x11a   :  { %v1009_v58 = vadd.f32 %v1008_v57, %v1007_v56  ;;  %v793_v59 = vadd.f32 %v1006_v55, %v744_v25 }
 0x11c   :  { %v842_v60 = vadd.f32 %v841_v50, %v793_v59  ;;  %v796_v49 = vadd.f32 %v1009_v58, %v747_v28 }
 0x11e   :  { %v856_v62 = vmul.f32 0.2, %v842_v60  ;;  %v845_v63 = vadd.f32 %v844_v53, %v796_v49  ;;  %v1010_v0 = vpop.f32.mrb[12].mxu0 }
 0x11f   :  { %v1011_v2 = vpop.f32.mrb[13].mxu0 }
 0x120   :  { %v864_v24 = vadd.f32 %v860_v61, %v856_v62  ;;  %v857_v3 = vmul.f32 0.2, %v845_v63  ;;  %v1012_v4 = vadd.f32 %v1011_v2, %v1010_v0  ;;  %v1013_v46 = vpop.f32.mrb[14].mxu0 }
 0x121   :  { %v1014_v5 = vpop.f32.mrb[15].mxu0 }
 0x122   :  { %868 = vst.msk [vmem:[%s1510_s5] sm:$0xff] %vm653_vm0, %v864_v24  ;;  %v865_v6 = vadd.f32 %v861_v1, %v857_v3  ;;  %v801_v7 = vadd.f32 %v1012_v4, %v752_v39  ;;  %v1015_v8 = vadd.f32 %v1014_v5, %v1013_v46 }
 0x124   :  { %869 = vst.msk [vmem:[%s1510_s5 + $0x8] sm:$0xff] %vm653_vm0, %v865_v6  ;;  %v850_v47 = vadd.f32 %v1038_v44, %v801_v7  ;;  %v804_v52 = vadd.f32 %v1015_v8, %v755_v43 }
 0x126   :  { %v858_v10 = vmul.f32 0.2, %v850_v47  ;;  %v853_v54 = vadd.f32 %v1039_v45, %v804_v52 }
 0x128   :  { %v866_v12 = vadd.f32 %v862_v9, %v858_v10  ;;  %v859_v13 = vmul.f32 0.2, %v853_v54 }
 0x12a   :  { %870 = vst.msk [vmem:[%s1510_s5 + $0x10] sm:$0xff] %vm653_vm0, %v866_v12  ;;  %v867_v14 = vadd.f32 %v863_v11, %v859_v13 }
 0x12c   :  { %871 = vst.msk [vmem:[%s1510_s5 + $0x18] sm:$0xff] %vm653_vm0, %v867_v14 }

// kernel: _lambda_.35
= control target key start
LH: loop header
LB: loop body
LE: loop exit
PB: predicated region body
PF: predicated region fallthrough
CT: control target
= control target key end

     0   :  { %v273_v3 = vmov 0.0|0.0   ;;  %vm274_vm0 = vmmov 0   ;;  %v275_v6 = vmov 0.0   ;;  %s381_s0 = inlined_call_operand.vmem [shape: f32[2,16,96], index: 0, kind: input, shape index: {}]   ;;  %s382_s1 = inlined_call_operand.vmem [shape: f32[1,1,96], index: 1, kind: input, shape index: {}]   ;;  %s383_s2 = inlined_call_operand.vmem [shape: f32[1,1,96], index: 2, kind: input, shape index: {}]   ;;  %s384_s3 = inlined_call_operand.vmem [shape: f32[96,10], index: 3, kind: input, shape index: {}]   ;;  %s385_s4 = inlined_call_operand.vmem [shape: f32[1,10], index: 4, kind: input, shape index: {}]   ;;  %s386_s5 = inlined_call_operand.hbm [shape: f32[2,10], index: 5, kind: output, shape index: {}]  }
   0x1   :  { %v72_v0 = vld [vmem:[%s384_s3] sm:$0xff]  ;;  %v73_v1 = vld [vmem:[%s384_s3 + $0x8] sm:$0xff]  ;;  %v74_v2 = vld [vmem:[%s384_s3 + $0x10] sm:$0xff]  ;;  %227 = vmatprep.subr.bf16.mxu0 %v273_v3  ;;  %224 = vmatprep.mubr.msk.f32.mxu0 %vm274_vm0, %v275_v6 }
   0x2   :  { %v228_v4 = vpack.c.bf16 %v73_v1, %v72_v0  ;;  %v75_v5 = vld [vmem:[%s384_s3 + $0x18] sm:$0xff]  ;;  %v76_v8 = vld [vmem:[%s384_s3 + $0x20] sm:$0xff]  ;;  %v77_v9 = vld [vmem:[%s384_s3 + $0x28] sm:$0xff] }
   0x3   :  { %v231_v7 = vpack.c.bf16 %v75_v5, %v74_v2  ;;  %v21_v10 = vld [vmem:[%s381_s0] sm:$0xff]  ;;  %v22_v11 = vld [vmem:[%s381_s0 + $0x8] sm:$0xff]  ;;  %v23_v12 = vld [vmem:[%s381_s0 + $0x10] sm:$0xff] }
   0x4   :  { %229 = vmatpush3.bf16.msra.mxu0 %v228_v4  ;;  %v24_v13 = vld [vmem:[%s381_s0 + $0x18] sm:$0xff]  ;;  %v183_v14 = vld [vmem:[%s382_s1] ss:$0 sm:$0xff] }
   0x5   :  { %230 = vmatprep.subr.bf16.mxu0 %v273_v3  ;;  %v184_v15 = vld [vmem:[%s383_s2] ss:$0 sm:$0xff]  ;;  %v32_v16 = vmul.f32 %v183_v14, %v21_v10  ;;  %v33_v17 = vmul.f32 %v183_v14, %v22_v11  ;;  %v34_v18 = vmul.f32 %v183_v14, %v23_v12  ;;  %v35_v19 = vmul.f32 %v183_v14, %v24_v13 }
   0x6   :  { %10 = vsyncpa [#allocation3], 0  ;;  %v234_v20 = vpack.c.bf16 %v77_v9, %v76_v8  ;;  %v78_v21 = vld [vmem:[%s384_s3 + $0x30] sm:$0xff]  ;;  %v79_v22 = vld [vmem:[%s384_s3 + $0x38] sm:$0xff]  ;;  %vm51_vm1 = vcmask 785408   ;;  %vm93_vm2 = vcmask 1041409  }
   0x7   :  { %v43_v23 = vadd.f32 %v184_v15, %v32_v16  ;;  %v44_v24 = vadd.f32 %v184_v15, %v33_v17  ;;  %v45_v25 = vadd.f32 %v184_v15, %v34_v18  ;;  %v46_v26 = vadd.f32 %v184_v15, %v35_v19  ;;  %v80_v32 = vld [vmem:[%s384_s3 + $0x40] sm:$0xff]  ;;  %v81_v33 = vld [vmem:[%s384_s3 + $0x48] sm:$0xff]  ;;  %v82_v43 = vld [vmem:[%s384_s3 + $0x50] sm:$0xff]  ;;  %s276_s27 = smov [#allocation2]  }
   0x8   :  { %232 = vmatpush3.bf16.msra.mxu0 %v231_v7  ;;  %v237_v31 = vpack.c.bf16 %v79_v22, %v78_v21  ;;  %v240_v40 = vpack.c.bf16 %v81_v33, %v80_v32  ;;  %v83_v44 = vld [vmem:[%s384_s3 + $0x58] sm:$0xff]  ;;  %v185_v59 = vld [vmem:[%s385_s4] ss:$0 sm:$0xff]  ;;  %s175_s28 = sshll.u32 %s276_s27, 4  ;;  %vm167_vm3 = vcmask 74752   ;;  %s176_s28 = int_to_ptr.vmem [resolvable:$true] %s175_s28 }
   0x9   :  { %233 = vmatprep.subr.bf16.mxu0 %v273_v3  ;;  %v47_v27 = vmax.f32 %v43_v23, 0.0  ;;  %v48_v28 = vmax.f32 %v44_v24, 0.0  ;;  %v49_v29 = vmax.f32 %v45_v25, 0.0  ;;  %v50_v30 = vmax.f32 %v46_v26, 0.0  ;;  %s249_s29 = scalar_lea.vmem %s176_s28, 32  ;;  %p254_p1 = scmp.lt.s32.totalorder %s176_s28, %s176_s28 }
   0xa   :  { %v243_v47 = vpack.c.bf16 %v83_v44, %v82_v43  ;;  %p250_p0 = scmp.ne.s32.totalorder %s176_s28, %s249_s29  ;;  %p255_p2 = scmp.lt.s32.totalorder %s249_s29, %s249_s29 }
   0xb   :  { %v52_v34 = vsel %vm51_vm1, %v47_v27, 0.0  ;;  %v53_v35 = vsel %vm51_vm1, %v48_v28, 0.0  ;;  %v61_v36 = vsel %vm51_vm1, %v49_v29, 0.0  ;;  %v62_v37 = vsel %vm51_vm1, %v50_v30, 0.0 }
   0xc   :  { %235 = vmatpush3.bf16.msra.mxu0 %v234_v20  ;;  %v54_v38 = vadd.f32 %v53_v35, %v52_v34  ;;  %v63_v39 = vadd.f32 %v62_v37, %v61_v36  ;;  %p256_p3 = por %p255_p2, %p254_p1 }
   0xd   :  { %236 = vmatprep.subr.bf16.mxu0 %v273_v3 }
   0xe   :  { %v55_v41 = vrot.slane %v54_v38, 4  ;;  %v64_v42 = vrot.slane %v63_v39, 4  ;;  %p257_p4 = pnand %p256_p3, %p250_p0 }
  0x10   :  { %238 = vmatpush3.bf16.msra.mxu0 %v237_v31  ;;  %v56_v45 = vadd.f32 %v55_v41, %v54_v38  ;;  %v65_v46 = vadd.f32 %v64_v42, %v63_v39 }
  0x11   :  { %239 = vmatprep.subr.bf16.mxu0 %v273_v3 }
  0x12   :  { %v57_v48 = vrot.slane %v56_v45, 2  ;;  %v66_v49 = vrot.slane %v65_v46, 2 }
  0x14   :  { %241 = vmatpush3.bf16.msra.mxu0 %v240_v40  ;;  %v58_v50 = vadd.f32 %v57_v48, %v56_v45  ;;  %v67_v51 = vadd.f32 %v66_v49, %v65_v46 }
  0x15   :  { %242 = vmatprep.subr.bf16.mxu0 %v273_v3 }
  0x16   :  { %v59_v52 = vrot.slane %v58_v50, 1  ;;  %v68_v53 = vrot.slane %v67_v51, 1 }
  0x18   :  { %244 = vmatpush3.bf16.msra.mxu0 %v243_v47  ;;  %v60_v54 = vadd.f32 %v59_v52, %v58_v50  ;;  %v69_v55 = vadd.f32 %v68_v53, %v67_v51 }
  0x1a   :  { %v70_v56 = vmul.f32 0.0625, %v60_v54  ;;  %v71_v57 = vmul.f32 0.0625, %v69_v55 }
  0x1c   :  { %v94_v58 = vsel %vm93_vm2, %v71_v57, %v70_v56 }
  0x1d   :  { %225 = vmatmul.mubr.msk.f32.vlgmr.msra.gmra.mrb[0].mxu0 %vm51_vm1, %v94_v58 }
  0xf0   :  { %v163_v60 = vpop.f32.mrb[0].mxu0 }
  0xf1   :  { %v164_v61 = vadd.f32 %v185_v59, %v163_v60  ;;  %v226_v62 = vpop.f32.mrb[1].mxu0 }
  0xf3   :  { %168 = vst.msk [vmem:[#allocation2] sm:$0x3] %vm167_vm3, %v164_v61 }
  0xf4   :  { %260 = shalt.err (!%p257_p4)
}
  0xf5   :  { %s261_s7 = scalar_lea.hbm %s386_s5, 32 }
  0xf6   :  { %p262_p5 = scmp.ne.s32.totalorder %s386_s5, %s261_s7  ;;  %p265_p6 = scmp.lt.u32.totalorder %s261_s7, %s386_s5 }
  0xf8   :  { %p267_p7 = pnand %p265_p6, %p262_p5 }
  0xfa   :  { %270 = shalt.err (!%p267_p7)
}
  0xfb   :  { %178 = dma.vmem_to_hbm [thread:$0]  %s176_s28, 32, %s386_s5, [#allocation3]  }
  0xfc   :  { %271 = dma.done.wait [#allocation3], 32  }
  0xfd   :  { %272 = vsyncadd [#allocation3], 4294967264 }
  0xfe   :  { %182 = vsyncpa [#allocation3], 1 }

</bundles_post_ra>
